<compile_context>
chip_gen: v6e
topology: v6e:2x2x1
jax: 0.10.0
libtpu: 0.0.40
codegen_flags: <defaults>
</compile_context>

<pallas_src>
import jax
import jax.numpy as jnp
import numpy as np
from jax.experimental import pallas as pl
from jax.experimental.pallas import tpu as pltpu


def _round_up(x, m):
    return (x + m - 1) // m * m


def _rows_per_group(h, w):
    # Flat padded activation rows per packed group: the (h+2)x(w+2) zero-padded map stored
    # row-major, +2 spare rows so the last (dy=2,dx=2) conv-tap slab stays inside the
    # group's region, rounded up to a sublane-friendly multiple.
    return _round_up((h + 2) * (w + 2) + 2, 16)


def _make_kernel(g_blk, dims, rows_pg):
    """Build the fused 4-block kernel for a fixed (g_blk, layer geometry)."""
    wps = [w + 2 for _, w in dims]
    m_tot = [(g_blk - 1) * rpg + h * wp for (h, _), wp, rpg in zip(dims, wps, rows_pg)]

    def kernel(x_ref, w1, w2, w3, w4, s1, s2, s3, s4, out_ref,
               pad2, pad3, pad4, conv1, conv2, conv3, conv4):
        # x_ref    : (g_blk*rows_pg[0], P*cin) f32 -- host-prepared flat zero-padded layer-1
        #            activations for g_blk lane-packed groups (doubles as the L1 pad buffer).
        # w{i}     : (9, P*cin_i, P*cout_i) bf16 block-diagonal conv weights (BN scale folded).
        # s{i}     : (1, P*cout_i) f32 folded BN shift (includes conv bias).
        # out_ref  : (1, g_blk, P*out_dim) f32 lane-dense output block.
        # pad{i}   : (g_blk*rows_pg[i-1], P*cin_i) f32 flat padded activations, layers 2..4.
        # conv{i}  : (m_tot[i-1], P*cout_i) f32 flat conv outputs (junk cols/rows never read).
        pads_in = (x_ref, pad2, pad3, pad4)
        pads_out = (pad2, pad3, pad4, None)
        convs = (conv1, conv2, conv3, conv4)
        weights = (w1, w2, w3, w4)
        shifts = (s1, s2, s3, s4)

        final_rows = []
        for li in range(4):
            h, w = dims[li]
            wp, rpg, m = wps[li], rows_pg[li], m_tot[li]
            pad_in, conv_s, w_ref = pads_in[li], convs[li], weights[li]
            shift = shifts[li][...]                         # (1, P*cout) f32, hoisted

            # ---- 3x3 conv: 9 whole-block MXU matmuls accumulated in VMEM ----------------
            # Tap (dy,dx) of the shift-slab conv is a contiguous slab starting at flat row
            # dy*wp+dx; all g_blk groups share one matmul per tap (group stride = rows_pg,
            # the junk rows between groups / in the 2 pad columns are never pooled).
            for t in range(9):
                dy, dx = divmod(t, 3)
                start = dy * wp + dx
                slab = pad_in[start:start + m, :].astype(jnp.bfloat16)       # (m, P*cin)
                part = jnp.dot(slab, w_ref[t], preferred_element_type=jnp.float32)
                if t == 0:
                    conv_s[...] = part + shift                # fold BN shift into tap 0
                elif t == 8:
                    conv_s[...] = jnp.maximum(conv_s[...] + part, 0.0)       # fused ReLU
                else:
                    conv_s[...] += part

            # ---- 2x2/2 max-pool, stored W-pre-padded into the next padded buffer --------
            ho, wo = h // 2, w // 2
            if li < 3:
                wpo, rpg_o = wo + 2, rows_pg[li + 1]
                cout = conv_s.shape[-1]
                zrow = jnp.zeros((1, cout), jnp.float32)
                zbrd = jnp.zeros((wpo, cout), jnp.float32)
                pad_out = pads_out[li]
            for g in range(g_blk):
                cbase = g * rpg
                if li < 3:
                    obase = g * rpg_o
                    pad_out[obase:obase + wpo, :] = zbrd                          # top border
                    pad_out[obase + (ho + 1) * wpo:obase + (ho + 2) * wpo, :] = zbrd  # bottom
                for ro in range(ho):
                    r0 = cbase + 2 * ro * wp
                    tl = conv_s[pl.ds(r0, wo, stride=2), :]          # even cols, even row
                    tr = conv_s[pl.ds(r0 + 1, wo, stride=2), :]      # odd  cols, even row
                    bl = conv_s[pl.ds(r0 + wp, wo, stride=2), :]     # even cols, odd  row
                    br = conv_s[pl.ds(r0 + wp + 1, wo, stride=2), :]  # odd cols, odd  row
                    pooled = jnp.maximum(jnp.maximum(tl, tr), jnp.maximum(bl, br))
                    if li < 3:
                        # One (wo+2)-row store per pooled row: left/right zero columns come
                        # for free, so the next layer's pad buffer never needs zeroing.
                        padded = jnp.concatenate([zrow, pooled, zrow], axis=0)
                        off = obase + (ro + 1) * wpo
                        pad_out[off:off + wpo, :] = padded
                    else:
                        final_rows.append(pooled)            # final map is 1x1 per group

        # One lane-dense (g_blk, P*out_dim) output store / HBM DMA per grid step.
        out_ref[0] = jnp.concatenate(final_rows, axis=0)

    return kernel


def _pack_weights(params, p):
    """Fold lane-packing into the weights: block-diagonal (9, P*cin, P*cout) bf16 + tiled shift."""
    eye = jnp.eye(p, dtype=jnp.bfloat16)
    packed = []
    for prm in params:
        wb = prm["w_bf16"]                                   # (3,3,cin,cout), BN scale folded
        cin, cout = wb.shape[2], wb.shape[3]
        w9 = wb.reshape(9, cin, cout)
        wbd = jnp.einsum("ab,tij->taibj", eye, w9).reshape(9, p * cin, p * cout)
        sh = jnp.tile(prm["shift"], (1, p)).astype(jnp.float32)      # (1, P*cout)
        packed.append((wbd.astype(jnp.bfloat16), sh))
    return packed


@jax.jit
def convnet4_forward(x_nchw, params):
    """ConvNet4.forward: conv1..conv4 then flatten(1). Input is NCHW (PyTorch convention)."""
    x = x_nchw.astype(jnp.float32)
    n, cin, hh, ww = x.shape
    if (hh, ww) != (16, 16):
        # TODO(synk): PyTorch MaxPool2d(2) floor-pools odd dims (e.g. 84x84 inputs); this
        #             fused kernel only handles the even 16x16 -> 8 -> 4 -> 2 -> 1 pyramid.
        raise ValueError("fused ConvNet4 kernel expects 16x16 spatial input")
    if cin != params[0]["w_bf16"].shape[2]:
        raise ValueError("input channel count does not match conv1 weights")
    hid = params[0]["w_bf16"].shape[-1]
    out_dim = params[3]["w_bf16"].shape[-1]

    # ---- lane-pack P images into the channel axis; block g_blk groups per grid step ----
    p = 8 if n >= 8 else 4                      # 8 fills the 256-wide MXU on v6e/v7x
    n_groups = -(-n // p)
    g_blk = min(4, n_groups)                    # up to 32 images / grid step
    n_groups_pad = -(-n_groups // g_blk) * g_blk
    n_steps = n_groups_pad // g_blk
    n_pad = n_groups_pad * p

    dims = [(16, 16), (8, 8), (4, 4), (2, 2)]
    rows_pg = [_rows_per_group(h, w) for h, w in dims]
    pc_in = [p * cin, p * hid, p * hid, p * hid]
    pc_out = [p * hid, p * hid, p * hid, p * out_dim]
    m_tot = [(g_blk - 1) * rpg + h * (w + 2) for (h, w), rpg in zip(dims, rows_pg)]

    # Host prep (one XLA fusion): pad the batch, pack P images along channels, zero-pad the
    # 16x16 map to 18x18 and flatten to the kernel's per-group flat padded-row layout. The
    # resulting array IS the layer-1 padded buffer, so the kernel never scatters the input.
    if n_pad != n:
        x = jnp.pad(x, ((0, n_pad - n), (0, 0), (0, 0), (0, 0)))
    xg = x.reshape(n_groups_pad, p, cin, 16, 16).transpose(0, 3, 4, 1, 2)
    xg = xg.reshape(n_groups_pad, 16, 16, p * cin)
    xg = jnp.pad(xg, ((0, 0), (1, 1), (1, 1), (0, 0)))                 # spatial zero border
    xg = xg.reshape(n_groups_pad, 18 * 18, p * cin)
    xg = jnp.pad(xg, ((0, 0), (0, rows_pg[0] - 18 * 18), (0, 0)))      # zero spare rows
    x_flat = xg.reshape(n_groups_pad * rows_pg[0], p * cin)

    packed = _pack_weights(params, p)
    w_list = [wp_ for wp_, _ in packed]
    s_list = [sh for _, sh in packed]

    in_specs = [pl.BlockSpec((g_blk * rows_pg[0], p * cin), lambda s: (s, 0))]
    in_specs += [pl.BlockSpec(wt.shape, lambda s: (0, 0, 0)) for wt in w_list]
    in_specs += [pl.BlockSpec(sh.shape, lambda s: (0, 0)) for sh in s_list]

    scratch = [pltpu.VMEM((g_blk * rpg, c), jnp.float32)
               for rpg, c in zip(rows_pg[1:], pc_in[1:])]               # pad2..pad4
    scratch += [pltpu.VMEM((m, c), jnp.float32)
                for m, c in zip(m_tot, pc_out)]                         # conv1..conv4

    out = pl.pallas_call(
        _make_kernel(g_blk, dims, rows_pg),
        out_shape=jax.ShapeDtypeStruct((n_steps, g_blk, p * out_dim), jnp.float32),
        grid_spec=pltpu.PrefetchScalarGridSpec(
            num_scalar_prefetch=0,
            grid=(n_steps,),
            in_specs=in_specs,
            out_specs=pl.BlockSpec((1, g_blk, p * out_dim), lambda s: (s, 0, 0)),
            scratch_shapes=scratch,
        ),
        compiler_params=pltpu.CompilerParams(
            dimension_semantics=("parallel",),
            vmem_limit_bytes=32 * 1024 * 1024,
        ),
    )(x_flat, *w_list, *s_list)

    # De-interleave the lane-packed outputs back to per-image feature vectors (flatten(1)
    # of the 1x1 final map is just the channel vector), and drop batch padding.
    out = out.reshape(n_groups_pad, p, out_dim).reshape(n_pad, out_dim)
    return out[:n]


def init_convnet4_params(key, hid_dim, out_dim, in_channels=3, eps=1e-5):
    """Deterministic parameters for the 4 ConvBlocks.

    BN (inference mode: running_mean=0, running_var=1) is folded into a per-channel
    (scale, shift); the scale is folded into the conv weights, pre-cast to bf16 for the MXU.
    """
    dims = [(in_channels, hid_dim), (hid_dim, hid_dim), (hid_dim, hid_dim), (hid_dim, out_dim)]
    params = []
    for i, (cin, cout) in enumerate(dims):
        k_w, k_b, k_g, k_beta = jax.random.split(jax.random.fold_in(key, i), 4)
        w = jax.random.normal(k_w, (3, 3, cin, cout), jnp.float32) / np.sqrt(9 * cin)
        b = 0.05 * jax.random.normal(k_b, (cout,), jnp.float32)
        gamma = 1.0 + 0.1 * jax.random.normal(k_g, (cout,), jnp.float32)
        beta = 0.1 * jax.random.normal(k_beta, (cout,), jnp.float32)
        running_mean = jnp.zeros((cout,), jnp.float32)
        running_var = jnp.ones((cout,), jnp.float32)
        scale = gamma / jnp.sqrt(running_var + eps)
        shift = beta + (b - running_mean) * scale
        params.append(dict(
            w=w,                                              # unfolded f32 (reference)
            w_bf16=(w * scale).astype(jnp.bfloat16),          # BN scale folded, MXU dtype
            scale=scale.reshape(1, cout),
            shift=shift.reshape(1, cout),
        ))
    return params


def _reference_forward(x_nchw, params, bf16_operands=True):
    """Pure-JAX reference (lax conv + reduce_window)."""
    x = jnp.transpose(x_nchw, (0, 2, 3, 1)).astype(jnp.float32)
    for prm in params:
        if bf16_operands:
            w = prm["w_bf16"].astype(jnp.float32)
            xin = x.astype(jnp.bfloat16).astype(jnp.float32)
        else:
            w = prm["w"] * prm["scale"][0]
            xin = x
        y = jax.lax.conv_general_dilated(
            xin, w, window_strides=(1, 1), padding="SAME",
            dimension_numbers=("NHWC", "HWIO", "NHWC"),
            precision=jax.lax.Precision.HIGHEST)
        y = jnp.maximum(y + prm["shift"][0], 0.0)
        x = jax.lax.reduce_window(y, -jnp.inf, jax.lax.max,
                                  (1, 2, 2, 1), (1, 2, 2, 1), "VALID")
    x = jnp.transpose(x, (0, 3, 1, 2))
    return x.reshape(x.shape[0], -1)


if __name__ == "__main__":
    key = jax.random.PRNGKey(0)
    k_x, k_p = jax.random.split(key)

    batch, in_ch, spatial = 2, 3, 16            # ConvNet4 fixes in_channels=3
    hid_dim, out_dim = 32, 32

    x = jax.random.normal(k_x, (batch, in_ch, spatial, spatial), jnp.float32)   # NCHW
    params = init_convnet4_params(k_p, hid_dim, out_dim, in_channels=in_ch)

    out = jax.block_until_ready(convnet4_forward(x, params))
    assert out.shape == (batch, out_dim), out.shape

    # Tight check vs a reference that uses the same bf16-operand / f32-accumulate scheme.
    ref_bf16 = jax.block_until_ready(_reference_forward(x, params, bf16_operands=True))
    np.testing.assert_allclose(np.asarray(out), np.asarray(ref_bf16), rtol=1e-3, atol=1e-3)

    # Loose check vs pure-f32 module semantics (bf16 operand rounding only).
    ref_f32 = jax.block_until_ready(_reference_forward(x, params, bf16_operands=False))
    np.testing.assert_allclose(np.asarray(out), np.asarray(ref_f32), rtol=5e-2, atol=5e-2)

    print("KERNEL_OK")
</pallas_src>

<mosaic_0001>
module attributes {stable_mosaic.version = 11 : i64} {
  func.func @kernel(%arg0: i32, %arg1: memref<336x12xf32, #tpu.memory_space<vmem>>, %arg2: memref<9x12x128xbf16, #tpu.memory_space<vmem>>, %arg3: memref<9x128x128xbf16, #tpu.memory_space<vmem>>, %arg4: memref<9x128x128xbf16, #tpu.memory_space<vmem>>, %arg5: memref<9x128x128xbf16, #tpu.memory_space<vmem>>, %arg6: memref<1x128xf32, #tpu.memory_space<vmem>>, %arg7: memref<1x128xf32, #tpu.memory_space<vmem>>, %arg8: memref<1x128xf32, #tpu.memory_space<vmem>>, %arg9: memref<1x128xf32, #tpu.memory_space<vmem>>, %arg10: memref<1x1x128xf32, #tpu.memory_space<vmem>>, %arg11: memref<112x128xf32, #tpu.memory_space<vmem>>, %arg12: memref<48x128xf32, #tpu.memory_space<vmem>>, %arg13: memref<32x128xf32, #tpu.memory_space<vmem>>, %arg14: memref<288x128xf32, #tpu.memory_space<vmem>>, %arg15: memref<80x128xf32, #tpu.memory_space<vmem>>, %arg16: memref<24x128xf32, #tpu.memory_space<vmem>>, %arg17: memref<8x128xf32, #tpu.memory_space<vmem>>) attributes {dimension_semantics = [#tpu.dimension_semantics<parallel>], iteration_bounds = array<i64: 1>, scalar_prefetch = 0 : i64, scratch_operands = 7 : i64, tpu.core_type = #tpu.core_type<tc>, window_params = [{transform_indices = @transform_0, window_bounds = array<i64: 336, 12>}, {pipeline_mode = #tpu.pipeline_mode<synchronous>, transform_indices = @transform_1, window_bounds = array<i64: 9, 12, 128>}, {pipeline_mode = #tpu.pipeline_mode<synchronous>, transform_indices = @transform_2, window_bounds = array<i64: 9, 128, 128>}, {pipeline_mode = #tpu.pipeline_mode<synchronous>, transform_indices = @transform_3, window_bounds = array<i64: 9, 128, 128>}, {pipeline_mode = #tpu.pipeline_mode<synchronous>, transform_indices = @transform_4, window_bounds = array<i64: 9, 128, 128>}, {pipeline_mode = #tpu.pipeline_mode<synchronous>, transform_indices = @transform_5, window_bounds = array<i64: 1, 128>}, {pipeline_mode = #tpu.pipeline_mode<synchronous>, transform_indices = @transform_6, window_bounds = array<i64: 1, 128>}, {pipeline_mode = #tpu.pipeline_mode<synchronous>, transform_indices = @transform_7, window_bounds = array<i64: 1, 128>}, {pipeline_mode = #tpu.pipeline_mode<synchronous>, transform_indices = @transform_8, window_bounds = array<i64: 1, 128>}, {transform_indices = @transform_9, window_bounds = array<i64: 1, 1, 128>}]} {
    %c0 = arith.constant 0 : index
    %c0_0 = arith.constant 0 : index
    %0 = vector.load %arg6[%c0, %c0_0] : memref<1x128xf32, #tpu.memory_space<vmem>>, vector<1x128xf32>
    %c0_1 = arith.constant 0 : index
    %c0_2 = arith.constant 0 : index
    %1 = vector.load %arg1[%c0_1, %c0_2] : memref<336x12xf32, #tpu.memory_space<vmem>>, vector<288x12xf32>
    %2 = arith.truncf %1 : vector<288x12xf32> to vector<288x12xbf16>
    %c0_3 = arith.constant 0 : index
    %c0_4 = arith.constant 0 : index
    %c0_5 = arith.constant 0 : index
    %3 = vector.load %arg2[%c0_3, %c0_4, %c0_5] : memref<9x12x128xbf16, #tpu.memory_space<vmem>>, vector<1x12x128xbf16>
    %4 = vector.shape_cast %3 : vector<1x12x128xbf16> to vector<12x128xbf16>
    %cst = arith.constant dense<0.000000e+00> : vector<288x128xf32>
    %5 = tpu.matmul %2, %4, %cst {dimension_numbers = #tpu.dot_dimension_numbers<[1], [0], [0], [1], [0, 0, 1, 1], [], []>} : vector<288x12xbf16>, vector<12x128xbf16>, vector<288x128xf32> -> vector<288x128xf32>
    %6 = vector.broadcast %0 : vector<1x128xf32> to vector<288x128xf32>
    %7 = arith.addf %5, %6 : vector<288x128xf32>
    %c0_6 = arith.constant 0 : index
    %c0_7 = arith.constant 0 : index
    %8 = vector.load %arg14[%c0_6, %c0_7] : memref<288x128xf32, #tpu.memory_space<vmem>>, vector<288x128xf32>
    tpu.vector_store %arg14[%c0_6, %c0_7], %7 {strides = array<i32>} : memref<288x128xf32, #tpu.memory_space<vmem>>, vector<288x128xf32>,
    %c1 = arith.constant 1 : index
    %c0_8 = arith.constant 0 : index
    %9 = vector.load %arg1[%c1, %c0_8] : memref<336x12xf32, #tpu.memory_space<vmem>>, vector<288x12xf32>
    %10 = arith.truncf %9 : vector<288x12xf32> to vector<288x12xbf16>
    %c1_9 = arith.constant 1 : index
    %c0_10 = arith.constant 0 : index
    %c0_11 = arith.constant 0 : index
    %11 = vector.load %arg2[%c1_9, %c0_10, %c0_11] : memref<9x12x128xbf16, #tpu.memory_space<vmem>>, vector<1x12x128xbf16>
    %12 = vector.shape_cast %11 : vector<1x12x128xbf16> to vector<12x128xbf16>
    %cst_12 = arith.constant dense<0.000000e+00> : vector<288x128xf32>
    %13 = tpu.matmul %10, %12, %cst_12 {dimension_numbers = #tpu.dot_dimension_numbers<[1], [0], [0], [1], [0, 0, 1, 1], [], []>} : vector<288x12xbf16>, vector<12x128xbf16>, vector<288x128xf32> -> vector<288x128xf32>
    %c0_13 = arith.constant 0 : index
    %c0_14 = arith.constant 0 : index
    %14 = vector.load %arg14[%c0_13, %c0_14] : memref<288x128xf32, #tpu.memory_space<vmem>>, vector<288x128xf32>
    %15 = arith.addf %14, %13 : vector<288x128xf32>
    %c0_15 = arith.constant 0 : index
    %c0_16 = arith.constant 0 : index
    %16 = vector.load %arg14[%c0_15, %c0_16] : memref<288x128xf32, #tpu.memory_space<vmem>>, vector<288x128xf32>
    tpu.vector_store %arg14[%c0_15, %c0_16], %15 {strides = array<i32>} : memref<288x128xf32, #tpu.memory_space<vmem>>, vector<288x128xf32>,
    %c2 = arith.constant 2 : index
    %c0_17 = arith.constant 0 : index
    %17 = vector.load %arg1[%c2, %c0_17] : memref<336x12xf32, #tpu.memory_space<vmem>>, vector<288x12xf32>
    %18 = arith.truncf %17 : vector<288x12xf32> to vector<288x12xbf16>
    %c2_18 = arith.constant 2 : index
    %c0_19 = arith.constant 0 : index
    %c0_20 = arith.constant 0 : index
    %19 = vector.load %arg2[%c2_18, %c0_19, %c0_20] : memref<9x12x128xbf16, #tpu.memory_space<vmem>>, vector<1x12x128xbf16>
    %20 = vector.shape_cast %19 : vector<1x12x128xbf16> to vector<12x128xbf16>
    %cst_21 = arith.constant dense<0.000000e+00> : vector<288x128xf32>
    %21 = tpu.matmul %18, %20, %cst_21 {dimension_numbers = #tpu.dot_dimension_numbers<[1], [0], [0], [1], [0, 0, 1, 1], [], []>} : vector<288x12xbf16>, vector<12x128xbf16>, vector<288x128xf32> -> vector<288x128xf32>
    %c0_22 = arith.constant 0 : index
    %c0_23 = arith.constant 0 : index
    %22 = vector.load %arg14[%c0_22, %c0_23] : memref<288x128xf32, #tpu.memory_space<vmem>>, vector<288x128xf32>
    %23 = arith.addf %22, %21 : vector<288x128xf32>
    %c0_24 = arith.constant 0 : index
    %c0_25 = arith.constant 0 : index
    %24 = vector.load %arg14[%c0_24, %c0_25] : memref<288x128xf32, #tpu.memory_space<vmem>>, vector<288x128xf32>
    tpu.vector_store %arg14[%c0_24, %c0_25], %23 {strides = array<i32>} : memref<288x128xf32, #tpu.memory_space<vmem>>, vector<288x128xf32>,
    %c18 = arith.constant 18 : index
    %c0_26 = arith.constant 0 : index
    %25 = vector.load %arg1[%c18, %c0_26] : memref<336x12xf32, #tpu.memory_space<vmem>>, vector<288x12xf32>
    %26 = arith.truncf %25 : vector<288x12xf32> to vector<288x12xbf16>
    %c3 = arith.constant 3 : index
    %c0_27 = arith.constant 0 : index
    %c0_28 = arith.constant 0 : index
    %27 = vector.load %arg2[%c3, %c0_27, %c0_28] : memref<9x12x128xbf16, #tpu.memory_space<vmem>>, vector<1x12x128xbf16>
    %28 = vector.shape_cast %27 : vector<1x12x128xbf16> to vector<12x128xbf16>
    %cst_29 = arith.constant dense<0.000000e+00> : vector<288x128xf32>
    %29 = tpu.matmul %26, %28, %cst_29 {dimension_numbers = #tpu.dot_dimension_numbers<[1], [0], [0], [1], [0, 0, 1, 1], [], []>} : vector<288x12xbf16>, vector<12x128xbf16>, vector<288x128xf32> -> vector<288x128xf32>
    %c0_30 = arith.constant 0 : index
    %c0_31 = arith.constant 0 : index
    %30 = vector.load %arg14[%c0_30, %c0_31] : memref<288x128xf32, #tpu.memory_space<vmem>>, vector<288x128xf32>
    %31 = arith.addf %30, %29 : vector<288x128xf32>
    %c0_32 = arith.constant 0 : index
    %c0_33 = arith.constant 0 : index
    %32 = vector.load %arg14[%c0_32, %c0_33] : memref<288x128xf32, #tpu.memory_space<vmem>>, vector<288x128xf32>
    tpu.vector_store %arg14[%c0_32, %c0_33], %31 {strides = array<i32>} : memref<288x128xf32, #tpu.memory_space<vmem>>, vector<288x128xf32>,
    %c19 = arith.constant 19 : index
    %c0_34 = arith.constant 0 : index
    %33 = vector.load %arg1[%c19, %c0_34] : memref<336x12xf32, #tpu.memory_space<vmem>>, vector<288x12xf32>
    %34 = arith.truncf %33 : vector<288x12xf32> to vector<288x12xbf16>
    %c4 = arith.constant 4 : index
    %c0_35 = arith.constant 0 : index
    %c0_36 = arith.constant 0 : index
    %35 = vector.load %arg2[%c4, %c0_35, %c0_36] : memref<9x12x128xbf16, #tpu.memory_space<vmem>>, vector<1x12x128xbf16>
    %36 = vector.shape_cast %35 : vector<1x12x128xbf16> to vector<12x128xbf16>
    %cst_37 = arith.constant dense<0.000000e+00> : vector<288x128xf32>
    %37 = tpu.matmul %34, %36, %cst_37 {dimension_numbers = #tpu.dot_dimension_numbers<[1], [0], [0], [1], [0, 0, 1, 1], [], []>} : vector<288x12xbf16>, vector<12x128xbf16>, vector<288x128xf32> -> vector<288x128xf32>
    %c0_38 = arith.constant 0 : index
    %c0_39 = arith.constant 0 : index
    %38 = vector.load %arg14[%c0_38, %c0_39] : memref<288x128xf32, #tpu.memory_space<vmem>>, vector<288x128xf32>
    %39 = arith.addf %38, %37 : vector<288x128xf32>
    %c0_40 = arith.constant 0 : index
    %c0_41 = arith.constant 0 : index
    %40 = vector.load %arg14[%c0_40, %c0_41] : memref<288x128xf32, #tpu.memory_space<vmem>>, vector<288x128xf32>
    tpu.vector_store %arg14[%c0_40, %c0_41], %39 {strides = array<i32>} : memref<288x128xf32, #tpu.memory_space<vmem>>, vector<288x128xf32>,
    %c20 = arith.constant 20 : index
    %c0_42 = arith.constant 0 : index
    %41 = vector.load %arg1[%c20, %c0_42] : memref<336x12xf32, #tpu.memory_space<vmem>>, vector<288x12xf32>
    %42 = arith.truncf %41 : vector<288x12xf32> to vector<288x12xbf16>
    %c5 = arith.constant 5 : index
    %c0_43 = arith.constant 0 : index
    %c0_44 = arith.constant 0 : index
    %43 = vector.load %arg2[%c5, %c0_43, %c0_44] : memref<9x12x128xbf16, #tpu.memory_space<vmem>>, vector<1x12x128xbf16>
    %44 = vector.shape_cast %43 : vector<1x12x128xbf16> to vector<12x128xbf16>
    %cst_45 = arith.constant dense<0.000000e+00> : vector<288x128xf32>
    %45 = tpu.matmul %42, %44, %cst_45 {dimension_numbers = #tpu.dot_dimension_numbers<[1], [0], [0], [1], [0, 0, 1, 1], [], []>} : vector<288x12xbf16>, vector<12x128xbf16>, vector<288x128xf32> -> vector<288x128xf32>
    %c0_46 = arith.constant 0 : index
    %c0_47 = arith.constant 0 : index
    %46 = vector.load %arg14[%c0_46, %c0_47] : memref<288x128xf32, #tpu.memory_space<vmem>>, vector<288x128xf32>
    %47 = arith.addf %46, %45 : vector<288x128xf32>
    %c0_48 = arith.constant 0 : index
    %c0_49 = arith.constant 0 : index
    %48 = vector.load %arg14[%c0_48, %c0_49] : memref<288x128xf32, #tpu.memory_space<vmem>>, vector<288x128xf32>
    tpu.vector_store %arg14[%c0_48, %c0_49], %47 {strides = array<i32>} : memref<288x128xf32, #tpu.memory_space<vmem>>, vector<288x128xf32>,
    %c36 = arith.constant 36 : index
    %c0_50 = arith.constant 0 : index
    %49 = vector.load %arg1[%c36, %c0_50] : memref<336x12xf32, #tpu.memory_space<vmem>>, vector<288x12xf32>
    %50 = arith.truncf %49 : vector<288x12xf32> to vector<288x12xbf16>
    %c6 = arith.constant 6 : index
    %c0_51 = arith.constant 0 : index
    %c0_52 = arith.constant 0 : index
    %51 = vector.load %arg2[%c6, %c0_51, %c0_52] : memref<9x12x128xbf16, #tpu.memory_space<vmem>>, vector<1x12x128xbf16>
    %52 = vector.shape_cast %51 : vector<1x12x128xbf16> to vector<12x128xbf16>
    %cst_53 = arith.constant dense<0.000000e+00> : vector<288x128xf32>
    %53 = tpu.matmul %50, %52, %cst_53 {dimension_numbers = #tpu.dot_dimension_numbers<[1], [0], [0], [1], [0, 0, 1, 1], [], []>} : vector<288x12xbf16>, vector<12x128xbf16>, vector<288x128xf32> -> vector<288x128xf32>
    %c0_54 = arith.constant 0 : index
    %c0_55 = arith.constant 0 : index
    %54 = vector.load %arg14[%c0_54, %c0_55] : memref<288x128xf32, #tpu.memory_space<vmem>>, vector<288x128xf32>
    %55 = arith.addf %54, %53 : vector<288x128xf32>
    %c0_56 = arith.constant 0 : index
    %c0_57 = arith.constant 0 : index
    %56 = vector.load %arg14[%c0_56, %c0_57] : memref<288x128xf32, #tpu.memory_space<vmem>>, vector<288x128xf32>
    tpu.vector_store %arg14[%c0_56, %c0_57], %55 {strides = array<i32>} : memref<288x128xf32, #tpu.memory_space<vmem>>, vector<288x128xf32>,
    %c37 = arith.constant 37 : index
    %c0_58 = arith.constant 0 : index
    %57 = vector.load %arg1[%c37, %c0_58] : memref<336x12xf32, #tpu.memory_space<vmem>>, vector<288x12xf32>
    %58 = arith.truncf %57 : vector<288x12xf32> to vector<288x12xbf16>
    %c7 = arith.constant 7 : index
    %c0_59 = arith.constant 0 : index
    %c0_60 = arith.constant 0 : index
    %59 = vector.load %arg2[%c7, %c0_59, %c0_60] : memref<9x12x128xbf16, #tpu.memory_space<vmem>>, vector<1x12x128xbf16>
    %60 = vector.shape_cast %59 : vector<1x12x128xbf16> to vector<12x128xbf16>
    %cst_61 = arith.constant dense<0.000000e+00> : vector<288x128xf32>
    %61 = tpu.matmul %58, %60, %cst_61 {dimension_numbers = #tpu.dot_dimension_numbers<[1], [0], [0], [1], [0, 0, 1, 1], [], []>} : vector<288x12xbf16>, vector<12x128xbf16>, vector<288x128xf32> -> vector<288x128xf32>
    %c0_62 = arith.constant 0 : index
    %c0_63 = arith.constant 0 : index
    %62 = vector.load %arg14[%c0_62, %c0_63] : memref<288x128xf32, #tpu.memory_space<vmem>>, vector<288x128xf32>
    %63 = arith.addf %62, %61 : vector<288x128xf32>
    %c0_64 = arith.constant 0 : index
    %c0_65 = arith.constant 0 : index
    %64 = vector.load %arg14[%c0_64, %c0_65] : memref<288x128xf32, #tpu.memory_space<vmem>>, vector<288x128xf32>
    tpu.vector_store %arg14[%c0_64, %c0_65], %63 {strides = array<i32>} : memref<288x128xf32, #tpu.memory_space<vmem>>, vector<288x128xf32>,
    %c38 = arith.constant 38 : index
    %c0_66 = arith.constant 0 : index
    %65 = vector.load %arg1[%c38, %c0_66] : memref<336x12xf32, #tpu.memory_space<vmem>>, vector<288x12xf32>
    %66 = arith.truncf %65 : vector<288x12xf32> to vector<288x12xbf16>
    %c8 = arith.constant 8 : index
    %c0_67 = arith.constant 0 : index
    %c0_68 = arith.constant 0 : index
    %67 = vector.load %arg2[%c8, %c0_67, %c0_68] : memref<9x12x128xbf16, #tpu.memory_space<vmem>>, vector<1x12x128xbf16>
    %68 = vector.shape_cast %67 : vector<1x12x128xbf16> to vector<12x128xbf16>
    %cst_69 = arith.constant dense<0.000000e+00> : vector<288x128xf32>
    %69 = tpu.matmul %66, %68, %cst_69 {dimension_numbers = #tpu.dot_dimension_numbers<[1], [0], [0], [1], [0, 0, 1, 1], [], []>} : vector<288x12xbf16>, vector<12x128xbf16>, vector<288x128xf32> -> vector<288x128xf32>
    %c0_70 = arith.constant 0 : index
    %c0_71 = arith.constant 0 : index
    %70 = vector.load %arg14[%c0_70, %c0_71] : memref<288x128xf32, #tpu.memory_space<vmem>>, vector<288x128xf32>
    %71 = arith.addf %70, %69 : vector<288x128xf32>
    %cst_72 = arith.constant 0.000000e+00 : f32
    %72 = vector.broadcast %cst_72 : f32 to vector<288x128xf32>
    %73 = arith.maximumf %71, %72 : vector<288x128xf32>
    %c0_73 = arith.constant 0 : index
    %c0_74 = arith.constant 0 : index
    %74 = vector.load %arg14[%c0_73, %c0_74] : memref<288x128xf32, #tpu.memory_space<vmem>>, vector<288x128xf32>
    tpu.vector_store %arg14[%c0_73, %c0_74], %73 {strides = array<i32>} : memref<288x128xf32, #tpu.memory_space<vmem>>, vector<288x128xf32>,
    %cst_75 = arith.constant 0.000000e+00 : f32
    %75 = vector.broadcast %cst_75 : f32 to vector<1x128xf32>
    %cst_76 = arith.constant 0.000000e+00 : f32
    %76 = vector.broadcast %cst_76 : f32 to vector<10x128xf32>
    %c0_77 = arith.constant 0 : index
    %c0_78 = arith.constant 0 : index
    %77 = vector.load %arg11[%c0_77, %c0_78] : memref<112x128xf32, #tpu.memory_space<vmem>>, vector<10x128xf32>
    tpu.vector_store %arg11[%c0_77, %c0_78], %76 {strides = array<i32>} : memref<112x128xf32, #tpu.memory_space<vmem>>, vector<10x128xf32>,
    %c90 = arith.constant 90 : index
    %c0_79 = arith.constant 0 : index
    %78 = vector.load %arg11[%c90, %c0_79] : memref<112x128xf32, #tpu.memory_space<vmem>>, vector<10x128xf32>
    tpu.vector_store %arg11[%c90, %c0_79], %76 {strides = array<i32>} : memref<112x128xf32, #tpu.memory_space<vmem>>, vector<10x128xf32>,
    %c0_80 = arith.constant 0 : index
    %c0_81 = arith.constant 0 : index
    %79 = tpu.strided_load %arg14[%c0_80, %c0_81] {strides = array<i32: 2, 1>} : memref<288x128xf32, #tpu.memory_space<vmem>>, vector<8x128xf32>
    %c1_82 = arith.constant 1 : index
    %c0_83 = arith.constant 0 : index
    %80 = tpu.strided_load %arg14[%c1_82, %c0_83] {strides = array<i32: 2, 1>} : memref<288x128xf32, #tpu.memory_space<vmem>>, vector<8x128xf32>
    %c18_84 = arith.constant 18 : index
    %c0_85 = arith.constant 0 : index
    %81 = tpu.strided_load %arg14[%c18_84, %c0_85] {strides = array<i32: 2, 1>} : memref<288x128xf32, #tpu.memory_space<vmem>>, vector<8x128xf32>
    %c19_86 = arith.constant 19 : index
    %c0_87 = arith.constant 0 : index
    %82 = tpu.strided_load %arg14[%c19_86, %c0_87] {strides = array<i32: 2, 1>} : memref<288x128xf32, #tpu.memory_space<vmem>>, vector<8x128xf32>
    %83 = arith.maximumf %79, %80 : vector<8x128xf32>
    %84 = arith.maximumf %81, %82 : vector<8x128xf32>
    %85 = arith.maximumf %83, %84 : vector<8x128xf32>
    %86 = tpu.concatenate %75, %85, %75 in 0 : vector<1x128xf32>, vector<8x128xf32>, vector<1x128xf32> -> vector<10x128xf32>
    %c10 = arith.constant 10 : index
    %c0_88 = arith.constant 0 : index
    %87 = vector.load %arg11[%c10, %c0_88] : memref<112x128xf32, #tpu.memory_space<vmem>>, vector<10x128xf32>
    tpu.vector_store %arg11[%c10, %c0_88], %86 {strides = array<i32>} : memref<112x128xf32, #tpu.memory_space<vmem>>, vector<10x128xf32>,
    %c36_89 = arith.constant 36 : index
    %c0_90 = arith.constant 0 : index
    %88 = tpu.strided_load %arg14[%c36_89, %c0_90] {strides = array<i32: 2, 1>} : memref<288x128xf32, #tpu.memory_space<vmem>>, vector<8x128xf32>
    %c37_91 = arith.constant 37 : index
    %c0_92 = arith.constant 0 : index
    %89 = tpu.strided_load %arg14[%c37_91, %c0_92] {strides = array<i32: 2, 1>} : memref<288x128xf32, #tpu.memory_space<vmem>>, vector<8x128xf32>
    %c54 = arith.constant 54 : index
    %c0_93 = arith.constant 0 : index
    %90 = tpu.strided_load %arg14[%c54, %c0_93] {strides = array<i32: 2, 1>} : memref<288x128xf32, #tpu.memory_space<vmem>>, vector<8x128xf32>
    %c55 = arith.constant 55 : index
    %c0_94 = arith.constant 0 : index
    %91 = tpu.strided_load %arg14[%c55, %c0_94] {strides = array<i32: 2, 1>} : memref<288x128xf32, #tpu.memory_space<vmem>>, vector<8x128xf32>
    %92 = arith.maximumf %88, %89 : vector<8x128xf32>
    %93 = arith.maximumf %90, %91 : vector<8x128xf32>
    %94 = arith.maximumf %92, %93 : vector<8x128xf32>
    %95 = tpu.concatenate %75, %94, %75 in 0 : vector<1x128xf32>, vector<8x128xf32>, vector<1x128xf32> -> vector<10x128xf32>
    %c20_95 = arith.constant 20 : index
    %c0_96 = arith.constant 0 : index
    %96 = vector.load %arg11[%c20_95, %c0_96] : memref<112x128xf32, #tpu.memory_space<vmem>>, vector<10x128xf32>
    tpu.vector_store %arg11[%c20_95, %c0_96], %95 {strides = array<i32>} : memref<112x128xf32, #tpu.memory_space<vmem>>, vector<10x128xf32>,
    %c72 = arith.constant 72 : index
    %c0_97 = arith.constant 0 : index
    %97 = tpu.strided_load %arg14[%c72, %c0_97] {strides = array<i32: 2, 1>} : memref<288x128xf32, #tpu.memory_space<vmem>>, vector<8x128xf32>
    %c73 = arith.constant 73 : index
    %c0_98 = arith.constant 0 : index
    %98 = tpu.strided_load %arg14[%c73, %c0_98] {strides = array<i32: 2, 1>} : memref<288x128xf32, #tpu.memory_space<vmem>>, vector<8x128xf32>
    %c90_99 = arith.constant 90 : index
    %c0_100 = arith.constant 0 : index
    %99 = tpu.strided_load %arg14[%c90_99, %c0_100] {strides = array<i32: 2, 1>} : memref<288x128xf32, #tpu.memory_space<vmem>>, vector<8x128xf32>
    %c91 = arith.constant 91 : index
    %c0_101 = arith.constant 0 : index
    %100 = tpu.strided_load %arg14[%c91, %c0_101] {strides = array<i32: 2, 1>} : memref<288x128xf32, #tpu.memory_space<vmem>>, vector<8x128xf32>
    %101 = arith.maximumf %97, %98 : vector<8x128xf32>
    %102 = arith.maximumf %99, %100 : vector<8x128xf32>
    %103 = arith.maximumf %101, %102 : vector<8x128xf32>
    %104 = tpu.concatenate %75, %103, %75 in 0 : vector<1x128xf32>, vector<8x128xf32>, vector<1x128xf32> -> vector<10x128xf32>
    %c30 = arith.constant 30 : index
    %c0_102 = arith.constant 0 : index
    %105 = vector.load %arg11[%c30, %c0_102] : memref<112x128xf32, #tpu.memory_space<vmem>>, vector<10x128xf32>
    tpu.vector_store %arg11[%c30, %c0_102], %104 {strides = array<i32>} : memref<112x128xf32, #tpu.memory_space<vmem>>, vector<10x128xf32>,
    %c108 = arith.constant 108 : index
    %c0_103 = arith.constant 0 : index
    %106 = tpu.strided_load %arg14[%c108, %c0_103] {strides = array<i32: 2, 1>} : memref<288x128xf32, #tpu.memory_space<vmem>>, vector<8x128xf32>
    %c109 = arith.constant 109 : index
    %c0_104 = arith.constant 0 : index
    %107 = tpu.strided_load %arg14[%c109, %c0_104] {strides = array<i32: 2, 1>} : memref<288x128xf32, #tpu.memory_space<vmem>>, vector<8x128xf32>
    %c126 = arith.constant 126 : index
    %c0_105 = arith.constant 0 : index
    %108 = tpu.strided_load %arg14[%c126, %c0_105] {strides = array<i32: 2, 1>} : memref<288x128xf32, #tpu.memory_space<vmem>>, vector<8x128xf32>
    %c127 = arith.constant 127 : index
    %c0_106 = arith.constant 0 : index
    %109 = tpu.strided_load %arg14[%c127, %c0_106] {strides = array<i32: 2, 1>} : memref<288x128xf32, #tpu.memory_space<vmem>>, vector<8x128xf32>
    %110 = arith.maximumf %106, %107 : vector<8x128xf32>
    %111 = arith.maximumf %108, %109 : vector<8x128xf32>
    %112 = arith.maximumf %110, %111 : vector<8x128xf32>
    %113 = tpu.concatenate %75, %112, %75 in 0 : vector<1x128xf32>, vector<8x128xf32>, vector<1x128xf32> -> vector<10x128xf32>
    %c40 = arith.constant 40 : index
    %c0_107 = arith.constant 0 : index
    %114 = vector.load %arg11[%c40, %c0_107] : memref<112x128xf32, #tpu.memory_space<vmem>>, vector<10x128xf32>
    tpu.vector_store %arg11[%c40, %c0_107], %113 {strides = array<i32>} : memref<112x128xf32, #tpu.memory_space<vmem>>, vector<10x128xf32>,
    %c144 = arith.constant 144 : index
    %c0_108 = arith.constant 0 : index
    %115 = tpu.strided_load %arg14[%c144, %c0_108] {strides = array<i32: 2, 1>} : memref<288x128xf32, #tpu.memory_space<vmem>>, vector<8x128xf32>
    %c145 = arith.constant 145 : index
    %c0_109 = arith.constant 0 : index
    %116 = tpu.strided_load %arg14[%c145, %c0_109] {strides = array<i32: 2, 1>} : memref<288x128xf32, #tpu.memory_space<vmem>>, vector<8x128xf32>
    %c162 = arith.constant 162 : index
    %c0_110 = arith.constant 0 : index
    %117 = tpu.strided_load %arg14[%c162, %c0_110] {strides = array<i32: 2, 1>} : memref<288x128xf32, #tpu.memory_space<vmem>>, vector<8x128xf32>
    %c163 = arith.constant 163 : index
    %c0_111 = arith.constant 0 : index
    %118 = tpu.strided_load %arg14[%c163, %c0_111] {strides = array<i32: 2, 1>} : memref<288x128xf32, #tpu.memory_space<vmem>>, vector<8x128xf32>
    %119 = arith.maximumf %115, %116 : vector<8x128xf32>
    %120 = arith.maximumf %117, %118 : vector<8x128xf32>
    %121 = arith.maximumf %119, %120 : vector<8x128xf32>
    %122 = tpu.concatenate %75, %121, %75 in 0 : vector<1x128xf32>, vector<8x128xf32>, vector<1x128xf32> -> vector<10x128xf32>
    %c50 = arith.constant 50 : index
    %c0_112 = arith.constant 0 : index
    %123 = vector.load %arg11[%c50, %c0_112] : memref<112x128xf32, #tpu.memory_space<vmem>>, vector<10x128xf32>
    tpu.vector_store %arg11[%c50, %c0_112], %122 {strides = array<i32>} : memref<112x128xf32, #tpu.memory_space<vmem>>, vector<10x128xf32>,
    %c180 = arith.constant 180 : index
    %c0_113 = arith.constant 0 : index
    %124 = tpu.strided_load %arg14[%c180, %c0_113] {strides = array<i32: 2, 1>} : memref<288x128xf32, #tpu.memory_space<vmem>>, vector<8x128xf32>
    %c181 = arith.constant 181 : index
    %c0_114 = arith.constant 0 : index
    %125 = tpu.strided_load %arg14[%c181, %c0_114] {strides = array<i32: 2, 1>} : memref<288x128xf32, #tpu.memory_space<vmem>>, vector<8x128xf32>
    %c198 = arith.constant 198 : index
    %c0_115 = arith.constant 0 : index
    %126 = tpu.strided_load %arg14[%c198, %c0_115] {strides = array<i32: 2, 1>} : memref<288x128xf32, #tpu.memory_space<vmem>>, vector<8x128xf32>
    %c199 = arith.constant 199 : index
    %c0_116 = arith.constant 0 : index
    %127 = tpu.strided_load %arg14[%c199, %c0_116] {strides = array<i32: 2, 1>} : memref<288x128xf32, #tpu.memory_space<vmem>>, vector<8x128xf32>
    %128 = arith.maximumf %124, %125 : vector<8x128xf32>
    %129 = arith.maximumf %126, %127 : vector<8x128xf32>
    %130 = arith.maximumf %128, %129 : vector<8x128xf32>
    %131 = tpu.concatenate %75, %130, %75 in 0 : vector<1x128xf32>, vector<8x128xf32>, vector<1x128xf32> -> vector<10x128xf32>
    %c60 = arith.constant 60 : index
    %c0_117 = arith.constant 0 : index
    %132 = vector.load %arg11[%c60, %c0_117] : memref<112x128xf32, #tpu.memory_space<vmem>>, vector<10x128xf32>
    tpu.vector_store %arg11[%c60, %c0_117], %131 {strides = array<i32>} : memref<112x128xf32, #tpu.memory_space<vmem>>, vector<10x128xf32>,
    %c216 = arith.constant 216 : index
    %c0_118 = arith.constant 0 : index
    %133 = tpu.strided_load %arg14[%c216, %c0_118] {strides = array<i32: 2, 1>} : memref<288x128xf32, #tpu.memory_space<vmem>>, vector<8x128xf32>
    %c217 = arith.constant 217 : index
    %c0_119 = arith.constant 0 : index
    %134 = tpu.strided_load %arg14[%c217, %c0_119] {strides = array<i32: 2, 1>} : memref<288x128xf32, #tpu.memory_space<vmem>>, vector<8x128xf32>
    %c234 = arith.constant 234 : index
    %c0_120 = arith.constant 0 : index
    %135 = tpu.strided_load %arg14[%c234, %c0_120] {strides = array<i32: 2, 1>} : memref<288x128xf32, #tpu.memory_space<vmem>>, vector<8x128xf32>
    %c235 = arith.constant 235 : index
    %c0_121 = arith.constant 0 : index
    %136 = tpu.strided_load %arg14[%c235, %c0_121] {strides = array<i32: 2, 1>} : memref<288x128xf32, #tpu.memory_space<vmem>>, vector<8x128xf32>
    %137 = arith.maximumf %133, %134 : vector<8x128xf32>
    %138 = arith.maximumf %135, %136 : vector<8x128xf32>
    %139 = arith.maximumf %137, %138 : vector<8x128xf32>
    %140 = tpu.concatenate %75, %139, %75 in 0 : vector<1x128xf32>, vector<8x128xf32>, vector<1x128xf32> -> vector<10x128xf32>
    %c70 = arith.constant 70 : index
    %c0_122 = arith.constant 0 : index
    %141 = vector.load %arg11[%c70, %c0_122] : memref<112x128xf32, #tpu.memory_space<vmem>>, vector<10x128xf32>
    tpu.vector_store %arg11[%c70, %c0_122], %140 {strides = array<i32>} : memref<112x128xf32, #tpu.memory_space<vmem>>, vector<10x128xf32>,
    %c252 = arith.constant 252 : index
    %c0_123 = arith.constant 0 : index
    %142 = tpu.strided_load %arg14[%c252, %c0_123] {strides = array<i32: 2, 1>} : memref<288x128xf32, #tpu.memory_space<vmem>>, vector<8x128xf32>
    %c253 = arith.constant 253 : index
    %c0_124 = arith.constant 0 : index
    %143 = tpu.strided_load %arg14[%c253, %c0_124] {strides = array<i32: 2, 1>} : memref<288x128xf32, #tpu.memory_space<vmem>>, vector<8x128xf32>
    %c270 = arith.constant 270 : index
    %c0_125 = arith.constant 0 : index
    %144 = tpu.strided_load %arg14[%c270, %c0_125] {strides = array<i32: 2, 1>} : memref<288x128xf32, #tpu.memory_space<vmem>>, vector<8x128xf32>
    %c271 = arith.constant 271 : index
    %c0_126 = arith.constant 0 : index
    %145 = tpu.strided_load %arg14[%c271, %c0_126] {strides = array<i32: 2, 1>} : memref<288x128xf32, #tpu.memory_space<vmem>>, vector<8x128xf32>
    %146 = arith.maximumf %142, %143 : vector<8x128xf32>
    %147 = arith.maximumf %144, %145 : vector<8x128xf32>
    %148 = arith.maximumf %146, %147 : vector<8x128xf32>
    %149 = tpu.concatenate %75, %148, %75 in 0 : vector<1x128xf32>, vector<8x128xf32>, vector<1x128xf32> -> vector<10x128xf32>
    %c80 = arith.constant 80 : index
    %c0_127 = arith.constant 0 : index
    %150 = vector.load %arg11[%c80, %c0_127] : memref<112x128xf32, #tpu.memory_space<vmem>>, vector<10x128xf32>
    tpu.vector_store %arg11[%c80, %c0_127], %149 {strides = array<i32>} : memref<112x128xf32, #tpu.memory_space<vmem>>, vector<10x128xf32>,
    %c0_128 = arith.constant 0 : index
    %c0_129 = arith.constant 0 : index
    %151 = vector.load %arg7[%c0_128, %c0_129] : memref<1x128xf32, #tpu.memory_space<vmem>>, vector<1x128xf32>
    %c0_130 = arith.constant 0 : index
    %c0_131 = arith.constant 0 : index
    %152 = vector.load %arg11[%c0_130, %c0_131] : memref<112x128xf32, #tpu.memory_space<vmem>>, vector<80x128xf32>
    %153 = arith.truncf %152 : vector<80x128xf32> to vector<80x128xbf16>
    %c0_132 = arith.constant 0 : index
    %c0_133 = arith.constant 0 : index
    %c0_134 = arith.constant 0 : index
    %154 = vector.load %arg3[%c0_132, %c0_133, %c0_134] : memref<9x128x128xbf16, #tpu.memory_space<vmem>>, vector<1x128x128xbf16>
    %155 = vector.shape_cast %154 : vector<1x128x128xbf16> to vector<128x128xbf16>
    %cst_135 = arith.constant dense<0.000000e+00> : vector<80x128xf32>
    %156 = tpu.matmul %153, %155, %cst_135 {dimension_numbers = #tpu.dot_dimension_numbers<[1], [0], [0], [1], [0, 0, 1, 1], [], []>} : vector<80x128xbf16>, vector<128x128xbf16>, vector<80x128xf32> -> vector<80x128xf32>
    %157 = vector.broadcast %151 : vector<1x128xf32> to vector<80x128xf32>
    %158 = arith.addf %156, %157 : vector<80x128xf32>
    %c0_136 = arith.constant 0 : index
    %c0_137 = arith.constant 0 : index
    %159 = vector.load %arg15[%c0_136, %c0_137] : memref<80x128xf32, #tpu.memory_space<vmem>>, vector<80x128xf32>
    tpu.vector_store %arg15[%c0_136, %c0_137], %158 {strides = array<i32>} : memref<80x128xf32, #tpu.memory_space<vmem>>, vector<80x128xf32>,
    %c1_138 = arith.constant 1 : index
    %c0_139 = arith.constant 0 : index
    %160 = vector.load %arg11[%c1_138, %c0_139] : memref<112x128xf32, #tpu.memory_space<vmem>>, vector<80x128xf32>
    %161 = arith.truncf %160 : vector<80x128xf32> to vector<80x128xbf16>
    %c1_140 = arith.constant 1 : index
    %c0_141 = arith.constant 0 : index
    %c0_142 = arith.constant 0 : index
    %162 = vector.load %arg3[%c1_140, %c0_141, %c0_142] : memref<9x128x128xbf16, #tpu.memory_space<vmem>>, vector<1x128x128xbf16>
    %163 = vector.shape_cast %162 : vector<1x128x128xbf16> to vector<128x128xbf16>
    %cst_143 = arith.constant dense<0.000000e+00> : vector<80x128xf32>
    %164 = tpu.matmul %161, %163, %cst_143 {dimension_numbers = #tpu.dot_dimension_numbers<[1], [0], [0], [1], [0, 0, 1, 1], [], []>} : vector<80x128xbf16>, vector<128x128xbf16>, vector<80x128xf32> -> vector<80x128xf32>
    %c0_144 = arith.constant 0 : index
    %c0_145 = arith.constant 0 : index
    %165 = vector.load %arg15[%c0_144, %c0_145] : memref<80x128xf32, #tpu.memory_space<vmem>>, vector<80x128xf32>
    %166 = arith.addf %165, %164 : vector<80x128xf32>
    %c0_146 = arith.constant 0 : index
    %c0_147 = arith.constant 0 : index
    %167 = vector.load %arg15[%c0_146, %c0_147] : memref<80x128xf32, #tpu.memory_space<vmem>>, vector<80x128xf32>
    tpu.vector_store %arg15[%c0_146, %c0_147], %166 {strides = array<i32>} : memref<80x128xf32, #tpu.memory_space<vmem>>, vector<80x128xf32>,
    %c2_148 = arith.constant 2 : index
    %c0_149 = arith.constant 0 : index
    %168 = vector.load %arg11[%c2_148, %c0_149] : memref<112x128xf32, #tpu.memory_space<vmem>>, vector<80x128xf32>
    %169 = arith.truncf %168 : vector<80x128xf32> to vector<80x128xbf16>
    %c2_150 = arith.constant 2 : index
    %c0_151 = arith.constant 0 : index
    %c0_152 = arith.constant 0 : index
    %170 = vector.load %arg3[%c2_150, %c0_151, %c0_152] : memref<9x128x128xbf16, #tpu.memory_space<vmem>>, vector<1x128x128xbf16>
    %171 = vector.shape_cast %170 : vector<1x128x128xbf16> to vector<128x128xbf16>
    %cst_153 = arith.constant dense<0.000000e+00> : vector<80x128xf32>
    %172 = tpu.matmul %169, %171, %cst_153 {dimension_numbers = #tpu.dot_dimension_numbers<[1], [0], [0], [1], [0, 0, 1, 1], [], []>} : vector<80x128xbf16>, vector<128x128xbf16>, vector<80x128xf32> -> vector<80x128xf32>
    %c0_154 = arith.constant 0 : index
    %c0_155 = arith.constant 0 : index
    %173 = vector.load %arg15[%c0_154, %c0_155] : memref<80x128xf32, #tpu.memory_space<vmem>>, vector<80x128xf32>
    %174 = arith.addf %173, %172 : vector<80x128xf32>
    %c0_156 = arith.constant 0 : index
    %c0_157 = arith.constant 0 : index
    %175 = vector.load %arg15[%c0_156, %c0_157] : memref<80x128xf32, #tpu.memory_space<vmem>>, vector<80x128xf32>
    tpu.vector_store %arg15[%c0_156, %c0_157], %174 {strides = array<i32>} : memref<80x128xf32, #tpu.memory_space<vmem>>, vector<80x128xf32>,
    %c10_158 = arith.constant 10 : index
    %c0_159 = arith.constant 0 : index
    %176 = vector.load %arg11[%c10_158, %c0_159] : memref<112x128xf32, #tpu.memory_space<vmem>>, vector<80x128xf32>
    %177 = arith.truncf %176 : vector<80x128xf32> to vector<80x128xbf16>
    %c3_160 = arith.constant 3 : index
    %c0_161 = arith.constant 0 : index
    %c0_162 = arith.constant 0 : index
    %178 = vector.load %arg3[%c3_160, %c0_161, %c0_162] : memref<9x128x128xbf16, #tpu.memory_space<vmem>>, vector<1x128x128xbf16>
    %179 = vector.shape_cast %178 : vector<1x128x128xbf16> to vector<128x128xbf16>
    %cst_163 = arith.constant dense<0.000000e+00> : vector<80x128xf32>
    %180 = tpu.matmul %177, %179, %cst_163 {dimension_numbers = #tpu.dot_dimension_numbers<[1], [0], [0], [1], [0, 0, 1, 1], [], []>} : vector<80x128xbf16>, vector<128x128xbf16>, vector<80x128xf32> -> vector<80x128xf32>
    %c0_164 = arith.constant 0 : index
    %c0_165 = arith.constant 0 : index
    %181 = vector.load %arg15[%c0_164, %c0_165] : memref<80x128xf32, #tpu.memory_space<vmem>>, vector<80x128xf32>
    %182 = arith.addf %181, %180 : vector<80x128xf32>
    %c0_166 = arith.constant 0 : index
    %c0_167 = arith.constant 0 : index
    %183 = vector.load %arg15[%c0_166, %c0_167] : memref<80x128xf32, #tpu.memory_space<vmem>>, vector<80x128xf32>
    tpu.vector_store %arg15[%c0_166, %c0_167], %182 {strides = array<i32>} : memref<80x128xf32, #tpu.memory_space<vmem>>, vector<80x128xf32>,
    %c11 = arith.constant 11 : index
    %c0_168 = arith.constant 0 : index
    %184 = vector.load %arg11[%c11, %c0_168] : memref<112x128xf32, #tpu.memory_space<vmem>>, vector<80x128xf32>
    %185 = arith.truncf %184 : vector<80x128xf32> to vector<80x128xbf16>
    %c4_169 = arith.constant 4 : index
    %c0_170 = arith.constant 0 : index
    %c0_171 = arith.constant 0 : index
    %186 = vector.load %arg3[%c4_169, %c0_170, %c0_171] : memref<9x128x128xbf16, #tpu.memory_space<vmem>>, vector<1x128x128xbf16>
    %187 = vector.shape_cast %186 : vector<1x128x128xbf16> to vector<128x128xbf16>
    %cst_172 = arith.constant dense<0.000000e+00> : vector<80x128xf32>
    %188 = tpu.matmul %185, %187, %cst_172 {dimension_numbers = #tpu.dot_dimension_numbers<[1], [0], [0], [1], [0, 0, 1, 1], [], []>} : vector<80x128xbf16>, vector<128x128xbf16>, vector<80x128xf32> -> vector<80x128xf32>
    %c0_173 = arith.constant 0 : index
    %c0_174 = arith.constant 0 : index
    %189 = vector.load %arg15[%c0_173, %c0_174] : memref<80x128xf32, #tpu.memory_space<vmem>>, vector<80x128xf32>
    %190 = arith.addf %189, %188 : vector<80x128xf32>
    %c0_175 = arith.constant 0 : index
    %c0_176 = arith.constant 0 : index
    %191 = vector.load %arg15[%c0_175, %c0_176] : memref<80x128xf32, #tpu.memory_space<vmem>>, vector<80x128xf32>
    tpu.vector_store %arg15[%c0_175, %c0_176], %190 {strides = array<i32>} : memref<80x128xf32, #tpu.memory_space<vmem>>, vector<80x128xf32>,
    %c12 = arith.constant 12 : index
    %c0_177 = arith.constant 0 : index
    %192 = vector.load %arg11[%c12, %c0_177] : memref<112x128xf32, #tpu.memory_space<vmem>>, vector<80x128xf32>
    %193 = arith.truncf %192 : vector<80x128xf32> to vector<80x128xbf16>
    %c5_178 = arith.constant 5 : index
    %c0_179 = arith.constant 0 : index
    %c0_180 = arith.constant 0 : index
    %194 = vector.load %arg3[%c5_178, %c0_179, %c0_180] : memref<9x128x128xbf16, #tpu.memory_space<vmem>>, vector<1x128x128xbf16>
    %195 = vector.shape_cast %194 : vector<1x128x128xbf16> to vector<128x128xbf16>
    %cst_181 = arith.constant dense<0.000000e+00> : vector<80x128xf32>
    %196 = tpu.matmul %193, %195, %cst_181 {dimension_numbers = #tpu.dot_dimension_numbers<[1], [0], [0], [1], [0, 0, 1, 1], [], []>} : vector<80x128xbf16>, vector<128x128xbf16>, vector<80x128xf32> -> vector<80x128xf32>
    %c0_182 = arith.constant 0 : index
    %c0_183 = arith.constant 0 : index
    %197 = vector.load %arg15[%c0_182, %c0_183] : memref<80x128xf32, #tpu.memory_space<vmem>>, vector<80x128xf32>
    %198 = arith.addf %197, %196 : vector<80x128xf32>
    %c0_184 = arith.constant 0 : index
    %c0_185 = arith.constant 0 : index
    %199 = vector.load %arg15[%c0_184, %c0_185] : memref<80x128xf32, #tpu.memory_space<vmem>>, vector<80x128xf32>
    tpu.vector_store %arg15[%c0_184, %c0_185], %198 {strides = array<i32>} : memref<80x128xf32, #tpu.memory_space<vmem>>, vector<80x128xf32>,
    %c20_186 = arith.constant 20 : index
    %c0_187 = arith.constant 0 : index
    %200 = vector.load %arg11[%c20_186, %c0_187] : memref<112x128xf32, #tpu.memory_space<vmem>>, vector<80x128xf32>
    %201 = arith.truncf %200 : vector<80x128xf32> to vector<80x128xbf16>
    %c6_188 = arith.constant 6 : index
    %c0_189 = arith.constant 0 : index
    %c0_190 = arith.constant 0 : index
    %202 = vector.load %arg3[%c6_188, %c0_189, %c0_190] : memref<9x128x128xbf16, #tpu.memory_space<vmem>>, vector<1x128x128xbf16>
    %203 = vector.shape_cast %202 : vector<1x128x128xbf16> to vector<128x128xbf16>
    %cst_191 = arith.constant dense<0.000000e+00> : vector<80x128xf32>
    %204 = tpu.matmul %201, %203, %cst_191 {dimension_numbers = #tpu.dot_dimension_numbers<[1], [0], [0], [1], [0, 0, 1, 1], [], []>} : vector<80x128xbf16>, vector<128x128xbf16>, vector<80x128xf32> -> vector<80x128xf32>
    %c0_192 = arith.constant 0 : index
    %c0_193 = arith.constant 0 : index
    %205 = vector.load %arg15[%c0_192, %c0_193] : memref<80x128xf32, #tpu.memory_space<vmem>>, vector<80x128xf32>
    %206 = arith.addf %205, %204 : vector<80x128xf32>
    %c0_194 = arith.constant 0 : index
    %c0_195 = arith.constant 0 : index
    %207 = vector.load %arg15[%c0_194, %c0_195] : memref<80x128xf32, #tpu.memory_space<vmem>>, vector<80x128xf32>
    tpu.vector_store %arg15[%c0_194, %c0_195], %206 {strides = array<i32>} : memref<80x128xf32, #tpu.memory_space<vmem>>, vector<80x128xf32>,
    %c21 = arith.constant 21 : index
    %c0_196 = arith.constant 0 : index
    %208 = vector.load %arg11[%c21, %c0_196] : memref<112x128xf32, #tpu.memory_space<vmem>>, vector<80x128xf32>
    %209 = arith.truncf %208 : vector<80x128xf32> to vector<80x128xbf16>
    %c7_197 = arith.constant 7 : index
    %c0_198 = arith.constant 0 : index
    %c0_199 = arith.constant 0 : index
    %210 = vector.load %arg3[%c7_197, %c0_198, %c0_199] : memref<9x128x128xbf16, #tpu.memory_space<vmem>>, vector<1x128x128xbf16>
    %211 = vector.shape_cast %210 : vector<1x128x128xbf16> to vector<128x128xbf16>
    %cst_200 = arith.constant dense<0.000000e+00> : vector<80x128xf32>
    %212 = tpu.matmul %209, %211, %cst_200 {dimension_numbers = #tpu.dot_dimension_numbers<[1], [0], [0], [1], [0, 0, 1, 1], [], []>} : vector<80x128xbf16>, vector<128x128xbf16>, vector<80x128xf32> -> vector<80x128xf32>
    %c0_201 = arith.constant 0 : index
    %c0_202 = arith.constant 0 : index
    %213 = vector.load %arg15[%c0_201, %c0_202] : memref<80x128xf32, #tpu.memory_space<vmem>>, vector<80x128xf32>
    %214 = arith.addf %213, %212 : vector<80x128xf32>
    %c0_203 = arith.constant 0 : index
    %c0_204 = arith.constant 0 : index
    %215 = vector.load %arg15[%c0_203, %c0_204] : memref<80x128xf32, #tpu.memory_space<vmem>>, vector<80x128xf32>
    tpu.vector_store %arg15[%c0_203, %c0_204], %214 {strides = array<i32>} : memref<80x128xf32, #tpu.memory_space<vmem>>, vector<80x128xf32>,
    %c22 = arith.constant 22 : index
    %c0_205 = arith.constant 0 : index
    %216 = vector.load %arg11[%c22, %c0_205] : memref<112x128xf32, #tpu.memory_space<vmem>>, vector<80x128xf32>
    %217 = arith.truncf %216 : vector<80x128xf32> to vector<80x128xbf16>
    %c8_206 = arith.constant 8 : index
    %c0_207 = arith.constant 0 : index
    %c0_208 = arith.constant 0 : index
    %218 = vector.load %arg3[%c8_206, %c0_207, %c0_208] : memref<9x128x128xbf16, #tpu.memory_space<vmem>>, vector<1x128x128xbf16>
    %219 = vector.shape_cast %218 : vector<1x128x128xbf16> to vector<128x128xbf16>
    %cst_209 = arith.constant dense<0.000000e+00> : vector<80x128xf32>
    %220 = tpu.matmul %217, %219, %cst_209 {dimension_numbers = #tpu.dot_dimension_numbers<[1], [0], [0], [1], [0, 0, 1, 1], [], []>} : vector<80x128xbf16>, vector<128x128xbf16>, vector<80x128xf32> -> vector<80x128xf32>
    %c0_210 = arith.constant 0 : index
    %c0_211 = arith.constant 0 : index
    %221 = vector.load %arg15[%c0_210, %c0_211] : memref<80x128xf32, #tpu.memory_space<vmem>>, vector<80x128xf32>
    %222 = arith.addf %221, %220 : vector<80x128xf32>
    %cst_212 = arith.constant 0.000000e+00 : f32
    %223 = vector.broadcast %cst_212 : f32 to vector<80x128xf32>
    %224 = arith.maximumf %222, %223 : vector<80x128xf32>
    %c0_213 = arith.constant 0 : index
    %c0_214 = arith.constant 0 : index
    %225 = vector.load %arg15[%c0_213, %c0_214] : memref<80x128xf32, #tpu.memory_space<vmem>>, vector<80x128xf32>
    tpu.vector_store %arg15[%c0_213, %c0_214], %224 {strides = array<i32>} : memref<80x128xf32, #tpu.memory_space<vmem>>, vector<80x128xf32>,
    %cst_215 = arith.constant 0.000000e+00 : f32
    %226 = vector.broadcast %cst_215 : f32 to vector<1x128xf32>
    %cst_216 = arith.constant 0.000000e+00 : f32
    %227 = vector.broadcast %cst_216 : f32 to vector<6x128xf32>
    %c0_217 = arith.constant 0 : index
    %c0_218 = arith.constant 0 : index
    %228 = vector.load %arg12[%c0_217, %c0_218] : memref<48x128xf32, #tpu.memory_space<vmem>>, vector<6x128xf32>
    tpu.vector_store %arg12[%c0_217, %c0_218], %227 {strides = array<i32>} : memref<48x128xf32, #tpu.memory_space<vmem>>, vector<6x128xf32>,
    %c30_219 = arith.constant 30 : index
    %c0_220 = arith.constant 0 : index
    %229 = vector.load %arg12[%c30_219, %c0_220] : memref<48x128xf32, #tpu.memory_space<vmem>>, vector<6x128xf32>
    tpu.vector_store %arg12[%c30_219, %c0_220], %227 {strides = array<i32>} : memref<48x128xf32, #tpu.memory_space<vmem>>, vector<6x128xf32>,
    %c0_221 = arith.constant 0 : index
    %c0_222 = arith.constant 0 : index
    %230 = tpu.strided_load %arg15[%c0_221, %c0_222] {strides = array<i32: 2, 1>} : memref<80x128xf32, #tpu.memory_space<vmem>>, vector<4x128xf32>
    %c1_223 = arith.constant 1 : index
    %c0_224 = arith.constant 0 : index
    %231 = tpu.strided_load %arg15[%c1_223, %c0_224] {strides = array<i32: 2, 1>} : memref<80x128xf32, #tpu.memory_space<vmem>>, vector<4x128xf32>
    %c10_225 = arith.constant 10 : index
    %c0_226 = arith.constant 0 : index
    %232 = tpu.strided_load %arg15[%c10_225, %c0_226] {strides = array<i32: 2, 1>} : memref<80x128xf32, #tpu.memory_space<vmem>>, vector<4x128xf32>
    %c11_227 = arith.constant 11 : index
    %c0_228 = arith.constant 0 : index
    %233 = tpu.strided_load %arg15[%c11_227, %c0_228] {strides = array<i32: 2, 1>} : memref<80x128xf32, #tpu.memory_space<vmem>>, vector<4x128xf32>
    %234 = arith.maximumf %230, %231 : vector<4x128xf32>
    %235 = arith.maximumf %232, %233 : vector<4x128xf32>
    %236 = arith.maximumf %234, %235 : vector<4x128xf32>
    %237 = tpu.concatenate %226, %236, %226 in 0 : vector<1x128xf32>, vector<4x128xf32>, vector<1x128xf32> -> vector<6x128xf32>
    %c6_229 = arith.constant 6 : index
    %c0_230 = arith.constant 0 : index
    %238 = vector.load %arg12[%c6_229, %c0_230] : memref<48x128xf32, #tpu.memory_space<vmem>>, vector<6x128xf32>
    tpu.vector_store %arg12[%c6_229, %c0_230], %237 {strides = array<i32>} : memref<48x128xf32, #tpu.memory_space<vmem>>, vector<6x128xf32>,
    %c20_231 = arith.constant 20 : index
    %c0_232 = arith.constant 0 : index
    %239 = tpu.strided_load %arg15[%c20_231, %c0_232] {strides = array<i32: 2, 1>} : memref<80x128xf32, #tpu.memory_space<vmem>>, vector<4x128xf32>
    %c21_233 = arith.constant 21 : index
    %c0_234 = arith.constant 0 : index
    %240 = tpu.strided_load %arg15[%c21_233, %c0_234] {strides = array<i32: 2, 1>} : memref<80x128xf32, #tpu.memory_space<vmem>>, vector<4x128xf32>
    %c30_235 = arith.constant 30 : index
    %c0_236 = arith.constant 0 : index
    %241 = tpu.strided_load %arg15[%c30_235, %c0_236] {strides = array<i32: 2, 1>} : memref<80x128xf32, #tpu.memory_space<vmem>>, vector<4x128xf32>
    %c31 = arith.constant 31 : index
    %c0_237 = arith.constant 0 : index
    %242 = tpu.strided_load %arg15[%c31, %c0_237] {strides = array<i32: 2, 1>} : memref<80x128xf32, #tpu.memory_space<vmem>>, vector<4x128xf32>
    %243 = arith.maximumf %239, %240 : vector<4x128xf32>
    %244 = arith.maximumf %241, %242 : vector<4x128xf32>
    %245 = arith.maximumf %243, %244 : vector<4x128xf32>
    %246 = tpu.concatenate %226, %245, %226 in 0 : vector<1x128xf32>, vector<4x128xf32>, vector<1x128xf32> -> vector<6x128xf32>
    %c12_238 = arith.constant 12 : index
    %c0_239 = arith.constant 0 : index
    %247 = vector.load %arg12[%c12_238, %c0_239] : memref<48x128xf32, #tpu.memory_space<vmem>>, vector<6x128xf32>
    tpu.vector_store %arg12[%c12_238, %c0_239], %246 {strides = array<i32>} : memref<48x128xf32, #tpu.memory_space<vmem>>, vector<6x128xf32>,
    %c40_240 = arith.constant 40 : index
    %c0_241 = arith.constant 0 : index
    %248 = tpu.strided_load %arg15[%c40_240, %c0_241] {strides = array<i32: 2, 1>} : memref<80x128xf32, #tpu.memory_space<vmem>>, vector<4x128xf32>
    %c41 = arith.constant 41 : index
    %c0_242 = arith.constant 0 : index
    %249 = tpu.strided_load %arg15[%c41, %c0_242] {strides = array<i32: 2, 1>} : memref<80x128xf32, #tpu.memory_space<vmem>>, vector<4x128xf32>
    %c50_243 = arith.constant 50 : index
    %c0_244 = arith.constant 0 : index
    %250 = tpu.strided_load %arg15[%c50_243, %c0_244] {strides = array<i32: 2, 1>} : memref<80x128xf32, #tpu.memory_space<vmem>>, vector<4x128xf32>
    %c51 = arith.constant 51 : index
    %c0_245 = arith.constant 0 : index
    %251 = tpu.strided_load %arg15[%c51, %c0_245] {strides = array<i32: 2, 1>} : memref<80x128xf32, #tpu.memory_space<vmem>>, vector<4x128xf32>
    %252 = arith.maximumf %248, %249 : vector<4x128xf32>
    %253 = arith.maximumf %250, %251 : vector<4x128xf32>
    %254 = arith.maximumf %252, %253 : vector<4x128xf32>
    %255 = tpu.concatenate %226, %254, %226 in 0 : vector<1x128xf32>, vector<4x128xf32>, vector<1x128xf32> -> vector<6x128xf32>
    %c18_246 = arith.constant 18 : index
    %c0_247 = arith.constant 0 : index
    %256 = vector.load %arg12[%c18_246, %c0_247] : memref<48x128xf32, #tpu.memory_space<vmem>>, vector<6x128xf32>
    tpu.vector_store %arg12[%c18_246, %c0_247], %255 {strides = array<i32>} : memref<48x128xf32, #tpu.memory_space<vmem>>, vector<6x128xf32>,
    %c60_248 = arith.constant 60 : index
    %c0_249 = arith.constant 0 : index
    %257 = tpu.strided_load %arg15[%c60_248, %c0_249] {strides = array<i32: 2, 1>} : memref<80x128xf32, #tpu.memory_space<vmem>>, vector<4x128xf32>
    %c61 = arith.constant 61 : index
    %c0_250 = arith.constant 0 : index
    %258 = tpu.strided_load %arg15[%c61, %c0_250] {strides = array<i32: 2, 1>} : memref<80x128xf32, #tpu.memory_space<vmem>>, vector<4x128xf32>
    %c70_251 = arith.constant 70 : index
    %c0_252 = arith.constant 0 : index
    %259 = tpu.strided_load %arg15[%c70_251, %c0_252] {strides = array<i32: 2, 1>} : memref<80x128xf32, #tpu.memory_space<vmem>>, vector<4x128xf32>
    %c71 = arith.constant 71 : index
    %c0_253 = arith.constant 0 : index
    %260 = tpu.strided_load %arg15[%c71, %c0_253] {strides = array<i32: 2, 1>} : memref<80x128xf32, #tpu.memory_space<vmem>>, vector<4x128xf32>
    %261 = arith.maximumf %257, %258 : vector<4x128xf32>
    %262 = arith.maximumf %259, %260 : vector<4x128xf32>
    %263 = arith.maximumf %261, %262 : vector<4x128xf32>
    %264 = tpu.concatenate %226, %263, %226 in 0 : vector<1x128xf32>, vector<4x128xf32>, vector<1x128xf32> -> vector<6x128xf32>
    %c24 = arith.constant 24 : index
    %c0_254 = arith.constant 0 : index
    %265 = vector.load %arg12[%c24, %c0_254] : memref<48x128xf32, #tpu.memory_space<vmem>>, vector<6x128xf32>
    tpu.vector_store %arg12[%c24, %c0_254], %264 {strides = array<i32>} : memref<48x128xf32, #tpu.memory_space<vmem>>, vector<6x128xf32>,
    %c0_255 = arith.constant 0 : index
    %c0_256 = arith.constant 0 : index
    %266 = vector.load %arg8[%c0_255, %c0_256] : memref<1x128xf32, #tpu.memory_space<vmem>>, vector<1x128xf32>
    %c0_257 = arith.constant 0 : index
    %c0_258 = arith.constant 0 : index
    %267 = vector.load %arg12[%c0_257, %c0_258] : memref<48x128xf32, #tpu.memory_space<vmem>>, vector<24x128xf32>
    %268 = arith.truncf %267 : vector<24x128xf32> to vector<24x128xbf16>
    %c0_259 = arith.constant 0 : index
    %c0_260 = arith.constant 0 : index
    %c0_261 = arith.constant 0 : index
    %269 = vector.load %arg4[%c0_259, %c0_260, %c0_261] : memref<9x128x128xbf16, #tpu.memory_space<vmem>>, vector<1x128x128xbf16>
    %270 = vector.shape_cast %269 : vector<1x128x128xbf16> to vector<128x128xbf16>
    %cst_262 = arith.constant dense<0.000000e+00> : vector<24x128xf32>
    %271 = tpu.matmul %268, %270, %cst_262 {dimension_numbers = #tpu.dot_dimension_numbers<[1], [0], [0], [1], [0, 0, 1, 1], [], []>} : vector<24x128xbf16>, vector<128x128xbf16>, vector<24x128xf32> -> vector<24x128xf32>
    %272 = vector.broadcast %266 : vector<1x128xf32> to vector<24x128xf32>
    %273 = arith.addf %271, %272 : vector<24x128xf32>
    %c0_263 = arith.constant 0 : index
    %c0_264 = arith.constant 0 : index
    %274 = vector.load %arg16[%c0_263, %c0_264] : memref<24x128xf32, #tpu.memory_space<vmem>>, vector<24x128xf32>
    tpu.vector_store %arg16[%c0_263, %c0_264], %273 {strides = array<i32>} : memref<24x128xf32, #tpu.memory_space<vmem>>, vector<24x128xf32>,
    %c1_265 = arith.constant 1 : index
    %c0_266 = arith.constant 0 : index
    %275 = vector.load %arg12[%c1_265, %c0_266] : memref<48x128xf32, #tpu.memory_space<vmem>>, vector<24x128xf32>
    %276 = arith.truncf %275 : vector<24x128xf32> to vector<24x128xbf16>
    %c1_267 = arith.constant 1 : index
    %c0_268 = arith.constant 0 : index
    %c0_269 = arith.constant 0 : index
    %277 = vector.load %arg4[%c1_267, %c0_268, %c0_269] : memref<9x128x128xbf16, #tpu.memory_space<vmem>>, vector<1x128x128xbf16>
    %278 = vector.shape_cast %277 : vector<1x128x128xbf16> to vector<128x128xbf16>
    %cst_270 = arith.constant dense<0.000000e+00> : vector<24x128xf32>
    %279 = tpu.matmul %276, %278, %cst_270 {dimension_numbers = #tpu.dot_dimension_numbers<[1], [0], [0], [1], [0, 0, 1, 1], [], []>} : vector<24x128xbf16>, vector<128x128xbf16>, vector<24x128xf32> -> vector<24x128xf32>
    %c0_271 = arith.constant 0 : index
    %c0_272 = arith.constant 0 : index
    %280 = vector.load %arg16[%c0_271, %c0_272] : memref<24x128xf32, #tpu.memory_space<vmem>>, vector<24x128xf32>
    %281 = arith.addf %280, %279 : vector<24x128xf32>
    %c0_273 = arith.constant 0 : index
    %c0_274 = arith.constant 0 : index
    %282 = vector.load %arg16[%c0_273, %c0_274] : memref<24x128xf32, #tpu.memory_space<vmem>>, vector<24x128xf32>
    tpu.vector_store %arg16[%c0_273, %c0_274], %281 {strides = array<i32>} : memref<24x128xf32, #tpu.memory_space<vmem>>, vector<24x128xf32>,
    %c2_275 = arith.constant 2 : index
    %c0_276 = arith.constant 0 : index
    %283 = vector.load %arg12[%c2_275, %c0_276] : memref<48x128xf32, #tpu.memory_space<vmem>>, vector<24x128xf32>
    %284 = arith.truncf %283 : vector<24x128xf32> to vector<24x128xbf16>
    %c2_277 = arith.constant 2 : index
    %c0_278 = arith.constant 0 : index
    %c0_279 = arith.constant 0 : index
    %285 = vector.load %arg4[%c2_277, %c0_278, %c0_279] : memref<9x128x128xbf16, #tpu.memory_space<vmem>>, vector<1x128x128xbf16>
    %286 = vector.shape_cast %285 : vector<1x128x128xbf16> to vector<128x128xbf16>
    %cst_280 = arith.constant dense<0.000000e+00> : vector<24x128xf32>
    %287 = tpu.matmul %284, %286, %cst_280 {dimension_numbers = #tpu.dot_dimension_numbers<[1], [0], [0], [1], [0, 0, 1, 1], [], []>} : vector<24x128xbf16>, vector<128x128xbf16>, vector<24x128xf32> -> vector<24x128xf32>
    %c0_281 = arith.constant 0 : index
    %c0_282 = arith.constant 0 : index
    %288 = vector.load %arg16[%c0_281, %c0_282] : memref<24x128xf32, #tpu.memory_space<vmem>>, vector<24x128xf32>
    %289 = arith.addf %288, %287 : vector<24x128xf32>
    %c0_283 = arith.constant 0 : index
    %c0_284 = arith.constant 0 : index
    %290 = vector.load %arg16[%c0_283, %c0_284] : memref<24x128xf32, #tpu.memory_space<vmem>>, vector<24x128xf32>
    tpu.vector_store %arg16[%c0_283, %c0_284], %289 {strides = array<i32>} : memref<24x128xf32, #tpu.memory_space<vmem>>, vector<24x128xf32>,
    %c6_285 = arith.constant 6 : index
    %c0_286 = arith.constant 0 : index
    %291 = vector.load %arg12[%c6_285, %c0_286] : memref<48x128xf32, #tpu.memory_space<vmem>>, vector<24x128xf32>
    %292 = arith.truncf %291 : vector<24x128xf32> to vector<24x128xbf16>
    %c3_287 = arith.constant 3 : index
    %c0_288 = arith.constant 0 : index
    %c0_289 = arith.constant 0 : index
    %293 = vector.load %arg4[%c3_287, %c0_288, %c0_289] : memref<9x128x128xbf16, #tpu.memory_space<vmem>>, vector<1x128x128xbf16>
    %294 = vector.shape_cast %293 : vector<1x128x128xbf16> to vector<128x128xbf16>
    %cst_290 = arith.constant dense<0.000000e+00> : vector<24x128xf32>
    %295 = tpu.matmul %292, %294, %cst_290 {dimension_numbers = #tpu.dot_dimension_numbers<[1], [0], [0], [1], [0, 0, 1, 1], [], []>} : vector<24x128xbf16>, vector<128x128xbf16>, vector<24x128xf32> -> vector<24x128xf32>
    %c0_291 = arith.constant 0 : index
    %c0_292 = arith.constant 0 : index
    %296 = vector.load %arg16[%c0_291, %c0_292] : memref<24x128xf32, #tpu.memory_space<vmem>>, vector<24x128xf32>
    %297 = arith.addf %296, %295 : vector<24x128xf32>
    %c0_293 = arith.constant 0 : index
    %c0_294 = arith.constant 0 : index
    %298 = vector.load %arg16[%c0_293, %c0_294] : memref<24x128xf32, #tpu.memory_space<vmem>>, vector<24x128xf32>
    tpu.vector_store %arg16[%c0_293, %c0_294], %297 {strides = array<i32>} : memref<24x128xf32, #tpu.memory_space<vmem>>, vector<24x128xf32>,
    %c7_295 = arith.constant 7 : index
    %c0_296 = arith.constant 0 : index
    %299 = vector.load %arg12[%c7_295, %c0_296] : memref<48x128xf32, #tpu.memory_space<vmem>>, vector<24x128xf32>
    %300 = arith.truncf %299 : vector<24x128xf32> to vector<24x128xbf16>
    %c4_297 = arith.constant 4 : index
    %c0_298 = arith.constant 0 : index
    %c0_299 = arith.constant 0 : index
    %301 = vector.load %arg4[%c4_297, %c0_298, %c0_299] : memref<9x128x128xbf16, #tpu.memory_space<vmem>>, vector<1x128x128xbf16>
    %302 = vector.shape_cast %301 : vector<1x128x128xbf16> to vector<128x128xbf16>
    %cst_300 = arith.constant dense<0.000000e+00> : vector<24x128xf32>
    %303 = tpu.matmul %300, %302, %cst_300 {dimension_numbers = #tpu.dot_dimension_numbers<[1], [0], [0], [1], [0, 0, 1, 1], [], []>} : vector<24x128xbf16>, vector<128x128xbf16>, vector<24x128xf32> -> vector<24x128xf32>
    %c0_301 = arith.constant 0 : index
    %c0_302 = arith.constant 0 : index
    %304 = vector.load %arg16[%c0_301, %c0_302] : memref<24x128xf32, #tpu.memory_space<vmem>>, vector<24x128xf32>
    %305 = arith.addf %304, %303 : vector<24x128xf32>
    %c0_303 = arith.constant 0 : index
    %c0_304 = arith.constant 0 : index
    %306 = vector.load %arg16[%c0_303, %c0_304] : memref<24x128xf32, #tpu.memory_space<vmem>>, vector<24x128xf32>
    tpu.vector_store %arg16[%c0_303, %c0_304], %305 {strides = array<i32>} : memref<24x128xf32, #tpu.memory_space<vmem>>, vector<24x128xf32>,
    %c8_305 = arith.constant 8 : index
    %c0_306 = arith.constant 0 : index
    %307 = vector.load %arg12[%c8_305, %c0_306] : memref<48x128xf32, #tpu.memory_space<vmem>>, vector<24x128xf32>
    %308 = arith.truncf %307 : vector<24x128xf32> to vector<24x128xbf16>
    %c5_307 = arith.constant 5 : index
    %c0_308 = arith.constant 0 : index
    %c0_309 = arith.constant 0 : index
    %309 = vector.load %arg4[%c5_307, %c0_308, %c0_309] : memref<9x128x128xbf16, #tpu.memory_space<vmem>>, vector<1x128x128xbf16>
    %310 = vector.shape_cast %309 : vector<1x128x128xbf16> to vector<128x128xbf16>
    %cst_310 = arith.constant dense<0.000000e+00> : vector<24x128xf32>
    %311 = tpu.matmul %308, %310, %cst_310 {dimension_numbers = #tpu.dot_dimension_numbers<[1], [0], [0], [1], [0, 0, 1, 1], [], []>} : vector<24x128xbf16>, vector<128x128xbf16>, vector<24x128xf32> -> vector<24x128xf32>
    %c0_311 = arith.constant 0 : index
    %c0_312 = arith.constant 0 : index
    %312 = vector.load %arg16[%c0_311, %c0_312] : memref<24x128xf32, #tpu.memory_space<vmem>>, vector<24x128xf32>
    %313 = arith.addf %312, %311 : vector<24x128xf32>
    %c0_313 = arith.constant 0 : index
    %c0_314 = arith.constant 0 : index
    %314 = vector.load %arg16[%c0_313, %c0_314] : memref<24x128xf32, #tpu.memory_space<vmem>>, vector<24x128xf32>
    tpu.vector_store %arg16[%c0_313, %c0_314], %313 {strides = array<i32>} : memref<24x128xf32, #tpu.memory_space<vmem>>, vector<24x128xf32>,
    %c12_315 = arith.constant 12 : index
    %c0_316 = arith.constant 0 : index
    %315 = vector.load %arg12[%c12_315, %c0_316] : memref<48x128xf32, #tpu.memory_space<vmem>>, vector<24x128xf32>
    %316 = arith.truncf %315 : vector<24x128xf32> to vector<24x128xbf16>
    %c6_317 = arith.constant 6 : index
    %c0_318 = arith.constant 0 : index
    %c0_319 = arith.constant 0 : index
    %317 = vector.load %arg4[%c6_317, %c0_318, %c0_319] : memref<9x128x128xbf16, #tpu.memory_space<vmem>>, vector<1x128x128xbf16>
    %318 = vector.shape_cast %317 : vector<1x128x128xbf16> to vector<128x128xbf16>
    %cst_320 = arith.constant dense<0.000000e+00> : vector<24x128xf32>
    %319 = tpu.matmul %316, %318, %cst_320 {dimension_numbers = #tpu.dot_dimension_numbers<[1], [0], [0], [1], [0, 0, 1, 1], [], []>} : vector<24x128xbf16>, vector<128x128xbf16>, vector<24x128xf32> -> vector<24x128xf32>
    %c0_321 = arith.constant 0 : index
    %c0_322 = arith.constant 0 : index
    %320 = vector.load %arg16[%c0_321, %c0_322] : memref<24x128xf32, #tpu.memory_space<vmem>>, vector<24x128xf32>
    %321 = arith.addf %320, %319 : vector<24x128xf32>
    %c0_323 = arith.constant 0 : index
    %c0_324 = arith.constant 0 : index
    %322 = vector.load %arg16[%c0_323, %c0_324] : memref<24x128xf32, #tpu.memory_space<vmem>>, vector<24x128xf32>
    tpu.vector_store %arg16[%c0_323, %c0_324], %321 {strides = array<i32>} : memref<24x128xf32, #tpu.memory_space<vmem>>, vector<24x128xf32>,
    %c13 = arith.constant 13 : index
    %c0_325 = arith.constant 0 : index
    %323 = vector.load %arg12[%c13, %c0_325] : memref<48x128xf32, #tpu.memory_space<vmem>>, vector<24x128xf32>
    %324 = arith.truncf %323 : vector<24x128xf32> to vector<24x128xbf16>
    %c7_326 = arith.constant 7 : index
    %c0_327 = arith.constant 0 : index
    %c0_328 = arith.constant 0 : index
    %325 = vector.load %arg4[%c7_326, %c0_327, %c0_328] : memref<9x128x128xbf16, #tpu.memory_space<vmem>>, vector<1x128x128xbf16>
    %326 = vector.shape_cast %325 : vector<1x128x128xbf16> to vector<128x128xbf16>
    %cst_329 = arith.constant dense<0.000000e+00> : vector<24x128xf32>
    %327 = tpu.matmul %324, %326, %cst_329 {dimension_numbers = #tpu.dot_dimension_numbers<[1], [0], [0], [1], [0, 0, 1, 1], [], []>} : vector<24x128xbf16>, vector<128x128xbf16>, vector<24x128xf32> -> vector<24x128xf32>
    %c0_330 = arith.constant 0 : index
    %c0_331 = arith.constant 0 : index
    %328 = vector.load %arg16[%c0_330, %c0_331] : memref<24x128xf32, #tpu.memory_space<vmem>>, vector<24x128xf32>
    %329 = arith.addf %328, %327 : vector<24x128xf32>
    %c0_332 = arith.constant 0 : index
    %c0_333 = arith.constant 0 : index
    %330 = vector.load %arg16[%c0_332, %c0_333] : memref<24x128xf32, #tpu.memory_space<vmem>>, vector<24x128xf32>
    tpu.vector_store %arg16[%c0_332, %c0_333], %329 {strides = array<i32>} : memref<24x128xf32, #tpu.memory_space<vmem>>, vector<24x128xf32>,
    %c14 = arith.constant 14 : index
    %c0_334 = arith.constant 0 : index
    %331 = vector.load %arg12[%c14, %c0_334] : memref<48x128xf32, #tpu.memory_space<vmem>>, vector<24x128xf32>
    %332 = arith.truncf %331 : vector<24x128xf32> to vector<24x128xbf16>
    %c8_335 = arith.constant 8 : index
    %c0_336 = arith.constant 0 : index
    %c0_337 = arith.constant 0 : index
    %333 = vector.load %arg4[%c8_335, %c0_336, %c0_337] : memref<9x128x128xbf16, #tpu.memory_space<vmem>>, vector<1x128x128xbf16>
    %334 = vector.shape_cast %333 : vector<1x128x128xbf16> to vector<128x128xbf16>
    %cst_338 = arith.constant dense<0.000000e+00> : vector<24x128xf32>
    %335 = tpu.matmul %332, %334, %cst_338 {dimension_numbers = #tpu.dot_dimension_numbers<[1], [0], [0], [1], [0, 0, 1, 1], [], []>} : vector<24x128xbf16>, vector<128x128xbf16>, vector<24x128xf32> -> vector<24x128xf32>
    %c0_339 = arith.constant 0 : index
    %c0_340 = arith.constant 0 : index
    %336 = vector.load %arg16[%c0_339, %c0_340] : memref<24x128xf32, #tpu.memory_space<vmem>>, vector<24x128xf32>
    %337 = arith.addf %336, %335 : vector<24x128xf32>
    %cst_341 = arith.constant 0.000000e+00 : f32
    %338 = vector.broadcast %cst_341 : f32 to vector<24x128xf32>
    %339 = arith.maximumf %337, %338 : vector<24x128xf32>
    %c0_342 = arith.constant 0 : index
    %c0_343 = arith.constant 0 : index
    %340 = vector.load %arg16[%c0_342, %c0_343] : memref<24x128xf32, #tpu.memory_space<vmem>>, vector<24x128xf32>
    tpu.vector_store %arg16[%c0_342, %c0_343], %339 {strides = array<i32>} : memref<24x128xf32, #tpu.memory_space<vmem>>, vector<24x128xf32>,
    %cst_344 = arith.constant 0.000000e+00 : f32
    %341 = vector.broadcast %cst_344 : f32 to vector<1x128xf32>
    %cst_345 = arith.constant 0.000000e+00 : f32
    %342 = vector.broadcast %cst_345 : f32 to vector<4x128xf32>
    %c0_346 = arith.constant 0 : index
    %c0_347 = arith.constant 0 : index
    %343 = vector.load %arg13[%c0_346, %c0_347] : memref<32x128xf32, #tpu.memory_space<vmem>>, vector<4x128xf32>
    tpu.vector_store %arg13[%c0_346, %c0_347], %342 {strides = array<i32>} : memref<32x128xf32, #tpu.memory_space<vmem>>, vector<4x128xf32>,
    %c12_348 = arith.constant 12 : index
    %c0_349 = arith.constant 0 : index
    %344 = vector.load %arg13[%c12_348, %c0_349] : memref<32x128xf32, #tpu.memory_space<vmem>>, vector<4x128xf32>
    tpu.vector_store %arg13[%c12_348, %c0_349], %342 {strides = array<i32>} : memref<32x128xf32, #tpu.memory_space<vmem>>, vector<4x128xf32>,
    %c0_350 = arith.constant 0 : index
    %c0_351 = arith.constant 0 : index
    %345 = tpu.strided_load %arg16[%c0_350, %c0_351] {strides = array<i32: 2, 1>} : memref<24x128xf32, #tpu.memory_space<vmem>>, vector<2x128xf32>
    %c1_352 = arith.constant 1 : index
    %c0_353 = arith.constant 0 : index
    %346 = tpu.strided_load %arg16[%c1_352, %c0_353] {strides = array<i32: 2, 1>} : memref<24x128xf32, #tpu.memory_space<vmem>>, vector<2x128xf32>
    %c6_354 = arith.constant 6 : index
    %c0_355 = arith.constant 0 : index
    %347 = tpu.strided_load %arg16[%c6_354, %c0_355] {strides = array<i32: 2, 1>} : memref<24x128xf32, #tpu.memory_space<vmem>>, vector<2x128xf32>
    %c7_356 = arith.constant 7 : index
    %c0_357 = arith.constant 0 : index
    %348 = tpu.strided_load %arg16[%c7_356, %c0_357] {strides = array<i32: 2, 1>} : memref<24x128xf32, #tpu.memory_space<vmem>>, vector<2x128xf32>
    %349 = arith.maximumf %345, %346 : vector<2x128xf32>
    %350 = arith.maximumf %347, %348 : vector<2x128xf32>
    %351 = arith.maximumf %349, %350 : vector<2x128xf32>
    %352 = tpu.concatenate %341, %351, %341 in 0 : vector<1x128xf32>, vector<2x128xf32>, vector<1x128xf32> -> vector<4x128xf32>
    %c4_358 = arith.constant 4 : index
    %c0_359 = arith.constant 0 : index
    %353 = vector.load %arg13[%c4_358, %c0_359] : memref<32x128xf32, #tpu.memory_space<vmem>>, vector<4x128xf32>
    tpu.vector_store %arg13[%c4_358, %c0_359], %352 {strides = array<i32>} : memref<32x128xf32, #tpu.memory_space<vmem>>, vector<4x128xf32>,
    %c12_360 = arith.constant 12 : index
    %c0_361 = arith.constant 0 : index
    %354 = tpu.strided_load %arg16[%c12_360, %c0_361] {strides = array<i32: 2, 1>} : memref<24x128xf32, #tpu.memory_space<vmem>>, vector<2x128xf32>
    %c13_362 = arith.constant 13 : index
    %c0_363 = arith.constant 0 : index
    %355 = tpu.strided_load %arg16[%c13_362, %c0_363] {strides = array<i32: 2, 1>} : memref<24x128xf32, #tpu.memory_space<vmem>>, vector<2x128xf32>
    %c18_364 = arith.constant 18 : index
    %c0_365 = arith.constant 0 : index
    %356 = tpu.strided_load %arg16[%c18_364, %c0_365] {strides = array<i32: 2, 1>} : memref<24x128xf32, #tpu.memory_space<vmem>>, vector<2x128xf32>
    %c19_366 = arith.constant 19 : index
    %c0_367 = arith.constant 0 : index
    %357 = tpu.strided_load %arg16[%c19_366, %c0_367] {strides = array<i32: 2, 1>} : memref<24x128xf32, #tpu.memory_space<vmem>>, vector<2x128xf32>
    %358 = arith.maximumf %354, %355 : vector<2x128xf32>
    %359 = arith.maximumf %356, %357 : vector<2x128xf32>
    %360 = arith.maximumf %358, %359 : vector<2x128xf32>
    %361 = tpu.concatenate %341, %360, %341 in 0 : vector<1x128xf32>, vector<2x128xf32>, vector<1x128xf32> -> vector<4x128xf32>
    %c8_368 = arith.constant 8 : index
    %c0_369 = arith.constant 0 : index
    %362 = vector.load %arg13[%c8_368, %c0_369] : memref<32x128xf32, #tpu.memory_space<vmem>>, vector<4x128xf32>
    tpu.vector_store %arg13[%c8_368, %c0_369], %361 {strides = array<i32>} : memref<32x128xf32, #tpu.memory_space<vmem>>, vector<4x128xf32>,
    %c0_370 = arith.constant 0 : index
    %c0_371 = arith.constant 0 : index
    %363 = vector.load %arg9[%c0_370, %c0_371] : memref<1x128xf32, #tpu.memory_space<vmem>>, vector<1x128xf32>
    %c0_372 = arith.constant 0 : index
    %c0_373 = arith.constant 0 : index
    %364 = vector.load %arg13[%c0_372, %c0_373] : memref<32x128xf32, #tpu.memory_space<vmem>>, vector<8x128xf32>
    %365 = arith.truncf %364 : vector<8x128xf32> to vector<8x128xbf16>
    %c0_374 = arith.constant 0 : index
    %c0_375 = arith.constant 0 : index
    %c0_376 = arith.constant 0 : index
    %366 = vector.load %arg5[%c0_374, %c0_375, %c0_376] : memref<9x128x128xbf16, #tpu.memory_space<vmem>>, vector<1x128x128xbf16>
    %367 = vector.shape_cast %366 : vector<1x128x128xbf16> to vector<128x128xbf16>
    %cst_377 = arith.constant dense<0.000000e+00> : vector<8x128xf32>
    %368 = tpu.matmul %365, %367, %cst_377 {dimension_numbers = #tpu.dot_dimension_numbers<[1], [0], [0], [1], [0, 0, 1, 1], [], []>} : vector<8x128xbf16>, vector<128x128xbf16>, vector<8x128xf32> -> vector<8x128xf32>
    %369 = vector.broadcast %363 : vector<1x128xf32> to vector<8x128xf32>
    %370 = arith.addf %368, %369 : vector<8x128xf32>
    %c0_378 = arith.constant 0 : index
    %c0_379 = arith.constant 0 : index
    %371 = vector.load %arg17[%c0_378, %c0_379] : memref<8x128xf32, #tpu.memory_space<vmem>>, vector<8x128xf32>
    tpu.vector_store %arg17[%c0_378, %c0_379], %370 {strides = array<i32>} : memref<8x128xf32, #tpu.memory_space<vmem>>, vector<8x128xf32>,
    %c1_380 = arith.constant 1 : index
    %c0_381 = arith.constant 0 : index
    %372 = vector.load %arg13[%c1_380, %c0_381] : memref<32x128xf32, #tpu.memory_space<vmem>>, vector<8x128xf32>
    %373 = arith.truncf %372 : vector<8x128xf32> to vector<8x128xbf16>
    %c1_382 = arith.constant 1 : index
    %c0_383 = arith.constant 0 : index
    %c0_384 = arith.constant 0 : index
    %374 = vector.load %arg5[%c1_382, %c0_383, %c0_384] : memref<9x128x128xbf16, #tpu.memory_space<vmem>>, vector<1x128x128xbf16>
    %375 = vector.shape_cast %374 : vector<1x128x128xbf16> to vector<128x128xbf16>
    %cst_385 = arith.constant dense<0.000000e+00> : vector<8x128xf32>
    %376 = tpu.matmul %373, %375, %cst_385 {dimension_numbers = #tpu.dot_dimension_numbers<[1], [0], [0], [1], [0, 0, 1, 1], [], []>} : vector<8x128xbf16>, vector<128x128xbf16>, vector<8x128xf32> -> vector<8x128xf32>
    %c0_386 = arith.constant 0 : index
    %c0_387 = arith.constant 0 : index
    %377 = vector.load %arg17[%c0_386, %c0_387] : memref<8x128xf32, #tpu.memory_space<vmem>>, vector<8x128xf32>
    %378 = arith.addf %377, %376 : vector<8x128xf32>
    %c0_388 = arith.constant 0 : index
    %c0_389 = arith.constant 0 : index
    %379 = vector.load %arg17[%c0_388, %c0_389] : memref<8x128xf32, #tpu.memory_space<vmem>>, vector<8x128xf32>
    tpu.vector_store %arg17[%c0_388, %c0_389], %378 {strides = array<i32>} : memref<8x128xf32, #tpu.memory_space<vmem>>, vector<8x128xf32>,
    %c2_390 = arith.constant 2 : index
    %c0_391 = arith.constant 0 : index
    %380 = vector.load %arg13[%c2_390, %c0_391] : memref<32x128xf32, #tpu.memory_space<vmem>>, vector<8x128xf32>
    %381 = arith.truncf %380 : vector<8x128xf32> to vector<8x128xbf16>
    %c2_392 = arith.constant 2 : index
    %c0_393 = arith.constant 0 : index
    %c0_394 = arith.constant 0 : index
    %382 = vector.load %arg5[%c2_392, %c0_393, %c0_394] : memref<9x128x128xbf16, #tpu.memory_space<vmem>>, vector<1x128x128xbf16>
    %383 = vector.shape_cast %382 : vector<1x128x128xbf16> to vector<128x128xbf16>
    %cst_395 = arith.constant dense<0.000000e+00> : vector<8x128xf32>
    %384 = tpu.matmul %381, %383, %cst_395 {dimension_numbers = #tpu.dot_dimension_numbers<[1], [0], [0], [1], [0, 0, 1, 1], [], []>} : vector<8x128xbf16>, vector<128x128xbf16>, vector<8x128xf32> -> vector<8x128xf32>
    %c0_396 = arith.constant 0 : index
    %c0_397 = arith.constant 0 : index
    %385 = vector.load %arg17[%c0_396, %c0_397] : memref<8x128xf32, #tpu.memory_space<vmem>>, vector<8x128xf32>
    %386 = arith.addf %385, %384 : vector<8x128xf32>
    %c0_398 = arith.constant 0 : index
    %c0_399 = arith.constant 0 : index
    %387 = vector.load %arg17[%c0_398, %c0_399] : memref<8x128xf32, #tpu.memory_space<vmem>>, vector<8x128xf32>
    tpu.vector_store %arg17[%c0_398, %c0_399], %386 {strides = array<i32>} : memref<8x128xf32, #tpu.memory_space<vmem>>, vector<8x128xf32>,
    %c4_400 = arith.constant 4 : index
    %c0_401 = arith.constant 0 : index
    %388 = vector.load %arg13[%c4_400, %c0_401] : memref<32x128xf32, #tpu.memory_space<vmem>>, vector<8x128xf32>
    %389 = arith.truncf %388 : vector<8x128xf32> to vector<8x128xbf16>
    %c3_402 = arith.constant 3 : index
    %c0_403 = arith.constant 0 : index
    %c0_404 = arith.constant 0 : index
    %390 = vector.load %arg5[%c3_402, %c0_403, %c0_404] : memref<9x128x128xbf16, #tpu.memory_space<vmem>>, vector<1x128x128xbf16>
    %391 = vector.shape_cast %390 : vector<1x128x128xbf16> to vector<128x128xbf16>
    %cst_405 = arith.constant dense<0.000000e+00> : vector<8x128xf32>
    %392 = tpu.matmul %389, %391, %cst_405 {dimension_numbers = #tpu.dot_dimension_numbers<[1], [0], [0], [1], [0, 0, 1, 1], [], []>} : vector<8x128xbf16>, vector<128x128xbf16>, vector<8x128xf32> -> vector<8x128xf32>
    %c0_406 = arith.constant 0 : index
    %c0_407 = arith.constant 0 : index
    %393 = vector.load %arg17[%c0_406, %c0_407] : memref<8x128xf32, #tpu.memory_space<vmem>>, vector<8x128xf32>
    %394 = arith.addf %393, %392 : vector<8x128xf32>
    %c0_408 = arith.constant 0 : index
    %c0_409 = arith.constant 0 : index
    %395 = vector.load %arg17[%c0_408, %c0_409] : memref<8x128xf32, #tpu.memory_space<vmem>>, vector<8x128xf32>
    tpu.vector_store %arg17[%c0_408, %c0_409], %394 {strides = array<i32>} : memref<8x128xf32, #tpu.memory_space<vmem>>, vector<8x128xf32>,
    %c5_410 = arith.constant 5 : index
    %c0_411 = arith.constant 0 : index
    %396 = vector.load %arg13[%c5_410, %c0_411] : memref<32x128xf32, #tpu.memory_space<vmem>>, vector<8x128xf32>
    %397 = arith.truncf %396 : vector<8x128xf32> to vector<8x128xbf16>
    %c4_412 = arith.constant 4 : index
    %c0_413 = arith.constant 0 : index
    %c0_414 = arith.constant 0 : index
    %398 = vector.load %arg5[%c4_412, %c0_413, %c0_414] : memref<9x128x128xbf16, #tpu.memory_space<vmem>>, vector<1x128x128xbf16>
    %399 = vector.shape_cast %398 : vector<1x128x128xbf16> to vector<128x128xbf16>
    %cst_415 = arith.constant dense<0.000000e+00> : vector<8x128xf32>
    %400 = tpu.matmul %397, %399, %cst_415 {dimension_numbers = #tpu.dot_dimension_numbers<[1], [0], [0], [1], [0, 0, 1, 1], [], []>} : vector<8x128xbf16>, vector<128x128xbf16>, vector<8x128xf32> -> vector<8x128xf32>
    %c0_416 = arith.constant 0 : index
    %c0_417 = arith.constant 0 : index
    %401 = vector.load %arg17[%c0_416, %c0_417] : memref<8x128xf32, #tpu.memory_space<vmem>>, vector<8x128xf32>
    %402 = arith.addf %401, %400 : vector<8x128xf32>
    %c0_418 = arith.constant 0 : index
    %c0_419 = arith.constant 0 : index
    %403 = vector.load %arg17[%c0_418, %c0_419] : memref<8x128xf32, #tpu.memory_space<vmem>>, vector<8x128xf32>
    tpu.vector_store %arg17[%c0_418, %c0_419], %402 {strides = array<i32>} : memref<8x128xf32, #tpu.memory_space<vmem>>, vector<8x128xf32>,
    %c6_420 = arith.constant 6 : index
    %c0_421 = arith.constant 0 : index
    %404 = vector.load %arg13[%c6_420, %c0_421] : memref<32x128xf32, #tpu.memory_space<vmem>>, vector<8x128xf32>
    %405 = arith.truncf %404 : vector<8x128xf32> to vector<8x128xbf16>
    %c5_422 = arith.constant 5 : index
    %c0_423 = arith.constant 0 : index
    %c0_424 = arith.constant 0 : index
    %406 = vector.load %arg5[%c5_422, %c0_423, %c0_424] : memref<9x128x128xbf16, #tpu.memory_space<vmem>>, vector<1x128x128xbf16>
    %407 = vector.shape_cast %406 : vector<1x128x128xbf16> to vector<128x128xbf16>
    %cst_425 = arith.constant dense<0.000000e+00> : vector<8x128xf32>
    %408 = tpu.matmul %405, %407, %cst_425 {dimension_numbers = #tpu.dot_dimension_numbers<[1], [0], [0], [1], [0, 0, 1, 1], [], []>} : vector<8x128xbf16>, vector<128x128xbf16>, vector<8x128xf32> -> vector<8x128xf32>
    %c0_426 = arith.constant 0 : index
    %c0_427 = arith.constant 0 : index
    %409 = vector.load %arg17[%c0_426, %c0_427] : memref<8x128xf32, #tpu.memory_space<vmem>>, vector<8x128xf32>
    %410 = arith.addf %409, %408 : vector<8x128xf32>
    %c0_428 = arith.constant 0 : index
    %c0_429 = arith.constant 0 : index
    %411 = vector.load %arg17[%c0_428, %c0_429] : memref<8x128xf32, #tpu.memory_space<vmem>>, vector<8x128xf32>
    tpu.vector_store %arg17[%c0_428, %c0_429], %410 {strides = array<i32>} : memref<8x128xf32, #tpu.memory_space<vmem>>, vector<8x128xf32>,
    %c8_430 = arith.constant 8 : index
    %c0_431 = arith.constant 0 : index
    %412 = vector.load %arg13[%c8_430, %c0_431] : memref<32x128xf32, #tpu.memory_space<vmem>>, vector<8x128xf32>
    %413 = arith.truncf %412 : vector<8x128xf32> to vector<8x128xbf16>
    %c6_432 = arith.constant 6 : index
    %c0_433 = arith.constant 0 : index
    %c0_434 = arith.constant 0 : index
    %414 = vector.load %arg5[%c6_432, %c0_433, %c0_434] : memref<9x128x128xbf16, #tpu.memory_space<vmem>>, vector<1x128x128xbf16>
    %415 = vector.shape_cast %414 : vector<1x128x128xbf16> to vector<128x128xbf16>
    %cst_435 = arith.constant dense<0.000000e+00> : vector<8x128xf32>
    %416 = tpu.matmul %413, %415, %cst_435 {dimension_numbers = #tpu.dot_dimension_numbers<[1], [0], [0], [1], [0, 0, 1, 1], [], []>} : vector<8x128xbf16>, vector<128x128xbf16>, vector<8x128xf32> -> vector<8x128xf32>
    %c0_436 = arith.constant 0 : index
    %c0_437 = arith.constant 0 : index
    %417 = vector.load %arg17[%c0_436, %c0_437] : memref<8x128xf32, #tpu.memory_space<vmem>>, vector<8x128xf32>
    %418 = arith.addf %417, %416 : vector<8x128xf32>
    %c0_438 = arith.constant 0 : index
    %c0_439 = arith.constant 0 : index
    %419 = vector.load %arg17[%c0_438, %c0_439] : memref<8x128xf32, #tpu.memory_space<vmem>>, vector<8x128xf32>
    tpu.vector_store %arg17[%c0_438, %c0_439], %418 {strides = array<i32>} : memref<8x128xf32, #tpu.memory_space<vmem>>, vector<8x128xf32>,
    %c9 = arith.constant 9 : index
    %c0_440 = arith.constant 0 : index
    %420 = vector.load %arg13[%c9, %c0_440] : memref<32x128xf32, #tpu.memory_space<vmem>>, vector<8x128xf32>
    %421 = arith.truncf %420 : vector<8x128xf32> to vector<8x128xbf16>
    %c7_441 = arith.constant 7 : index
    %c0_442 = arith.constant 0 : index
    %c0_443 = arith.constant 0 : index
    %422 = vector.load %arg5[%c7_441, %c0_442, %c0_443] : memref<9x128x128xbf16, #tpu.memory_space<vmem>>, vector<1x128x128xbf16>
    %423 = vector.shape_cast %422 : vector<1x128x128xbf16> to vector<128x128xbf16>
    %cst_444 = arith.constant dense<0.000000e+00> : vector<8x128xf32>
    %424 = tpu.matmul %421, %423, %cst_444 {dimension_numbers = #tpu.dot_dimension_numbers<[1], [0], [0], [1], [0, 0, 1, 1], [], []>} : vector<8x128xbf16>, vector<128x128xbf16>, vector<8x128xf32> -> vector<8x128xf32>
    %c0_445 = arith.constant 0 : index
    %c0_446 = arith.constant 0 : index
    %425 = vector.load %arg17[%c0_445, %c0_446] : memref<8x128xf32, #tpu.memory_space<vmem>>, vector<8x128xf32>
    %426 = arith.addf %425, %424 : vector<8x128xf32>
    %c0_447 = arith.constant 0 : index
    %c0_448 = arith.constant 0 : index
    %427 = vector.load %arg17[%c0_447, %c0_448] : memref<8x128xf32, #tpu.memory_space<vmem>>, vector<8x128xf32>
    tpu.vector_store %arg17[%c0_447, %c0_448], %426 {strides = array<i32>} : memref<8x128xf32, #tpu.memory_space<vmem>>, vector<8x128xf32>,
    %c10_449 = arith.constant 10 : index
    %c0_450 = arith.constant 0 : index
    %428 = vector.load %arg13[%c10_449, %c0_450] : memref<32x128xf32, #tpu.memory_space<vmem>>, vector<8x128xf32>
    %429 = arith.truncf %428 : vector<8x128xf32> to vector<8x128xbf16>
    %c8_451 = arith.constant 8 : index
    %c0_452 = arith.constant 0 : index
    %c0_453 = arith.constant 0 : index
    %430 = vector.load %arg5[%c8_451, %c0_452, %c0_453] : memref<9x128x128xbf16, #tpu.memory_space<vmem>>, vector<1x128x128xbf16>
    %431 = vector.shape_cast %430 : vector<1x128x128xbf16> to vector<128x128xbf16>
    %cst_454 = arith.constant dense<0.000000e+00> : vector<8x128xf32>
    %432 = tpu.matmul %429, %431, %cst_454 {dimension_numbers = #tpu.dot_dimension_numbers<[1], [0], [0], [1], [0, 0, 1, 1], [], []>} : vector<8x128xbf16>, vector<128x128xbf16>, vector<8x128xf32> -> vector<8x128xf32>
    %c0_455 = arith.constant 0 : index
    %c0_456 = arith.constant 0 : index
    %433 = vector.load %arg17[%c0_455, %c0_456] : memref<8x128xf32, #tpu.memory_space<vmem>>, vector<8x128xf32>
    %434 = arith.addf %433, %432 : vector<8x128xf32>
    %cst_457 = arith.constant 0.000000e+00 : f32
    %435 = vector.broadcast %cst_457 : f32 to vector<8x128xf32>
    %436 = arith.maximumf %434, %435 : vector<8x128xf32>
    %c0_458 = arith.constant 0 : index
    %c0_459 = arith.constant 0 : index
    %437 = vector.load %arg17[%c0_458, %c0_459] : memref<8x128xf32, #tpu.memory_space<vmem>>, vector<8x128xf32>
    tpu.vector_store %arg17[%c0_458, %c0_459], %436 {strides = array<i32>} : memref<8x128xf32, #tpu.memory_space<vmem>>, vector<8x128xf32>,
    %c0_460 = arith.constant 0 : index
    %c0_461 = arith.constant 0 : index
    %438 = tpu.strided_load %arg17[%c0_460, %c0_461] {strides = array<i32: 2, 1>} : memref<8x128xf32, #tpu.memory_space<vmem>>, vector<1x128xf32>
    %c1_462 = arith.constant 1 : index
    %c0_463 = arith.constant 0 : index
    %439 = tpu.strided_load %arg17[%c1_462, %c0_463] {strides = array<i32: 2, 1>} : memref<8x128xf32, #tpu.memory_space<vmem>>, vector<1x128xf32>
    %c4_464 = arith.constant 4 : index
    %c0_465 = arith.constant 0 : index
    %440 = tpu.strided_load %arg17[%c4_464, %c0_465] {strides = array<i32: 2, 1>} : memref<8x128xf32, #tpu.memory_space<vmem>>, vector<1x128xf32>
    %c5_466 = arith.constant 5 : index
    %c0_467 = arith.constant 0 : index
    %441 = tpu.strided_load %arg17[%c5_466, %c0_467] {strides = array<i32: 2, 1>} : memref<8x128xf32, #tpu.memory_space<vmem>>, vector<1x128xf32>
    %442 = arith.maximumf %438, %439 : vector<1x128xf32>
    %443 = arith.maximumf %440, %441 : vector<1x128xf32>
    %444 = arith.maximumf %442, %443 : vector<1x128xf32>
    %c0_468 = arith.constant 0 : index
    %c0_469 = arith.constant 0 : index
    %c0_470 = arith.constant 0 : index
    %445 = vector.load %arg10[%c0_468, %c0_469, %c0_470] : memref<1x1x128xf32, #tpu.memory_space<vmem>>, vector<1x1x128xf32>
    %446 = vector.shape_cast %445 : vector<1x1x128xf32> to vector<1x128xf32>
    %447 = vector.shape_cast %444 : vector<1x128xf32> to vector<1x1x128xf32>
    tpu.vector_store %arg10[%c0_468, %c0_469, %c0_470], %447 {strides = array<i32>} : memref<1x1x128xf32, #tpu.memory_space<vmem>>, vector<1x1x128xf32>,
    return
  }
  func.func @transform_0(%arg0: i32) -> (i32, i32) {
    %c0_i32 = arith.constant 0 : i32
    %c0_i32_0 = arith.constant 0 : i32
    return %arg0, %c0_i32 : i32, i32
  }
  func.func @transform_1(%arg0: i32) -> (i32, i32, i32) {
    %c0_i32 = arith.constant 0 : i32
    %c0_i32_0 = arith.constant 0 : i32
    %c0_i32_1 = arith.constant 0 : i32
    %c0_i32_2 = arith.constant 0 : i32
    return %c0_i32, %c0_i32_0, %c0_i32_1 : i32, i32, i32
  }
  func.func @transform_2(%arg0: i32) -> (i32, i32, i32) {
    %c0_i32 = arith.constant 0 : i32
    %c0_i32_0 = arith.constant 0 : i32
    %c0_i32_1 = arith.constant 0 : i32
    %c0_i32_2 = arith.constant 0 : i32
    return %c0_i32, %c0_i32_0, %c0_i32_1 : i32, i32, i32
  }
  func.func @transform_3(%arg0: i32) -> (i32, i32, i32) {
    %c0_i32 = arith.constant 0 : i32
    %c0_i32_0 = arith.constant 0 : i32
    %c0_i32_1 = arith.constant 0 : i32
    %c0_i32_2 = arith.constant 0 : i32
    return %c0_i32, %c0_i32_0, %c0_i32_1 : i32, i32, i32
  }
  func.func @transform_4(%arg0: i32) -> (i32, i32, i32) {
    %c0_i32 = arith.constant 0 : i32
    %c0_i32_0 = arith.constant 0 : i32
    %c0_i32_1 = arith.constant 0 : i32
    %c0_i32_2 = arith.constant 0 : i32
    return %c0_i32, %c0_i32_0, %c0_i32_1 : i32, i32, i32
  }
  func.func @transform_5(%arg0: i32) -> (i32, i32) {
    %c0_i32 = arith.constant 0 : i32
    %c0_i32_0 = arith.constant 0 : i32
    %c0_i32_1 = arith.constant 0 : i32
    return %c0_i32, %c0_i32_0 : i32, i32
  }
  func.func @transform_6(%arg0: i32) -> (i32, i32) {
    %c0_i32 = arith.constant 0 : i32
    %c0_i32_0 = arith.constant 0 : i32
    %c0_i32_1 = arith.constant 0 : i32
    return %c0_i32, %c0_i32_0 : i32, i32
  }
  func.func @transform_7(%arg0: i32) -> (i32, i32) {
    %c0_i32 = arith.constant 0 : i32
    %c0_i32_0 = arith.constant 0 : i32
    %c0_i32_1 = arith.constant 0 : i32
    return %c0_i32, %c0_i32_0 : i32, i32
  }
  func.func @transform_8(%arg0: i32) -> (i32, i32) {
    %c0_i32 = arith.constant 0 : i32
    %c0_i32_0 = arith.constant 0 : i32
    %c0_i32_1 = arith.constant 0 : i32
    return %c0_i32, %c0_i32_0 : i32, i32
  }
  func.func @transform_9(%arg0: i32) -> (i32, i32, i32) {
    %c0_i32 = arith.constant 0 : i32
    %c0_i32_0 = arith.constant 0 : i32
    %c0_i32_1 = arith.constant 0 : i32
    return %arg0, %c0_i32, %c0_i32_0 : i32, i32, i32
  }
}

</mosaic_0001>

<bundles_post_ra>
// kernel: convnet4_forward.1
= control target key start
LH: loop header
LB: loop body
LE: loop exit
PB: predicated region body
PF: predicated region fallthrough
CT: control target
= control target key end

     0   :  { %vm156_vm0 = vcmask 1045504   ;;  %vm101_vm1 = vcmask 97280   ;;  %vm10253_vm2 = vmmov 0   ;;  %vm3658_vm3 = vcmask 1040384   ;;  %s13344_s1 = inlined_call_operand.vmem [shape: bf16[9,12,128], index: 1, kind: input, shape index: {}]   ;;  %s13345_s0 = inlined_call_operand.vmem [shape: f32[336,12], index: 0, kind: input, shape index: {}]   ;;  %s13346_s5 = inlined_call_operand.vmem [shape: f32[1,128], index: 5, kind: input, shape index: {}]   ;;  %s13347_s2 = inlined_call_operand.vmem [shape: bf16[9,128,128], index: 2, kind: input, shape index: {}]   ;;  %s13348_s6 = inlined_call_operand.vmem [shape: f32[1,128], index: 6, kind: input, shape index: {}]   ;;  %s13349_s3 = inlined_call_operand.vmem [shape: bf16[9,128,128], index: 3, kind: input, shape index: {}]   ;;  %s13350_s7 = inlined_call_operand.vmem [shape: f32[1,128], index: 7, kind: input, shape index: {}]   ;;  %s13351_s4 = inlined_call_operand.vmem [shape: bf16[9,128,128], index: 4, kind: input, shape index: {}]   ;;  %s13352_s8 = inlined_call_operand.vmem [shape: f32[1,128], index: 8, kind: input, shape index: {}]   ;;  %s13353_s9 = inlined_call_operand.vmem [shape: f32[1,1,128], index: 9, kind: output, shape index: {}]  }
   0x1   :  { %v9984_v0 = vld [vmem:[%s13344_s1] sm:$0x3f]   ;;  %v35_v2 = vld [vmem:[%s13345_s0 + $0x8] sm:$0xff]  ;;  %v36_v7 = vld [vmem:[%s13345_s0 + $0x10] sm:$0xff]  ;;  %vm10254_vm5 = vmmov 1   ;;  %vm5448_vm8 = vcmask 1044480  }
   0x2   :  { %v34_v1 = vld [vmem:[%s13345_s0] sm:$0xff]  ;;  %9972 = vmatprep.subr.msk.bf16.mxu0 %vm156_vm0, %v9984_v0  ;;  %9973 = vmatprep.subr.msk.bf16.mxu1 %vm156_vm0, %v9984_v0  ;;  %v158_v4 = vsel %vm156_vm0, %v9984_v0, 0  ;;  %v63_v6 = vld [vmem:[%s13345_s0 + $0xe8] sm:$0xff]  ;;  %v37_v8 = vld [vmem:[%s13345_s0 + $0x18] sm:$0xff]  ;;  %vm6664_vm9 = vcmask 1042432  }
   0x3   :  { %v62_v3 = vld [vmem:[%s13345_s0 + $0xe0] sm:$0xff]  ;;  %v70_v5 = vpack.c.bf16 %v35_v2, %v34_v1  ;;  %8945 = vmatpush3.bf16.msra.mxu0 %v158_v4  ;;  %9971 = vmatpush3.bf16.msra.mxu1 %v158_v4  ;;  %v71_v10 = vpack.c.bf16 %v37_v8, %v36_v7  ;;  %v64_v11 = vld [vmem:[%s13345_s0 + $0xf0] sm:$0xff]  ;;  %v65_v12 = vld [vmem:[%s13345_s0 + $0xf8] sm:$0xff] }
   0x4   :  { %v84_v9 = vpack.c.bf16 %v63_v6, %v62_v3  ;;  %v85_v13 = vpack.c.bf16 %v65_v12, %v64_v11  ;;  %v9985_v14 = vld [vmem:[%s13344_s1 + $0x10] sm:$0x3f]   ;;  %v38_v15 = vld [vmem:[%s13345_s0 + $0x20] sm:$0xff]  ;;  %v39_v16 = vld [vmem:[%s13345_s0 + $0x28] sm:$0xff] }
   0x5   :  { %8946 = vmatprep.mubr.msk.bf16.mxu0 %vm101_vm1, %v70_v5  ;;  %v66_v17 = vld [vmem:[%s13345_s0 + $0x100] sm:$0xff]  ;;  %v67_v18 = vld [vmem:[%s13345_s0 + $0x108] sm:$0xff]  ;;  %v894_v19 = vsel %vm156_vm0, %v9985_v14, 0  ;;  %v72_v20 = vpack.c.bf16 %v39_v16, %v38_v15  ;;  %v40_v22 = vld [vmem:[%s13345_s0 + $0x30] sm:$0xff]  ;;  %9975 = vmatprep.subr.msk.bf16.mxu0 %vm156_vm0, %v9985_v14 }
   0x6   :  { %8974 = vmatprep.mubr.msk.bf16.mxu1 %vm101_vm1, %v84_v9  ;;  %8947 = vmatmul.mubr.msk.bf16.vlgmr.msra.gmra.mxu0 %vm101_vm1, %v71_v10  ;;  %v86_v21 = vpack.c.bf16 %v67_v18, %v66_v17  ;;  %v41_v23 = vld [vmem:[%s13345_s0 + $0x38] sm:$0xff]  ;;  %v68_v24 = vld [vmem:[%s13345_s0 + $0x110] sm:$0xff]  ;;  %v9986_v26 = vld [vmem:[%s13344_s1 + $0x8] sm:$0x3f]  }
   0x7   :  { %8975 = vmatmul.mubr.msk.bf16.vlgmr.msra.gmra.mxu1 %vm101_vm1, %v85_v13  ;;  %v69_v25 = vld [vmem:[%s13345_s0 + $0x118] sm:$0xff]  ;;  %9021 = vmatpush3.bf16.msra.mxu0 %v894_v19  ;;  %v42_v27 = vld [vmem:[%s13345_s0 + $0x40] sm:$0xff]  ;;  %v43_v28 = vld [vmem:[%s13345_s0 + $0x48] sm:$0xff]  ;;  %v73_v31 = vpack.c.bf16 %v41_v23, %v40_v22  ;;  %v490_v33 = vsel %vm156_vm0, %v9986_v26, 0 }
   0x8   :  { %8950 = vmatprep.mubr.msk.bf16.mxu0 %vm101_vm1, %v72_v20  ;;  %8978 = vmatprep.mubr.msk.bf16.mxu1 %vm101_vm1, %v86_v21  ;;  %v373_v29 = vld [vmem:[%s13345_s0 + $0x1] sm:$0xff]  ;;  %v374_v30 = vld [vmem:[%s13345_s0 + $0x9] sm:$0xff]  ;;  %v87_v32 = vpack.c.bf16 %v69_v25, %v68_v24  ;;  %v74_v34 = vpack.c.bf16 %v43_v28, %v42_v27  ;;  %v45_v37 = vld [vmem:[%s13345_s0 + $0x58] sm:$0xff] }
   0x9   :  { %9974 = vmatprep.subr.msk.bf16.mxu1 %vm156_vm0, %v9986_v26  ;;  %v409_v35 = vpack.c.bf16 %v374_v30, %v373_v29  ;;  %v44_v36 = vld [vmem:[%s13345_s0 + $0x50] sm:$0xff]  ;;  %v376_v39 = vld [vmem:[%s13345_s0 + $0x19] sm:$0xff]  ;;  %v47_v41 = vld [vmem:[%s13345_s0 + $0x68] sm:$0xff] }
   0xa   :  { %8983 = vmatpush3.bf16.msra.mxu1 %v490_v33  ;;  %v375_v38 = vld [vmem:[%s13345_s0 + $0x11] sm:$0xff]  ;;  %v46_v40 = vld [vmem:[%s13345_s0 + $0x60] sm:$0xff]  ;;  %v378_v43 = vld [vmem:[%s13345_s0 + $0x29] sm:$0xff]  ;;  %v75_v44 = vpack.c.bf16 %v45_v37, %v44_v36 }
   0xb   :  { %v377_v42 = vld [vmem:[%s13345_s0 + $0x21] sm:$0xff]  ;;  %v410_v45 = vpack.c.bf16 %v376_v39, %v375_v38  ;;  %v76_v46 = vpack.c.bf16 %v47_v41, %v46_v40  ;;  %v9987_v48 = vld [vmem:[%s13344_s1 + $0x18] sm:$0x3f]   ;;  %v48_v50 = vld [vmem:[%s13345_s0 + $0x70] sm:$0xff] }
   0xc   :  { %v411_v47 = vpack.c.bf16 %v378_v43, %v377_v42  ;;  %9976 = vmatprep.subr.msk.bf16.mxu1 %vm156_vm0, %v9987_v48  ;;  %v1298_v49 = vsel %vm156_vm0, %v9987_v48, 0  ;;  %v49_v51 = vld [vmem:[%s13345_s0 + $0x78] sm:$0xff]  ;;  %v50_v54 = vld [vmem:[%s13345_s0 + $0x80] sm:$0xff]  ;;  %v51_v55 = vld [vmem:[%s13345_s0 + $0x88] sm:$0xff] }
   0xd   :  { %v379_v52 = vld [vmem:[%s13345_s0 + $0x31] sm:$0xff]  ;;  %v380_v53 = vld [vmem:[%s13345_s0 + $0x39] sm:$0xff]  ;;  %v381_v56 = vld [vmem:[%s13345_s0 + $0x41] sm:$0xff]  ;;  %v77_v58 = vpack.c.bf16 %v49_v51, %v48_v50  ;;  %v78_v61 = vpack.c.bf16 %v51_v55, %v50_v54 }
   0xe   :  { %8951 = vmatmul.mubr.msk.bf16.gmra.mxu0 %vm101_vm1, %v73_v31  ;;  %v382_v57 = vld [vmem:[%s13345_s0 + $0x49] sm:$0xff]  ;;  %v412_v59 = vpack.c.bf16 %v380_v53, %v379_v52  ;;  %v10451_v60 = vld [vmem:[%s13344_s1 + $0x20] sm:$0x3f]   ;;  %v53_v0 = vld [vmem:[%s13345_s0 + $0x98] sm:$0xff] }
   0xf   :  { %8979 = vmatmul.mubr.msk.bf16.gmra.mxu1 %vm101_vm1, %v87_v32  ;;  %8954 = vmatprep.mubr.msk.bf16.mxu0 %vm101_vm1, %v74_v34  ;;  %v413_v62 = vpack.c.bf16 %v382_v57, %v381_v56  ;;  %v52_v63 = vld [vmem:[%s13345_s0 + $0x90] sm:$0xff]  ;;  %v384_v2 = vld [vmem:[%s13345_s0 + $0x59] sm:$0xff]  ;;  %v55_v4 = vld [vmem:[%s13345_s0 + $0xa8] sm:$0xff] }
  0x10   :  { %8984 = vmatprep.mubr.msk.bf16.mxu1 %vm101_vm1, %v409_v35  ;;  %9977 = vmatprep.subr.msk.bf16.mxu0 %vm156_vm0, %v10451_v60  ;;  %v383_v1 = vld [vmem:[%s13345_s0 + $0x51] sm:$0xff]  ;;  %v54_v3 = vld [vmem:[%s13345_s0 + $0xa0] sm:$0xff]  ;;  %v386_v6 = vld [vmem:[%s13345_s0 + $0x69] sm:$0xff]  ;;  %v79_v7 = vpack.c.bf16 %v53_v0, %v52_v63 }
  0x11   :  { %v385_v5 = vld [vmem:[%s13345_s0 + $0x61] sm:$0xff]  ;;  %v414_v8 = vpack.c.bf16 %v384_v2, %v383_v1  ;;  %v80_v9 = vpack.c.bf16 %v55_v4, %v54_v3  ;;  %v56_v11 = vld [vmem:[%s13345_s0 + $0xb0] sm:$0xff]  ;;  %v57_v12 = vld [vmem:[%s13345_s0 + $0xb8] sm:$0xff] }
  0x12   :  { %v415_v10 = vpack.c.bf16 %v386_v6, %v385_v5  ;;  %v387_v13 = vld [vmem:[%s13345_s0 + $0x71] sm:$0xff]  ;;  %v388_v14 = vld [vmem:[%s13345_s0 + $0x79] sm:$0xff]  ;;  %v59_v16 = vld [vmem:[%s13345_s0 + $0xc8] sm:$0xff]  ;;  %v81_v20 = vpack.c.bf16 %v57_v12, %v56_v11 }
  0x13   :  { %v58_v15 = vld [vmem:[%s13345_s0 + $0xc0] sm:$0xff]  ;;  %v390_v18 = vld [vmem:[%s13345_s0 + $0x89] sm:$0xff]  ;;  %v416_v21 = vpack.c.bf16 %v388_v14, %v387_v13  ;;  %v61_v25 = vld [vmem:[%s13345_s0 + $0xd8] sm:$0xff] }
  0x14   :  { %v389_v17 = vld [vmem:[%s13345_s0 + $0x81] sm:$0xff]  ;;  %v82_v22 = vpack.c.bf16 %v59_v16, %v58_v15  ;;  %v60_v24 = vld [vmem:[%s13345_s0 + $0xd0] sm:$0xff]  ;;  %v392_v27 = vld [vmem:[%s13345_s0 + $0x99] sm:$0xff] }
  0x15   :  { %v10514_v19 = vld [vmem:[%s13344_s1 + $0x28] sm:$0x3f]   ;;  %v417_v23 = vpack.c.bf16 %v390_v18, %v389_v17  ;;  %v391_v26 = vld [vmem:[%s13345_s0 + $0x91] sm:$0xff]  ;;  %v83_v32 = vpack.c.bf16 %v61_v25, %v60_v24  ;;  %v396_v37 = vld [vmem:[%s13345_s0 + $0xb9] sm:$0xff] }
  0x16   :  { %8955 = vmatmul.mubr.msk.bf16.gmra.mxu0 %vm101_vm1, %v75_v44  ;;  %v393_v28 = vld [vmem:[%s13345_s0 + $0xa1] sm:$0xff]  ;;  %v394_v29 = vld [vmem:[%s13345_s0 + $0xa9] sm:$0xff]  ;;  %v418_v33 = vpack.c.bf16 %v392_v27, %v391_v26  ;;  %v395_v36 = vld [vmem:[%s13345_s0 + $0xb1] sm:$0xff]  ;;  %v2106_v26 = vsel %vm156_vm0, %v10514_v19, 0 }
  0x17   :  { %8985 = vmatmul.mubr.msk.bf16.vlgmr.msra.gmra.mxu1 %vm101_vm1, %v410_v45  ;;  %8958 = vmatprep.mubr.msk.bf16.mxu0 %vm101_vm1, %v76_v46  ;;  %v777_v30 = vld [vmem:[%s13345_s0 + $0x2] sm:$0xff]  ;;  %v778_v31 = vld [vmem:[%s13345_s0 + $0xa] sm:$0xff]  ;;  %v419_v34 = vpack.c.bf16 %v394_v29, %v393_v28  ;;  %v779_v38 = vld [vmem:[%s13345_s0 + $0x12] sm:$0xff]  ;;  %v420_v44 = vpack.c.bf16 %v396_v37, %v395_v36  ;;  %v1702_v46 = vsel %vm156_vm0, %v10451_v60, 0 }
  0x18   :  { %8988 = vmatprep.mubr.msk.bf16.mxu1 %vm101_vm1, %v411_v47  ;;  %9059 = vmatpush3.bf16.msra.mxu1 %v1298_v49  ;;  %v813_v35 = vpack.c.bf16 %v778_v31, %v777_v30  ;;  %v780_v39 = vld [vmem:[%s13345_s0 + $0x1a] sm:$0xff]  ;;  %v398_v41 = vld [vmem:[%s13345_s0 + $0xc9] sm:$0xff]  ;;  %v399_v50 = vld [vmem:[%s13345_s0 + $0xd1] sm:$0xff] }
  0x19   :  { %9978 = vmatprep.subr.msk.bf16.mxu1 %vm156_vm0, %v10514_v19  ;;  %v397_v40 = vld [vmem:[%s13345_s0 + $0xc1] sm:$0xff]  ;;  %v782_v43 = vld [vmem:[%s13345_s0 + $0x2a] sm:$0xff]  ;;  %v814_v45 = vpack.c.bf16 %v780_v39, %v779_v38  ;;  %v400_v51 = vld [vmem:[%s13345_s0 + $0xd9] sm:$0xff] }
  0x1a   :  { %v781_v42 = vld [vmem:[%s13345_s0 + $0x22] sm:$0xff]  ;;  %v421_v47 = vpack.c.bf16 %v398_v41, %v397_v40  ;;  %v10579_v48 = vld [vmem:[%s13344_s1 + $0x30] sm:$0x3f]   ;;  %v784_v53 = vld [vmem:[%s13345_s0 + $0x3a] sm:$0xff] }
  0x1b   :  { %v815_v49 = vpack.c.bf16 %v782_v43, %v781_v42  ;;  %v783_v52 = vld [vmem:[%s13345_s0 + $0x32] sm:$0xff]  ;;  %v401_v54 = vld [vmem:[%s13345_s0 + $0xe1] sm:$0xff]  ;;  %v402_v55 = vld [vmem:[%s13345_s0 + $0xe9] sm:$0xff] }
  0x1c   :  { %v785_v56 = vld [vmem:[%s13345_s0 + $0x42] sm:$0xff]  ;;  %v786_v57 = vld [vmem:[%s13345_s0 + $0x4a] sm:$0xff]  ;;  %v423_v60 = vpack.c.bf16 %v402_v55, %v401_v54  ;;  %v404_v63 = vld [vmem:[%s13345_s0 + $0xf9] sm:$0xff] }
  0x1d   :  { %v787_v0 = vld [vmem:[%s13345_s0 + $0x52] sm:$0xff]  ;;  %v788_v1 = vld [vmem:[%s13345_s0 + $0x5a] sm:$0xff]  ;;  %v406_v3 = vld [vmem:[%s13345_s0 + $0x109] sm:$0xff] }
  0x1e   :  { %8959 = vmatmul.mubr.msk.bf16.gmra.mxu0 %vm101_vm1, %v77_v58  ;;  %v422_v58 = vpack.c.bf16 %v400_v51, %v399_v50  ;;  %v405_v2 = vld [vmem:[%s13345_s0 + $0x101] sm:$0xff]  ;;  %v790_v5 = vld [vmem:[%s13345_s0 + $0x6a] sm:$0xff]  ;;  %v408_v11 = vld [vmem:[%s13345_s0 + $0x119] sm:$0xff] }
  0x1f   :  { %8989 = vmatmul.mubr.msk.bf16.gmra.mxu1 %vm101_vm1, %v412_v59  ;;  %8962 = vmatprep.mubr.msk.bf16.mxu0 %vm101_vm1, %v78_v61  ;;  %v816_v59 = vpack.c.bf16 %v784_v53, %v783_v52  ;;  %v817_v61 = vpack.c.bf16 %v786_v57, %v785_v56  ;;  %v789_v4 = vld [vmem:[%s13345_s0 + $0x62] sm:$0xff]  ;;  %v791_v12 = vld [vmem:[%s13345_s0 + $0x72] sm:$0xff]  ;;  %v792_v13 = vld [vmem:[%s13345_s0 + $0x7a] sm:$0xff]  ;;  %v2510_v57 = vsel %vm156_vm0, %v10579_v48, 0 }
  0x20   :  { %8992 = vmatprep.mubr.msk.bf16.mxu1 %vm101_vm1, %v413_v62  ;;  %v403_v62 = vld [vmem:[%s13345_s0 + $0xf1] sm:$0xff]  ;;  %v793_v14 = vld [vmem:[%s13345_s0 + $0x82] sm:$0xff]  ;;  %v820_v17 = vpack.c.bf16 %v792_v13, %v791_v12  ;;  %v800_v19 = vld [vmem:[%s13345_s0 + $0xba] sm:$0xff] }
  0x21   :  { %v424_v6 = vpack.c.bf16 %v404_v63, %v403_v62  ;;  %v794_v15 = vld [vmem:[%s13345_s0 + $0x8a] sm:$0xff]  ;;  %v10682_v27 = vld [vmem:[%s13344_s1 + $0x38] sm:$0x3f]   ;;  %v801_v29 = vld [vmem:[%s13345_s0 + $0xc2] sm:$0xff] }
  0x22   :  { %v821_v18 = vpack.c.bf16 %v794_v15, %v793_v14  ;;  %v799_v28 = vld [vmem:[%s13345_s0 + $0xb2] sm:$0xff]  ;;  %v802_v30 = vld [vmem:[%s13345_s0 + $0xca] sm:$0xff]  ;;  %v808_v40 = vld [vmem:[%s13345_s0 + $0xfa] sm:$0xff] }
  0x23   :  { %v824_v31 = vpack.c.bf16 %v800_v19, %v799_v28  ;;  %v806_v36 = vld [vmem:[%s13345_s0 + $0xea] sm:$0xff]  ;;  %v807_v39 = vld [vmem:[%s13345_s0 + $0xf2] sm:$0xff]  ;;  %v809_v41 = vld [vmem:[%s13345_s0 + $0x102] sm:$0xff] }
  0x24   :  { %v810_v42 = vld [vmem:[%s13345_s0 + $0x10a] sm:$0xff]  ;;  %v828_v43 = vpack.c.bf16 %v808_v40, %v807_v39  ;;  %v1589_v54 = vld [vmem:[%s13345_s0 + $0x33] sm:$0xff]  ;;  %v1590_v55 = vld [vmem:[%s13345_s0 + $0x3b] sm:$0xff] }
  0x25   :  { %v1587_v52 = vld [vmem:[%s13345_s0 + $0x23] sm:$0xff]  ;;  %v1588_v53 = vld [vmem:[%s13345_s0 + $0x2b] sm:$0xff]  ;;  %v1594_v62 = vld [vmem:[%s13345_s0 + $0x5b] sm:$0xff] }
  0x26   :  { %8963 = vmatmul.mubr.msk.bf16.gmra.mxu0 %vm101_vm1, %v79_v7  ;;  %v818_v7 = vpack.c.bf16 %v788_v1, %v787_v0  ;;  %v1622_v56 = vpack.c.bf16 %v1588_v53, %v1587_v52  ;;  %v1595_v1 = vld [vmem:[%s13345_s0 + $0x63] sm:$0xff]  ;;  %v1602_v12 = vld [vmem:[%s13345_s0 + $0x9b] sm:$0xff]  ;;  %vm12140_vm4 = vmneg %vm3658_vm3 }
  0x27   :  { %8993 = vmatmul.mubr.msk.bf16.gmra.mxu1 %vm101_vm1, %v414_v8  ;;  %8966 = vmatprep.mubr.msk.bf16.mxu0 %vm101_vm1, %v80_v9  ;;  %v425_v8 = vpack.c.bf16 %v406_v3, %v405_v2  ;;  %v819_v9 = vpack.c.bf16 %v790_v5, %v789_v4  ;;  %v1596_v2 = vld [vmem:[%s13345_s0 + $0x6b] sm:$0xff]  ;;  %v1597_v3 = vld [vmem:[%s13345_s0 + $0x73] sm:$0xff]  ;;  %v1598_v4 = vld [vmem:[%s13345_s0 + $0x7b] sm:$0xff] }
  0x28   :  { %8996 = vmatprep.mubr.msk.bf16.mxu1 %vm101_vm1, %v415_v10  ;;  %v407_v10 = vld [vmem:[%s13345_s0 + $0x111] sm:$0xff]  ;;  %v1626_v5 = vpack.c.bf16 %v1596_v2, %v1595_v1  ;;  %v1990_v14 = vld [vmem:[%s13345_s0 + $0x1c] sm:$0xff]  ;;  %vm12147_vm6 = vmpackc.low %vm12140_vm4, %vm10254_vm5 }
  0x29   :  { %v426_v16 = vpack.c.bf16 %v408_v11, %v407_v10  ;;  %v1600_v10 = vld [vmem:[%s13345_s0 + $0x8b] sm:$0xff]  ;;  %v1601_v11 = vld [vmem:[%s13345_s0 + $0x93] sm:$0xff]  ;;  %v1994_v28 = vld [vmem:[%s13345_s0 + $0x3c] sm:$0xff] }
  0x2a   :  { %v1989_v13 = vld [vmem:[%s13345_s0 + $0x14] sm:$0xff]  ;;  %v1998_v39 = vld [vmem:[%s13345_s0 + $0x5c] sm:$0xff]  ;;  %vm12352_vm7 = vmpackc.low %vm10254_vm5, %vm12140_vm4 }
  0x2b   :  { %v2002_v52 = vld [vmem:[%s13345_s0 + $0x7c] sm:$0xff] }
  0x2e   :  { %8967 = vmatmul.mubr.msk.bf16.gmra.mxu0 %vm101_vm1, %v81_v20  ;;  %v795_v20 = vld [vmem:[%s13345_s0 + $0x92] sm:$0xff] }
  0x2f   :  { %8997 = vmatmul.mubr.msk.bf16.gmra.mxu1 %vm101_vm1, %v416_v21  ;;  %8970 = vmatprep.mubr.msk.bf16.mxu0 %vm101_vm1, %v82_v22  ;;  %v796_v21 = vld [vmem:[%s13345_s0 + $0x9a] sm:$0xff]  ;;  %v797_v22 = vld [vmem:[%s13345_s0 + $0xa2] sm:$0xff] }
  0x30   :  { %9000 = vmatprep.mubr.msk.bf16.mxu1 %vm101_vm1, %v417_v23  ;;  %v798_v23 = vld [vmem:[%s13345_s0 + $0xaa] sm:$0xff]  ;;  %v822_v24 = vpack.c.bf16 %v796_v21, %v795_v20 }
  0x31   :  { %v823_v25 = vpack.c.bf16 %v798_v23, %v797_v22  ;;  %v1603_v20 = vld [vmem:[%s13345_s0 + $0xa3] sm:$0xff]  ;;  %v1604_v21 = vld [vmem:[%s13345_s0 + $0xab] sm:$0xff] }
  0x32   :  { %v1991_v22 = vld [vmem:[%s13345_s0 + $0x24] sm:$0xff]  ;;  %v1992_v23 = vld [vmem:[%s13345_s0 + $0x2c] sm:$0xff]  ;;  %v1630_v19 = vpack.c.bf16 %v1604_v21, %v1603_v20  ;;  %v2013_v21 = vld [vmem:[%s13345_s0 + $0xd4] sm:$0xff] }
  0x36   :  { %8971 = vmatmul.mubr.msk.bf16.gmra.mxu0 %vm101_vm1, %v83_v32  ;;  %v825_v32 = vpack.c.bf16 %v802_v30, %v801_v29  ;;  %v10863_v29 = vpack.c.bf16 %v1992_v23, %v1991_v22  ;;  %v2014_v22 = vld [vmem:[%s13345_s0 + $0xdc] sm:$0xff] }
  0x37   :  { %9001 = vmatmul.mubr.msk.bf16.gmra.mxu1 %vm101_vm1, %v418_v33  ;;  %9022 = vmatprep.mubr.msk.bf16.mxu0 %vm101_vm1, %v813_v35  ;;  %v803_v33 = vld [vmem:[%s13345_s0 + $0xd2] sm:$0xff]  ;;  %v805_v35 = vld [vmem:[%s13345_s0 + $0xe2] sm:$0xff] }
  0x38   :  { %9004 = vmatprep.mubr.msk.bf16.mxu1 %vm101_vm1, %v419_v34  ;;  %v804_v34 = vld [vmem:[%s13345_s0 + $0xda] sm:$0xff]  ;;  %v827_v38 = vpack.c.bf16 %v806_v36, %v805_v35  ;;  %v1996_v35 = vld [vmem:[%s13345_s0 + $0x4c] sm:$0xff] }
  0x39   :  { %v826_v37 = vpack.c.bf16 %v804_v34, %v803_v33  ;;  %v1607_v33 = vld [vmem:[%s13345_s0 + $0xc3] sm:$0xff]  ;;  %v1608_v34 = vld [vmem:[%s13345_s0 + $0xcb] sm:$0xff]  ;;  %v1609_v36 = vld [vmem:[%s13345_s0 + $0xd3] sm:$0xff] }
  0x3a   :  { %v1632_v40 = vpack.c.bf16 %v1608_v34, %v1607_v33 }
  0x3e   :  { %9023 = vmatmul.mubr.msk.bf16.vlgmr.msra.gmra.mxu0 %vm101_vm1, %v814_v45 }
  0x3f   :  { %9005 = vmatmul.mubr.msk.bf16.gmra.mxu1 %vm101_vm1, %v420_v44  ;;  %9097 = vmatpush3.bf16.msra.mxu0 %v1702_v46  ;;  %v829_v44 = vpack.c.bf16 %v810_v42, %v809_v41  ;;  %v812_v46 = vld [vmem:[%s13345_s0 + $0x11a] sm:$0xff] }
  0x40   :  { %9008 = vmatprep.mubr.msk.bf16.mxu1 %vm101_vm1, %v421_v47  ;;  %9026 = vmatprep.mubr.msk.bf16.mxu0 %vm101_vm1, %v815_v49  ;;  %v1585_v47 = vld [vmem:[%s13345_s0 + $0x13] sm:$0xff] }
  0x41   :  { %9979 = vmatprep.subr.msk.bf16.mxu0 %vm156_vm0, %v10579_v48  ;;  %v1592_v48 = vld [vmem:[%s13345_s0 + $0x4b] sm:$0xff] }
  0x46   :  { %9027 = vmatmul.mubr.msk.bf16.gmra.mxu0 %vm101_vm1, %v816_v59 }
  0x47   :  { %9009 = vmatmul.mubr.msk.bf16.gmra.mxu1 %vm101_vm1, %v422_v58  ;;  %9030 = vmatprep.mubr.msk.bf16.mxu0 %vm101_vm1, %v817_v61  ;;  %v1623_v58 = vpack.c.bf16 %v1590_v55, %v1589_v54 }
  0x48   :  { %9012 = vmatprep.mubr.msk.bf16.mxu1 %vm101_vm1, %v423_v60  ;;  %v1591_v60 = vld [vmem:[%s13345_s0 + $0x43] sm:$0xff] }
  0x49   :  { %v1624_v63 = vpack.c.bf16 %v1592_v48, %v1591_v60  ;;  %v2003_v60 = vld [vmem:[%s13345_s0 + $0x84] sm:$0xff]  ;;  %v2004_v48 = vld [vmem:[%s13345_s0 + $0x8c] sm:$0xff] }
  0x4a   :  { %v10967_v2 = vpack.c.bf16 %v2004_v48, %v2003_v60  ;;  %v2021_v60 = vld [vmem:[%s13345_s0 + $0x114] sm:$0xff]  ;;  %v2022_v48 = vld [vmem:[%s13345_s0 + $0x11c] sm:$0xff] }
  0x4e   :  { %9031 = vmatmul.mubr.msk.bf16.gmra.mxu0 %vm101_vm1, %v818_v7 }
  0x4f   :  { %9013 = vmatmul.mubr.msk.bf16.gmra.mxu1 %vm101_vm1, %v424_v6  ;;  %9034 = vmatprep.mubr.msk.bf16.mxu0 %vm101_vm1, %v819_v9  ;;  %v1627_v6 = vpack.c.bf16 %v1598_v4, %v1597_v3 }
  0x50   :  { %9016 = vmatprep.mubr.msk.bf16.mxu1 %vm101_vm1, %v425_v8  ;;  %v1216_v8 = vld [vmem:[%s13345_s0 + $0x12a] sm:$0xff] }
  0x56   :  { %9035 = vmatmul.mubr.msk.bf16.gmra.mxu0 %vm101_vm1, %v820_v17 }
  0x57   :  { %9017 = vmatmul.mubr.msk.bf16.gmra.mxu1 %vm101_vm1, %v426_v16  ;;  %9038 = vmatprep.mubr.msk.bf16.mxu0 %vm101_vm1, %v821_v18 }
  0x58   :  { %9060 = vmatprep.mubr.msk.bf16.mxu1 %vm101_vm1, %v814_v45  ;;  %v811_v45 = vld [vmem:[%s13345_s0 + $0x112] sm:$0xff] }
  0x59   :  { %v830_v50 = vpack.c.bf16 %v812_v46, %v811_v45  ;;  %v1612_v45 = vld [vmem:[%s13345_s0 + $0xeb] sm:$0xff] }
  0x5a   :  { %v1999_v46 = vld [vmem:[%s13345_s0 + $0x64] sm:$0xff] }
  0x5e   :  { %9039 = vmatmul.mubr.msk.bf16.gmra.mxu0 %vm101_vm1, %v822_v24 }
  0x5f   :  { %9061 = vmatmul.mubr.msk.bf16.vlgmr.msra.gmra.mxu1 %vm101_vm1, %v815_v49  ;;  %9042 = vmatprep.mubr.msk.bf16.mxu0 %vm101_vm1, %v823_v25  ;;  %v1586_v49 = vld [vmem:[%s13345_s0 + $0x1b] sm:$0xff] }
  0x60   :  { %9064 = vmatprep.mubr.msk.bf16.mxu1 %vm101_vm1, %v816_v59  ;;  %9135 = vmatpush3.bf16.msra.mxu1 %v2106_v26  ;;  %v1621_v51 = vpack.c.bf16 %v1586_v49, %v1585_v47  ;;  %v10771_v59 = vld [vmem:[%s13344_s1 + $0x40] sm:$0x3f]   ;;  %v1993_v26 = vld [vmem:[%s13345_s0 + $0x34] sm:$0xff]  ;;  %v2000_v47 = vld [vmem:[%s13345_s0 + $0x6c] sm:$0xff] }
  0x61   :  { %9980 = vmatprep.subr.msk.bf16.mxu1 %vm156_vm0, %v10682_v27  ;;  %v1613_v49 = vld [vmem:[%s13345_s0 + $0xf3] sm:$0xff]  ;;  %v10933_v54 = vpack.c.bf16 %v2000_v47, %v1999_v46 }
  0x66   :  { %9043 = vmatmul.mubr.msk.bf16.gmra.mxu0 %vm101_vm1, %v824_v31 }
  0x67   :  { %9065 = vmatmul.mubr.msk.bf16.gmra.mxu1 %vm101_vm1, %v817_v61  ;;  %9046 = vmatprep.mubr.msk.bf16.mxu0 %vm101_vm1, %v825_v32  ;;  %v1593_v61 = vld [vmem:[%s13345_s0 + $0x53] sm:$0xff] }
  0x68   :  { %9068 = vmatprep.mubr.msk.bf16.mxu1 %vm101_vm1, %v818_v7  ;;  %v1625_v0 = vpack.c.bf16 %v1594_v62, %v1593_v61  ;;  %v1215_v7 = vld [vmem:[%s13345_s0 + $0x122] sm:$0xff]  ;;  %v1617_v61 = vld [vmem:[%s13345_s0 + $0x113] sm:$0xff] }
  0x69   :  { %v1234_v15 = vpack.c.bf16 %v1216_v8, %v1215_v7  ;;  %v1618_v62 = vld [vmem:[%s13345_s0 + $0x11b] sm:$0xff]  ;;  %v2007_v7 = vld [vmem:[%s13345_s0 + $0xa4] sm:$0xff]  ;;  %v2008_v8 = vld [vmem:[%s13345_s0 + $0xac] sm:$0xff] }
  0x6a   :  { %v1637_v3 = vpack.c.bf16 %v1618_v62, %v1617_v61 }
  0x6e   :  { %9047 = vmatmul.mubr.msk.bf16.gmra.mxu0 %vm101_vm1, %v826_v37 }
  0x6f   :  { %9069 = vmatmul.mubr.msk.bf16.gmra.mxu1 %vm101_vm1, %v819_v9  ;;  %9050 = vmatprep.mubr.msk.bf16.mxu0 %vm101_vm1, %v827_v38  ;;  %v1599_v9 = vld [vmem:[%s13345_s0 + $0x83] sm:$0xff] }
  0x70   :  { %9072 = vmatprep.mubr.msk.bf16.mxu1 %vm101_vm1, %v820_v17  ;;  %v1628_v16 = vpack.c.bf16 %v1600_v10, %v1599_v9  ;;  %v1629_v17 = vpack.c.bf16 %v1602_v12, %v1601_v11  ;;  %v2009_v9 = vld [vmem:[%s13345_s0 + $0xb4] sm:$0xff]  ;;  %v2010_v10 = vld [vmem:[%s13345_s0 + $0xbc] sm:$0xff]  ;;  %v10995_v12 = vpack.c.bf16 %v2008_v8, %v2007_v7 }
  0x76   :  { %9051 = vmatmul.mubr.msk.bf16.gmra.mxu0 %vm101_vm1, %v828_v43 }
  0x77   :  { %9073 = vmatmul.mubr.msk.bf16.gmra.mxu1 %vm101_vm1, %v821_v18  ;;  %9054 = vmatprep.mubr.msk.bf16.mxu0 %vm101_vm1, %v829_v44  ;;  %v2025_v18 = vpack.c.bf16 %v1990_v14, %v1989_v13  ;;  %v10997_v13 = vpack.c.bf16 %v2010_v10, %v2009_v9 }
  0x78   :  { %9076 = vmatprep.mubr.msk.bf16.mxu1 %vm101_vm1, %v822_v24  ;;  %v1605_v24 = vld [vmem:[%s13345_s0 + $0xb3] sm:$0xff] }
  0x7e   :  { %9055 = vmatmul.mubr.msk.bf16.gmra.mxu0 %vm101_vm1, %v830_v50 }
  0x7f   :  { %9077 = vmatmul.mubr.msk.bf16.gmra.mxu1 %vm101_vm1, %v823_v25  ;;  %9098 = vmatprep.mubr.msk.bf16.mxu0 %vm101_vm1, %v1621_v51  ;;  %v1606_v25 = vld [vmem:[%s13345_s0 + $0xbb] sm:$0xff] }
  0x80   :  { %9080 = vmatprep.mubr.msk.bf16.mxu1 %vm101_vm1, %v824_v31  ;;  %v1631_v30 = vpack.c.bf16 %v1606_v25, %v1605_v24  ;;  %v10865_v31 = vpack.c.bf16 %v1994_v28, %v1993_v26  ;;  %v2001_v51 = vld [vmem:[%s13345_s0 + $0x74] sm:$0xff]  ;;  %v11026_v26 = vpack.c.bf16 %v2014_v22, %v2013_v21  ;;  %v2797_v22 = vld [vmem:[%s13345_s0 + $0x25] sm:$0xff] }
  0x86   :  { %9099 = vmatmul.mubr.msk.bf16.vlgmr.msra.gmra.mxu0 %vm101_vm1, %v1622_v56  ;;  %v10935_v56 = vpack.c.bf16 %v2002_v52, %v2001_v51 }
  0x87   :  { %9081 = vmatmul.mubr.msk.bf16.gmra.mxu1 %vm101_vm1, %v825_v32  ;;  %9173 = vmatpush3.bf16.msra.mxu0 %v2510_v57  ;;  %v2914_v32 = vsel %vm156_vm0, %v10682_v27, 0  ;;  %v1995_v27 = vld [vmem:[%s13345_s0 + $0x44] sm:$0xff] }
  0x88   :  { %9084 = vmatprep.mubr.msk.bf16.mxu1 %vm101_vm1, %v826_v37  ;;  %9102 = vmatprep.mubr.msk.bf16.mxu0 %vm101_vm1, %v1623_v58  ;;  %v1610_v37 = vld [vmem:[%s13345_s0 + $0xdb] sm:$0xff]  ;;  %v10899_v41 = vpack.c.bf16 %v1996_v35, %v1995_v27  ;;  %v1615_v57 = vld [vmem:[%s13345_s0 + $0x103] sm:$0xff]  ;;  %v1616_v58 = vld [vmem:[%s13345_s0 + $0x10b] sm:$0xff] }
  0x89   :  { %9981 = vmatprep.subr.msk.bf16.mxu0 %vm156_vm0, %v10771_v59  ;;  %v1633_v42 = vpack.c.bf16 %v1610_v37, %v1609_v36  ;;  %v1636_v1 = vpack.c.bf16 %v1616_v58, %v1615_v57  ;;  %v2016_v27 = vld [vmem:[%s13345_s0 + $0xec] sm:$0xff]  ;;  %v2018_v37 = vld [vmem:[%s13345_s0 + $0xfc] sm:$0xff] }
  0x8a   :  { %v2020_v57 = vld [vmem:[%s13345_s0 + $0x10c] sm:$0xff] }
  0x8e   :  { %9103 = vmatmul.mubr.msk.bf16.gmra.mxu0 %vm101_vm1, %v1624_v63  ;;  %v2005_v63 = vld [vmem:[%s13345_s0 + $0x94] sm:$0xff] }
  0x8f   :  { %9085 = vmatmul.mubr.msk.bf16.gmra.mxu1 %vm101_vm1, %v827_v38  ;;  %9106 = vmatprep.mubr.msk.bf16.mxu0 %vm101_vm1, %v1625_v0  ;;  %v1997_v38 = vld [vmem:[%s13345_s0 + $0x54] sm:$0xff]  ;;  %v2006_v0 = vld [vmem:[%s13345_s0 + $0x9c] sm:$0xff] }
  0x90   :  { %9088 = vmatprep.mubr.msk.bf16.mxu1 %vm101_vm1, %v828_v43  ;;  %v10901_v43 = vpack.c.bf16 %v1998_v39, %v1997_v38  ;;  %v10969_v4 = vpack.c.bf16 %v2006_v0, %v2005_v63 }
  0x96   :  { %9107 = vmatmul.mubr.msk.bf16.gmra.mxu0 %vm101_vm1, %v1626_v5  ;;  %v1619_v5 = vld [vmem:[%s13345_s0 + $0x123] sm:$0xff] }
  0x97   :  { %9089 = vmatmul.mubr.msk.bf16.gmra.mxu1 %vm101_vm1, %v829_v44  ;;  %9110 = vmatprep.mubr.msk.bf16.mxu0 %vm101_vm1, %v1627_v6  ;;  %v1611_v44 = vld [vmem:[%s13345_s0 + $0xe3] sm:$0xff]  ;;  %v1620_v6 = vld [vmem:[%s13345_s0 + $0x12b] sm:$0xff] }
  0x98   :  { %9092 = vmatprep.mubr.msk.bf16.mxu1 %vm101_vm1, %v830_v50  ;;  %v1614_v50 = vld [vmem:[%s13345_s0 + $0xfb] sm:$0xff]  ;;  %v1634_v53 = vpack.c.bf16 %v1612_v45, %v1611_v44  ;;  %v1638_v11 = vpack.c.bf16 %v1620_v6, %v1619_v5  ;;  %v11105_v5 = vpack.c.bf16 %v2022_v48, %v2021_v60 }
  0x99   :  { %v1635_v55 = vpack.c.bf16 %v1614_v50, %v1613_v49 }
  0x9e   :  { %9111 = vmatmul.mubr.msk.bf16.gmra.mxu0 %vm101_vm1, %v1628_v16  ;;  %v2011_v16 = vld [vmem:[%s13345_s0 + $0xc4] sm:$0xff] }
  0x9f   :  { %9093 = vmatmul.mubr.msk.bf16.gmra.mxu1 %vm101_vm1, %v1234_v15  ;;  %9114 = vmatprep.mubr.msk.bf16.mxu0 %vm101_vm1, %v1629_v17  ;;  %v2012_v17 = vld [vmem:[%s13345_s0 + $0xcc] sm:$0xff] }
  0xa0   :  { %9136 = vmatprep.mubr.msk.bf16.mxu1 %vm101_vm1, %v2025_v18  ;;  %v11024_v25 = vpack.c.bf16 %v2012_v17, %v2011_v16  ;;  %v2023_v17 = vld [vmem:[%s13345_s0 + $0x124] sm:$0xff] }
  0xa6   :  { %9115 = vmatmul.mubr.msk.bf16.gmra.mxu0 %vm101_vm1, %v1630_v19 }
  0xa7   :  { %9137 = vmatmul.mubr.msk.bf16.vlgmr.msra.gmra.mxu1 %vm101_vm1, %v10863_v29  ;;  %9118 = vmatprep.mubr.msk.bf16.mxu0 %vm101_vm1, %v1631_v30  ;;  %v11035_v30 = vld [vmem:[%s13346_s5] ss:$0 sm:$0xff] }
  0xa8   :  { %9140 = vmatprep.mubr.msk.bf16.mxu1 %vm101_vm1, %v10865_v31  ;;  %9211 = vmatpush3.bf16.msra.mxu1 %v2914_v32 }
  0xae   :  { %9119 = vmatmul.mubr.msk.bf16.gmra.mxu0 %vm101_vm1, %v1632_v40 }
  0xaf   :  { %9141 = vmatmul.mubr.msk.bf16.gmra.mxu1 %vm101_vm1, %v10899_v41  ;;  %9122 = vmatprep.mubr.msk.bf16.mxu0 %vm101_vm1, %v1633_v42 }
  0xb0   :  { %9144 = vmatprep.mubr.msk.bf16.mxu1 %vm101_vm1, %v10901_v43 }
  0xb6   :  { %9123 = vmatmul.mubr.msk.bf16.gmra.mxu0 %vm101_vm1, %v1634_v53 }
  0xb7   :  { %9145 = vmatmul.mubr.msk.bf16.gmra.mxu1 %vm101_vm1, %v10933_v54  ;;  %9126 = vmatprep.mubr.msk.bf16.mxu0 %vm101_vm1, %v1635_v55  ;;  %v2019_v55 = vld [vmem:[%s13345_s0 + $0x104] sm:$0xff] }
  0xb8   :  { %9148 = vmatprep.mubr.msk.bf16.mxu1 %vm101_vm1, %v10935_v56  ;;  %v11100_v0 = vpack.c.bf16 %v2020_v57, %v2019_v55 }
  0xbe   :  { %9127 = vmatmul.mubr.msk.bf16.gmra.mxu0 %vm101_vm1, %v1636_v1 }
  0xbf   :  { %9149 = vmatmul.mubr.msk.bf16.gmra.mxu1 %vm101_vm1, %v10967_v2  ;;  %9130 = vmatprep.mubr.msk.bf16.mxu0 %vm101_vm1, %v1637_v3 }
  0xc0   :  { %9152 = vmatprep.mubr.msk.bf16.mxu1 %vm101_vm1, %v10969_v4 }
  0xc6   :  { %v8948_v14 = vpop.f32.mrf.mxu0  ;;  %9131 = vmatmul.mubr.msk.bf16.gmra.mxu0 %vm101_vm1, %v1638_v11 }
  0xc7   :  { %v10999_v15 = vpop.f32.mrf.mxu1  ;;  %9153 = vmatmul.mubr.msk.bf16.gmra.mxu1 %vm101_vm1, %v10995_v12  ;;  %9174 = vmatprep.mubr.msk.bf16.mxu0 %vm101_vm1, %v10863_v29  ;;  %v3318_v29 = vsel %vm156_vm0, %v10771_v59, 0  ;;  %v2015_v59 = vld [vmem:[%s13345_s0 + $0xe4] sm:$0xff]  ;;  %v203_v47 = vadd.f32 %v8948_v14, %v11035_v30 }
  0xc8   :  { %9156 = vmatprep.mubr.msk.bf16.mxu1 %vm101_vm1, %v10997_v13  ;;  %v194_v18 = vpop.f32.mrf.mxu0  ;;  %v11063_v42 = vpack.c.bf16 %v2016_v27, %v2015_v59 }
  0xc9   :  { %v11014_v20 = vpop.f32.mrf.mxu1  ;;  %v195_v52 = vadd.f32 %v11035_v30, %v194_v18  ;;  %v2024_v18 = vld [vmem:[%s13345_s0 + $0x12c] sm:$0xff] }
  0xca   :  { %v8949_v23 = vpop.f32.mrf.mxu0 }
  0xcb   :  { %v11022_v24 = vpop.f32.mrf.mxu1 }
  0xcc   :  { %v197_v28 = vpop.f32.mrf.mxu0 }
  0xcd   :  { %v11028_v19 = vpop.f32.mrf.mxu1  ;;  %v198_v1 = vadd.f32 %v11035_v30, %v197_v28 }
  0xce   :  { %v8952_v32 = vpop.f32.mrf.mxu0  ;;  %9175 = vmatmul.mubr.msk.bf16.vlgmr.msra.gmra.mxu0 %vm101_vm1, %v10865_v31  ;;  %v2017_v31 = vld [vmem:[%s13345_s0 + $0xf4] sm:$0xff] }
  0xcf   :  { %v8980_v33 = vpop.f32.mrf.mxu1  ;;  %9157 = vmatmul.mubr.msk.bf16.gmra.mxu1 %vm101_vm1, %v11024_v25  ;;  %9249 = vmatpush3.bf16.msra.mxu0 %v3318_v29  ;;  %v11068_v45 = vpack.c.bf16 %v2018_v37, %v2017_v31  ;;  %v219_v8 = vadd.f32 %v8952_v32, %v11035_v30 }
  0xd0   :  { %v11042_v34 = vadd.f32 %v8980_v33, %v11035_v30  ;;  %9160 = vmatprep.mubr.msk.bf16.mxu1 %vm101_vm1, %v11026_v26  ;;  %v210_v35 = vpop.f32.mrf.mxu0  ;;  %9178 = vmatprep.mubr.msk.bf16.mxu0 %vm101_vm1, %v10899_v41  ;;  %v11136_v33 = vpack.c.bf16 %v2024_v18, %v2023_v17 }
  0xd1   :  { %v322_v36 = vpop.f32.mrf.mxu1  ;;  %v211_v14 = vadd.f32 %v11035_v30, %v210_v35 }
  0xd2   :  { %v11061_v38 = vadd.f32 %v11035_v30, %v322_v36  ;;  %v8953_v39 = vpop.f32.mrf.mxu0 }
  0xd3   :  { %v8981_v40 = vpop.f32.mrf.mxu1 }
  0xd4   :  { %v11066_v44 = vadd.f32 %v8981_v40, %v11035_v30  ;;  %v213_v41 = vpop.f32.mrf.mxu0 }
  0xd5   :  { %v325_v46 = vpop.f32.mrf.mxu1  ;;  %v214_v59 = vadd.f32 %v11035_v30, %v213_v41 }
  0xd6   :  { %v11072_v49 = vadd.f32 %v11035_v30, %v325_v46  ;;  %v8956_v50 = vpop.f32.mrf.mxu0  ;;  %9179 = vmatmul.mubr.msk.bf16.gmra.mxu0 %vm101_vm1, %v10901_v43 }
  0xd7   :  { %v8986_v51 = vpop.f32.mrf.mxu1  ;;  %9161 = vmatmul.mubr.msk.bf16.gmra.mxu1 %vm101_vm1, %v11063_v42  ;;  %9182 = vmatprep.mubr.msk.bf16.mxu0 %vm101_vm1, %v10933_v54  ;;  %v206_v54 = vadd.f32 %v8949_v23, %v11035_v30  ;;  %v2798_v23 = vld [vmem:[%s13345_s0 + $0x2d] sm:$0xff]  ;;  %v235_v37 = vadd.f32 %v8956_v50, %v11035_v30  ;;  %v2799_v50 = vld [vmem:[%s13345_s0 + $0x35] sm:$0xff] }
  0xd8   :  { %13354 = vst [vmem:[#allocation9_spill] sm:$0xff] %v11072_v49  ;;  %v11079_v53 = vadd.f32 %v8986_v51, %v203_v47  ;;  %9164 = vmatprep.mubr.msk.bf16.mxu1 %vm101_vm1, %v11068_v45  ;;  %v226_v58 = vpop.f32.mrf.mxu0  ;;  %v2833_v35 = vpack.c.bf16 %v2798_v23, %v2797_v22  ;;  %v2800_v51 = vld [vmem:[%s13345_s0 + $0x3d] sm:$0xff] }
  0xd9   :  { %v526_v43 = vpop.f32.mrf.mxu1  ;;  %v2834_v48 = vpack.c.bf16 %v2800_v51, %v2799_v50  ;;  %v10007_v49 = vld [vmem:[%s13347_s2] sm:$0xff]  }
  0xda   :  { %v11098_v61 = vadd.f32 %v526_v43, %v195_v52  ;;  %v8957_v62 = vpop.f32.mrf.mxu0 }
  0xdb   :  { %v8987_v63 = vpop.f32.mrf.mxu1  ;;  %v238_v57 = vadd.f32 %v8957_v62, %v11035_v30 }
  0xdc   :  { %v11103_v3 = vadd.f32 %v8987_v63, %v206_v54  ;;  %v229_v6 = vpop.f32.mrf.mxu0 }
  0xdd   :  { %v529_v7 = vpop.f32.mrf.mxu1  ;;  %v230_v54 = vadd.f32 %v11035_v30, %v229_v6  ;;  %v2803_v6 = vld [vmem:[%s13345_s0 + $0x55] sm:$0xff] }
  0xde   :  { %v11108_v9 = vadd.f32 %v529_v7, %v198_v1  ;;  %v8960_v10 = vpop.f32.mrf.mxu0  ;;  %9183 = vmatmul.mubr.msk.bf16.gmra.mxu0 %vm101_vm1, %v10935_v56 }
  0xdf   :  { %v8990_v11 = vpop.f32.mrf.mxu1  ;;  %9165 = vmatmul.mubr.msk.bf16.gmra.mxu1 %vm101_vm1, %v11100_v0  ;;  %9186 = vmatprep.mubr.msk.bf16.mxu0 %vm101_vm1, %v10967_v2  ;;  %v222_v2 = vadd.f32 %v8953_v39, %v11035_v30  ;;  %v227_v39 = vadd.f32 %v11035_v30, %v226_v58 }
  0xe0   :  { %v11115_v16 = vadd.f32 %v8990_v11, %v219_v8  ;;  %9168 = vmatprep.mubr.msk.bf16.mxu1 %vm101_vm1, %v11105_v5  ;;  %v242_v21 = vpop.f32.mrf.mxu0  ;;  %v251_v11 = vadd.f32 %v8960_v10, %v11035_v30  ;;  %v2804_v10 = vld [vmem:[%s13345_s0 + $0x5d] sm:$0xff] }
  0xe1   :  { %v542_v56 = vpop.f32.mrf.mxu1  ;;  %v243_v62 = vadd.f32 %v11035_v30, %v242_v21  ;;  %v2805_v21 = vld [vmem:[%s13345_s0 + $0x65] sm:$0xff] }
  0xe2   :  { %v11134_v28 = vadd.f32 %v542_v56, %v211_v14  ;;  %v8961_v29 = vpop.f32.mrf.mxu0 }
  0xe3   :  { %v8991_v32 = vpop.f32.mrf.mxu1  ;;  %v254_v23 = vadd.f32 %v8961_v29, %v11035_v30 }
  0xe4   :  { %v11139_v27 = vadd.f32 %v8991_v32, %v222_v2  ;;  %v245_v36 = vpop.f32.mrf.mxu0 }
  0xe5   :  { %v545_v31 = vpop.f32.mrf.mxu1 }
  0xe6   :  { %v11142_v40 = vadd.f32 %v545_v31, %v214_v59  ;;  %v8964_v46 = vpop.f32.mrf.mxu0  ;;  %9187 = vmatmul.mubr.msk.bf16.gmra.mxu0 %vm101_vm1, %v10969_v4  ;;  %v2801_v4 = vld [vmem:[%s13345_s0 + $0x45] sm:$0xff]  ;;  %v246_v31 = vadd.f32 %v11035_v30, %v245_v36  ;;  %v2807_v36 = vld [vmem:[%s13345_s0 + $0x75] sm:$0xff] }
  0xe7   :  { %v8994_v47 = vpop.f32.mrf.mxu1  ;;  %9169 = vmatmul.mubr.msk.bf16.gmra.mxu1 %vm101_vm1, %v11136_v33  ;;  %9190 = vmatprep.mubr.msk.bf16.mxu0 %vm101_vm1, %v10995_v12  ;;  %v2802_v12 = vld [vmem:[%s13345_s0 + $0x4d] sm:$0xff]  ;;  %v267_v51 = vadd.f32 %v8964_v46, %v11035_v30  ;;  %v2808_v46 = vld [vmem:[%s13345_s0 + $0x7d] sm:$0xff] }
  0xe8   :  { %v11149_v41 = vadd.f32 %v8994_v47, %v235_v37  ;;  %9212 = vmatprep.mubr.msk.bf16.mxu1 %vm101_vm1, %v2833_v35  ;;  %v258_v52 = vpop.f32.mrf.mxu0  ;;  %v2835_v1 = vpack.c.bf16 %v2802_v12, %v2801_v4  ;;  %v2836_v35 = vpack.c.bf16 %v2804_v10, %v2803_v6 }
  0xe9   :  { %v558_v55 = vpop.f32.mrf.mxu1  ;;  %v259_v29 = vadd.f32 %v11035_v30, %v258_v52  ;;  %v2809_v52 = vld [vmem:[%s13345_s0 + $0x85] sm:$0xff] }
  0xea   :  { %v11167_v58 = vadd.f32 %v558_v55, %v227_v39  ;;  %v8965_v43 = vpop.f32.mrf.mxu0 }
  0xeb   :  { %v8995_v60 = vpop.f32.mrf.mxu1 }
  0xec   :  { %v11170_v63 = vadd.f32 %v8995_v60, %v238_v57  ;;  %v261_v7 = vpop.f32.mrf.mxu0 }
  0xed   :  { %v561_v8 = vpop.f32.mrf.mxu1 }
  0xee   :  { %v11173_v14 = vadd.f32 %v561_v8, %v230_v54  ;;  %v8968_v17 = vpop.f32.mrf.mxu0  ;;  %9191 = vmatmul.mubr.msk.bf16.gmra.mxu0 %vm101_vm1, %v10997_v13 }
  0xef   :  { %v8998_v18 = vpop.f32.mrf.mxu1  ;;  %9213 = vmatmul.mubr.msk.bf16.vlgmr.msra.gmra.mxu1 %vm101_vm1, %v2834_v48  ;;  %9194 = vmatprep.mubr.msk.bf16.mxu0 %vm101_vm1, %v11024_v25  ;;  %v2806_v25 = vld [vmem:[%s13345_s0 + $0x6d] sm:$0xff]  ;;  %v270_v48 = vadd.f32 %v8965_v43, %v11035_v30 }
  0xf0   :  { %v11179_v56 = vadd.f32 %v8998_v18, %v251_v11  ;;  %9216 = vmatprep.mubr.msk.bf16.mxu1 %vm101_vm1, %v2835_v1  ;;  %v274_v13 = vpop.f32.mrf.mxu0  ;;  %v2837_v47 = vpack.c.bf16 %v2806_v25, %v2805_v21  ;;  %v2838_v11 = vpack.c.bf16 %v2808_v46, %v2807_v36  ;;  %v262_v18 = vadd.f32 %v11035_v30, %v261_v7 }
  0xf1   :  { %v574_v22 = vpop.f32.mrf.mxu1  ;;  %v283_v21 = vadd.f32 %v8968_v17, %v11035_v30  ;;  %v275_v43 = vadd.f32 %v11035_v30, %v274_v13  ;;  %v2811_v17 = vld [vmem:[%s13345_s0 + $0x95] sm:$0xff] }
  0xf2   :  { %v11197_v2 = vadd.f32 %v574_v22, %v243_v62  ;;  %v8969_v32 = vpop.f32.mrf.mxu0 }
  0xf3   :  { %v8999_v59 = vpop.f32.mrf.mxu1 }
  0xf4   :  { %v11200_v37 = vadd.f32 %v8999_v59, %v254_v23  ;;  %v277_v39 = vpop.f32.mrf.mxu0 }
  0xf5   :  { %v577_v50 = vpop.f32.mrf.mxu1  ;;  %v278_v46 = vadd.f32 %v11035_v30, %v277_v39  ;;  %v2428_v39 = vld [vmem:[%s13345_s0 + $0x13c] sm:$0xff] }
  0xf6   :  { %v11203_v55 = vadd.f32 %v577_v50, %v246_v31  ;;  %v8972_v4 = vpop.f32.mrf.mxu0  ;;  %9195 = vmatmul.mubr.msk.bf16.gmra.mxu0 %vm101_vm1, %v11026_v26 }
  0xf7   :  { %v9002_v12 = vpop.f32.mrf.mxu1  ;;  %9217 = vmatmul.mubr.msk.bf16.gmra.mxu1 %vm101_vm1, %v2836_v35  ;;  %9198 = vmatprep.mubr.msk.bf16.mxu0 %vm101_vm1, %v11063_v42  ;;  %v2810_v42 = vld [vmem:[%s13345_s0 + $0x8d] sm:$0xff] }
  0xf8   :  { %v11209_v57 = vadd.f32 %v9002_v12, %v267_v51  ;;  %9220 = vmatprep.mubr.msk.bf16.mxu1 %vm101_vm1, %v2837_v47  ;;  %v290_v26 = vpop.f32.mrf.mxu0  ;;  %v2839_v6 = vpack.c.bf16 %v2810_v42, %v2809_v52  ;;  %v286_v47 = vadd.f32 %v8969_v32, %v11035_v30  ;;  %v299_v32 = vadd.f32 %v8972_v4, %v11035_v30 }
  0xf9   :  { %v590_v60 = vpop.f32.mrf.mxu1  ;;  %v291_v4 = vadd.f32 %v11035_v30, %v290_v26  ;;  %v2818_v26 = vld [vmem:[%s13345_s0 + $0xcd] sm:$0xff] }
  0xfa   :  { %v11227_v54 = vadd.f32 %v590_v60, %v259_v29  ;;  %v8973_v1 = vpop.f32.mrf.mxu0 }
  0xfb   :  { %v9003_v8 = vpop.f32.mrf.mxu1 }
  0xfc   :  { %v11230_v62 = vadd.f32 %v9003_v8, %v270_v48  ;;  %v293_v10 = vpop.f32.mrf.mxu0 }
  0xfd   :  { %v593_v22 = vpop.f32.mrf.mxu1 }
  0xfe   :  { %v11233_v25 = vadd.f32 %v593_v22, %v262_v18  ;;  %v9024_v59 = vpop.f32.mrf.mxu0  ;;  %9199 = vmatmul.mubr.msk.bf16.gmra.mxu0 %vm101_vm1, %v11068_v45  ;;  %v2812_v45 = vld [vmem:[%s13345_s0 + $0x9d] sm:$0xff] }
  0xff   :  { %v9006_v23 = vpop.f32.mrf.mxu1  ;;  %9221 = vmatmul.mubr.msk.bf16.gmra.mxu1 %vm101_vm1, %v2838_v11  ;;  %v11242_v7 = vadd.f32 %v9024_v59, %v11079_v53  ;;  %9202 = vmatprep.mubr.msk.bf16.mxu0 %vm101_vm1, %v11100_v0  ;;  %v2813_v53 = vld [vmem:[%s13345_s0 + $0xa5] sm:$0xff]  ;;  %v2814_v0 = vld [vmem:[%s13345_s0 + $0xad] sm:$0xff]  ;;  %v2840_v36 = vpack.c.bf16 %v2812_v45, %v2811_v17  ;;  %v302_v17 = vadd.f32 %v8973_v1, %v11035_v30 }
 0x100   :  { %v11239_v35 = vadd.f32 %v9006_v23, %v283_v21  ;;  %9224 = vmatprep.mubr.msk.bf16.mxu1 %vm101_vm1, %v2839_v6  ;;  %v930_v13 = vpop.f32.mrf.mxu0  ;;  %v2841_v42 = vpack.c.bf16 %v2814_v0, %v2813_v53  ;;  %v2816_v21 = vld [vmem:[%s13345_s0 + $0xbd] sm:$0xff]  ;;  %v2817_v23 = vld [vmem:[%s13345_s0 + $0xc5] sm:$0xff] }
 0x101   :  { %v606_v31 = vpop.f32.mrf.mxu1  ;;  %v11263_v51 = vadd.f32 %v930_v13, %v11098_v61 }
 0x102   :  { %v11260_v50 = vadd.f32 %v606_v31, %v275_v43  ;;  %v9025_v29 = vpop.f32.mrf.mxu0  ;;  %v3202_v43 = vld [vmem:[%s13345_s0 + $0x2e] sm:$0xff] }
 0x103   :  { %v9007_v12 = vpop.f32.mrf.mxu1  ;;  %v11269_v52 = vadd.f32 %v9025_v29, %v11103_v3  ;;  %v2427_v3 = vld [vmem:[%s13345_s0 + $0x134] sm:$0xff]  ;;  %v294_v29 = vadd.f32 %v11035_v30, %v293_v10  ;;  %v2820_v10 = vld [vmem:[%s13345_s0 + $0xdd] sm:$0xff] }
 0x104   :  { %v11266_v60 = vadd.f32 %v9007_v12, %v286_v47  ;;  %v933_v8 = vpop.f32.mrf.mxu0  ;;  %v2446_v0 = vpack.c.bf16 %v2428_v39, %v2427_v3  ;;  %v2843_v12 = vpack.c.bf16 %v2818_v26, %v2817_v23  ;;  %v3206_v26 = vld [vmem:[%s13345_s0 + $0x4e] sm:$0xff] }
 0x105   :  { %v609_v48 = vpop.f32.mrf.mxu1  ;;  %v11275_v61 = vadd.f32 %v933_v8, %v11108_v9  ;;  %v2815_v9 = vld [vmem:[%s13345_s0 + $0xb5] sm:$0xff]  ;;  %v315_v8 = vadd.f32 %v10999_v15, %v11035_v30 }
 0x106   :  { %v11272_v11 = vadd.f32 %v609_v48, %v278_v46  ;;  %v9028_v6 = vpop.f32.mrf.mxu0  ;;  %9203 = vmatmul.mubr.msk.bf16.gmra.mxu0 %vm101_vm1, %v11105_v5  ;;  %v2842_v47 = vpack.c.bf16 %v2816_v21, %v2815_v9  ;;  %v3203_v15 = vld [vmem:[%s13345_s0 + $0x36] sm:$0xff]  ;;  %v3204_v9 = vld [vmem:[%s13345_s0 + $0x3e] sm:$0xff] }
 0x107   :  { %v9010_v18 = vpop.f32.mrf.mxu1  ;;  %9225 = vmatmul.mubr.msk.bf16.gmra.mxu1 %vm101_vm1, %v2840_v36  ;;  %v11293_v5 = vadd.f32 %v9028_v6, %v11115_v16  ;;  %9206 = vmatprep.mubr.msk.bf16.mxu0 %vm101_vm1, %v11136_v33  ;;  %v3201_v33 = vld [vmem:[%s13345_s0 + $0x26] sm:$0xff] }
 0x108   :  { %v11290_v22 = vadd.f32 %v9010_v18, %v299_v32  ;;  %9228 = vmatprep.mubr.msk.bf16.mxu1 %vm101_vm1, %v2841_v42  ;;  %v946_v16 = vpop.f32.mrf.mxu0  ;;  %v3237_v42 = vpack.c.bf16 %v3202_v43, %v3201_v33 }
 0x109   :  { %v622_v59 = vpop.f32.mrf.mxu1  ;;  %v11317_v31 = vadd.f32 %v946_v16, %v11134_v28 }
 0x10a   :  { %v11314_v45 = vadd.f32 %v622_v59, %v291_v4  ;;  %v9029_v53 = vpop.f32.mrf.mxu0  ;;  %v2821_v4 = vld [vmem:[%s13345_s0 + $0xe5] sm:$0xff]  ;;  %v318_v59 = vadd.f32 %v11022_v24, %v11035_v30 }
 0x10b   :  { %v9011_v13 = vpop.f32.mrf.mxu1  ;;  %v11323_v46 = vadd.f32 %v9029_v53, %v11139_v27  ;;  %v2819_v27 = vld [vmem:[%s13345_s0 + $0xd5] sm:$0xff]  ;;  %v3238_v53 = vpack.c.bf16 %v3204_v9, %v3203_v15 }
 0x10c   :  { %v11320_v36 = vadd.f32 %v9011_v13, %v302_v17  ;;  %v949_v1 = vpop.f32.mrf.mxu0  ;;  %v2844_v13 = vpack.c.bf16 %v2820_v10, %v2819_v27  ;;  %v3208_v27 = vld [vmem:[%s13345_s0 + $0x5e] sm:$0xff]  ;;  %v3210_v9 = vld [vmem:[%s13345_s0 + $0x6e] sm:$0xff] }
 0x10d   :  { %v625_v48 = vpop.f32.mrf.mxu1  ;;  %v11330_v32 = vadd.f32 %v949_v1, %v11142_v40  ;;  %v307_v40 = vadd.f32 %v11035_v30, %v11014_v20  ;;  %v2822_v20 = vld [vmem:[%s13345_s0 + $0xed] sm:$0xff] }
 0x10e   :  { %v11327_v28 = vadd.f32 %v625_v48, %v294_v29  ;;  %v9032_v6 = vpop.f32.mrf.mxu0  ;;  %9207 = vmatmul.mubr.msk.bf16.gmra.mxu0 %vm101_vm1, %v2446_v0  ;;  %v2845_v0 = vpack.c.bf16 %v2822_v20, %v2821_v4 }
 0x10f   :  { %v9014_v18 = vpop.f32.mrf.mxu1  ;;  %9229 = vmatmul.mubr.msk.bf16.gmra.mxu1 %vm101_vm1, %v2842_v47  ;;  %v11348_v39 = vadd.f32 %v9032_v6, %v11149_v41  ;;  %9250 = vmatprep.mubr.msk.bf16.mxu0 %vm101_vm1, %v3237_v42  ;;  %v3205_v41 = vld [vmem:[%s13345_s0 + $0x46] sm:$0xff]  ;;  %v310_v47 = vadd.f32 %v11035_v30, %v11028_v19  ;;  %v2823_v19 = vld [vmem:[%s13345_s0 + $0xf5] sm:$0xff]  ;;  %v2824_v30 = vld [vmem:[%s13345_s0 + $0xfd] sm:$0xff] }
 0x110   :  { %v11345_v3 = vadd.f32 %v9014_v18, %v315_v8  ;;  %9232 = vmatprep.mubr.msk.bf16.mxu1 %vm101_vm1, %v2843_v12  ;;  %v962_v23 = vpop.f32.mrf.mxu0  ;;  %v3239_v42 = vpack.c.bf16 %v3206_v26, %v3205_v41  ;;  %v3207_v6 = vld [vmem:[%s13345_s0 + $0x56] sm:$0xff]  ;;  %v2846_v41 = vpack.c.bf16 %v2824_v30, %v2823_v19  ;;  %v3213_v19 = vld [vmem:[%s13345_s0 + $0x86] sm:$0xff]  ;;  %v3214_v30 = vld [vmem:[%s13345_s0 + $0x8e] sm:$0xff] }
 0x111   :  { %v638_v21 = vpop.f32.mrf.mxu1  ;;  %v11372_v33 = vadd.f32 %v962_v23, %v11167_v58  ;;  %v3240_v26 = vpack.c.bf16 %v3208_v27, %v3207_v6 }
 0x112   :  { %v11369_v16 = vadd.f32 %v638_v21, %v307_v40  ;;  %v9033_v17 = vpop.f32.mrf.mxu0  ;;  %v3209_v40 = vld [vmem:[%s13345_s0 + $0x66] sm:$0xff] }
 0x113   :  { %v9015_v43 = vpop.f32.mrf.mxu1  ;;  %v11379_v29 = vadd.f32 %v9033_v17, %v11170_v63 }
 0x114   :  { %v11376_v12 = vadd.f32 %v9015_v43, %v318_v59  ;;  %v965_v48 = vpop.f32.mrf.mxu0 }
 0x115   :  { %v641_v24 = vpop.f32.mrf.mxu1  ;;  %v11384_v58 = vadd.f32 %v965_v48, %v11173_v14  ;;  %v3212_v48 = vld [vmem:[%s13345_s0 + $0x7e] sm:$0xff] }
 0x116   :  { %v11381_v1 = vadd.f32 %v641_v24, %v310_v47  ;;  %v9036_v18 = vpop.f32.mrf.mxu0  ;;  %9251 = vmatmul.mubr.msk.bf16.vlgmr.msra.gmra.mxu0 %vm101_vm1, %v3238_v53  ;;  %v3211_v24 = vld [vmem:[%s13345_s0 + $0x76] sm:$0xff] }
 0x117   :  { %v9018_v8 = vpop.f32.mrf.mxu1  ;;  %9233 = vmatmul.mubr.msk.bf16.gmra.mxu1 %vm101_vm1, %v2844_v13  ;;  %v11398_v14 = vadd.f32 %v9036_v18, %v11179_v56  ;;  %9254 = vmatprep.mubr.msk.bf16.mxu0 %vm101_vm1, %v3239_v42  ;;  %v2826_v56 = vld [vmem:[%s13345_s0 + $0x10d] sm:$0xff]  ;;  %v3241_v13 = vpack.c.bf16 %v3210_v9, %v3209_v40 }
 0x118   :  { %v11395_v63 = vadd.f32 %v9018_v8, %v11042_v34  ;;  %9236 = vmatprep.mubr.msk.bf16.mxu1 %vm101_vm1, %v2845_v0  ;;  %v2825_v34 = vld [vmem:[%s13345_s0 + $0x105] sm:$0xff]  ;;  %v978_v15 = vpop.f32.mrf.mxu0 }
 0x119   :  { %v654_v10 = vpop.f32.mrf.mxu1  ;;  %v11424_v20 = vadd.f32 %v978_v15, %v11197_v2  ;;  %v2847_v17 = vpack.c.bf16 %v2826_v56, %v2825_v34  ;;  %v3242_v56 = vpack.c.bf16 %v3212_v48, %v3211_v24 }
 0x11a   :  { %v11421_v4 = vadd.f32 %v654_v10, %v11061_v38  ;;  %v9037_v23 = vpop.f32.mrf.mxu0 }
 0x11b   :  { %v9019_v21 = vpop.f32.mrf.mxu1  ;;  %v11430_v43 = vadd.f32 %v9037_v23, %v11200_v37  ;;  %v2828_v37 = vld [vmem:[%s13345_s0 + $0x11d] sm:$0xff]  ;;  %v3243_v23 = vpack.c.bf16 %v3214_v30, %v3213_v19 }
 0x11c   :  { %v11427_v59 = vadd.f32 %v9019_v21, %v11066_v44  ;;  %v981_v0 = vpop.f32.mrf.mxu0  ;;  %v2827_v44 = vld [vmem:[%s13345_s0 + $0x115] sm:$0xff] }
 0x11d   :  { %v11432_v53 = vpop.f32.mrf.mxu1  ;;  %v11435_v38 = vadd.f32 %v981_v0, %v11203_v55  ;;  %v2848_v15 = vpack.c.bf16 %v2828_v37, %v2827_v44  ;;  %v3215_v0 = vld [vmem:[%s13345_s0 + $0x96] sm:$0xff]  ;;  %v3218_v44 = vld [vmem:[%s13345_s0 + $0xae] sm:$0xff] }
 0x11e   :  { %13355 = vst [vmem:[#allocation10_spill] sm:$0xff] %v11432_v53  ;;  %v9040_v2 = vpop.f32.mrf.mxu0  ;;  %9255 = vmatmul.mubr.msk.bf16.gmra.mxu0 %vm101_vm1, %v3240_v26 }
 0x11f   :  { %v9062_v47 = vpop.f32.mrf.mxu1  ;;  %9237 = vmatmul.mubr.msk.bf16.gmra.mxu1 %vm101_vm1, %v2846_v41  ;;  %v11446_v42 = vadd.f32 %v9040_v2, %v11209_v57  ;;  %9258 = vmatprep.mubr.msk.bf16.mxu0 %vm101_vm1, %v3241_v13  ;;  %v2829_v57 = vld [vmem:[%s13345_s0 + $0x125] sm:$0xff] }
 0x120   :  { %v11449_v55 = vadd.f32 %v9062_v47, %v11242_v7  ;;  %9240 = vmatprep.mubr.msk.bf16.mxu1 %vm101_vm1, %v2847_v17  ;;  %v994_v8 = vpop.f32.mrf.mxu0  ;;  %v2830_v7 = vld [vmem:[%s13345_s0 + $0x12d] sm:$0xff] }
 0x121   :  { %v1334_v18 = vpop.f32.mrf.mxu1  ;;  %v11472_v6 = vadd.f32 %v994_v8, %v11227_v54  ;;  %v2849_v21 = vpack.c.bf16 %v2830_v7, %v2829_v57 }
 0x122   :  { %v11475_v27 = vadd.f32 %v1334_v18, %v11263_v51  ;;  %v9041_v34 = vpop.f32.mrf.mxu0 }
 0x123   :  { %v9063_v10 = vpop.f32.mrf.mxu1  ;;  %v11478_v40 = vadd.f32 %v9041_v34, %v11230_v62  ;;  %v2831_v62 = vld [vmem:[%s13345_s0 + $0x135] sm:$0xff] }
 0x124   :  { %v11481_v9 = vadd.f32 %v9063_v10, %v11269_v52  ;;  %v997_v41 = vpop.f32.mrf.mxu0 }
 0x125   :  { %v11483_v26 = vpop.f32.mrf.mxu1  ;;  %v11486_v54 = vadd.f32 %v997_v41, %v11233_v25  ;;  %v2832_v25 = vld [vmem:[%s13345_s0 + $0x13d] sm:$0xff] }
 0x126   :  { %v9044_v51 = vpop.f32.mrf.mxu0  ;;  %9259 = vmatmul.mubr.msk.bf16.gmra.mxu0 %vm101_vm1, %v3242_v56  ;;  %v2850_v8 = vpack.c.bf16 %v2832_v25, %v2831_v62 }
 0x127   :  { %13356 = vst [vmem:[#allocation11_spill] sm:$0xff] %v11486_v54  ;;  %v9066_v17 = vpop.f32.mrf.mxu1  ;;  %9241 = vmatmul.mubr.msk.bf16.gmra.mxu1 %vm101_vm1, %v2848_v15  ;;  %v11494_v52 = vadd.f32 %v9044_v51, %v11239_v35  ;;  %9262 = vmatprep.mubr.msk.bf16.mxu0 %vm101_vm1, %v3243_v23  ;;  %v3216_v35 = vld [vmem:[%s13345_s0 + $0x9e] sm:$0xff] }
 0x128   :  { %v11497_v13 = vadd.f32 %v9066_v17, %v11293_v5  ;;  %9244 = vmatprep.mubr.msk.bf16.mxu1 %vm101_vm1, %v2849_v21  ;;  %v1010_v2 = vpop.f32.mrf.mxu0  ;;  %v3217_v5 = vld [vmem:[%s13345_s0 + $0xa6] sm:$0xff]  ;;  %v3244_v18 = vpack.c.bf16 %v3216_v35, %v3215_v0 }
 0x129   :  { %v1350_v47 = vpop.f32.mrf.mxu1  ;;  %v11517_v37 = vadd.f32 %v1010_v2, %v11260_v50  ;;  %v3245_v30 = vpack.c.bf16 %v3218_v44, %v3217_v5 }
 0x12a   :  { %v11520_v24 = vadd.f32 %v1350_v47, %v11317_v31  ;;  %v9045_v48 = vpop.f32.mrf.mxu0 }
 0x12b   :  { %v9067_v57 = vpop.f32.mrf.mxu1  ;;  %v11523_v7 = vadd.f32 %v9045_v48, %v11266_v60 }
 0x12c   :  { %v11526_v19 = vadd.f32 %v9067_v57, %v11323_v46  ;;  %v1013_v34 = vpop.f32.mrf.mxu0  ;;  %v3219_v46 = vld [vmem:[%s13345_s0 + $0xb6] sm:$0xff] }
 0x12d   :  { %v11528_v10 = vpop.f32.mrf.mxu1  ;;  %v11531_v50 = vadd.f32 %v1013_v34, %v11272_v11  ;;  %v3220_v11 = vld [vmem:[%s13345_s0 + $0xbe] sm:$0xff] }
 0x12e   :  { %v9048_v15 = vpop.f32.mrf.mxu0  ;;  %9263 = vmatmul.mubr.msk.bf16.gmra.mxu0 %vm101_vm1, %v3244_v18  ;;  %v3246_v25 = vpack.c.bf16 %v3220_v11, %v3219_v46 }
 0x12f   :  { %13357 = vst [vmem:[#allocation12_spill] sm:$0xff] %v11531_v50  ;;  %v9070_v31 = vpop.f32.mrf.mxu1  ;;  %9245 = vmatmul.mubr.msk.bf16.gmra.mxu1 %vm101_vm1, %v2850_v8  ;;  %v11536_v56 = vadd.f32 %v9048_v15, %v11290_v22  ;;  %9266 = vmatprep.mubr.msk.bf16.mxu0 %vm101_vm1, %v3245_v30  ;;  %v3221_v22 = vld [vmem:[%s13345_s0 + $0xc6] sm:$0xff] }
 0x130   :  { %v11539_v60 = vadd.f32 %v9070_v31, %v11348_v39  ;;  %v1026_v21 = vpop.f32.mrf.mxu0  ;;  %v3222_v39 = vld [vmem:[%s13345_s0 + $0xce] sm:$0xff] }
 0x131   :  { %v1366_v23 = vpop.f32.mrf.mxu1  ;;  %v11555_v41 = vadd.f32 %v1026_v21, %v11314_v45  ;;  %v3247_v2 = vpack.c.bf16 %v3222_v39, %v3221_v22 }
 0x132   :  { %v11558_v51 = vadd.f32 %v1366_v23, %v11372_v33  ;;  %v9049_v17 = vpop.f32.mrf.mxu0 }
 0x133   :  { %v9071_v62 = vpop.f32.mrf.mxu1  ;;  %v11561_v0 = vadd.f32 %v9049_v17, %v11320_v36 }
 0x134   :  { %v11564_v35 = vadd.f32 %v9071_v62, %v11379_v29  ;;  %v1029_v47 = vpop.f32.mrf.mxu0  ;;  %v3223_v29 = vld [vmem:[%s13345_s0 + $0xd6] sm:$0xff] }
 0x135   :  { %v11566_v5 = vpop.f32.mrf.mxu1  ;;  %v11569_v44 = vadd.f32 %v1029_v47, %v11327_v28  ;;  %v3224_v28 = vld [vmem:[%s13345_s0 + $0xde] sm:$0xff] }
 0x136   :  { %v9052_v45 = vpop.f32.mrf.mxu0  ;;  %9267 = vmatmul.mubr.msk.bf16.gmra.mxu0 %vm101_vm1, %v3246_v25  ;;  %v3248_v31 = vpack.c.bf16 %v3224_v28, %v3223_v29 }
 0x137   :  { %13358 = vst [vmem:[#allocation13_spill] sm:$0xff] %v11569_v44  ;;  %v9074_v48 = vpop.f32.mrf.mxu1  ;;  %v11573_v33 = vadd.f32 %v9052_v45, %v11345_v3  ;;  %9270 = vmatprep.mubr.msk.bf16.mxu0 %vm101_vm1, %v3247_v2  ;;  %v3225_v3 = vld [vmem:[%s13345_s0 + $0xe6] sm:$0xff] }
 0x138   :  { %v11576_v36 = vadd.f32 %v9074_v48, %v11398_v14  ;;  %v1042_v57 = vpop.f32.mrf.mxu0  ;;  %v3226_v14 = vld [vmem:[%s13345_s0 + $0xee] sm:$0xff] }
 0x139   :  { %v1382_v8 = vpop.f32.mrf.mxu1  ;;  %v11592_v18 = vadd.f32 %v1042_v57, %v11369_v16  ;;  %v3249_v21 = vpack.c.bf16 %v3226_v14, %v3225_v3 }
 0x13a   :  { %v11595_v30 = vadd.f32 %v1382_v8, %v11424_v20  ;;  %v9053_v34 = vpop.f32.mrf.mxu0 }
 0x13b   :  { %v9075_v15 = vpop.f32.mrf.mxu1  ;;  %v11598_v46 = vadd.f32 %v9053_v34, %v11376_v12 }
 0x13c   :  { %v11601_v11 = vadd.f32 %v9075_v15, %v11430_v43  ;;  %v1045_v23 = vpop.f32.mrf.mxu0  ;;  %v3227_v43 = vld [vmem:[%s13345_s0 + $0xf6] sm:$0xff] }
 0x13d   :  { %v11603_v22 = vpop.f32.mrf.mxu1  ;;  %v11606_v39 = vadd.f32 %v1045_v23, %v11381_v1  ;;  %v3228_v1 = vld [vmem:[%s13345_s0 + $0xfe] sm:$0xff] }
 0x13e   :  { %v9056_v16 = vpop.f32.mrf.mxu0  ;;  %9271 = vmatmul.mubr.msk.bf16.gmra.mxu0 %vm101_vm1, %v3248_v31  ;;  %v3250_v29 = vpack.c.bf16 %v3228_v1, %v3227_v43 }
 0x13f   :  { %13359 = vst [vmem:[#allocation14_spill] sm:$0xff] %v11606_v39  ;;  %v9078_v17 = vpop.f32.mrf.mxu1  ;;  %v11610_v20 = vadd.f32 %v9056_v16, %v11395_v63  ;;  %9274 = vmatprep.mubr.msk.bf16.mxu0 %vm101_vm1, %v3249_v21  ;;  %v3229_v63 = vld [vmem:[%s13345_s0 + $0x106] sm:$0xff] }
 0x140   :  { %v11613_v12 = vadd.f32 %v9078_v17, %v11446_v42  ;;  %v1058_v62 = vpop.f32.mrf.mxu0  ;;  %v3230_v42 = vld [vmem:[%s13345_s0 + $0x10e] sm:$0xff] }
 0x141   :  { %v1398_v25 = vpop.f32.mrf.mxu1  ;;  %v11629_v2 = vadd.f32 %v1058_v62, %v11421_v4  ;;  %v3251_v8 = vpack.c.bf16 %v3230_v42, %v3229_v63 }
 0x142   :  { %v11632_v47 = vadd.f32 %v1398_v25, %v11472_v6  ;;  %v9057_v45 = vpop.f32.mrf.mxu0 }
 0x143   :  { %v9079_v48 = vpop.f32.mrf.mxu1  ;;  %v11635_v28 = vadd.f32 %v9057_v45, %v11427_v59  ;;  %v3231_v59 = vld [vmem:[%s13345_s0 + $0x116] sm:$0xff] }
 0x144   :  { %v11638_v57 = vadd.f32 %v9079_v48, %v11478_v40  ;;  %v11640_v3 = vpop.f32.mrf.mxu0  ;;  %v3232_v40 = vld [vmem:[%s13345_s0 + $0x11e] sm:$0xff]  ;;  %v10252_v48 = vmov 0.0  }
 0x145   :  { %13360 = vst [vmem:[#allocation15_spill] sm:$0xff] %v11640_v3  ;;  %v11642_v14 = vpop.f32.mrf.mxu1  ;;  %v3252_v1 = vpack.c.bf16 %v3232_v40, %v3231_v59  ;;  %9286 = vmatprep.subr.bf16.mxu1 %v10252_v48  ;;  %3641 = vst [vmem:[#allocation2] sm:$0xff] %v10252_v48  ;;  %9358 = vmatprep.subr.bf16.mxu0 %v10252_v48 }
 0x146   :  { %13361 = vst [vmem:[#allocation16_spill] sm:$0xff] %v11642_v14  ;;  %v9100_v4 = vpop.f32.mrf.mxu0  ;;  %9275 = vmatmul.mubr.msk.bf16.gmra.mxu0 %vm101_vm1, %v3250_v29  ;;  %3642 = vst [vmem:[#allocation2 + $0x8] sm:$0x3] %v10252_v48  ;;  %9302 = vmatprep.mubr.msk.bf16.mxu1 %vm10253_vm2, %v10252_v48 }
 0x147   :  { %v9082_v34 = vpop.f32.mrf.mxu1  ;;  %v11649_v15 = vadd.f32 %v9100_v4, %v11449_v55  ;;  %9278 = vmatprep.mubr.msk.bf16.mxu0 %vm101_vm1, %v3251_v8  ;;  %v3234_v55 = vld [vmem:[%s13345_s0 + $0x12e] sm:$0xff]  ;;  %3643 = vst [vmem:[#allocation2 + $0x5a] sm:$0xff] %v10252_v48  ;;  %3644 = vst [vmem:[#allocation2 + $0x62] sm:$0x3] %v10252_v48 }
 0x148   :  { %v11646_v6 = vadd.f32 %v9082_v34, %v11494_v52  ;;  %v1738_v21 = vpop.f32.mrf.mxu0  ;;  %v3233_v52 = vld [vmem:[%s13345_s0 + $0x126] sm:$0xff]  ;;  %5432 = vst [vmem:[#allocation3] sm:$0x3f] %v10252_v48  ;;  %5433 = vst [vmem:[#allocation3 + $0x1e] sm:$0x3f] %v10252_v48 }
 0x149   :  { %v1414_v31 = vpop.f32.mrf.mxu1  ;;  %v11668_v16 = vadd.f32 %v1738_v21, %v11475_v27  ;;  %v3253_v63 = vpack.c.bf16 %v3234_v55, %v3233_v52  ;;  %6648 = vst [vmem:[#allocation4] sm:$0xf] %v10252_v48  ;;  %6649 = vst [vmem:[#allocation4 + $0xc] sm:$0xf] %v10252_v48  ;;  %v9993_v27 = vld [vmem:[%s13347_s2 + $0x38] sm:$0xff]  }
 0x14a   :  { %v11665_v23 = vadd.f32 %v1414_v31, %v11517_v37  ;;  %v9101_v43 = vpop.f32.mrf.mxu0  ;;  %v3236_v37 = vld [vmem:[%s13345_s0 + $0x13e] sm:$0xff]  ;;  %9287 = vmatpush3.bf16.msra.mxu1 %v9993_v27 }
 0x14b   :  { %v9083_v17 = vpop.f32.mrf.mxu1  ;;  %v11674_v25 = vadd.f32 %v9101_v43, %v11481_v9  ;;  %v3235_v9 = vld [vmem:[%s13345_s0 + $0x136] sm:$0xff]  ;;  %9288 = vmatprep.subr.bf16.mxu1 %v10252_v48 }
 0x14c   :  { %v11671_v62 = vadd.f32 %v9083_v17, %v11523_v7  ;;  %v11678_v45 = vpop.f32.mrf.mxu0  ;;  %v3254_v55 = vpack.c.bf16 %v3236_v37, %v3235_v9 }
 0x14d   :  { %v11676_v42 = vpop.f32.mrf.mxu1 }
 0x14e   :  { %13362 = vst [vmem:[#allocation17_spill] sm:$0xff] %v11676_v42  ;;  %v9104_v29 = vpop.f32.mrf.mxu0  ;;  %9279 = vmatmul.mubr.msk.bf16.gmra.mxu0 %vm101_vm1, %v3252_v1 }
 0x14f   :  { %v9086_v7 = vpop.f32.mrf.mxu1  ;;  %v11704_v34 = vadd.f32 %v9104_v29, %v11497_v13  ;;  %9282 = vmatprep.mubr.msk.bf16.mxu0 %vm101_vm1, %v3253_v63 }
 0x150   :  { %v11701_v8 = vadd.f32 %v9086_v7, %v11536_v56  ;;  %v1754_v59 = vpop.f32.mrf.mxu0 }
 0x151   :  { %v1430_v4 = vpop.f32.mrf.mxu1  ;;  %v11712_v31 = vadd.f32 %v1754_v59, %v11520_v24  ;;  %v9996_v24 = vld [vmem:[%s13347_s2 + $0xb8] sm:$0xff]  }
 0x152   :  { %v11709_v40 = vadd.f32 %v1430_v4, %v11555_v41  ;;  %v9105_v52 = vpop.f32.mrf.mxu0  ;;  %v9994_v41 = vld [vmem:[%s13347_s2 + $0x30] sm:$0xff]   ;;  %9359 = vmatpush3.bf16.msra.mxu0 %v9996_v24 }
 0x153   :  { %v9087_v21 = vpop.f32.mrf.mxu1  ;;  %v11718_v13 = vadd.f32 %v9105_v52, %v11526_v19  ;;  %9289 = vmatpush3.bf16.msra.mxu1 %v9994_v41  ;;  %9360 = vmatprep.subr.bf16.mxu0 %v10252_v48 }
 0x154   :  { %v11715_v56 = vadd.f32 %v9087_v21, %v11561_v0  ;;  %v11722_v43 = vpop.f32.mrf.mxu0  ;;  %9290 = vmatprep.subr.bf16.mxu1 %v10252_v48 }
 0x155   :  { %v11720_v17 = vpop.f32.mrf.mxu1 }
 0x156   :  { %13363 = vst [vmem:[#allocation18_spill] sm:$0xff] %v11720_v17  ;;  %v9108_v63 = vpop.f32.mrf.mxu0  ;;  %9283 = vmatmul.mubr.msk.bf16.gmra.mxu0 %vm101_vm1, %v3254_v55 }
 0x157   :  { %v9090_v1 = vpop.f32.mrf.mxu1  ;;  %v11735_v19 = vadd.f32 %v9108_v63, %v11539_v60  ;;  %9374 = vmatprep.mubr.msk.bf16.mxu0 %vm10253_vm2, %v10252_v48 }
 0x158   :  { %v11732_v0 = vadd.f32 %v9090_v1, %v11573_v33  ;;  %v1770_v9 = vpop.f32.mrf.mxu0  ;;  %v9997_v33 = vld [vmem:[%s13347_s2 + $0xb0] sm:$0xff]  }
 0x159   :  { %v1446_v27 = vpop.f32.mrf.mxu1  ;;  %v11743_v7 = vadd.f32 %v1770_v9, %v11558_v51  ;;  %9361 = vmatpush3.bf16.msra.mxu0 %v9997_v33  ;;  %v9999_v51 = vld [vmem:[%s13347_s2 + $0xa8] sm:$0xff]  }
 0x15a   :  { %v11740_v37 = vadd.f32 %v1446_v27, %v11592_v18  ;;  %v9109_v29 = vpop.f32.mrf.mxu0  ;;  %9362 = vmatprep.subr.bf16.mxu0 %v10252_v48  ;;  %v10000_v27 = vld [vmem:[%s13347_s2 + $0xa0] sm:$0xff]  }
 0x15b   :  { %v9091_v60 = vpop.f32.mrf.mxu1  ;;  %v11752_v59 = vadd.f32 %v9109_v29, %v11564_v35  ;;  %v10002_v29 = vld [vmem:[%s13347_s2 + $0x98] sm:$0xff]  }
 0x15c   :  { %v11749_v4 = vadd.f32 %v9091_v60, %v11598_v46  ;;  %v11756_v18 = vpop.f32.mrf.mxu0 }
 0x15d   :  { %v11754_v21 = vpop.f32.mrf.mxu1  ;;  %9363 = vmatpush3.bf16.msra.mxu0 %v9999_v51 }
 0x15e   :  { %13364 = vst [vmem:[#allocation19_spill] sm:$0xff] %v11754_v21  ;;  %v9112_v55 = vpop.f32.mrf.mxu0  ;;  %9364 = vmatprep.subr.bf16.mxu0 %v10252_v48 }
 0x15f   :  { %v9094_v52 = vpop.f32.mrf.mxu1  ;;  %v11766_v46 = vadd.f32 %v9112_v55, %v11576_v36 }
 0x160   :  { %v11763_v41 = vadd.f32 %v9094_v52, %v11610_v20  ;;  %v1786_v24 = vpop.f32.mrf.mxu0 }
 0x161   :  { %v1462_v35 = vpop.f32.mrf.mxu1  ;;  %v11773_v63 = vadd.f32 %v1786_v24, %v11595_v30  ;;  %9365 = vmatpush3.bf16.msra.mxu0 %v10000_v27  ;;  %v9995_v30 = vld [vmem:[%s13347_s2 + $0x28] sm:$0xff]  }
 0x162   :  { %v11770_v1 = vadd.f32 %v1462_v35, %v11629_v2  ;;  %v9113_v9 = vpop.f32.mrf.mxu0  ;;  %9366 = vmatprep.subr.bf16.mxu0 %v10252_v48  ;;  %9291 = vmatpush3.bf16.msra.mxu1 %v9995_v30 }
 0x163   :  { %v9095_v20 = vpop.f32.mrf.mxu1  ;;  %v11782_v33 = vadd.f32 %v9113_v9, %v11601_v11  ;;  %9292 = vmatprep.subr.bf16.mxu1 %v10252_v48  ;;  %v10004_v9 = vld [vmem:[%s13347_s2 + $0x90] sm:$0xff]  }
 0x164   :  { %v11779_v36 = vadd.f32 %v9095_v20, %v11635_v28  ;;  %v11786_v2 = vpop.f32.mrf.mxu0 }
 0x165   :  { %v11784_v60 = vpop.f32.mrf.mxu1  ;;  %9367 = vmatpush3.bf16.msra.mxu0 %v10002_v29 }
 0x166   :  { %13365 = vst [vmem:[#allocation20_spill] sm:$0xff] %v11784_v60  ;;  %v9116_v28 = vpop.f32.mrf.mxu0  ;;  %9368 = vmatprep.subr.bf16.mxu0 %v10252_v48 }
 0x167   :  { %v9138_v51 = vpop.f32.mrf.mxu1  ;;  %v11796_v11 = vadd.f32 %v9116_v28, %v11613_v12  ;;  %v9998_v12 = vld [vmem:[%s13347_s2 + $0x20] sm:$0xff]   ;;  %v10001_v28 = vld [vmem:[%s13347_s2 + $0x18] sm:$0xff]  }
 0x168   :  { %v11799_v52 = vadd.f32 %v9138_v51, %v11649_v15  ;;  %v1802_v55 = vpop.f32.mrf.mxu0  ;;  %9293 = vmatpush3.bf16.msra.mxu1 %v9998_v12 }
 0x169   :  { %v2142_v35 = vpop.f32.mrf.mxu1  ;;  %v11804_v24 = vadd.f32 %v1802_v55, %v11632_v47  ;;  %9294 = vmatprep.subr.bf16.mxu1 %v10252_v48  ;;  %9369 = vmatpush3.bf16.msra.mxu0 %v10004_v9 }
 0x16a   :  { %v11807_v27 = vadd.f32 %v2142_v35, %v11668_v16  ;;  %v9117_v15 = vpop.f32.mrf.mxu0  ;;  %9370 = vmatprep.subr.bf16.mxu0 %v10252_v48 }
 0x16b   :  { %v9139_v20 = vpop.f32.mrf.mxu1  ;;  %v11816_v30 = vadd.f32 %v9117_v15, %v11638_v57 }
 0x16c   :  { %v11819_v29 = vadd.f32 %v9139_v20, %v11674_v25  ;;  %v11821_v47 = vpop.f32.mrf.mxu0  ;;  %v10006_v25 = vld [vmem:[%s13347_s2 + $0x88] sm:$0xff]   ;;  %9295 = vmatpush3.bf16.msra.mxu1 %v10001_v28  ;;  %v10008_v28 = vld [vmem:[%s13347_s2 + $0x80] sm:$0xff]  }
 0x16d   :  { %13366 = vst [vmem:[#allocation21_spill] sm:$0xff] %v11821_v47  ;;  %v11823_v16 = vpop.f32.mrf.mxu1  ;;  %9296 = vmatprep.subr.bf16.mxu1 %v10252_v48  ;;  %9371 = vmatpush3.bf16.msra.mxu0 %v10006_v25 }
 0x16e   :  { %v9120_v51 = vpop.f32.mrf.mxu0  ;;  %9372 = vmatprep.subr.bf16.mxu0 %v10252_v48 }
 0x16f   :  { %v9142_v57 = vpop.f32.mrf.mxu1  ;;  %v11834_v55 = vadd.f32 %v9120_v51, %v11646_v6 }
 0x170   :  { %v11837_v35 = vadd.f32 %v9142_v57, %v11704_v34  ;;  %v1818_v12 = vpop.f32.mrf.mxu0  ;;  %v10003_v34 = vld [vmem:[%s13347_s2 + $0x10] sm:$0xff]  }
 0x171   :  { %v2158_v15 = vpop.f32.mrf.mxu1  ;;  %v11841_v20 = vadd.f32 %v1818_v12, %v11665_v23  ;;  %9297 = vmatpush3.bf16.msra.mxu1 %v10003_v34  ;;  %9373 = vmatpush3.bf16.msra.mxu0 %v10008_v28 }
 0x172   :  { %v11844_v9 = vadd.f32 %v2158_v15, %v11712_v31  ;;  %v9121_v60 = vpop.f32.mrf.mxu0  ;;  %9298 = vmatprep.subr.bf16.mxu1 %v10252_v48  ;;  %9430 = vmatprep.subr.bf16.mxu0 %v10252_v48 }
 0x173   :  { %v9143_v6 = vpop.f32.mrf.mxu1  ;;  %v11854_v51 = vadd.f32 %v9121_v60, %v11671_v62  ;;  %v10005_v62 = vld [vmem:[%s13347_s2 + $0x8] sm:$0xff]  }
 0x174   :  { %v11857_v23 = vadd.f32 %v9143_v6, %v11718_v13  ;;  %v11859_v31 = vpop.f32.mrf.mxu0 }
 0x175   :  { %13367 = vst [vmem:[#allocation22_spill] sm:$0xff] %v11859_v31  ;;  %v11861_v57 = vpop.f32.mrf.mxu1  ;;  %9299 = vmatpush3.bf16.msra.mxu1 %v10005_v62 }
 0x176   :  { %v9124_v25 = vpop.f32.mrf.mxu0  ;;  %9300 = vmatprep.subr.bf16.mxu1 %v10252_v48 }
 0x177   :  { %v9146_v12 = vpop.f32.mrf.mxu1  ;;  %v1943_v13 = vadd.f32 %v9124_v25, %v11701_v8 }
 0x178   :  { %v11874_v60 = vadd.f32 %v9146_v12, %v11735_v19  ;;  %v1834_v15 = vpop.f32.mrf.mxu0 }
 0x179   :  { %v2174_v6 = vpop.f32.mrf.mxu1  ;;  %v1941_v34 = vadd.f32 %v1834_v15, %v11709_v40  ;;  %9301 = vmatpush3.bf16.msra.mxu1 %v10007_v49 }
 0x17a   :  { %v11878_v28 = vadd.f32 %v2174_v6, %v11743_v7  ;;  %v9125_v3 = vpop.f32.mrf.mxu0  ;;  %9322 = vmatprep.subr.bf16.mxu1 %v10252_v48 }
 0x17b   :  { %v9147_v53 = vpop.f32.mrf.mxu1  ;;  %v1944_v8 = vadd.f32 %v9125_v3, %v11715_v56 }
 0x17c   :  { %v11886_v19 = vadd.f32 %v9147_v53, %v11752_v59  ;;  %v11888_v25 = vpop.f32.mrf.mxu0 }
 0x17d   :  { %13368 = vst [vmem:[#allocation23_spill] sm:$0xff] %v11888_v25  ;;  %v11890_v12 = vpop.f32.mrf.mxu1 }
 0x17e   :  { %v9128_v40 = vpop.f32.mrf.mxu0 }
 0x17f   :  { %v9150_v7 = vpop.f32.mrf.mxu1  ;;  %v1947_v62 = vadd.f32 %v9128_v40, %v11732_v0 }
 0x180   :  { %v11895_v15 = vadd.f32 %v9150_v7, %v11766_v46  ;;  %v1850_v6 = vpop.f32.mrf.mxu0 }
 0x181   :  { %v2190_v21 = vpop.f32.mrf.mxu1  ;;  %v1945_v3 = vadd.f32 %v1850_v6, %v11740_v37 }
 0x182   :  { %v11899_v53 = vadd.f32 %v2190_v21, %v11773_v63  ;;  %v9129_v56 = vpop.f32.mrf.mxu0 }
 0x183   :  { %v9151_v59 = vpop.f32.mrf.mxu1  ;;  %v1948_v49 = vadd.f32 %v9129_v56, %v11749_v4 }
 0x184   :  { %v11903_v48 = vadd.f32 %v9151_v59, %v11782_v33  ;;  %v11905_v39 = vpop.f32.mrf.mxu0 }
 0x185   :  { %13369 = vst [vmem:[#allocation24_spill] sm:$0xff] %v11905_v39  ;;  %v11907_v0 = vpop.f32.mrf.mxu1 }
 0x186   :  { %v9132_v46 = vpop.f32.mrf.mxu0 }
 0x187   :  { %v9154_v40 = vpop.f32.mrf.mxu1  ;;  %v1951_v7 = vadd.f32 %v9132_v46, %v11763_v41 }
 0x188   :  { %v11911_v37 = vadd.f32 %v9154_v40, %v11796_v11  ;;  %v1866_v21 = vpop.f32.mrf.mxu0 }
 0x189   :  { %v2206_v63 = vpop.f32.mrf.mxu1  ;;  %v1949_v6 = vadd.f32 %v1866_v21, %v11770_v1 }
 0x18a   :  { %v11915_v4 = vadd.f32 %v2206_v63, %v11804_v24  ;;  %v9133_v33 = vpop.f32.mrf.mxu0 }
 0x18b   :  { %v9155_v56 = vpop.f32.mrf.mxu1  ;;  %v1952_v59 = vadd.f32 %v9133_v33, %v11779_v36 }
 0x18c   :  { %v11919_v39 = vadd.f32 %v9155_v56, %v11816_v30  ;;  %v11921_v25 = vpop.f32.mrf.mxu0 }
 0x18d   :  { %13370 = vst [vmem:[#allocation25_spill] sm:$0xff] %v11921_v25  ;;  %v11923_v41 = vpop.f32.mrf.mxu1 }
 0x18e   :  { %13371 = vst [vmem:[#allocation26_spill] sm:$0xff] %v11923_v41  ;;  %v9176_v46 = vpop.f32.mrf.mxu0 }
 0x18f   :  { %v9158_v11 = vpop.f32.mrf.mxu1  ;;  %v11929_v1 = vadd.f32 %v9176_v46, %v11799_v52 }
 0x190   :  { %v11926_v40 = vadd.f32 %v9158_v11, %v11834_v55  ;;  %v2546_v21 = vpop.f32.mrf.mxu0 }
 0x191   :  { %v2222_v24 = vpop.f32.mrf.mxu1  ;;  %v11935_v36 = vadd.f32 %v2546_v21, %v11807_v27 }
 0x192   :  { %v11932_v63 = vadd.f32 %v2222_v24, %v11841_v20  ;;  %v9177_v33 = vpop.f32.mrf.mxu0 }
 0x193   :  { %v9159_v30 = vpop.f32.mrf.mxu1  ;;  %v11941_v25 = vadd.f32 %v9177_v33, %v11819_v29 }
 0x194   :  { %v11938_v56 = vadd.f32 %v9159_v30, %v11854_v51  ;;  %v11945_v52 = vpop.f32.mrf.mxu0 }
 0x195   :  { %v11943_v55 = vpop.f32.mrf.mxu1 }
 0x196   :  { %13372 = vst [vmem:[#allocation27_spill] sm:$0xff] %v11943_v55  ;;  %v9180_v46 = vpop.f32.mrf.mxu0 }
 0x197   :  { %v9162_v11 = vpop.f32.mrf.mxu1  ;;  %v11950_v20 = vadd.f32 %v9180_v46, %v11837_v35 }
 0x198   :  { %v11947_v17 = vadd.f32 %v9162_v11, %v1943_v13  ;;  %v2562_v24 = vpop.f32.mrf.mxu0 }
 0x199   :  { %v2238_v27 = vpop.f32.mrf.mxu1  ;;  %v11955_v51 = vadd.f32 %v2562_v24, %v11844_v9 }
 0x19a   :  { %v11952_v21 = vadd.f32 %v2238_v27, %v1941_v34  ;;  %v9181_v30 = vpop.f32.mrf.mxu0 }
 0x19b   :  { %v9163_v29 = vpop.f32.mrf.mxu1  ;;  %v11958_v44 = vadd.f32 %v9181_v30, %v11857_v23 }
 0x19c   :  { %v2348_v33 = vadd.f32 %v9163_v29, %v1944_v8  ;;  %v11962_v13 = vpop.f32.mrf.mxu0 }
 0x19d   :  { %v11960_v55 = vpop.f32.mrf.mxu1 }
 0x19e   :  { %13373 = vst [vmem:[#allocation28_spill] sm:$0xff] %v11960_v55  ;;  %v9184_v35 = vpop.f32.mrf.mxu0 }
 0x19f   :  { %v9166_v11 = vpop.f32.mrf.mxu1  ;;  %v11965_v31 = vadd.f32 %v9184_v35, %v11874_v60 }
 0x1a0   :  { %v2351_v46 = vadd.f32 %v9166_v11, %v1947_v62  ;;  %v2578_v27 = vpop.f32.mrf.mxu0 }
 0x1a1   :  { %v2254_v34 = vpop.f32.mrf.mxu1  ;;  %v11968_v24 = vadd.f32 %v2578_v27, %v11878_v28 }
 0x1a2   :  { %v2349_v9 = vadd.f32 %v2254_v34, %v1945_v3  ;;  %v9185_v29 = vpop.f32.mrf.mxu0 }
 0x1a3   :  { %v9167_v8 = vpop.f32.mrf.mxu1  ;;  %v11971_v30 = vadd.f32 %v9185_v29, %v11886_v19 }
 0x1a4   :  { %v2352_v23 = vadd.f32 %v9167_v8, %v1948_v49  ;;  %v11975_v42 = vpop.f32.mrf.mxu0 }
 0x1a5   :  { %v11973_v55 = vpop.f32.mrf.mxu1 }
 0x1a6   :  { %13374 = vst [vmem:[#allocation29_spill] sm:$0xff] %v11973_v55  ;;  %v9188_v11 = vpop.f32.mrf.mxu0 }
 0x1a7   :  { %v9170_v62 = vpop.f32.mrf.mxu1  ;;  %v11978_v35 = vadd.f32 %v9188_v11, %v11895_v15 }
 0x1a8   :  { %v2355_v60 = vadd.f32 %v9170_v62, %v1951_v7  ;;  %v2594_v34 = vpop.f32.mrf.mxu0 }
 0x1a9   :  { %v2270_v3 = vpop.f32.mrf.mxu1  ;;  %v11981_v27 = vadd.f32 %v2594_v34, %v11899_v53 }
 0x1aa   :  { %v2353_v28 = vadd.f32 %v2270_v3, %v1949_v6  ;;  %v9189_v8 = vpop.f32.mrf.mxu0 }
 0x1ab   :  { %v9171_v49 = vpop.f32.mrf.mxu1  ;;  %v11984_v29 = vadd.f32 %v9189_v8, %v11903_v48 }
 0x1ac   :  { %v2356_v19 = vadd.f32 %v9171_v49, %v1952_v59  ;;  %v11988_v50 = vpop.f32.mrf.mxu0 }
 0x1ad   :  { %v11986_v55 = vpop.f32.mrf.mxu1 }
 0x1ae   :  { %13375 = vst [vmem:[#allocation30_spill] sm:$0xff] %v11986_v55  ;;  %v9192_v7 = vpop.f32.mrf.mxu0 }
 0x1af   :  { %v9214_v62 = vpop.f32.mrf.mxu1  ;;  %v11991_v15 = vadd.f32 %v9192_v7, %v11911_v37 }
 0x1b0   :  { %v2610_v11 = vpop.f32.mrf.mxu0 }
 0x1b1   :  { %13376 = vst [vmem:[#allocation31_spill] sm:$0xff] %v11991_v15  ;;  %v2950_v6 = vpop.f32.mrf.mxu1  ;;  %v11994_v53 = vadd.f32 %v2610_v11, %v11915_v4 }
 0x1b2   :  { %v9193_v3 = vpop.f32.mrf.mxu0 }
 0x1b3   :  { %13377 = vst [vmem:[#allocation32_spill] sm:$0xff] %v11994_v53  ;;  %v9215_v34 = vpop.f32.mrf.mxu1  ;;  %v11997_v59 = vadd.f32 %v9193_v3, %v11919_v39 }
 0x1b4   :  { %v11999_v48 = vpop.f32.mrf.mxu0 }
 0x1b5   :  { %13378 = vst [vmem:[#allocation33_spill] sm:$0xff] %v11997_v59  ;;  %13379 = vst [vmem:[#allocation34_spill] sm:$0xff] %v11999_v48  ;;  %v2953_v49 = vpop.f32.mrf.mxu1 }
 0x1b6   :  { %v9196_v8 = vpop.f32.mrf.mxu0 }
 0x1b7   :  { %v12001_v55 = vpop.f32.mrf.mxu1  ;;  %v12004_v41 = vadd.f32 %v9196_v8, %v11926_v40 }
 0x1b8   :  { %v2626_v37 = vpop.f32.mrf.mxu0 }
 0x1b9   :  { %13380 = vst [vmem:[#allocation35_spill] sm:$0xff] %v12004_v41  ;;  %v12006_v7 = vpop.f32.mrf.mxu1  ;;  %v12009_v4 = vadd.f32 %v2626_v37, %v11932_v63 }
 0x1ba   :  { %v9197_v11 = vpop.f32.mrf.mxu0 }
 0x1bb   :  { %13381 = vst [vmem:[#allocation36_spill] sm:$0xff] %v12009_v4  ;;  %v12011_v53 = vpop.f32.mrf.mxu1  ;;  %v12014_v39 = vadd.f32 %v9197_v11, %v11938_v56 }
 0x1bc   :  { %v12016_v3 = vpop.f32.mrf.mxu0 }
 0x1bd   :  { %13382 = vst [vmem:[#allocation37_spill] sm:$0xff] %v12014_v39  ;;  %13383 = vst [vmem:[#allocation38_spill] sm:$0xff] %v12016_v3  ;;  %v12018_v59 = vpop.f32.mrf.mxu1 }
 0x1be   :  { %v9200_v48 = vpop.f32.mrf.mxu0 }
 0x1bf   :  { %v12020_v15 = vpop.f32.mrf.mxu1  ;;  %v12023_v40 = vadd.f32 %v9200_v48, %v11947_v17 }
 0x1c0   :  { %v2642_v8 = vpop.f32.mrf.mxu0 }
 0x1c1   :  { %13384 = vst [vmem:[#allocation39_spill] sm:$0xff] %v12023_v40  ;;  %v12025_v41 = vpop.f32.mrf.mxu1  ;;  %v12028_v63 = vadd.f32 %v2642_v8, %v11952_v21 }
 0x1c2   :  { %v9201_v37 = vpop.f32.mrf.mxu0 }
 0x1c3   :  { %13385 = vst [vmem:[#allocation40_spill] sm:$0xff] %v12028_v63  ;;  %v12030_v4 = vpop.f32.mrf.mxu1  ;;  %v12032_v56 = vadd.f32 %v9201_v37, %v2348_v33 }
 0x1c4   :  { %v12034_v11 = vpop.f32.mrf.mxu0 }
 0x1c5   :  { %13386 = vst [vmem:[#allocation41_spill] sm:$0xff] %v12032_v56  ;;  %13387 = vst [vmem:[#allocation42_spill] sm:$0xff] %v12034_v11  ;;  %v12036_v39 = vpop.f32.mrf.mxu1 }
 0x1c6   :  { %v9204_v3 = vpop.f32.mrf.mxu0 }
 0x1c7   :  { %v12038_v47 = vpop.f32.mrf.mxu1  ;;  %v12040_v17 = vadd.f32 %v9204_v3, %v2351_v46 }
 0x1c8   :  { %v2658_v48 = vpop.f32.mrf.mxu0 }
 0x1c9   :  { %13388 = vst [vmem:[#allocation43_spill] sm:$0xff] %v12040_v17  ;;  %v12042_v40 = vpop.f32.mrf.mxu1  ;;  %v12044_v14 = vadd.f32 %v2658_v48, %v2349_v9  ;;  %v1514_v48 = vadd.f32 %v11483_v26, %v11275_v61  ;;  %v3132_v26 = vadd.f32 %v9215_v34, %v11941_v25 }
 0x1ca   :  { %v9205_v21 = vpop.f32.mrf.mxu0 }
 0x1cb   :  { %13389 = vst [vmem:[#allocation44_spill] sm:$0xff] %v12044_v14  ;;  %v12046_v8 = vpop.f32.mrf.mxu1  ;;  %v12048_v63 = vadd.f32 %v9205_v21, %v2352_v23  ;;  %v1918_v14 = vadd.f32 %v11678_v45, %v1514_v48  ;;  %v1518_v45 = vadd.f32 %v11528_v10, %v11330_v32  ;;  %v3133_v32 = vadd.f32 %v12006_v7, %v11955_v51 }
 0x1cc   :  { %v12050_v33 = vpop.f32.mrf.mxu0 }
 0x1cd   :  { %13390 = vst [vmem:[#allocation45_spill] sm:$0xff] %v12048_v63  ;;  %13391 = vst [vmem:[#allocation46_spill] sm:$0xff] %v12050_v33  ;;  %v12052_v37 = vpop.f32.mrf.mxu1 }
 0x1ce   :  { %v9208_v56 = vpop.f32.mrf.mxu0 }
 0x1cf   :  { %v12054_v11 = vpop.f32.mrf.mxu1  ;;  %v12056_v54 = vadd.f32 %v9208_v56, %v2355_v60  ;;  %v3131_v60 = vadd.f32 %v9214_v62, %v11929_v1 }
 0x1d0   :  { %v2674_v46 = vpop.f32.mrf.mxu0 }
 0x1d1   :  { %13392 = vst [vmem:[#allocation47_spill] sm:$0xff] %v12056_v54  ;;  %v12058_v3 = vpop.f32.mrf.mxu1  ;;  %v12060_v17 = vadd.f32 %v2674_v46, %v2353_v28  ;;  %v2322_v54 = vadd.f32 %v11823_v16, %v1918_v14  ;;  %v3129_v28 = vadd.f32 %v2950_v6, %v11935_v36  ;;  %v1922_v6 = vadd.f32 %v11722_v43, %v1518_v45 }
 0x1d2   :  { %v9209_v9 = vpop.f32.mrf.mxu0 }
 0x1d3   :  { %13393 = vst [vmem:[#allocation48_spill] sm:$0xff] %v12060_v17  ;;  %v12064_v23 = vadd.f32 %v9209_v9, %v2356_v19  ;;  %v12066_v21 = vpop.f32.mrf.mxu1  ;;  %v2726_v61 = vadd.f32 %v11945_v52, %v2322_v54  ;;  %v3135_v54 = vadd.f32 %v12001_v55, %v11950_v20  ;;  %v3136_v55 = vadd.f32 %v12011_v53, %v11958_v44 }
 0x1d4   :  { %v12068_v63 = vpop.f32.mrf.mxu0  ;;  %v3139_v44 = vadd.f32 %v12020_v15, %v11965_v31  ;;  %v3140_v31 = vadd.f32 %v12030_v4, %v11971_v30  ;;  %v3143_v30 = vadd.f32 %v12038_v47, %v11978_v35  ;;  %v3141_v47 = vadd.f32 %v12042_v40, %v11981_v27 }
 0x1d5   :  { %13394 = vst [vmem:[#allocation49_spill] sm:$0xff] %v12064_v23  ;;  %v12074_v46 = vpop.f32.mrf.mxu1  ;;  %v3130_v1 = vadd.f32 %v2953_v49, %v2726_v61 }
 0x1d6   :  { %v9252_v56 = vpop.f32.mrf.mxu0 }
 0x1d7   :  { %v3535_v17 = vadd.f32 %v9252_v56, %v3131_v60  ;;  %v12080_v62 = vpop.f32.mrf.mxu1 }
 0x1d8   :  { %v3354_v33 = vpop.f32.mrf.mxu0 }
 0x1d9   :  { %v3571_v19 = vmax.f32 %v3535_v17, 0.0  ;;  %v3533_v9 = vadd.f32 %v3354_v33, %v3129_v28  ;;  %v2326_v17 = vadd.f32 %v11861_v57, %v1922_v6  ;;  %v12088_v10 = vpop.f32.mrf.mxu1  ;;  %v1522_v57 = vadd.f32 %v11566_v5, %v11384_v58 }
 0x1da   :  { %v9253_v23 = vpop.f32.mrf.mxu0  ;;  %v3137_v58 = vadd.f32 %v12025_v41, %v11968_v24 }
 0x1db   :  { %3607 = vst [vmem:[#allocation5 + $0x10] sm:$0xff] %v3571_v19  ;;  %v3569_v14 = vmax.f32 %v3533_v9, 0.0  ;;  %v3536_v16 = vadd.f32 %v9253_v23, %v3132_v26  ;;  %v2730_v43 = vadd.f32 %v11962_v13, %v2326_v17  ;;  %v12096_v7 = vpop.f32.mrf.mxu1  ;;  %v1926_v13 = vadd.f32 %v11756_v18, %v1522_v57  ;;  %v13395_v57 = vld [vmem:[#allocation11_spill] sm:$0xff] }
 0x1dc   :  { %v3357_v36 = vpop.f32.mrf.mxu0 }
 0x1dd   :  { %3605 = vst [vmem:[#allocation5] sm:$0xff] %v3569_v14  ;;  %v3572_v25 = vmax.f32 %v3536_v16, 0.0  ;;  %v3534_v52 = vadd.f32 %v3357_v36, %v3130_v1  ;;  %v3134_v51 = vadd.f32 %v12018_v59, %v2730_v43  ;;  %v2330_v9 = vadd.f32 %v11890_v12, %v1926_v13  ;;  %v12104_v5 = vpop.f32.mrf.mxu1 }
 0x1de   :  { %v9256_v34 = vpop.f32.mrf.mxu0  ;;  %v1526_v12 = vadd.f32 %v11603_v22, %v11435_v38 }
 0x1df   :  { %3608 = vst [vmem:[#allocation5 + $0x18] sm:$0xff] %v3572_v25  ;;  %v3570_v49 = vmax.f32 %v3534_v52, 0.0  ;;  %v3539_v33 = vadd.f32 %v9256_v34, %v3135_v54  ;;  %v2734_v18 = vadd.f32 %v11975_v42, %v2330_v9  ;;  %v12112_v6 = vpop.f32.mrf.mxu1  ;;  %v13398_v9 = vld [vmem:[#allocation31_spill] sm:$0xff] }
 0x1e0   :  { %v3370_v48 = vpop.f32.mrf.mxu0  ;;  %v1930_v42 = vadd.f32 %v11786_v2, %v1526_v12  ;;  %v13399_v12 = vld [vmem:[#allocation26_spill] sm:$0xff] }
 0x1e1   :  { %3606 = vst [vmem:[#allocation5 + $0x8] sm:$0xff] %v3570_v49  ;;  %v3575_v20 = vmax.f32 %v3539_v33, 0.0  ;;  %v3537_v23 = vadd.f32 %v3370_v48, %v3133_v32  ;;  %v3138_v24 = vadd.f32 %v12036_v39, %v2734_v18  ;;  %v12118_v33 = vpop.f32.mrf.mxu1 }
 0x1e2   :  { %v9257_v60 = vpop.f32.mrf.mxu0  ;;  %v2334_v39 = vadd.f32 %v11907_v0, %v1930_v42  ;;  %v4141_v0 = vld [vmem:[#allocation2 + $0x2] sm:$0xff] }
 0x1e3   :  { %3611 = vst [vmem:[#allocation5 + $0x30] sm:$0xff] %v3575_v20  ;;  %v3573_v56 = vmax.f32 %v3537_v23, 0.0  ;;  %v3540_v28 = vadd.f32 %v9257_v60, %v3136_v55  ;;  %v3144_v20 = vadd.f32 %v12046_v8, %v11984_v29  ;;  %v10013_v8 = vld [vmem:[%s13347_s2 + $0x138] sm:$0xff]  }
 0x1e4   :  { %v3373_v61 = vpop.f32.mrf.mxu0  ;;  %v2738_v55 = vadd.f32 %v11988_v50, %v2334_v39 }
 0x1e5   :  { %3609 = vst [vmem:[#allocation5 + $0x20] sm:$0xff] %v3573_v56  ;;  %v3576_v53 = vmax.f32 %v3540_v28, 0.0  ;;  %v3538_v26 = vadd.f32 %v3373_v61, %v3134_v51  ;;  %v13396_v51 = vld [vmem:[#allocation16_spill] sm:$0xff] }
 0x1e6   :  { %v9260_v19 = vpop.f32.mrf.mxu0  ;;  %v1530_v56 = vadd.f32 %v13396_v51, %v13395_v57  ;;  %v3142_v27 = vadd.f32 %v12052_v37, %v2738_v55 }
 0x1e7   :  { %3612 = vst [vmem:[#allocation5 + $0x38] sm:$0xff] %v3576_v53  ;;  %v3574_v59 = vmax.f32 %v3538_v26, 0.0  ;;  %v3543_v45 = vadd.f32 %v9260_v19, %v3139_v44  ;;  %v12129_v53 = vpop.f32.mrf.mxu1  ;;  %v13397_v26 = vld [vmem:[#allocation21_spill] sm:$0xff] }
 0x1e8   :  { %v3386_v1 = vpop.f32.mrf.mxu0  ;;  %v3645_v16 = vld [vmem:[#allocation5] ss:$2 sm:$0xff]  ;;  %v3647_v36 = vld [vmem:[#allocation5 + $0x1] ss:$2 sm:$0xff]  ;;  %v1934_v19 = vadd.f32 %v13397_v26, %v1530_v56  ;;  %v10009_v56 = vld [vmem:[%s13347_s2 + $0x78] sm:$0xff]  }
 0x1e9   :  { %3610 = vst [vmem:[#allocation5 + $0x28] sm:$0xff] %v3574_v59  ;;  %v3579_v15 = vmax.f32 %v3543_v45, 0.0  ;;  %v3541_v14 = vadd.f32 %v3386_v1, %v3137_v58  ;;  %v3652_v17 = vmax.f32 %v3645_v16, %v3647_v36  ;;  %v3147_v58 = vadd.f32 %v12054_v11, %v13398_v9  ;;  %v12155_v42 = vpop.f32.mrf.mxu1  ;;  %v10061_v11 = vld [vmem:[%s13347_s2 + $0x1d8] sm:$0xff]  }
 0x1ea   :  { %v9261_v41 = vpop.f32.mrf.mxu0  ;;  %v2338_v16 = vadd.f32 %v13399_v12, %v1934_v19 }
 0x1eb   :  { %3615 = vst [vmem:[#allocation5 + $0x50] sm:$0xff] %v3579_v15  ;;  %v3577_v54 = vmax.f32 %v3541_v14, 0.0  ;;  %v3544_v25 = vadd.f32 %v9261_v41, %v3140_v31 }
 0x1ec   :  { %v3649_v4 = vld [vmem:[#allocation5 + $0x12] ss:$2 sm:$0xff]  ;;  %v3651_v52 = vld [vmem:[#allocation5 + $0x13] ss:$2 sm:$0xff]  ;;  %v3389_v34 = vpop.f32.mrf.mxu0 }
 0x1ed   :  { %v3653_v38 = vmax.f32 %v3649_v4, %v3651_v52  ;;  %3613 = vst [vmem:[#allocation5 + $0x40] sm:$0xff] %v3577_v54  ;;  %v3580_v22 = vmax.f32 %v3544_v25, 0.0  ;;  %v3542_v32 = vadd.f32 %v3389_v34, %v3138_v24  ;;  %v13404_v54 = vld [vmem:[#allocation32_spill] sm:$0xff]  ;;  %v12157_v34 = vld [vmem:[#allocation2] sm:$0xff] }
 0x1ee   :  { %v9264_v49 = vpop.f32.mrf.mxu0  ;;  %v3145_v25 = vadd.f32 %v12058_v3, %v13404_v54  ;;  %v13406_v3 = vld [vmem:[#allocation33_spill] sm:$0xff] }
 0x1ef   :  { %v3654_v48 = vmax.f32 %v3652_v17, %v3653_v38  ;;  %3616 = vst [vmem:[#allocation5 + $0x58] sm:$0xff] %v3580_v22  ;;  %v3578_v43 = vmax.f32 %v3542_v32, 0.0  ;;  %v3547_v2 = vadd.f32 %v9264_v49, %v3143_v30  ;;  %v10015_v17 = vld [vmem:[%s13347_s2 + $0x130] sm:$0xff]   ;;  %v13405_v38 = vld [vmem:[#allocation34_spill] sm:$0xff]  ;;  %v3148_v49 = vadd.f32 %v12066_v21, %v13406_v3 }
 0x1f0   :  { %v3402_v35 = vpop.f32.mrf.mxu0  ;;  %v3664_v28 = vld [vmem:[#allocation5 + $0x24] ss:$2 sm:$0xff]  ;;  %v3666_v61 = vld [vmem:[#allocation5 + $0x25] ss:$2 sm:$0xff]  ;;  %v2742_v22 = vadd.f32 %v13405_v38, %v2338_v16 }
 0x1f1   :  { %v3656_v23 = vrot.slane %v3654_v48, 7  ;;  %3614 = vst [vmem:[#allocation5 + $0x48] sm:$0xff] %v3578_v43  ;;  %v3583_v60 = vmax.f32 %v3547_v2, 0.0  ;;  %v3545_v13 = vadd.f32 %v3402_v35, %v3141_v47  ;;  %v3671_v18 = vmax.f32 %v3664_v28, %v3666_v61  ;;  %v13407_v2 = vld [vmem:[#allocation12_spill] sm:$0xff]  ;;  %v13408_v47 = vld [vmem:[#allocation17_spill] sm:$0xff]  ;;  %v13409_v28 = vld [vmem:[#allocation22_spill] sm:$0xff] }
 0x1f2   :  { %v9265_v44 = vpop.f32.mrf.mxu0  ;;  %v1534_v35 = vadd.f32 %v13408_v47, %v13407_v2  ;;  %v3146_v55 = vadd.f32 %v12074_v46, %v2742_v22  ;;  %v13417_v2 = vld [vmem:[#allocation23_spill] sm:$0xff] }
 0x1f3   :  { %v3659_v40 = vsel %vm3658_vm3, 0.0, %v3656_v23  ;;  %3619 = vst [vmem:[#allocation5 + $0x70] sm:$0xff] %v3583_v60  ;;  %v3548_v50 = vadd.f32 %v9265_v44, %v3144_v20  ;;  %v3660_v29 = vsel %vm3658_vm3, %v3656_v23, 0.0  ;;  %v3581_v45 = vmax.f32 %v3545_v13, 0.0  ;;  %v10016_v44 = vld [vmem:[%s13347_s2 + $0x128] sm:$0xff]  }
 0x1f4   :  { %3661 = vst [vmem:[#allocation2 + $0xa] sm:$0xff] %v3659_v40  ;;  %v3668_v59 = vld [vmem:[#allocation5 + $0x36] ss:$2 sm:$0xff]  ;;  %v3670_v37 = vld [vmem:[#allocation5 + $0x37] ss:$2 sm:$0xff]  ;;  %v3405_v1 = vpop.f32.mrf.mxu0  ;;  %v10214_v24 = vpack.c.bf16 %v3656_v23, %v4141_v0  ;;  %v12173_v23 = vpop.f32.mrf.mxu1  ;;  %v1938_v46 = vadd.f32 %v13409_v28, %v1534_v35 }
 0x1f5   :  { %3662 = vst [vmem:[#allocation2 + $0x12] sm:$0x3] %v3660_v29  ;;  %v3672_v31 = vmax.f32 %v3668_v59, %v3670_v37  ;;  %v3584_v15 = vmax.f32 %v3548_v50, 0.0  ;;  %v3546_v14 = vadd.f32 %v3405_v1, %v3142_v27  ;;  %3617 = vst [vmem:[#allocation5 + $0x60] sm:$0xff] %v3581_v45  ;;  %v13410_v27 = vld [vmem:[#allocation35_spill] sm:$0xff]  ;;  %v13412_v59 = vld [vmem:[#allocation36_spill] sm:$0xff] }
 0x1f6   :  { %v9268_v36 = vpop.f32.mrf.mxu0  ;;  %10215 = vmatmul.mubr.msk.bf16.vlgmr.msra.gmra.mxu0 %vm12147_vm6, %v10214_v24  ;;  %v3151_v40 = vadd.f32 %v12080_v62, %v13410_v27  ;;  %v3149_v37 = vadd.f32 %v12088_v10, %v13412_v59  ;;  %v12193_v45 = vpop.f32.mrf.mxu1  ;;  %v10010_v62 = vld [vmem:[%s13347_s2 + $0x70] sm:$0xff]   ;;  %v10018_v24 = vld [vmem:[%s13347_s2 + $0x120] sm:$0xff]  }
 0x1f7   :  { %v3673_v30 = vmax.f32 %v3671_v18, %v3672_v31  ;;  %3620 = vst [vmem:[#allocation5 + $0x78] sm:$0xff] %v3584_v15  ;;  %v3582_v4 = vmax.f32 %v3546_v14, 0.0  ;;  %v3551_v52 = vadd.f32 %v9268_v36, %v3147_v58  ;;  %9378 = vmatprep.mubr.msk.bf16.mxu0 %vm10253_vm2, %v12157_v34  ;;  %9431 = vmatpush3.bf16.msra.mxu0 %v10013_v8  ;;  %v13411_v8 = vld [vmem:[#allocation27_spill] sm:$0xff]  ;;  %v13413_v31 = vld [vmem:[#allocation38_spill] sm:$0xff]  ;;  %v13414_v14 = vld [vmem:[#allocation37_spill] sm:$0xff] }
 0x1f8   :  { %v3418_v32 = vpop.f32.mrf.mxu0  ;;  %9432 = vmatprep.subr.bf16.mxu0 %v12157_v34  ;;  %v2342_v26 = vadd.f32 %v13411_v8, %v1938_v46  ;;  %v3682_v19 = vld [vmem:[#allocation5 + $0x48] ss:$2 sm:$0xff]  ;;  %v3684_v9 = vld [vmem:[#allocation5 + $0x49] ss:$2 sm:$0xff]  ;;  %v3152_v12 = vadd.f32 %v12096_v7, %v13414_v14  ;;  %v13422_v8 = vld [vmem:[#allocation19_spill] sm:$0xff] }
 0x1f9   :  { %v12168_v39 = vrot.slane %v3673_v30, 7  ;;  %3618 = vst [vmem:[#allocation5 + $0x68] sm:$0xff] %v3582_v4  ;;  %v3587_v48 = vmax.f32 %v3551_v52, 0.0  ;;  %v3549_v43 = vadd.f32 %v3418_v32, %v3145_v25  ;;  %v3689_v54 = vmax.f32 %v3682_v19, %v3684_v9  ;;  %v13415_v52 = vld [vmem:[#allocation13_spill] sm:$0xff]  ;;  %v12211_v32 = vpop.f32.mrf.mxu1  ;;  %v13423_v19 = vld [vmem:[#allocation42_spill] sm:$0xff] }
 0x1fa   :  { %v9269_v20 = vpop.f32.mrf.mxu0  ;;  %v2746_v15 = vadd.f32 %v13413_v31, %v2342_v26 }
 0x1fb   :  { %3623 = vst [vmem:[#allocation5 + $0x90] sm:$0xff] %v3587_v48  ;;  %v3585_v60 = vmax.f32 %v3549_v43, 0.0  ;;  %v3552_v0 = vadd.f32 %v9269_v20, %v3148_v49  ;;  %v3791_v57 = vld [vmem:[#allocation2 + $0x8] sm:$0xff]  ;;  %v3677_v21 = vsel %vm3658_vm3, 0.0, %v12168_v39  ;;  %v3678_v51 = vsel %vm3658_vm3, %v12168_v39, 0.0  ;;  %9433 = vmatpush3.bf16.msra.mxu0 %v10015_v17  ;;  %v13416_v17 = vld [vmem:[#allocation18_spill] sm:$0xff] }
 0x1fc   :  { %v3421_v61 = vpop.f32.mrf.mxu0  ;;  %v3800_v13 = vpack.c.bf16 %v3791_v57, %v12157_v34  ;;  %3679 = vst [vmem:[#allocation2 + $0x14] sm:$0xff] %v3677_v21  ;;  %3680 = vst [vmem:[#allocation2 + $0x1c] sm:$0x3] %v3678_v51  ;;  %9434 = vmatprep.subr.bf16.mxu0 %v12157_v34  ;;  %v1538_v7 = vadd.f32 %v13416_v17, %v13415_v52  ;;  %v3150_v22 = vadd.f32 %v12104_v5, %v2746_v15  ;;  %v10011_v43 = vld [vmem:[%s13347_s2 + $0x68] sm:$0xff]   ;;  %v10020_v5 = vld [vmem:[%s13347_s2 + $0x118] sm:$0xff]  }
 0x1fd   :  { %3621 = vst [vmem:[#allocation5 + $0x80] sm:$0xff] %v3585_v60  ;;  %v3588_v50 = vmax.f32 %v3552_v0, 0.0  ;;  %v3550_v29 = vadd.f32 %v3421_v61, %v3146_v55  ;;  %v13418_v55 = vld [vmem:[#allocation39_spill] sm:$0xff]  ;;  %v13419_v21 = vld [vmem:[#allocation28_spill] sm:$0xff] }
 0x1fe   :  { %v9272_v58 = vpop.f32.mrf.mxu0  ;;  %9303 = vmatmul.mubr.bf16.vlgmr.msra.gmra.mxu1 %v3800_v13  ;;  %v1942_v47 = vadd.f32 %v13417_v2, %v1538_v7  ;;  %v3155_v20 = vadd.f32 %v12112_v6, %v13418_v55  ;;  %v13420_v61 = vld [vmem:[#allocation40_spill] sm:$0xff]  ;;  %v10014_v7 = vld [vmem:[%s13347_s2 + $0x58] sm:$0xff]  }
 0x1ff   :  { %3624 = vst [vmem:[#allocation5 + $0x98] sm:$0xff] %v3588_v50  ;;  %v3586_v1 = vmax.f32 %v3550_v29, 0.0  ;;  %v3555_v18 = vadd.f32 %v9272_v58, %v3151_v40  ;;  %9306 = vmatprep.mubr.msk.bf16.mxu1 %vm10253_vm2, %v12157_v34  ;;  %9323 = vmatpush3.bf16.msra.mxu1 %v10009_v56  ;;  %v3153_v13 = vadd.f32 %v12118_v33, %v13420_v61  ;;  %v10012_v50 = vld [vmem:[%s13347_s2 + $0x60] sm:$0xff]   ;;  %v13421_v29 = vld [vmem:[#allocation14_spill] sm:$0xff]  ;;  %v13424_v58 = vld [vmem:[#allocation41_spill] sm:$0xff] }
 0x200   :  { %v3686_v16 = vld [vmem:[#allocation5 + $0x5a] ss:$2 sm:$0xff]  ;;  %v3688_v10 = vld [vmem:[#allocation5 + $0x5b] ss:$2 sm:$0xff]  ;;  %v3434_v36 = vpop.f32.mrf.mxu0  ;;  %9324 = vmatprep.subr.bf16.mxu1 %v12157_v34  ;;  %9435 = vmatpush3.bf16.msra.mxu0 %v10016_v44  ;;  %v2346_v51 = vadd.f32 %v13419_v21, %v1942_v47  ;;  %v12229_v44 = vpop.f32.mrf.mxu1  ;;  %v1542_v26 = vadd.f32 %v13422_v8, %v13421_v29  ;;  %v3156_v33 = vadd.f32 %v12129_v53, %v13424_v58  ;;  %v13425_v53 = vld [vmem:[#allocation9_spill] sm:$0xff] }
 0x201   :  { %v3690_v25 = vmax.f32 %v3686_v16, %v3688_v10  ;;  %3622 = vst [vmem:[#allocation5 + $0x88] sm:$0xff] %v3586_v1  ;;  %v3591_v30 = vmax.f32 %v3555_v18, 0.0  ;;  %v3553_v4 = vadd.f32 %v3434_v36, %v3149_v37  ;;  %9436 = vmatprep.subr.bf16.mxu0 %v12157_v34  ;;  %v3700_v56 = vld [vmem:[#allocation5 + $0x6c] ss:$2 sm:$0xff]  ;;  %v3702_v28 = vld [vmem:[#allocation5 + $0x6d] ss:$2 sm:$0xff] }
 0x202   :  { %v9273_v38 = vpop.f32.mrf.mxu0  ;;  %v2750_v9 = vadd.f32 %v13423_v19, %v2346_v51  ;;  %v3707_v31 = vmax.f32 %v3700_v56, %v3702_v28  ;;  %v13426_v16 = vld [vmem:[#allocation10_spill] sm:$0xff]  ;;  %v13427_v36 = vld [vmem:[#allocation24_spill] sm:$0xff] }
 0x203   :  { %v3691_v3 = vmax.f32 %v3689_v54, %v3690_v25  ;;  %3627 = vst [vmem:[#allocation5 + $0xb0] sm:$0xff] %v3591_v30  ;;  %v3589_v49 = vmax.f32 %v3553_v4, 0.0  ;;  %v3556_v48 = vadd.f32 %v9273_v38, %v3152_v12  ;;  %9325 = vmatpush3.bf16.msra.mxu1 %v10010_v62  ;;  %v10022_v62 = vld [vmem:[%s13347_s2 + $0x110] sm:$0xff]   ;;  %v738_v10 = vadd.f32 %v13426_v16, %v13425_v53  ;;  %v12252_v30 = vpop.f32.mrf.mxu1  ;;  %v13428_v38 = vld [vmem:[#allocation15_spill] sm:$0xff]  ;;  %v13431_v55 = vld [vmem:[#allocation20_spill] sm:$0xff] }
 0x204   :  { %v3437_v35 = vpop.f32.mrf.mxu0  ;;  %9326 = vmatprep.subr.bf16.mxu1 %v12157_v34  ;;  %9437 = vmatpush3.bf16.msra.mxu0 %v10018_v24  ;;  %v1946_v24 = vadd.f32 %v13427_v36, %v1542_v26  ;;  %v3154_v25 = vadd.f32 %v12155_v42, %v2750_v9  ;;  %v10024_v42 = vld [vmem:[%s13347_s2 + $0x108] sm:$0xff]   ;;  %v3792_v61 = vld [vmem:[#allocation2 + $0x10] sm:$0xff] }
 0x205   :  { %v12223_v60 = vrot.slane %v3691_v3, 7  ;;  %3625 = vst [vmem:[#allocation5 + $0xa0] sm:$0xff] %v3589_v49  ;;  %v3592_v0 = vmax.f32 %v3556_v48, 0.0  ;;  %v3554_v57 = vadd.f32 %v3437_v35, %v3150_v22  ;;  %9438 = vmatprep.subr.bf16.mxu0 %v12157_v34  ;;  %v1142_v22 = vadd.f32 %v13428_v38, %v738_v10  ;;  %v13429_v3 = vld [vmem:[#allocation29_spill] sm:$0xff]  ;;  %v13433_v21 = vld [vmem:[#allocation44_spill] sm:$0xff] }
 0x206   :  { %v9276_v46 = vpop.f32.mrf.mxu0  ;;  %v2350_v49 = vadd.f32 %v13429_v3, %v1946_v24  ;;  %v3157_v51 = vadd.f32 %v12193_v45, %v13433_v21  ;;  %v3718_v56 = vld [vmem:[#allocation5 + $0x90] ss:$2 sm:$0xff]  ;;  %v3720_v28 = vld [vmem:[#allocation5 + $0x91] ss:$2 sm:$0xff] }
 0x207   :  { %3628 = vst [vmem:[#allocation5 + $0xb8] sm:$0xff] %v3592_v0  ;;  %v3590_v27 = vmax.f32 %v3554_v57, 0.0  ;;  %v3559_v6 = vadd.f32 %v9276_v46, %v3155_v20  ;;  %v3695_v40 = vsel %vm3658_vm3, 0.0, %v12223_v60  ;;  %9327 = vmatpush3.bf16.msra.mxu1 %v10011_v43  ;;  %v3696_v18 = vsel %vm3658_vm3, %v12223_v60, 0.0  ;;  %v13430_v43 = vld [vmem:[#allocation43_spill] sm:$0xff]  ;;  %v13432_v0 = vld [vmem:[#allocation46_spill] sm:$0xff] }
 0x208   :  { %v3704_v59 = vld [vmem:[#allocation5 + $0x7e] ss:$2 sm:$0xff]  ;;  %v3706_v37 = vld [vmem:[#allocation5 + $0x7f] ss:$2 sm:$0xff]  ;;  %v3450_v1 = vpop.f32.mrf.mxu0  ;;  %3697 = vst [vmem:[#allocation2 + $0x1e] sm:$0xff] %v3695_v40  ;;  %9328 = vmatprep.subr.bf16.mxu1 %v12157_v34  ;;  %9439 = vmatpush3.bf16.msra.mxu0 %v10020_v5  ;;  %v3159_v2 = vadd.f32 %v12173_v23, %v13430_v43  ;;  %v1546_v20 = vadd.f32 %v13431_v55, %v1142_v22  ;;  %v10017_v23 = vld [vmem:[%s13347_s2 + $0x50] sm:$0xff]  }
 0x209   :  { %v3708_v15 = vmax.f32 %v3704_v59, %v3706_v37  ;;  %3626 = vst [vmem:[#allocation5 + $0xa8] sm:$0xff] %v3590_v27  ;;  %v3595_v14 = vmax.f32 %v3559_v6, 0.0  ;;  %v3557_v12 = vadd.f32 %v3450_v1, %v3153_v13  ;;  %3698 = vst [vmem:[#allocation2 + $0x26] sm:$0x3] %v3696_v18  ;;  %9440 = vmatprep.subr.bf16.mxu0 %v12157_v34  ;;  %v3078_v13 = vpop.f32.mrf.mxu1  ;;  %v13434_v26 = vld [vmem:[#allocation45_spill] sm:$0xff]  ;;  %v10025_v1 = vld [vmem:[%s13347_s2 + $0x100] sm:$0xff]  }
 0x20a   :  { %v9277_v54 = vpop.f32.mrf.mxu0  ;;  %v2754_v57 = vadd.f32 %v13432_v0, %v2350_v49  ;;  %v3160_v19 = vadd.f32 %v12211_v32, %v13434_v26  ;;  %v3725_v18 = vmax.f32 %v3718_v56, %v3720_v28  ;;  %v13439_v43 = vld [vmem:[#allocation49_spill] sm:$0xff] }
 0x20b   :  { %v3709_v4 = vmax.f32 %v3707_v31, %v3708_v15  ;;  %3631 = vst [vmem:[#allocation5 + $0xd0] sm:$0xff] %v3595_v14  ;;  %v3593_v52 = vmax.f32 %v3557_v12, 0.0  ;;  %v3560_v17 = vadd.f32 %v9277_v54, %v3156_v33  ;;  %9329 = vmatpush3.bf16.msra.mxu1 %v10012_v50  ;;  %v12275_v50 = vld [vmem:[#allocation2 + $0x12] sm:$0xff]  ;;  %v9247_v16 = vpop.f32.mrf.mxu1 }
 0x20c   :  { %v3453_v48 = vpop.f32.mrf.mxu0  ;;  %9330 = vmatprep.subr.bf16.mxu1 %v12157_v34  ;;  %9441 = vmatpush3.bf16.msra.mxu0 %v10022_v62  ;;  %v13435_v15 = vld [vmem:[#allocation25_spill] sm:$0xff]  ;;  %v3158_v53 = vadd.f32 %v12229_v44, %v2754_v57  ;;  %v13436_v54 = vld [vmem:[#allocation30_spill] sm:$0xff]  ;;  %v13437_v44 = vld [vmem:[#allocation47_spill] sm:$0xff] }
 0x20d   :  { %v12265_v47 = vrot.slane %v3709_v4, 7  ;;  %3629 = vst [vmem:[#allocation5 + $0xc0] sm:$0xff] %v3593_v52  ;;  %v3596_v35 = vmax.f32 %v3560_v17, 0.0  ;;  %v3558_v5 = vadd.f32 %v3453_v48, %v3154_v25  ;;  %9442 = vmatprep.subr.bf16.mxu0 %v12157_v34  ;;  %v1950_v14 = vadd.f32 %v13435_v15, %v1546_v20  ;;  %v10019_v52 = vld [vmem:[%s13347_s2 + $0x48] sm:$0xff]  }
 0x20e   :  { %v9280_v46 = vpop.f32.mrf.mxu0  ;;  %v3163_v17 = vadd.f32 %v12252_v30, %v13437_v44  ;;  %v13438_v48 = vld [vmem:[#allocation48_spill] sm:$0xff] }
 0x20f   :  { %3632 = vst [vmem:[#allocation5 + $0xd8] sm:$0xff] %v3596_v35  ;;  %v3594_v27 = vmax.f32 %v3558_v5, 0.0  ;;  %v3563_v6 = vadd.f32 %v9280_v46, %v3159_v2  ;;  %v3793_v40 = vld [vmem:[#allocation2 + $0x18] sm:$0xff]  ;;  %v3713_v45 = vsel %vm3658_vm3, 0.0, %v12265_v47  ;;  %v3714_v8 = vsel %vm3658_vm3, %v12265_v47, 0.0  ;;  %9331 = vmatpush3.bf16.msra.mxu1 %v10014_v7 }
 0x210   :  { %v12277_v29 = vld [vmem:[#allocation2 + $0x1a] sm:$0xff]  ;;  %v3722_v9 = vld [vmem:[#allocation5 + $0xa2] ss:$2 sm:$0xff]  ;;  %v3724_v58 = vld [vmem:[#allocation5 + $0xa3] ss:$2 sm:$0xff]  ;;  %v3466_v33 = vpop.f32.mrf.mxu0  ;;  %v3801_v59 = vpack.c.bf16 %v3793_v40, %v3792_v61  ;;  %3715 = vst [vmem:[#allocation2 + $0x28] sm:$0xff] %v3713_v45  ;;  %9332 = vmatprep.subr.bf16.mxu1 %v12157_v34  ;;  %9443 = vmatpush3.bf16.msra.mxu0 %v10024_v42  ;;  %v2354_v25 = vadd.f32 %v13436_v54, %v1950_v14 }
 0x211   :  { %v4152_v37 = vpack.c.bf16 %v12277_v29, %v12275_v50  ;;  %3716 = vst [vmem:[#allocation2 + $0x30] sm:$0x3] %v3714_v8  ;;  %v3726_v62 = vmax.f32 %v3722_v9, %v3724_v58  ;;  %3630 = vst [vmem:[#allocation5 + $0xc8] sm:$0xff] %v3594_v27  ;;  %v3599_v32 = vmax.f32 %v3563_v6, 0.0  ;;  %v3561_v31 = vadd.f32 %v3466_v33, %v3157_v51  ;;  %v3794_v3 = vld [vmem:[#allocation2 + $0x20] sm:$0xff]  ;;  %v3081_v51 = vpop.f32.mrf.mxu1 }
 0x212   :  { %9444 = vmatprep.subr.bf16.mxu0 %v12157_v34  ;;  %v9281_v12 = vpop.f32.mrf.mxu0  ;;  %9307 = vmatmul.mubr.bf16.gmra.mxu1 %v3801_v59  ;;  %v2758_v49 = vadd.f32 %v12068_v63, %v2354_v25  ;;  %v3161_v42 = vadd.f32 %v3078_v13, %v13438_v48  ;;  %v3164_v2 = vadd.f32 %v9247_v16, %v13439_v43 }
 0x213   :  { %9379 = vmatmul.mubr.bf16.gmra.mxu0 %v4152_v37  ;;  %v3727_v10 = vmax.f32 %v3725_v18, %v3726_v62  ;;  %3635 = vst [vmem:[#allocation5 + $0xf0] sm:$0xff] %v3599_v32  ;;  %v3597_v36 = vmax.f32 %v3561_v31, 0.0  ;;  %v3564_v24 = vadd.f32 %v9281_v12, %v3160_v19  ;;  %9310 = vmatprep.mubr.msk.bf16.mxu1 %vm10253_vm2, %v12157_v34 }
 0x214   :  { %9382 = vmatprep.mubr.msk.bf16.mxu0 %vm10253_vm2, %v12157_v34  ;;  %v3469_v4 = vpop.f32.mrf.mxu0  ;;  %9333 = vmatpush3.bf16.msra.mxu1 %v10017_v23  ;;  %v3736_v35 = vld [vmem:[#allocation5 + $0xb4] ss:$2 sm:$0xff]  ;;  %v3738_v5 = vld [vmem:[#allocation5 + $0xb5] ss:$2 sm:$0xff]  ;;  %v10218_v26 = vpack.c.bf16 %v12265_v47, %v3794_v3  ;;  %v3162_v19 = vadd.f32 %v3081_v51, %v2758_v49 }
 0x215   :  { %9445 = vmatpush3.bf16.msra.mxu0 %v10025_v1  ;;  %v12304_v7 = vrot.slane %v3727_v10, 7  ;;  %3633 = vst [vmem:[#allocation5 + $0xe0] sm:$0xff] %v3597_v36  ;;  %v3600_v38 = vmax.f32 %v3564_v24, 0.0  ;;  %v3562_v22 = vadd.f32 %v3469_v4, %v3158_v53  ;;  %9334 = vmatprep.subr.bf16.mxu1 %v12157_v34  ;;  %v10021_v23 = vld [vmem:[%s13347_s2 + $0x40] sm:$0xff]   ;;  %v3743_v27 = vmax.f32 %v3736_v35, %v3738_v5  ;;  %v10023_v51 = vld [vmem:[%s13347_s2 + $0xf8] sm:$0xff]  }
 0x216   :  { %9502 = vmatprep.subr.bf16.mxu0 %v12157_v34  ;;  %v9284_v55 = vpop.f32.mrf.mxu0 }
 0x217   :  { %3636 = vst [vmem:[#allocation5 + $0xf8] sm:$0xff] %v3600_v38  ;;  %v3598_v30 = vmax.f32 %v3562_v22, 0.0  ;;  %v3567_v20 = vadd.f32 %v9284_v55, %v3163_v17  ;;  %v12311_v0 = vld [vmem:[#allocation2 + $0x22] sm:$0xff]  ;;  %v3731_v21 = vsel %vm3658_vm3, 0.0, %v12304_v7  ;;  %v3732_v63 = vsel %vm3658_vm3, %v12304_v7, 0.0 }
 0x218   :  { %v12313_v57 = vld [vmem:[#allocation2 + $0x2a] sm:$0xff]  ;;  %v3482_v46 = vpop.f32.mrf.mxu0  ;;  %3733 = vst [vmem:[#allocation2 + $0x32] sm:$0xff] %v3731_v21  ;;  %3734 = vst [vmem:[#allocation2 + $0x3a] sm:$0x3] %v3732_v63  ;;  %9335 = vmatpush3.bf16.msra.mxu1 %v10019_v52  ;;  %v4335_v13 = vpack.c.bf16 %v12311_v0, %v12277_v29  ;;  %v3958_v21 = vld [vmem:[#allocation2 + $0x1] sm:$0xff] }
 0x219   :  { %v3740_v56 = vld [vmem:[#allocation5 + $0xc6] ss:$2 sm:$0xff]  ;;  %v3742_v28 = vld [vmem:[#allocation5 + $0xc7] ss:$2 sm:$0xff]  ;;  %v4153_v61 = vpack.c.bf16 %v12313_v57, %v12311_v0  ;;  %3634 = vst [vmem:[#allocation5 + $0xe8] sm:$0xff] %v3598_v30  ;;  %v3603_v40 = vmax.f32 %v3567_v20, 0.0  ;;  %v3565_v45 = vadd.f32 %v3482_v46, %v3161_v42  ;;  %9336 = vmatprep.subr.bf16.mxu1 %v12157_v34 }
 0x21a   :  { %v3744_v6 = vmax.f32 %v3740_v56, %v3742_v28  ;;  %v9285_v8 = vpop.f32.mrf.mxu0  ;;  %10219 = vmatmul.mubr.msk.bf16.gmra.mxu1 %vm12147_vm6, %v10218_v26  ;;  %v3959_v63 = vld [vmem:[#allocation2 + $0x9] sm:$0xff] }
 0x21b   :  { %9383 = vmatmul.mubr.bf16.gmra.mxu0 %v4153_v61  ;;  %3639 = vst [vmem:[#allocation5 + $0x110] sm:$0xff] %v3603_v40  ;;  %v3601_v58 = vmax.f32 %v3565_v45, 0.0  ;;  %v3568_v33 = vadd.f32 %v9285_v8, %v3164_v2  ;;  %9314 = vmatprep.mubr.msk.bf16.mxu1 %vm10253_vm2, %v12157_v34  ;;  %v3968_v56 = vpack.c.bf16 %v3959_v63, %v3958_v21  ;;  %v3960_v40 = vld [vmem:[#allocation2 + $0x11] sm:$0xff]  ;;  %v10027_v45 = vld [vmem:[%s13347_s2 + $0xe8] sm:$0xff]  }
 0x21c   :  { %v3745_v9 = vmax.f32 %v3743_v27, %v3744_v6  ;;  %9386 = vmatprep.mubr.msk.bf16.mxu0 %vm10253_vm2, %v12157_v34  ;;  %v3485_v59 = vpop.f32.mrf.mxu0  ;;  %9337 = vmatpush3.bf16.msra.mxu1 %v10021_v23  ;;  %v3754_v18 = vld [vmem:[#allocation5 + $0xd8] ss:$2 sm:$0xff]  ;;  %v3756_v62 = vld [vmem:[#allocation5 + $0xd9] ss:$2 sm:$0xff]  ;;  %v10026_v23 = vld [vmem:[%s13347_s2 + $0xf0] sm:$0xff]  }
 0x21d   :  { %3637 = vst [vmem:[#allocation5 + $0x100] sm:$0xff] %v3601_v58  ;;  %v3604_v47 = vmax.f32 %v3568_v33, 0.0  ;;  %v3566_v1 = vadd.f32 %v3485_v59, %v3162_v19  ;;  %9394 = vmatprep.subr.bf16.mxu1 %v12157_v34  ;;  %v3761_v53 = vmax.f32 %v3754_v18, %v3756_v62  ;;  %v3961_v27 = vld [vmem:[#allocation2 + $0x19] sm:$0xff]  ;;  %v4507_v26 = vld [vmem:[#allocation2 + $0xb] sm:$0xff]  ;;  %v3962_v33 = vld [vmem:[#allocation2 + $0x21] sm:$0xff] }
 0x21e   :  { %v12334_v37 = vrot.slane %v3745_v9, 7  ;;  %v4508_v6 = vld [vmem:[#allocation2 + $0x13] sm:$0xff]  ;;  %v3969_v8 = vpack.c.bf16 %v3961_v27, %v3960_v40  ;;  %v10028_v58 = vld [vmem:[%s13347_s2 + $0xe0] sm:$0xff]   ;;  %v3963_v59 = vld [vmem:[#allocation2 + $0x29] sm:$0xff] }
 0x21f   :  { %3640 = vst [vmem:[#allocation5 + $0x118] sm:$0xff] %v3604_v47  ;;  %v3602_v32 = vmax.f32 %v3566_v1, 0.0  ;;  %v3796_v24 = vld [vmem:[#allocation2 + $0x30] sm:$0xff]  ;;  %v4517_v19 = vpack.c.bf16 %v4508_v6, %v4507_v26  ;;  %v10029_v9 = vld [vmem:[%s13347_s2 + $0x1b8] sm:$0xff]   ;;  %v4510_v1 = vld [vmem:[#allocation2 + $0x23] sm:$0xff]  ;;  %v3970_v62 = vpack.c.bf16 %v3963_v59, %v3962_v33 }
 0x220   :  { %v3749_v31 = vsel %vm3658_vm3, 0.0, %v12334_v37  ;;  %v3750_v15 = vsel %vm3658_vm3, %v12334_v37, 0.0  ;;  %v3758_v14 = vld [vmem:[#allocation5 + $0xea] ss:$2 sm:$0xff]  ;;  %v3760_v12 = vld [vmem:[#allocation5 + $0xeb] ss:$2 sm:$0xff] }
 0x221   :  { %3751 = vst [vmem:[#allocation2 + $0x3c] sm:$0xff] %v3749_v31  ;;  %3752 = vst [vmem:[#allocation2 + $0x44] sm:$0x3] %v3750_v15  ;;  %v3762_v16 = vmax.f32 %v3758_v14, %v3760_v12  ;;  %v10031_v47 = vld [vmem:[%s13347_s2 + $0x1b0] sm:$0xff]   ;;  %v10030_v18 = vld [vmem:[%s13347_s2 + $0xd8] sm:$0xff]  }
 0x222   :  { %3638 = vst [vmem:[#allocation5 + $0x108] sm:$0xff] %v3602_v32  ;;  %v4509_v32 = vld [vmem:[#allocation2 + $0x1b] sm:$0xff]  ;;  %v10032_v15 = vld [vmem:[%s13347_s2 + $0x1a8] sm:$0xff]   ;;  %v10033_v14 = vld [vmem:[%s13347_s2 + $0xd0] sm:$0xff]  }
 0x223   :  { %v3763_v10 = vmax.f32 %v3761_v53, %v3762_v16  ;;  %v4518_v31 = vpack.c.bf16 %v4510_v1, %v4509_v32  ;;  %v10034_v53 = vld [vmem:[%s13347_s2 + $0x1a0] sm:$0xff]   ;;  %v4511_v16 = vld [vmem:[#allocation2 + $0x2b] sm:$0xff] }
 0x224   :  { %v10044_v27 = vld [vmem:[%s13347_s2 + $0x160] sm:$0xff]   ;;  %v10047_v29 = vld [vmem:[%s13347_s2 + $0x230] sm:$0xff]   ;;  %v10056_v32 = vld [vmem:[%s13347_s2 + $0x208] sm:$0xff]  }
 0x225   :  { %v12341_v36 = vrot.slane %v3763_v10, 7  ;;  %v4512_v10 = vld [vmem:[#allocation2 + $0x33] sm:$0xff]  ;;  %v12503_v6 = vld [vmem:[#allocation2 + $0x24] sm:$0xff] }
 0x226   :  { %v12497_v0 = vld [vmem:[#allocation2 + $0x2c] sm:$0xff] }
 0x227   :  { %v3767_v4 = vsel %vm3658_vm3, 0.0, %v12341_v36  ;;  %v3768_v52 = vsel %vm3658_vm3, %v12341_v36, 0.0  ;;  %v4884_v40 = vpack.c.bf16 %v12497_v0, %v12503_v6  ;;  %v10049_v26 = vld [vmem:[%s13347_s2 + $0x150] sm:$0xff]  }
 0x228   :  { %v3797_v54 = vld [vmem:[#allocation2 + $0x38] sm:$0xff]  ;;  %3769 = vst [vmem:[#allocation2 + $0x46] sm:$0xff] %v3767_v4  ;;  %3770 = vst [vmem:[#allocation2 + $0x4e] sm:$0x3] %v3768_v52  ;;  %v10035_v4 = vld [vmem:[%s13347_s2 + $0xc8] sm:$0xff]   ;;  %v4519_v52 = vpack.c.bf16 %v4512_v10, %v4511_v16 }
 0x229   :  { %v12343_v25 = vld [vmem:[#allocation2 + $0x3a] sm:$0xff]  ;;  %v3803_v22 = vpack.c.bf16 %v3797_v54, %v3796_v24  ;;  %v3964_v24 = vld [vmem:[#allocation2 + $0x31] sm:$0xff] }
 0x22a   :  { %v3772_v44 = vld [vmem:[#allocation5 + $0xfc] ss:$2 sm:$0xff]  ;;  %v3774_v17 = vld [vmem:[#allocation5 + $0xfd] ss:$2 sm:$0xff]  ;;  %v10222_v43 = vpack.c.bf16 %v12343_v25, %v12304_v7  ;;  %v10054_v59 = vld [vmem:[%s13347_s2 + $0x210] sm:$0xff]  }
 0x22b   :  { %v3776_v38 = vld [vmem:[#allocation5 + $0x10e] ss:$2 sm:$0xff]  ;;  %v3778_v3 = vld [vmem:[#allocation5 + $0x10f] ss:$2 sm:$0xff]  ;;  %v3779_v49 = vmax.f32 %v3772_v44, %v3774_v17  ;;  %9315 = vmatmul.mubr.bf16.gmra.mxu1 %v3803_v22  ;;  %v10037_v17 = vld [vmem:[%s13347_s2 + $0xc0] sm:$0xff]  }
 0x22c   :  { %v3780_v48 = vmax.f32 %v3776_v38, %v3778_v3  ;;  %10223 = vmatmul.mubr.msk.bf16.gmra.mxu0 %vm12352_vm7, %v10222_v43  ;;  %9318 = vmatprep.mubr.msk.bf16.mxu1 %vm10253_vm2, %v12157_v34  ;;  %v3965_v12 = vld [vmem:[#allocation2 + $0x39] sm:$0xff]  ;;  %v10038_v22 = vld [vmem:[%s13347_s2 + $0x190] sm:$0xff]  }
 0x22d   :  { %9390 = vmatprep.mubr.msk.bf16.mxu0 %vm10253_vm2, %v12157_v34  ;;  %v3971_v54 = vpack.c.bf16 %v3965_v12, %v3964_v24  ;;  %v10036_v44 = vld [vmem:[%s13347_s2 + $0x198] sm:$0xff]   ;;  %v10058_v10 = vld [vmem:[%s13347_s2 + $0x1f0] sm:$0xff]  }
 0x22e   :  { %v3781_v2 = vmax.f32 %v3779_v49, %v3780_v48  ;;  %v4513_v43 = vld [vmem:[#allocation2 + $0x3b] sm:$0xff] }
 0x22f   :  { %v3798_v41 = vld [vmem:[#allocation2 + $0x40] sm:$0xff]  ;;  %v3799_v5 = vld [vmem:[#allocation2 + $0x48] sm:$0xff]  ;;  %v10055_v12 = vld [vmem:[%s13347_s2 + $0x1f8] sm:$0xff]  }
 0x230   :  { %v3783_v35 = vrot.slane %v3781_v2, 7  ;;  %v3804_v55 = vpack.c.bf16 %v3799_v5, %v3798_v41  ;;  %v12371_v28 = vld [vmem:[#allocation2 + $0x42] sm:$0xff] }
 0x231   :  { %v4514_v3 = vld [vmem:[#allocation2 + $0x43] sm:$0xff] }
 0x232   :  { %v3785_v30 = vsel %vm3658_vm3, 0.0, %v3783_v35  ;;  %v3786_v20 = vsel %vm3658_vm3, %v3783_v35, 0.0  ;;  %v3966_v49 = vld [vmem:[#allocation2 + $0x41] sm:$0xff]  ;;  %v4520_v2 = vpack.c.bf16 %v4514_v3, %v4513_v43  ;;  %v5243_v3 = vld [vmem:[#allocation2 + $0x36] sm:$0xff] }
 0x233   :  { %3787 = vst [vmem:[#allocation2 + $0x50] sm:$0xff] %v3785_v30  ;;  %3788 = vst [vmem:[#allocation2 + $0x58] sm:$0x3] %v3786_v20  ;;  %9319 = vmatmul.mubr.bf16.gmra.mxu1 %v3804_v55  ;;  %v10040_v35 = vld [vmem:[%s13347_s2 + $0x188] sm:$0xff]   ;;  %v10041_v41 = vld [vmem:[%s13347_s2 + $0x180] sm:$0xff]  }
 0x234   :  { %9338 = vmatprep.mubr.msk.bf16.mxu1 %vm10253_vm2, %v12157_v34  ;;  %v4324_v30 = vld [vmem:[#allocation2 + $0xa] sm:$0xff]  ;;  %v10039_v20 = vld [vmem:[%s13347_s2 + $0x178] sm:$0xff]  }
 0x235   :  { %v4334_v21 = vpack.c.bf16 %v12275_v50, %v4324_v30  ;;  %v12470_v50 = vld [vmem:[#allocation2 + $0x1c] sm:$0xff]  ;;  %v10063_v43 = vld [vmem:[%s13347_s2 + $0x1c8] sm:$0xff]  }
 0x236   :  { %v4701_v24 = vpack.c.bf16 %v12503_v6, %v12470_v50 }
 0x23a   :  { %v12373_v46 = vld [vmem:[#allocation2 + $0x4a] sm:$0xff]  ;;  %v4516_v55 = vld [vmem:[#allocation2 + $0x53] sm:$0xff] }
 0x23b   :  { %v4155_v61 = vpack.c.bf16 %v12373_v46, %v12371_v28  ;;  %9339 = vmatmul.mubr.bf16.vlgmr.msra.gmra.mxu1 %v3968_v56  ;;  %v3967_v38 = vld [vmem:[#allocation2 + $0x49] sm:$0xff]  ;;  %v5247_v30 = vld [vmem:[#allocation2 + $0x56] sm:$0xff] }
 0x23c   :  { %9395 = vmatpush3.bf16.msra.mxu1 %v10023_v51  ;;  %9342 = vmatprep.mubr.msk.bf16.mxu1 %vm10253_vm2, %v12157_v34  ;;  %v3972_v48 = vpack.c.bf16 %v3967_v38, %v3966_v49  ;;  %v4515_v5 = vld [vmem:[#allocation2 + $0x4b] sm:$0xff]  ;;  %v5244_v49 = vld [vmem:[#allocation2 + $0x3e] sm:$0xff] }
 0x23d   :  { %9391 = vmatmul.mubr.bf16.gmra.mxu0 %v4155_v61  ;;  %9396 = vmatprep.subr.bf16.mxu1 %v12157_v34  ;;  %v4521_v63 = vpack.c.bf16 %v4516_v55, %v4515_v5  ;;  %v10042_v51 = vld [vmem:[%s13347_s2 + $0x170] sm:$0xff]   ;;  %v10043_v56 = vld [vmem:[%s13347_s2 + $0x168] sm:$0xff]   ;;  %v10045_v61 = vld [vmem:[%s13347_s2 + $0x238] sm:$0xff]  }
 0x23e   :  { %9446 = vmatprep.mubr.msk.bf16.mxu0 %vm10253_vm2, %v12157_v34  ;;  %v5057_v55 = vld [vmem:[#allocation2 + $0x1d] sm:$0xff] }
 0x240   :  { %9397 = vmatpush3.bf16.msra.mxu1 %v10026_v23  ;;  %v10226_v23 = vpack.c.bf16 %v12470_v50, %v12168_v39  ;;  %v5059_v50 = vld [vmem:[#allocation2 + $0x2d] sm:$0xff] }
 0x241   :  { %9398 = vmatprep.subr.bf16.mxu1 %v12157_v34 }
 0x243   :  { %9343 = vmatmul.mubr.bf16.gmra.mxu1 %v3969_v8  ;;  %v10230_v8 = vpack.c.bf16 %v12304_v7, %v12313_v57  ;;  %v10050_v7 = vld [vmem:[%s13347_s2 + $0x220] sm:$0xff]   ;;  %v12527_v57 = vld [vmem:[#allocation2 + $0x34] sm:$0xff] }
 0x244   :  { %9399 = vmatpush3.bf16.msra.mxu1 %v10027_v45  ;;  %9346 = vmatprep.mubr.msk.bf16.mxu1 %vm10253_vm2, %v12157_v34  ;;  %v10048_v45 = vld [vmem:[%s13347_s2 + $0x228] sm:$0xff]   ;;  %v10234_v33 = vpack.c.bf16 %v12334_v37, %v12527_v57 }
 0x245   :  { %9447 = vmatmul.mubr.bf16.vlgmr.msra.gmra.mxu0 %v4517_v19  ;;  %9400 = vmatprep.subr.bf16.mxu1 %v12157_v34  ;;  %v4337_v19 = vpack.c.bf16 %v12371_v28, %v12343_v25  ;;  %v10053_v25 = vld [vmem:[%s13347_s2 + $0x140] sm:$0xff]   ;;  %v4333_v28 = vld [vmem:[#allocation2 + $0x52] sm:$0xff] }
 0x246   :  { %9450 = vmatprep.mubr.msk.bf16.mxu0 %vm10253_vm2, %v12157_v34  ;;  %9503 = vmatpush3.bf16.msra.mxu0 %v10029_v9  ;;  %v10051_v9 = vld [vmem:[%s13347_s2 + $0x148] sm:$0xff]   ;;  %v4338_v1 = vpack.c.bf16 %v4333_v28, %v12373_v46 }
 0x247   :  { %9504 = vmatprep.subr.bf16.mxu0 %v12157_v34  ;;  %v4690_v46 = vld [vmem:[#allocation2 + $0xc] sm:$0xff] }
 0x248   :  { %9401 = vmatpush3.bf16.msra.mxu1 %v10028_v58  ;;  %v10052_v58 = vld [vmem:[%s13347_s2 + $0x218] sm:$0xff]   ;;  %v10238_v16 = vpack.c.bf16 %v12168_v39, %v4690_v46  ;;  %v10059_v39 = vld [vmem:[%s13347_s2 + $0x1e8] sm:$0xff]  }
 0x249   :  { %9402 = vmatprep.subr.bf16.mxu1 %v12157_v34 }
 0x24a   :  { %9505 = vmatpush3.bf16.msra.mxu0 %v10031_v47  ;;  %v12555_v47 = vld [vmem:[#allocation2 + $0x4c] sm:$0xff] }
 0x24b   :  { %9347 = vmatmul.mubr.bf16.gmra.mxu1 %v3970_v62  ;;  %9506 = vmatprep.subr.bf16.mxu0 %v12157_v34 }
 0x24c   :  { %9403 = vmatpush3.bf16.msra.mxu1 %v10030_v18  ;;  %9350 = vmatprep.mubr.msk.bf16.mxu1 %vm10253_vm2, %v12157_v34  ;;  %v12559_v18 = vld [vmem:[#allocation2 + $0x44] sm:$0xff] }
 0x24d   :  { %9451 = vmatmul.mubr.bf16.gmra.mxu0 %v4518_v31  ;;  %9404 = vmatprep.subr.bf16.mxu1 %v12157_v34  ;;  %v4886_v62 = vpack.c.bf16 %v12555_v47, %v12559_v18  ;;  %v10057_v31 = vld [vmem:[%s13347_s2 + $0x200] sm:$0xff]  }
 0x24e   :  { %9454 = vmatprep.mubr.msk.bf16.mxu0 %vm10253_vm2, %v12157_v34  ;;  %9507 = vmatpush3.bf16.msra.mxu0 %v10032_v15  ;;  %v4881_v15 = vld [vmem:[#allocation2 + $0x54] sm:$0xff] }
 0x24f   :  { %9508 = vmatprep.subr.bf16.mxu0 %v12157_v34  ;;  %v4704_v5 = vpack.c.bf16 %v4881_v15, %v12555_v47 }
 0x250   :  { %9405 = vmatpush3.bf16.msra.mxu1 %v10033_v14  ;;  %v4882_v14 = vld [vmem:[#allocation2 + $0x5c] sm:$0xff] }
 0x251   :  { %9406 = vmatprep.subr.bf16.mxu1 %v12157_v34 }
 0x252   :  { %9509 = vmatpush3.bf16.msra.mxu0 %v10034_v53  ;;  %v4887_v53 = vpack.c.bf16 %v4882_v14, %v4881_v15 }
 0x253   :  { %9351 = vmatmul.mubr.bf16.gmra.mxu1 %v3971_v54  ;;  %9510 = vmatprep.subr.bf16.mxu0 %v12157_v34  ;;  %v5239_v54 = vld [vmem:[#allocation2 + $0x16] sm:$0xff] }
 0x254   :  { %9354 = vmatprep.mubr.msk.bf16.mxu1 %vm10253_vm2, %v12157_v34  ;;  %9407 = vmatpush3.bf16.msra.mxu1 %v10035_v4  ;;  %v10242_v4 = vpack.c.bf16 %v12223_v60, %v5239_v54  ;;  %v4702_v60 = vpack.c.bf16 %v12527_v57, %v12497_v0  ;;  %v5061_v0 = vld [vmem:[#allocation2 + $0x3d] sm:$0xff] }
 0x255   :  { %9455 = vmatmul.mubr.bf16.gmra.mxu0 %v4519_v52  ;;  %9408 = vmatprep.subr.bf16.mxu1 %v12157_v34  ;;  %v10060_v52 = vld [vmem:[%s13347_s2 + $0x1e0] sm:$0xff]  }
 0x256   :  { %9458 = vmatprep.mubr.msk.bf16.mxu0 %vm10253_vm2, %v12157_v34  ;;  %9511 = vmatpush3.bf16.msra.mxu0 %v10036_v44  ;;  %v5242_v44 = vld [vmem:[#allocation2 + $0x2e] sm:$0xff] }
 0x257   :  { %9512 = vmatprep.subr.bf16.mxu0 %v12157_v34 }
 0x258   :  { %9409 = vmatpush3.bf16.msra.mxu1 %v10037_v17  ;;  %v5241_v17 = vld [vmem:[#allocation2 + $0x26] sm:$0xff] }
 0x259   :  { %9466 = vmatprep.subr.bf16.mxu1 %v12157_v34  ;;  %v5250_v38 = vpack.c.bf16 %v5242_v44, %v5241_v17 }
 0x25a   :  { %9513 = vmatpush3.bf16.msra.mxu0 %v10038_v22  ;;  %v10062_v22 = vld [vmem:[%s13347_s2 + $0x1d0] sm:$0xff]  }
 0x25b   :  { %9355 = vmatmul.mubr.bf16.gmra.mxu1 %v3972_v48  ;;  %9514 = vmatprep.subr.bf16.mxu0 %v12157_v34  ;;  %v10210_v48 = vld [vmem:[#allocation2] sm:$0xff] }
 0x25c   :  { %9410 = vmatprep.mubr.msk.bf16.mxu1 %vm10253_vm2, %v12157_v34 }
 0x25d   :  { %9459 = vmatmul.mubr.bf16.gmra.mxu0 %v4520_v2  ;;  %v5251_v2 = vpack.c.bf16 %v5244_v49, %v5243_v3 }
 0x25e   :  { %9462 = vmatprep.mubr.msk.bf16.mxu0 %vm10253_vm2, %v12157_v34  ;;  %9515 = vmatpush3.bf16.msra.mxu0 %v10040_v35  ;;  %v10246_v35 = vpack.c.bf16 %v12559_v18, %v12334_v37 }
 0x25f   :  { %9516 = vmatprep.subr.bf16.mxu0 %v12157_v34 }
 0x262   :  { %9517 = vmatpush3.bf16.msra.mxu0 %v10041_v41  ;;  %v5246_v41 = vld [vmem:[#allocation2 + $0x4e] sm:$0xff] }
 0x263   :  { %9411 = vmatmul.mubr.bf16.vlgmr.msra.gmra.mxu1 %v4334_v21  ;;  %9574 = vmatprep.subr.bf16.mxu0 %v12157_v34  ;;  %v10250_v37 = vpack.c.bf16 %v5246_v41, %v12341_v36  ;;  %v5056_v21 = vld [vmem:[#allocation2 + $0x15] sm:$0xff]  ;;  %v5058_v36 = vld [vmem:[#allocation2 + $0x25] sm:$0xff] }
 0x264   :  { %9467 = vmatpush3.bf16.msra.mxu1 %v10039_v20  ;;  %9414 = vmatprep.mubr.msk.bf16.mxu1 %vm10253_vm2, %v12157_v34  ;;  %v5248_v20 = vld [vmem:[#allocation2 + $0x5e] sm:$0xff]  ;;  %v5067_v42 = vpack.c.bf16 %v5059_v50, %v5058_v36 }
 0x265   :  { %9463 = vmatmul.mubr.bf16.gmra.mxu0 %v4521_v63  ;;  %9468 = vmatprep.subr.bf16.mxu1 %v12157_v34  ;;  %v5066_v63 = vpack.c.bf16 %v5057_v55, %v5056_v21 }
 0x266   :  { %9518 = vmatprep.mubr.msk.bf16.mxu0 %vm10253_vm2, %v12157_v34 }
 0x268   :  { %9469 = vmatpush3.bf16.msra.mxu1 %v10042_v51  ;;  %v5253_v51 = vpack.c.bf16 %v5248_v20, %v5247_v30 }
 0x269   :  { %9470 = vmatprep.subr.bf16.mxu1 %v12157_v34 }
 0x26b   :  { %9415 = vmatmul.mubr.bf16.gmra.mxu1 %v4335_v13  ;;  %v10046_v13 = vld [vmem:[%s13347_s2 + $0x158] sm:$0xff]  }
 0x26c   :  { %9471 = vmatpush3.bf16.msra.mxu1 %v10043_v56  ;;  %9418 = vmatprep.mubr.msk.bf16.mxu1 %vm10253_vm2, %v12157_v34 }
 0x26d   :  { %10227 = vmatmul.mubr.msk.bf16.vlgmr.msra.gmra.mxu0 %vm12352_vm7, %v10226_v23  ;;  %9472 = vmatprep.subr.bf16.mxu1 %v12157_v34 }
 0x26e   :  { %9522 = vmatprep.mubr.msk.bf16.mxu0 %vm10253_vm2, %v12157_v34  ;;  %9575 = vmatpush3.bf16.msra.mxu0 %v10045_v61 }
 0x26f   :  { %9576 = vmatprep.subr.bf16.mxu0 %v12157_v34 }
 0x270   :  { %9473 = vmatpush3.bf16.msra.mxu1 %v10044_v27 }
 0x271   :  { %9474 = vmatprep.subr.bf16.mxu1 %v12157_v34 }
 0x272   :  { %9577 = vmatpush3.bf16.msra.mxu0 %v10047_v29  ;;  %v5060_v29 = vld [vmem:[#allocation2 + $0x35] sm:$0xff] }
 0x273   :  { %10231 = vmatmul.mubr.msk.bf16.gmra.mxu1 %vm12147_vm6, %v10230_v8  ;;  %9578 = vmatprep.subr.bf16.mxu0 %v12157_v34 }
 0x274   :  { %9475 = vmatpush3.bf16.msra.mxu1 %v10046_v13  ;;  %9422 = vmatprep.mubr.msk.bf16.mxu1 %vm10253_vm2, %v12157_v34 }
 0x275   :  { %9523 = vmatmul.mubr.bf16.gmra.mxu0 %v4884_v40  ;;  %9476 = vmatprep.subr.bf16.mxu1 %v12157_v34  ;;  %v5068_v40 = vpack.c.bf16 %v5061_v0, %v5060_v29 }
 0x276   :  { %9526 = vmatprep.mubr.msk.bf16.mxu0 %vm10253_vm2, %v12157_v34  ;;  %9579 = vmatpush3.bf16.msra.mxu0 %v10048_v45 }
 0x277   :  { %9580 = vmatprep.subr.bf16.mxu0 %v12157_v34 }
 0x278   :  { %9477 = vmatpush3.bf16.msra.mxu1 %v10049_v26  ;;  %v5063_v26 = vld [vmem:[#allocation2 + $0x4d] sm:$0xff] }
 0x279   :  { %9478 = vmatprep.subr.bf16.mxu1 %v12157_v34 }
 0x27a   :  { %9581 = vmatpush3.bf16.msra.mxu0 %v10050_v7  ;;  %v5062_v7 = vld [vmem:[#allocation2 + $0x45] sm:$0xff] }
 0x27b   :  { %9423 = vmatmul.mubr.bf16.gmra.mxu1 %v4337_v19  ;;  %9582 = vmatprep.subr.bf16.mxu0 %v12157_v34  ;;  %v5069_v57 = vpack.c.bf16 %v5063_v26, %v5062_v7  ;;  %v5064_v19 = vld [vmem:[#allocation2 + $0x55] sm:$0xff] }
 0x27c   :  { %9426 = vmatprep.mubr.msk.bf16.mxu1 %vm10253_vm2, %v12157_v34  ;;  %9479 = vmatpush3.bf16.msra.mxu1 %v10051_v9  ;;  %v5065_v9 = vld [vmem:[#allocation2 + $0x5d] sm:$0xff] }
 0x27d   :  { %10235 = vmatmul.mubr.msk.bf16.gmra.mxu0 %vm12147_vm6, %v10234_v33  ;;  %9480 = vmatprep.subr.bf16.mxu1 %v12157_v34 }
 0x27e   :  { %9530 = vmatprep.mubr.msk.bf16.mxu0 %vm10253_vm2, %v12157_v34  ;;  %9583 = vmatpush3.bf16.msra.mxu0 %v10052_v58  ;;  %v5070_v58 = vpack.c.bf16 %v5065_v9, %v5064_v19 }
 0x27f   :  { %9584 = vmatprep.subr.bf16.mxu0 %v12157_v34 }
 0x280   :  { %9481 = vmatpush3.bf16.msra.mxu1 %v10053_v25 }
 0x281   :  { %9538 = vmatprep.subr.bf16.mxu1 %v12157_v34 }
 0x282   :  { %9585 = vmatpush3.bf16.msra.mxu0 %v10054_v59 }
 0x283   :  { %9427 = vmatmul.mubr.bf16.gmra.mxu1 %v4338_v1  ;;  %9586 = vmatprep.subr.bf16.mxu0 %v12157_v34 }
 0x284   :  { %9482 = vmatprep.mubr.msk.bf16.mxu1 %vm10253_vm2, %v12157_v34 }
 0x285   :  { %9531 = vmatmul.mubr.bf16.gmra.mxu0 %v4886_v62 }
 0x286   :  { %9534 = vmatprep.mubr.msk.bf16.mxu0 %vm10253_vm2, %v12157_v34  ;;  %9587 = vmatpush3.bf16.msra.mxu0 %v10056_v32 }
 0x287   :  { %9588 = vmatprep.subr.bf16.mxu0 %v12157_v34 }
 0x28a   :  { %9589 = vmatpush3.bf16.msra.mxu0 %v10057_v31 }
 0x28b   :  { %10239 = vmatmul.mubr.msk.bf16.vlgmr.msra.gmra.mxu1 %vm12147_vm6, %v10238_v16 }
 0x28c   :  { %9539 = vmatpush3.bf16.msra.mxu1 %v10055_v12  ;;  %9486 = vmatprep.mubr.msk.bf16.mxu1 %vm10253_vm2, %v12157_v34 }
 0x28d   :  { %9535 = vmatmul.mubr.bf16.gmra.mxu0 %v4887_v53  ;;  %9540 = vmatprep.subr.bf16.mxu1 %v12157_v34 }
 0x28e   :  { %9590 = vmatprep.mubr.msk.bf16.mxu0 %vm10253_vm2, %v12157_v34 }
 0x290   :  { %9541 = vmatpush3.bf16.msra.mxu1 %v10058_v10 }
 0x291   :  { %9542 = vmatprep.subr.bf16.mxu1 %v12157_v34 }
 0x293   :  { %9487 = vmatmul.mubr.bf16.gmra.mxu1 %v4701_v24 }
 0x294   :  { %9543 = vmatpush3.bf16.msra.mxu1 %v10059_v39  ;;  %9490 = vmatprep.mubr.msk.bf16.mxu1 %vm10253_vm2, %v12157_v34 }
 0x295   :  { %10243 = vmatmul.mubr.msk.bf16.vlgmr.msra.gmra.mxu0 %vm12147_vm6, %v10242_v4  ;;  %9544 = vmatprep.subr.bf16.mxu1 %v12157_v34 }
 0x296   :  { %9594 = vmatprep.mubr.msk.bf16.mxu0 %vm10253_vm2, %v12157_v34 }
 0x298   :  { %9545 = vmatpush3.bf16.msra.mxu1 %v10060_v52 }
 0x299   :  { %9546 = vmatprep.subr.bf16.mxu1 %v12157_v34 }
 0x29b   :  { %9491 = vmatmul.mubr.bf16.gmra.mxu1 %v4702_v60 }
 0x29c   :  { %9547 = vmatpush3.bf16.msra.mxu1 %v10061_v11  ;;  %9494 = vmatprep.mubr.msk.bf16.mxu1 %vm10253_vm2, %v12157_v34 }
 0x29d   :  { %9595 = vmatmul.mubr.bf16.gmra.mxu0 %v5250_v38  ;;  %9548 = vmatprep.subr.bf16.mxu1 %v12157_v34  ;;  %v12656_v38 = vld [vmem:[%s13348_s6] ss:$0 sm:$0xff] }
 0x29e   :  { %9598 = vmatprep.mubr.msk.bf16.mxu0 %vm10253_vm2, %v12157_v34  ;;  %v10064_v34 = vld [vmem:[%s13347_s2 + $0x1c0] sm:$0xff]  }
 0x2a0   :  { %9549 = vmatpush3.bf16.msra.mxu1 %v10062_v22 }
 0x2a1   :  { %9550 = vmatprep.subr.bf16.mxu1 %v10210_v48 }
 0x2a3   :  { %10247 = vmatmul.mubr.msk.bf16.gmra.mxu1 %vm12352_vm7, %v10246_v35 }
 0x2a4   :  { %9498 = vmatprep.mubr.msk.bf16.mxu1 %vm10253_vm2, %v10210_v48  ;;  %9551 = vmatpush3.bf16.msra.mxu1 %v10063_v43 }
 0x2a5   :  { %9599 = vmatmul.mubr.bf16.gmra.mxu0 %v5251_v2  ;;  %9552 = vmatprep.subr.bf16.mxu1 %v10210_v48 }
 0x2a6   :  { %9602 = vmatprep.mubr.msk.bf16.mxu0 %vm10253_vm2, %v10210_v48 }
 0x2a8   :  { %9553 = vmatpush3.bf16.msra.mxu1 %v10064_v34 }
 0x2ab   :  { %9499 = vmatmul.mubr.bf16.gmra.mxu1 %v4704_v5 }
 0x2ac   :  { %9554 = vmatprep.mubr.msk.bf16.mxu1 %vm10253_vm2, %v10210_v48 }
 0x2ad   :  { %10251 = vmatmul.mubr.msk.bf16.gmra.mxu0 %vm12352_vm7, %v10250_v37 }
 0x2ae   :  { %9606 = vmatprep.mubr.msk.bf16.mxu0 %vm10253_vm2, %v10210_v48 }
 0x2b3   :  { %9555 = vmatmul.mubr.bf16.vlgmr.msra.gmra.mxu1 %v5066_v63 }
 0x2b4   :  { %9558 = vmatprep.mubr.msk.bf16.mxu1 %vm10253_vm2, %v10210_v48 }
 0x2b5   :  { %9607 = vmatmul.mubr.bf16.gmra.mxu0 %v5253_v51 }
 0x2b6   :  { %v12640_v56 = vpop.f32.mrf.mxu0 }
 0x2b8   :  { %v9376_v61 = vpop.f32.mrf.mxu0 }
 0x2ba   :  { %v12642_v23 = vpop.f32.mrf.mxu0 }
 0x2bb   :  { %9559 = vmatmul.mubr.bf16.gmra.mxu1 %v5067_v42 }
 0x2bc   :  { %9562 = vmatprep.mubr.msk.bf16.mxu1 %vm10253_vm2, %v10210_v48  ;;  %v9377_v27 = vpop.f32.mrf.mxu0 }
 0x2be   :  { %v3909_v13 = vpop.f32.mrf.mxu1 }
 0x2bf   :  { %v3910_v49 = vadd.f32 %v12656_v38, %v3909_v13 }
 0x2c0   :  { %v9304_v6 = vpop.f32.mrf.mxu1 }
 0x2c2   :  { %v3912_v45 = vpop.f32.mrf.mxu1 }
 0x2c3   :  { %9563 = vmatmul.mubr.bf16.gmra.mxu1 %v5068_v40  ;;  %v3913_v34 = vadd.f32 %v12656_v38, %v3912_v45 }
 0x2c4   :  { %9566 = vmatprep.mubr.msk.bf16.mxu1 %vm10253_vm2, %v10210_v48  ;;  %v9305_v8 = vpop.f32.mrf.mxu1 }
 0x2cb   :  { %9567 = vmatmul.mubr.bf16.gmra.mxu1 %v5069_v57 }
 0x2cc   :  { %9570 = vmatprep.mubr.msk.bf16.mxu1 %vm10253_vm2, %v10210_v48 }
 0x2d2   :  { %v3917_v33 = vpop.f32.mrf.mxu1 }
 0x2d3   :  { %v4263_v25 = vpop.f32.mrf.mxu0  ;;  %9571 = vmatmul.mubr.bf16.gmra.mxu1 %v5070_v58  ;;  %v3918_v20 = vadd.f32 %v12656_v38, %v3917_v33 }
 0x2d4   :  { %v9308_v28 = vpop.f32.mrf.mxu1 }
 0x2d5   :  { %v9380_v59 = vpop.f32.mrf.mxu0 }
 0x2d6   :  { %v3920_v47 = vpop.f32.mrf.mxu1 }
 0x2d7   :  { %v4266_v1 = vpop.f32.mrf.mxu0  ;;  %v3921_v42 = vadd.f32 %v12656_v38, %v3920_v47 }
 0x2d8   :  { %v9309_v18 = vpop.f32.mrf.mxu1 }
 0x2d9   :  { %v9381_v62 = vpop.f32.mrf.mxu0 }
 0x2da   :  { %v3925_v32 = vpop.f32.mrf.mxu1 }
 0x2db   :  { %v4271_v46 = vpop.f32.mrf.mxu0  ;;  %v3926_v40 = vadd.f32 %v12656_v38, %v3925_v32 }
 0x2dc   :  { %v9312_v31 = vpop.f32.mrf.mxu1 }
 0x2dd   :  { %v9384_v15 = vpop.f32.mrf.mxu0 }
 0x2de   :  { %v3928_v14 = vpop.f32.mrf.mxu1 }
 0x2df   :  { %v4274_v12 = vpop.f32.mrf.mxu0  ;;  %v3929_v9 = vadd.f32 %v12656_v38, %v3928_v14 }
 0x2e0   :  { %v9313_v53 = vpop.f32.mrf.mxu1 }
 0x2e1   :  { %v9385_v16 = vpop.f32.mrf.mxu0  ;;  %v10066_v53 = vld [vmem:[%s13349_s3 + $0x30] sm:$0xff]  }
 0x2eb   :  { %v3933_v10 = vpop.f32.mrf.mxu1 }
 0x2ec   :  { %v12647_v39 = vpop.f32.mrf.mxu0  ;;  %v3934_v18 = vadd.f32 %v12656_v38, %v3933_v10 }
 0x2ed   :  { %v9316_v24 = vpop.f32.mrf.mxu1 }
 0x2ee   :  { %v9388_v54 = vpop.f32.mrf.mxu0 }
 0x2ef   :  { %v3936_v4 = vpop.f32.mrf.mxu1 }
 0x2f0   :  { %v12649_v52 = vpop.f32.mrf.mxu0  ;;  %v3937_v16 = vadd.f32 %v12656_v38, %v3936_v4 }
 0x2f1   :  { %v9317_v44 = vpop.f32.mrf.mxu1 }
 0x2f2   :  { %v9389_v11 = vpop.f32.mrf.mxu0 }
 0x2f3   :  { %v12651_v60 = vpop.f32.mrf.mxu1 }
 0x2f4   :  { %v3942_v4 = vadd.f32 %v12656_v38, %v12651_v60  ;;  %v10070_v60 = vld [vmem:[%s13349_s3 + $0x70] sm:$0xff]  }
 0x2f5   :  { %v9320_v17 = vpop.f32.mrf.mxu1 }
 0x2f6   :  { %v10067_v17 = vld [vmem:[%s13349_s3 + $0x28] sm:$0xff]  }
 0x2f7   :  { %v12658_v22 = vpop.f32.mrf.mxu1 }
 0x2f9   :  { %v9321_v3 = vpop.f32.mrf.mxu1 }
 0x2fa   :  { %v10069_v3 = vld [vmem:[%s13349_s3 + $0x78] sm:$0xff]  }
 0x2fb   :  { %v4072_v48 = vpop.f32.mrf.mxu1  ;;  %9630 = vmatprep.subr.bf16.mxu0 %v10069_v3 }
 0x2fc   :  { %v12661_v43 = vadd.f32 %v4072_v48, %v3910_v49  ;;  %9631 = vmatpush3.bf16.msra.mxu0 %v10069_v3 }
 0x2fd   :  { %v12663_v2 = vpop.f32.mrf.mxu0  ;;  %v9340_v35 = vpop.f32.mrf.mxu1  ;;  %9632 = vmatprep.subr.bf16.mxu0 %v10070_v60 }
 0x2ff   :  { %v9392_v41 = vpop.f32.mrf.mxu0  ;;  %v4075_v5 = vpop.f32.mrf.mxu1 }
 0x300   :  { %v12666_v37 = vadd.f32 %v4075_v5, %v3913_v34  ;;  %v10068_v5 = vld [vmem:[%s13349_s3 + $0x20] sm:$0xff]   ;;  %9633 = vmatpush3.bf16.msra.mxu0 %v10070_v60 }
 0x301   :  { %v12668_v55 = vpop.f32.mrf.mxu0  ;;  %v9341_v30 = vpop.f32.mrf.mxu1 }
 0x303   :  { %v9393_v21 = vpop.f32.mrf.mxu0  ;;  %v4080_v63 = vpop.f32.mrf.mxu1 }
 0x304   :  { %v4123_v51 = vadd.f32 %v4080_v63, %v3918_v20 }
 0x305   :  { %v12671_v50 = vpop.f32.mrf.mxu0  ;;  %v9344_v36 = vpop.f32.mrf.mxu1 }
 0x306   :  { %v12674_v27 = vadd.f32 %v4263_v25, %v4123_v51 }
 0x307   :  { %v9448_v61 = vpop.f32.mrf.mxu0  ;;  %v4083_v29 = vpop.f32.mrf.mxu1 }
 0x308   :  { %v4124_v0 = vadd.f32 %v4083_v29, %v3921_v42  ;;  %v10071_v42 = vld [vmem:[%s13349_s3 + $0x18] sm:$0xff]  }
 0x309   :  { %v12676_v13 = vpop.f32.mrf.mxu0  ;;  %v9345_v6 = vpop.f32.mrf.mxu1 }
 0x30a   :  { %v12679_v8 = vadd.f32 %v4266_v1, %v4124_v0  ;;  %v10065_v1 = vld [vmem:[%s13349_s3 + $0x38] sm:$0xff]  }
 0x30b   :  { %v9449_v45 = vpop.f32.mrf.mxu0  ;;  %v4088_v26 = vpop.f32.mrf.mxu1  ;;  %9610 = vmatprep.subr.bf16.mxu1 %v10065_v1 }
 0x30c   :  { %v4125_v7 = vadd.f32 %v4088_v26, %v3926_v40  ;;  %9611 = vmatpush3.bf16.msra.mxu1 %v10065_v1  ;;  %v10073_v45 = vld [vmem:[%s13349_s3 + $0x10] sm:$0xff]  }
 0x30d   :  { %v12681_v57 = vpop.f32.mrf.mxu0  ;;  %v9348_v19 = vpop.f32.mrf.mxu1  ;;  %9612 = vmatprep.subr.bf16.mxu1 %v10066_v53 }
 0x30e   :  { %v12684_v33 = vadd.f32 %v4271_v46, %v4125_v7 }
 0x30f   :  { %v9452_v58 = vpop.f32.mrf.mxu0  ;;  %v4091_v25 = vpop.f32.mrf.mxu1 }
 0x310   :  { %v4126_v28 = vadd.f32 %v4091_v25, %v3929_v9  ;;  %9613 = vmatpush3.bf16.msra.mxu1 %v10066_v53  ;;  %v10075_v25 = vld [vmem:[%s13349_s3 + $0x8] sm:$0xff]  }
 0x311   :  { %v12686_v59 = vpop.f32.mrf.mxu0  ;;  %v9349_v47 = vpop.f32.mrf.mxu1  ;;  %9614 = vmatprep.subr.bf16.mxu1 %v10067_v17 }
 0x312   :  { %v12692_v32 = vadd.f32 %v4274_v12, %v4126_v28 }
 0x313   :  { %v9453_v62 = vpop.f32.mrf.mxu0  ;;  %v4096_v31 = vpop.f32.mrf.mxu1 }
 0x314   :  { %v4127_v15 = vadd.f32 %v4096_v31, %v3934_v18  ;;  %9615 = vmatpush3.bf16.msra.mxu1 %v10067_v17  ;;  %v10077_v62 = vld [vmem:[%s13349_s3] sm:$0xff]   ;;  %v10078_v31 = vld [vmem:[%s13349_s3 + $0x50] sm:$0xff]  }
 0x315   :  { %v12694_v14 = vpop.f32.mrf.mxu0  ;;  %v9352_v46 = vpop.f32.mrf.mxu1  ;;  %9616 = vmatprep.subr.bf16.mxu1 %v10068_v5 }
 0x316   :  { %v12701_v54 = vadd.f32 %v12647_v39, %v4127_v15  ;;  %v12784_v46 = vld [vmem:[%s13349_s3 + $0xb8] sm:$0xff]  }
 0x317   :  { %v9456_v24 = vpop.f32.mrf.mxu0  ;;  %v4099_v10 = vpop.f32.mrf.mxu1 }
 0x318   :  { %v4128_v12 = vadd.f32 %v4099_v10, %v3937_v16  ;;  %9617 = vmatpush3.bf16.msra.mxu1 %v10068_v5 }
 0x319   :  { %v12703_v44 = vpop.f32.mrf.mxu0  ;;  %v9353_v11 = vpop.f32.mrf.mxu1  ;;  %9618 = vmatprep.subr.bf16.mxu1 %v10071_v42 }
 0x31a   :  { %v12714_v49 = vadd.f32 %v12649_v52, %v4128_v12  ;;  %v3945_v52 = vadd.f32 %v12656_v38, %v12658_v22  ;;  %v10072_v38 = vld [vmem:[%s13349_s3 + $0x68] sm:$0xff]   ;;  %v10081_v11 = vld [vmem:[%s13349_s3 + $0x40] sm:$0xff]  }
 0x31b   :  { %v9457_v39 = vpop.f32.mrf.mxu0  ;;  %v4104_v48 = vpop.f32.mrf.mxu1  ;;  %9634 = vmatprep.subr.bf16.mxu0 %v10072_v38 }
 0x31c   :  { %v4129_v35 = vadd.f32 %v4104_v48, %v3942_v4  ;;  %9619 = vmatpush3.bf16.msra.mxu1 %v10071_v42  ;;  %9635 = vmatpush3.bf16.msra.mxu0 %v10072_v38 }
 0x31d   :  { %v12716_v34 = vpop.f32.mrf.mxu0  ;;  %v9356_v41 = vpop.f32.mrf.mxu1  ;;  %9620 = vmatprep.subr.bf16.mxu1 %v10073_v45 }
 0x31e   :  { %v12727_v20 = vadd.f32 %v12663_v2, %v4129_v35  ;;  %v4304_v2 = vadd.f32 %v12640_v56, %v12661_v43  ;;  %v10074_v56 = vld [vmem:[%s13349_s3 + $0x60] sm:$0xff]   ;;  %v12797_v41 = vld [vmem:[%s13349_s3 + $0xf8] sm:$0xff]  }
 0x31f   :  { %v9460_v30 = vpop.f32.mrf.mxu0  ;;  %v4107_v21 = vpop.f32.mrf.mxu1  ;;  %9636 = vmatprep.subr.bf16.mxu0 %v10074_v56 }
 0x320   :  { %v4130_v63 = vadd.f32 %v4107_v21, %v3945_v52  ;;  %9621 = vmatpush3.bf16.msra.mxu1 %v10073_v45  ;;  %9637 = vmatpush3.bf16.msra.mxu0 %v10074_v56 }
 0x321   :  { %v12729_v51 = vpop.f32.mrf.mxu0  ;;  %v9357_v36 = vpop.f32.mrf.mxu1  ;;  %9622 = vmatprep.subr.bf16.mxu1 %v10075_v25 }
 0x322   :  { %v12740_v61 = vadd.f32 %v12668_v55, %v4130_v63  ;;  %v4305_v55 = vadd.f32 %v12642_v23, %v12666_v37  ;;  %v10076_v23 = vld [vmem:[%s13349_s3 + $0x58] sm:$0xff]  }
 0x323   :  { %v9461_v22 = vpop.f32.mrf.mxu0  ;;  %v4438_v29 = vpop.f32.mrf.mxu1  ;;  %9638 = vmatprep.subr.bf16.mxu0 %v10076_v23 }
 0x324   :  { %v4487_v0 = vadd.f32 %v4438_v29, %v4304_v2  ;;  %9623 = vmatpush3.bf16.msra.mxu1 %v10075_v25  ;;  %9639 = vmatpush3.bf16.msra.mxu0 %v10076_v23 }
 0x325   :  { %v12742_v6 = vpop.f32.mrf.mxu0  ;;  %v9412_v40 = vpop.f32.mrf.mxu1  ;;  %9624 = vmatprep.subr.bf16.mxu1 %v10077_v62  ;;  %9640 = vmatprep.subr.bf16.mxu0 %v10078_v31 }
 0x326   :  { %v12753_v26 = vadd.f32 %v12671_v50, %v4487_v0 }
 0x327   :  { %v9464_v43 = vpop.f32.mrf.mxu0  ;;  %v4441_v7 = vpop.f32.mrf.mxu1 }
 0x328   :  { %v4488_v19 = vadd.f32 %v4441_v7, %v4305_v55  ;;  %9625 = vmatpush3.bf16.msra.mxu1 %v10077_v62  ;;  %9641 = vmatpush3.bf16.msra.mxu0 %v10078_v31 }
 0x329   :  { %v12755_v9 = vpop.f32.mrf.mxu0  ;;  %v9413_v58 = vpop.f32.mrf.mxu1  ;;  %9650 = vmatprep.subr.bf16.mxu1 %v12784_v46 }
 0x32a   :  { %v12764_v50 = vadd.f32 %v12676_v13, %v4488_v19 }
 0x32b   :  { %v9465_v37 = vpop.f32.mrf.mxu0  ;;  %v4446_v28 = vpop.f32.mrf.mxu1 }
 0x32c   :  { %v4489_v47 = vadd.f32 %v4446_v28, %v12674_v27  ;;  %v10079_v27 = vld [vmem:[%s13349_s3 + $0x48] sm:$0xff]  }
 0x32d   :  { %v12767_v1 = vpop.f32.mrf.mxu0  ;;  %v9416_v18 = vpop.f32.mrf.mxu1  ;;  %9642 = vmatprep.subr.bf16.mxu0 %v10079_v27 }
 0x32e   :  { %v12776_v15 = vadd.f32 %v12681_v57, %v4489_v47  ;;  %9643 = vmatpush3.bf16.msra.mxu0 %v10079_v27 }
 0x32f   :  { %v9520_v13 = vpop.f32.mrf.mxu0  ;;  %v4449_v53 = vpop.f32.mrf.mxu1  ;;  %9644 = vmatprep.subr.bf16.mxu0 %v10081_v11 }
 0x330   :  { %v4490_v16 = vadd.f32 %v4449_v53, %v12679_v8 }
 0x331   :  { %v4990_v24 = vpop.f32.mrf.mxu0  ;;  %v9417_v10 = vpop.f32.mrf.mxu1 }
 0x332   :  { %v4673_v12 = vadd.f32 %v12686_v59, %v4490_v16  ;;  %9645 = vmatpush3.bf16.msra.mxu0 %v10081_v11 }
 0x333   :  { %v9521_v57 = vpop.f32.mrf.mxu0  ;;  %v4454_v17 = vpop.f32.mrf.mxu1  ;;  %9670 = vmatprep.subr.bf16.mxu0 %v12797_v41 }
 0x334   :  { %v4491_v3 = vadd.f32 %v4454_v17, %v12684_v33 }
 0x335   :  { %v4995_v4 = vpop.f32.mrf.mxu0  ;;  %v9420_v8 = vpop.f32.mrf.mxu1 }
 0x336   :  { %v4674_v48 = vadd.f32 %v12694_v14, %v4491_v3 }
 0x337   :  { %v9524_v39 = vpop.f32.mrf.mxu0  ;;  %v4457_v35 = vpop.f32.mrf.mxu1 }
 0x338   :  { %v4492_v59 = vadd.f32 %v4457_v35, %v12692_v32 }
 0x339   :  { %v4998_v5 = vpop.f32.mrf.mxu0  ;;  %v9421_v60 = vpop.f32.mrf.mxu1 }
 0x33a   :  { %v4675_v52 = vadd.f32 %v12703_v44, %v4492_v59 }
 0x33b   :  { %v9525_v33 = vpop.f32.mrf.mxu0  ;;  %v4462_v30 = vpop.f32.mrf.mxu1 }
 0x33c   :  { %v4493_v21 = vadd.f32 %v4462_v30, %v12701_v54 }
 0x33d   :  { %v5003_v14 = vpop.f32.mrf.mxu0  ;;  %v9424_v63 = vpop.f32.mrf.mxu1 }
 0x33e   :  { %v4676_v42 = vadd.f32 %v12716_v34, %v4493_v21 }
 0x33f   :  { %v9528_v36 = vpop.f32.mrf.mxu0  ;;  %v4465_v38 = vpop.f32.mrf.mxu1 }
 0x340   :  { %v4494_v22 = vadd.f32 %v4465_v38, %v12714_v49 }
 0x341   :  { %v5006_v32 = vpop.f32.mrf.mxu0  ;;  %v9425_v2 = vpop.f32.mrf.mxu1 }
 0x342   :  { %v4677_v0 = vadd.f32 %v12729_v51, %v4494_v22 }
 0x343   :  { %v9529_v29 = vpop.f32.mrf.mxu0  ;;  %v4470_v40 = vpop.f32.mrf.mxu1 }
 0x344   :  { %v4495_v45 = vadd.f32 %v4470_v40, %v12727_v20 }
 0x345   :  { %v5011_v44 = vpop.f32.mrf.mxu0  ;;  %v9428_v56 = vpop.f32.mrf.mxu1 }
 0x346   :  { %v4678_v54 = vadd.f32 %v12742_v6, %v4495_v45 }
 0x347   :  { %v9532_v43 = vpop.f32.mrf.mxu0  ;;  %v4473_v55 = vpop.f32.mrf.mxu1 }
 0x348   :  { %v4496_v7 = vadd.f32 %v4473_v55, %v12740_v61 }
 0x349   :  { %v5014_v34 = vpop.f32.mrf.mxu0  ;;  %v9429_v19 = vpop.f32.mrf.mxu1 }
 0x34a   :  { %v4679_v49 = vadd.f32 %v12755_v9, %v4496_v7 }
 0x34b   :  { %v9533_v58 = vpop.f32.mrf.mxu0  ;;  %v4804_v25 = vpop.f32.mrf.mxu1 }
 0x34c   :  { %v4853_v23 = vadd.f32 %v4804_v25, %v12753_v26 }
 0x34d   :  { %v5019_v51 = vpop.f32.mrf.mxu0  ;;  %v9484_v37 = vpop.f32.mrf.mxu1 }
 0x34e   :  { %v5036_v20 = vadd.f32 %v12767_v1, %v4853_v23 }
 0x34f   :  { %v9536_v28 = vpop.f32.mrf.mxu0  ;;  %v4807_v47 = vpop.f32.mrf.mxu1 }
 0x350   :  { %v4854_v18 = vadd.f32 %v4807_v47, %v12764_v50 }
 0x351   :  { %v5022_v6 = vpop.f32.mrf.mxu0  ;;  %v9485_v62 = vpop.f32.mrf.mxu1 }
 0x352   :  { %v5037_v61 = vadd.f32 %v4990_v24, %v4854_v18 }
 0x353   :  { %v9537_v31 = vpop.f32.mrf.mxu0  ;;  %v4812_v13 = vpop.f32.mrf.mxu1 }
 0x354   :  { %v4855_v27 = vadd.f32 %v4812_v13, %v12776_v15 }
 0x355   :  { %v5353_v53 = vpop.f32.mrf.mxu0  ;;  %v9488_v9 = vpop.f32.mrf.mxu1 }
 0x356   :  { %v5038_v10 = vadd.f32 %v4995_v4, %v4855_v27 }
 0x357   :  { %v9592_v16 = vpop.f32.mrf.mxu0  ;;  %v4815_v26 = vpop.f32.mrf.mxu1 }
 0x358   :  { %v4856_v57 = vadd.f32 %v4815_v26, %v4673_v12 }
 0x359   :  { %v5356_v11 = vpop.f32.mrf.mxu0  ;;  %v9489_v17 = vpop.f32.mrf.mxu1 }
 0x35a   :  { %v5039_v1 = vadd.f32 %v4998_v5, %v4856_v57 }
 0x35b   :  { %v9593_v3 = vpop.f32.mrf.mxu0  ;;  %v4820_v8 = vpop.f32.mrf.mxu1 }
 0x35c   :  { %v4857_v39 = vadd.f32 %v4820_v8, %v4674_v48 }
 0x35d   :  { %v5361_v50 = vpop.f32.mrf.mxu0  ;;  %v9492_v35 = vpop.f32.mrf.mxu1 }
 0x35e   :  { %v5040_v60 = vadd.f32 %v5003_v14, %v4857_v39 }
 0x35f   :  { %v9596_v59 = vpop.f32.mrf.mxu0  ;;  %v4823_v24 = vpop.f32.mrf.mxu1 }
 0x360   :  { %v4858_v33 = vadd.f32 %v4823_v24, %v4675_v52 }
 0x361   :  { %v5364_v30 = vpop.f32.mrf.mxu0  ;;  %v9493_v15 = vpop.f32.mrf.mxu1 }
 0x362   :  { %v5041_v63 = vadd.f32 %v5006_v32, %v4858_v33 }
 0x363   :  { %v9597_v21 = vpop.f32.mrf.mxu0  ;;  %v4828_v36 = vpop.f32.mrf.mxu1 }
 0x364   :  { %v4859_v4 = vadd.f32 %v4828_v36, %v4676_v42 }
 0x365   :  { %v5369_v38 = vpop.f32.mrf.mxu0  ;;  %v9496_v12 = vpop.f32.mrf.mxu1 }
 0x366   :  { %v12814_v2 = vadd.f32 %v5011_v44, %v4859_v4 }
 0x367   :  { %v9600_v22 = vpop.f32.mrf.mxu0  ;;  %v4831_v5 = vpop.f32.mrf.mxu1 }
 0x368   :  { %v4860_v29 = vadd.f32 %v4831_v5, %v4677_v0 }
 0x369   :  { %v5372_v48 = vpop.f32.mrf.mxu0  ;;  %v9497_v40 = vpop.f32.mrf.mxu1 }
 0x36a   :  { %v12816_v56 = vadd.f32 %v5014_v34, %v4860_v29 }
 0x36b   :  { %v9601_v45 = vpop.f32.mrf.mxu0  ;;  %v4836_v14 = vpop.f32.mrf.mxu1 }
 0x36c   :  { %v4861_v52 = vadd.f32 %v4836_v14, %v4678_v54 }
 0x36d   :  { %v5377_v43 = vpop.f32.mrf.mxu0  ;;  %v9500_v55 = vpop.f32.mrf.mxu1 }
 0x36e   :  { %v12818_v32 = vadd.f32 %v5019_v51, %v4861_v52 }
 0x36f   :  { %v9604_v7 = vpop.f32.mrf.mxu0  ;;  %v4839_v42 = vpop.f32.mrf.mxu1 }
 0x370   :  { %v4862_v19 = vadd.f32 %v4839_v42, %v4679_v49 }
 0x371   :  { %v12820_v58 = vpop.f32.mrf.mxu0  ;;  %v9501_v44 = vpop.f32.mrf.mxu1 }
 0x372   :  { %v12822_v23 = vadd.f32 %v5022_v6, %v4862_v19 }
 0x373   :  { %v9605_v25 = vpop.f32.mrf.mxu0  ;;  %v5170_v0 = vpop.f32.mrf.mxu1 }
 0x374   :  { %v5219_v37 = vadd.f32 %v5170_v0, %v5036_v20 }
 0x375   :  { %v12824_v28 = vpop.f32.mrf.mxu0  ;;  %v9556_v34 = vpop.f32.mrf.mxu1 }
 0x376   :  { %v5402_v47 = vadd.f32 %v5353_v53, %v5219_v37 }
 0x377   :  { %v9608_v54 = vpop.f32.mrf.mxu0  ;;  %v5173_v18 = vpop.f32.mrf.mxu1 }
 0x378   :  { %v5412_v62 = vmax.f32 %v5402_v47, 0.0  ;;  %v5220_v31 = vadd.f32 %v5173_v18, %v5037_v61 }
 0x379   :  { %v12826_v51 = vpop.f32.mrf.mxu0  ;;  %v9557_v13 = vpop.f32.mrf.mxu1 }
 0x37a   :  { %5422 = vst [vmem:[#allocation6] sm:$0xff] %v5412_v62  ;;  %v5403_v49 = vadd.f32 %v5356_v11, %v5220_v31 }
 0x37b   :  { %v9609_v27 = vpop.f32.mrf.mxu0  ;;  %v5178_v9 = vpop.f32.mrf.mxu1 }
 0x37c   :  { %v5413_v16 = vmax.f32 %v5403_v49, 0.0  ;;  %v5221_v6 = vadd.f32 %v5178_v9, %v5038_v10 }
 0x37d   :  { %v9560_v26 = vpop.f32.mrf.mxu1 }
 0x37e   :  { %5423 = vst [vmem:[#allocation6 + $0x8] sm:$0xff] %v5413_v16  ;;  %v5404_v20 = vadd.f32 %v5361_v50, %v5221_v6 }
 0x37f   :  { %v5181_v57 = vpop.f32.mrf.mxu1 }
 0x380   :  { %v5414_v17 = vmax.f32 %v5404_v20, 0.0  ;;  %v5222_v3 = vadd.f32 %v5181_v57, %v5039_v1 }
 0x381   :  { %v9561_v53 = vpop.f32.mrf.mxu1  ;;  %v5434_v11 = vld [vmem:[#allocation6] ss:$2 sm:$0xf]  ;;  %v5436_v33 = vld [vmem:[#allocation6 + $0x1] ss:$2 sm:$0xf] }
 0x382   :  { %5424 = vst [vmem:[#allocation6 + $0x10] sm:$0xff] %v5414_v17  ;;  %v5405_v8 = vadd.f32 %v5364_v30, %v5222_v3  ;;  %v5441_v12 = vmax.f32 %v5434_v11, %v5436_v33 }
 0x383   :  { %v5186_v39 = vpop.f32.mrf.mxu1 }
 0x384   :  { %v5415_v61 = vmax.f32 %v5405_v8, 0.0  ;;  %v5223_v35 = vadd.f32 %v5186_v39, %v5040_v60 }
 0x385   :  { %v9564_v59 = vpop.f32.mrf.mxu1 }
 0x386   :  { %5425 = vst [vmem:[#allocation6 + $0x18] sm:$0xff] %v5415_v61  ;;  %v5406_v24 = vadd.f32 %v5369_v38, %v5223_v35 }
 0x387   :  { %v5189_v15 = vpop.f32.mrf.mxu1 }
 0x388   :  { %v5416_v21 = vmax.f32 %v5406_v24, 0.0  ;;  %v5224_v10 = vadd.f32 %v5189_v15, %v5041_v63 }
 0x389   :  { %v5438_v36 = vld [vmem:[#allocation6 + $0xa] ss:$2 sm:$0xf]  ;;  %v5440_v4 = vld [vmem:[#allocation6 + $0xb] ss:$2 sm:$0xf]  ;;  %v9565_v50 = vpop.f32.mrf.mxu1 }
 0x38a   :  { %v5442_v22 = vmax.f32 %v5438_v36, %v5440_v4  ;;  %5426 = vst [vmem:[#allocation6 + $0x20] sm:$0xff] %v5416_v21  ;;  %v5407_v1 = vadd.f32 %v5372_v48, %v5224_v10 }
 0x38b   :  { %v5194_v5 = vpop.f32.mrf.mxu1 }
 0x38c   :  { %v5417_v30 = vmax.f32 %v5407_v1, 0.0  ;;  %v5225_v29 = vadd.f32 %v5194_v5, %v12814_v2  ;;  %v5443_v60 = vmax.f32 %v5441_v12, %v5442_v22 }
 0x38d   :  { %v9568_v40 = vpop.f32.mrf.mxu1  ;;  %v5452_v14 = vld [vmem:[#allocation6 + $0x14] ss:$2 sm:$0xf]  ;;  %v5454_v52 = vld [vmem:[#allocation6 + $0x15] ss:$2 sm:$0xf] }
 0x38e   :  { %5427 = vst [vmem:[#allocation6 + $0x28] sm:$0xff] %v5417_v30  ;;  %v5408_v38 = vadd.f32 %v5377_v43, %v5225_v29  ;;  %v5445_v45 = vrot.slane %v5443_v60, 7  ;;  %v5459_v25 = vmax.f32 %v5452_v14, %v5454_v52  ;;  %v10082_v60 = vld [vmem:[%s13349_s3 + $0xb0] sm:$0xff]  }
 0x38f   :  { %v5197_v63 = vpop.f32.mrf.mxu1 }
 0x390   :  { %v5418_v55 = vmax.f32 %v5408_v38, 0.0  ;;  %v5226_v7 = vadd.f32 %v5197_v63, %v12816_v56  ;;  %v5447_v42 = vsel %vm3658_vm3, 0.0, %v5445_v45  ;;  %v10083_v38 = vld [vmem:[%s13349_s3 + $0xa8] sm:$0xff]  }
 0x391   :  { %v5456_v19 = vld [vmem:[#allocation6 + $0x1e] ss:$2 sm:$0xf]  ;;  %v5458_v48 = vld [vmem:[#allocation6 + $0x1f] ss:$2 sm:$0xf]  ;;  %v9569_v44 = vpop.f32.mrf.mxu1 }
 0x392   :  { %v5460_v0 = vmax.f32 %v5456_v19, %v5458_v48  ;;  %5428 = vst [vmem:[#allocation6 + $0x30] sm:$0xff] %v5418_v55  ;;  %v5409_v2 = vadd.f32 %v12820_v58, %v5226_v7  ;;  %v5449_v43 = vsel %vm5448_vm8, %v5447_v42, 0.0  ;;  %v10086_v55 = vld [vmem:[%s13349_s3 + $0xf0] sm:$0xff]   ;;  %v10088_v42 = vld [vmem:[%s13349_s3 + $0xe8] sm:$0xff]   ;;  %v10087_v19 = vld [vmem:[%s13349_s3 + $0x98] sm:$0xff]  }
 0x393   :  { %v5202_v37 = vpop.f32.mrf.mxu1  ;;  %5450 = vst [vmem:[#allocation3 + $0x6] sm:$0x3f] %v5449_v43  ;;  %v10090_v48 = vld [vmem:[%s13349_s3 + $0xe0] sm:$0xff]   ;;  %v10092_v44 = vld [vmem:[%s13349_s3 + $0xd8] sm:$0xff]   ;;  %v10095_v43 = vld [vmem:[%s13349_s3 + $0xc8] sm:$0xff]  }
 0x394   :  { %v5419_v34 = vmax.f32 %v5409_v2, 0.0  ;;  %v5227_v47 = vadd.f32 %v5202_v37, %v12818_v32  ;;  %v5461_v54 = vmax.f32 %v5459_v25, %v5460_v0  ;;  %v10091_v25 = vld [vmem:[%s13349_s3 + $0x88] sm:$0xff]   ;;  %v10094_v0 = vld [vmem:[%s13349_s3 + $0xd0] sm:$0xff]   ;;  %v10093_v2 = vld [vmem:[%s13349_s3 + $0x80] sm:$0xff]  }
 0x395   :  { %v9572_v18 = vpop.f32.mrf.mxu1  ;;  %v5469_v32 = vld [vmem:[#allocation6 + $0x28] ss:$2 sm:$0xf]  ;;  %v5471_v6 = vld [vmem:[#allocation6 + $0x29] ss:$2 sm:$0xf] }
 0x396   :  { %5429 = vst [vmem:[#allocation6 + $0x38] sm:$0xff] %v5419_v34  ;;  %v5410_v56 = vadd.f32 %v12824_v28, %v5227_v47  ;;  %v5463_v62 = vrot.slane %v5461_v54, 7  ;;  %v5476_v28 = vmax.f32 %v5469_v32, %v5471_v6  ;;  %v10096_v37 = vld [vmem:[%s13349_s3 + $0x138] sm:$0xff]   ;;  %v10101_v32 = vld [vmem:[%s13349_s3 + $0x120] sm:$0xff]   ;;  %v10104_v6 = vld [vmem:[%s13349_s3 + $0x168] sm:$0xff]  }
 0x397   :  { %v5205_v31 = vpop.f32.mrf.mxu1 }
 0x398   :  { %v5420_v13 = vmax.f32 %v5410_v56, 0.0  ;;  %v5228_v49 = vadd.f32 %v5205_v31, %v12822_v23  ;;  %v5465_v27 = vsel %vm3658_vm3, 0.0, %v5463_v62  ;;  %v10097_v56 = vld [vmem:[%s13349_s3 + $0xc0] sm:$0xff]   ;;  %v10098_v62 = vld [vmem:[%s13349_s3 + $0x130] sm:$0xff]  }
 0x399   :  { %v9573_v58 = vpop.f32.mrf.mxu1  ;;  %v5466_v9 = vsel %vm5448_vm8, %v5465_v27, 0.0  ;;  %v10099_v27 = vld [vmem:[%s13349_s3 + $0x128] sm:$0xff]  }
 0x39a   :  { %5430 = vst [vmem:[#allocation6 + $0x40] sm:$0xff] %v5420_v13  ;;  %v5411_v16 = vadd.f32 %v12826_v51, %v5228_v49  ;;  %5467 = vst [vmem:[#allocation3 + $0xc] sm:$0x3f] %v5466_v9  ;;  %v5503_v53 = vld [vmem:[#allocation3] sm:$0xff]  ;;  %v10100_v13 = vld [vmem:[%s13349_s3 + $0x178] sm:$0xff]  }
 0x39b   :  { %v5629_v39 = vld [vmem:[#allocation3 + $0x1] sm:$0xff] }
 0x39c   :  { %v5421_v26 = vmax.f32 %v5411_v16, 0.0  ;;  %v5756_v29 = vld [vmem:[#allocation3 + $0x2] sm:$0xff] }
 0x39d   :  { %v5473_v20 = vld [vmem:[#allocation6 + $0x32] ss:$2 sm:$0xf]  ;;  %v5475_v57 = vld [vmem:[#allocation6 + $0x33] ss:$2 sm:$0xf] }
 0x39e   :  { %v5477_v17 = vmax.f32 %v5473_v20, %v5475_v57  ;;  %5431 = vst [vmem:[#allocation6 + $0x48] sm:$0xff] %v5421_v26  ;;  %v10102_v9 = vld [vmem:[%s13349_s3 + $0x170] sm:$0xff]   ;;  %v10103_v26 = vld [vmem:[%s13349_s3 + $0x118] sm:$0xff]   ;;  %v10106_v20 = vld [vmem:[%s13349_s3 + $0x160] sm:$0xff]  }
 0x39f   :  { %v10105_v57 = vld [vmem:[%s13349_s3 + $0x110] sm:$0xff]  }
 0x3a0   :  { %v5478_v3 = vmax.f32 %v5476_v28, %v5477_v17  ;;  %v10108_v28 = vld [vmem:[%s13349_s3 + $0x158] sm:$0xff]   ;;  %v10107_v17 = vld [vmem:[%s13349_s3 + $0x108] sm:$0xff]  }
 0x3a1   :  { %v12839_v8 = vld [vmem:[#allocation3 + $0x8] sm:$0xff] }
 0x3a2   :  { %v5480_v23 = vrot.slane %v5478_v3, 7  ;;  %v5630_v61 = vld [vmem:[#allocation3 + $0x9] sm:$0xff]  ;;  %v5506_v51 = vpack.c.bf16 %v12839_v8, %v5503_v53  ;;  %v10110_v3 = vld [vmem:[%s13349_s3 + $0x150] sm:$0xff]  }
 0x3a3   :  { %v5486_v35 = vld [vmem:[#allocation6 + $0x3c] ss:$2 sm:$0xf]  ;;  %v5488_v59 = vld [vmem:[#allocation6 + $0x3d] ss:$2 sm:$0xf]  ;;  %v5632_v24 = vpack.c.bf16 %v5630_v61, %v5629_v39 }
 0x3a4   :  { %v5482_v11 = vsel %vm3658_vm3, 0.0, %v5480_v23  ;;  %9626 = vmatprep.mubr.bf16.mxu1 %v5506_v51  ;;  %v5493_v21 = vmax.f32 %v5486_v35, %v5488_v59  ;;  %v5757_v1 = vld [vmem:[#allocation3 + $0xa] sm:$0xff]  ;;  %v10111_v23 = vld [vmem:[%s13349_s3 + $0x148] sm:$0xff]  }
 0x3a5   :  { %v5490_v33 = vld [vmem:[#allocation6 + $0x46] ss:$2 sm:$0xf]  ;;  %v5492_v15 = vld [vmem:[#allocation6 + $0x47] ss:$2 sm:$0xf]  ;;  %9646 = vmatprep.mubr.bf16.mxu0 %v5632_v24  ;;  %v5759_v40 = vpack.c.bf16 %v5757_v1, %v5756_v29 }
 0x3a6   :  { %v5494_v10 = vmax.f32 %v5490_v33, %v5492_v15  ;;  %v5483_v36 = vsel %vm5448_vm8, %v5482_v11, 0.0  ;;  %v5883_v63 = vld [vmem:[#allocation3 + $0x6] sm:$0xff]  ;;  %v10109_v53 = vld [vmem:[%s13349_s3 + $0x100] sm:$0xff]   ;;  %v10120_v1 = vld [vmem:[%s13349_s3 + $0x1e8] sm:$0xff]  }
 0x3a7   :  { %5484 = vst [vmem:[#allocation3 + $0x12] sm:$0x3f] %v5483_v36  ;;  %v6010_v18 = vld [vmem:[#allocation3 + $0x7] sm:$0xff]  ;;  %v10113_v51 = vld [vmem:[%s13349_s3 + $0x140] sm:$0xff]  }
 0x3a8   :  { %v5495_v4 = vmax.f32 %v5493_v21, %v5494_v10  ;;  %v10114_v24 = vld [vmem:[%s13349_s3 + $0x1b0] sm:$0xff]   ;;  %v10116_v33 = vld [vmem:[%s13349_s3 + $0x1f8] sm:$0xff]   ;;  %v10115_v21 = vld [vmem:[%s13349_s3 + $0x1a8] sm:$0xff]  }
 0x3a9   :  { %v10121_v29 = vld [vmem:[%s13349_s3 + $0x190] sm:$0xff]  }
 0x3aa   :  { %v5497_v50 = vrot.slane %v5495_v4, 7 }
 0x3ac   :  { %v5499_v12 = vsel %vm3658_vm3, 0.0, %v5497_v50  ;;  %v10118_v50 = vld [vmem:[%s13349_s3 + $0x1f0] sm:$0xff]  }
 0x3ad   :  { %v5500_v22 = vsel %vm5448_vm8, %v5499_v12, 0.0 }
 0x3ae   :  { %5501 = vst [vmem:[#allocation3 + $0x18] sm:$0x3f] %v5500_v22  ;;  %v12846_v5 = vld [vmem:[#allocation3 + $0x10] sm:$0xff] }
 0x3af   :  { %v5507_v30 = vpack.c.bf16 %v12846_v5, %v12846_v5  ;;  %v12857_v45 = vld [vmem:[#allocation3 + $0xe] sm:$0xff]  ;;  %v6140_v16 = vpack.c.bf16 %v12846_v5, %v12839_v8 }
 0x3b0   :  { %v5886_v7 = vpack.c.bf16 %v12857_v45, %v5883_v63  ;;  %v6011_v47 = vld [vmem:[#allocation3 + $0xf] sm:$0xff] }
 0x3b1   :  { %9627 = vmatmul.mubr.bf16.vlgmr.msra.gmra.mxu1 %v5507_v30  ;;  %v6013_v31 = vpack.c.bf16 %v6011_v47, %v6010_v18  ;;  %v10112_v8 = vld [vmem:[%s13349_s3 + $0x1b8] sm:$0xff]   ;;  %v10117_v22 = vld [vmem:[%s13349_s3 + $0x1a0] sm:$0xff]  }
 0x3b2   :  { %9651 = vmatpush3.bf16.msra.mxu1 %v12784_v46  ;;  %9666 = vmatprep.mubr.bf16.mxu1 %v5759_v40  ;;  %v10085_v46 = vld [vmem:[%s13349_s3 + $0xa0] sm:$0xff]   ;;  %v10119_v5 = vld [vmem:[%s13349_s3 + $0x198] sm:$0xff]   ;;  %v10123_v40 = vld [vmem:[%s13349_s3 + $0x188] sm:$0xff]  }
 0x3b3   :  { %9652 = vmatprep.subr.bf16.mxu1 %v10082_v60  ;;  %v6264_v59 = vld [vmem:[#allocation3 + $0xc] sm:$0xff] }
 0x3b4   :  { %v6391_v4 = vld [vmem:[#allocation3 + $0xd] sm:$0xff] }
 0x3b5   :  { %v5631_v14 = vld [vmem:[#allocation3 + $0x11] sm:$0xff]  ;;  %v10128_v63 = vld [vmem:[%s13349_s3 + $0x238] sm:$0xff]  }
 0x3b6   :  { %9653 = vmatpush3.bf16.msra.mxu1 %v10082_v60  ;;  %v5633_v52 = vpack.c.bf16 %v5631_v14, %v5631_v14  ;;  %v5758_v34 = vld [vmem:[#allocation3 + $0x12] sm:$0xff]  ;;  %v10124_v60 = vld [vmem:[%s13349_s3 + $0x1d8] sm:$0xff]  }
 0x3b7   :  { %9654 = vmatprep.subr.bf16.mxu1 %v10083_v38  ;;  %v5760_v54 = vpack.c.bf16 %v5758_v34, %v5758_v34  ;;  %v12906_v49 = vld [vmem:[#allocation3 + $0x16] sm:$0xff]  ;;  %v6520_v34 = vld [vmem:[#allocation3 + $0x1e] sm:$0xff] }
 0x3b8   :  { %9647 = vmatmul.mubr.bf16.vlgmr.msra.gmra.mxu0 %v5633_v52  ;;  %v5887_v58 = vpack.c.bf16 %v12906_v49, %v12906_v49  ;;  %v6012_v39 = vld [vmem:[#allocation3 + $0x17] sm:$0xff]  ;;  %v6522_v47 = vpack.c.bf16 %v6520_v34, %v6520_v34 }
 0x3b9   :  { %9671 = vmatpush3.bf16.msra.mxu0 %v12797_v41  ;;  %9686 = vmatprep.mubr.bf16.mxu0 %v5886_v7  ;;  %v10089_v41 = vld [vmem:[%s13349_s3 + $0x90] sm:$0xff]   ;;  %v6265_v61 = vld [vmem:[#allocation3 + $0x14] sm:$0xff]  ;;  %v6014_v35 = vpack.c.bf16 %v6012_v39, %v6012_v39 }
 0x3ba   :  { %9655 = vmatpush3.bf16.msra.mxu1 %v10083_v38  ;;  %9672 = vmatprep.subr.bf16.mxu0 %v10086_v55  ;;  %v6267_v11 = vpack.c.bf16 %v6265_v61, %v6264_v59  ;;  %v6139_v15 = vld [vmem:[#allocation3 + $0x18] sm:$0xff]  ;;  %v10122_v30 = vld [vmem:[%s13349_s3 + $0x1e0] sm:$0xff]   ;;  %v10126_v38 = vld [vmem:[%s13349_s3 + $0x1d0] sm:$0xff]  }
 0x3bb   :  { %9656 = vmatprep.subr.bf16.mxu1 %v10085_v46  ;;  %v6392_v10 = vld [vmem:[#allocation3 + $0x15] sm:$0xff]  ;;  %v6141_v36 = vpack.c.bf16 %v6139_v15, %v6139_v15  ;;  %v10145_v61 = vld [vmem:[%s13351_s4 + $0x18] sm:$0xff]   ;;  %v10147_v59 = vld [vmem:[%s13351_s4 + $0x10] sm:$0xff]  }
 0x3bc   :  { %v6394_v12 = vpack.c.bf16 %v6392_v10, %v6391_v4  ;;  %v10125_v14 = vld [vmem:[%s13349_s3 + $0x180] sm:$0xff]   ;;  %v10127_v52 = vld [vmem:[%s13349_s3 + $0x1c8] sm:$0xff]  }
 0x3bd   :  { %9673 = vmatpush3.bf16.msra.mxu0 %v10086_v55  ;;  %v6266_v55 = vld [vmem:[#allocation3 + $0x1c] sm:$0xff]  ;;  %v10144_v39 = vld [vmem:[%s13351_s4 + $0x60] sm:$0xff]  }
 0x3be   :  { %9657 = vmatpush3.bf16.msra.mxu1 %v10085_v46  ;;  %9674 = vmatprep.subr.bf16.mxu0 %v10088_v42  ;;  %v6268_v7 = vpack.c.bf16 %v6266_v55, %v6266_v55  ;;  %v10129_v46 = vld [vmem:[%s13349_s3 + $0x1c0] sm:$0xff]  }
 0x3bf   :  { %9658 = vmatprep.subr.bf16.mxu1 %v10087_v19  ;;  %v10152_v15 = vld [vmem:[%s13351_s4 + $0x40] sm:$0xff]  }
 0x3c1   :  { %9675 = vmatpush3.bf16.msra.mxu0 %v10088_v42  ;;  %v10130_v42 = vld [vmem:[%s13349_s3 + $0x230] sm:$0xff]  }
 0x3c2   :  { %9659 = vmatpush3.bf16.msra.mxu1 %v10087_v19  ;;  %9676 = vmatprep.subr.bf16.mxu0 %v10090_v48  ;;  %v6521_v19 = vpack.c.bf16 %v12906_v49, %v12857_v45  ;;  %v10132_v45 = vld [vmem:[%s13349_s3 + $0x220] sm:$0xff]   ;;  %v10138_v49 = vld [vmem:[%s13351_s4 + $0x78] sm:$0xff]  }
 0x3c3   :  { %9660 = vmatprep.subr.bf16.mxu1 %v10089_v41 }
 0x3c5   :  { %9677 = vmatpush3.bf16.msra.mxu0 %v10090_v48  ;;  %v6393_v48 = vld [vmem:[#allocation3 + $0x1d] sm:$0xff] }
 0x3c6   :  { %9661 = vmatpush3.bf16.msra.mxu1 %v10089_v41  ;;  %9678 = vmatprep.subr.bf16.mxu0 %v10092_v44  ;;  %v10131_v41 = vld [vmem:[%s13349_s3 + $0x228] sm:$0xff]  }
 0x3c7   :  { %9662 = vmatprep.subr.bf16.mxu1 %v10091_v25 }
 0x3c9   :  { %9679 = vmatpush3.bf16.msra.mxu0 %v10092_v44  ;;  %v6395_v44 = vpack.c.bf16 %v6393_v48, %v6393_v48 }
 0x3ca   :  { %9663 = vmatpush3.bf16.msra.mxu1 %v10091_v25  ;;  %9680 = vmatprep.subr.bf16.mxu0 %v10094_v0  ;;  %v13010_v25 = vld [vmem:[#allocation2] sm:$0xff] }
 0x3cb   :  { %9664 = vmatprep.subr.bf16.mxu1 %v10093_v2 }
 0x3cd   :  { %9681 = vmatpush3.bf16.msra.mxu0 %v10094_v0  ;;  %v10133_v0 = vld [vmem:[%s13349_s3 + $0x218] sm:$0xff]  }
 0x3ce   :  { %9665 = vmatpush3.bf16.msra.mxu1 %v10093_v2  ;;  %9682 = vmatprep.subr.bf16.mxu0 %v10095_v43  ;;  %v10134_v2 = vld [vmem:[%s13349_s3 + $0x210] sm:$0xff]  }
 0x3cf   :  { %9690 = vmatprep.subr.bf16.mxu1 %v10096_v37 }
 0x3d1   :  { %9667 = vmatmul.mubr.bf16.vlgmr.msra.gmra.mxu1 %v5760_v54  ;;  %9683 = vmatpush3.bf16.msra.mxu0 %v10095_v43  ;;  %v10135_v43 = vld [vmem:[%s13349_s3 + $0x208] sm:$0xff]  }
 0x3d2   :  { %9691 = vmatpush3.bf16.msra.mxu1 %v10096_v37  ;;  %9706 = vmatprep.mubr.bf16.mxu1 %v6013_v31  ;;  %v10136_v37 = vld [vmem:[%s13349_s3 + $0x200] sm:$0xff]   ;;  %v10137_v31 = vld [vmem:[%s13351_s4 + $0x38] sm:$0xff]  }
 0x3d3   :  { %9684 = vmatprep.subr.bf16.mxu0 %v10097_v56  ;;  %9692 = vmatprep.subr.bf16.mxu1 %v10098_v62 }
 0x3d5   :  { %9685 = vmatpush3.bf16.msra.mxu0 %v10097_v56  ;;  %v8083_v56 = vld [vmem:[%s13350_s7] ss:$0 sm:$0xff] }
 0x3d6   :  { %9693 = vmatpush3.bf16.msra.mxu1 %v10098_v62  ;;  %9710 = vmatprep.subr.bf16.mxu0 %v10100_v13 }
 0x3d7   :  { %9694 = vmatprep.subr.bf16.mxu1 %v10099_v27 }
 0x3d8   :  { %9687 = vmatmul.mubr.bf16.vlgmr.msra.gmra.mxu0 %v5887_v58 }
 0x3d9   :  { %9711 = vmatpush3.bf16.msra.mxu0 %v10100_v13  ;;  %9726 = vmatprep.mubr.bf16.mxu0 %v6140_v16 }
 0x3da   :  { %9695 = vmatpush3.bf16.msra.mxu1 %v10099_v27  ;;  %9712 = vmatprep.subr.bf16.mxu0 %v10102_v9 }
 0x3db   :  { %9696 = vmatprep.subr.bf16.mxu1 %v10101_v32 }
 0x3dd   :  { %9713 = vmatpush3.bf16.msra.mxu0 %v10102_v9 }
 0x3de   :  { %9697 = vmatpush3.bf16.msra.mxu1 %v10101_v32  ;;  %9714 = vmatprep.subr.bf16.mxu0 %v10104_v6 }
 0x3df   :  { %9698 = vmatprep.subr.bf16.mxu1 %v10103_v26 }
 0x3e1   :  { %9715 = vmatpush3.bf16.msra.mxu0 %v10104_v6  ;;  %v10139_v6 = vld [vmem:[%s13351_s4 + $0x30] sm:$0xff]  }
 0x3e2   :  { %9699 = vmatpush3.bf16.msra.mxu1 %v10103_v26  ;;  %9716 = vmatprep.subr.bf16.mxu0 %v10106_v20  ;;  %v10140_v26 = vld [vmem:[%s13351_s4 + $0x70] sm:$0xff]  }
 0x3e3   :  { %9700 = vmatprep.subr.bf16.mxu1 %v10105_v57 }
 0x3e5   :  { %9717 = vmatpush3.bf16.msra.mxu0 %v10106_v20 }
 0x3e6   :  { %9701 = vmatpush3.bf16.msra.mxu1 %v10105_v57  ;;  %9718 = vmatprep.subr.bf16.mxu0 %v10108_v28 }
 0x3e7   :  { %9702 = vmatprep.subr.bf16.mxu1 %v10107_v17 }
 0x3e9   :  { %9719 = vmatpush3.bf16.msra.mxu0 %v10108_v28 }
 0x3ea   :  { %9703 = vmatpush3.bf16.msra.mxu1 %v10107_v17  ;;  %9720 = vmatprep.subr.bf16.mxu0 %v10110_v3 }
 0x3eb   :  { %9704 = vmatprep.subr.bf16.mxu1 %v10109_v53 }
 0x3ed   :  { %9721 = vmatpush3.bf16.msra.mxu0 %v10110_v3  ;;  %v10141_v3 = vld [vmem:[%s13351_s4 + $0x28] sm:$0xff]  }
 0x3ee   :  { %9705 = vmatpush3.bf16.msra.mxu1 %v10109_v53  ;;  %9722 = vmatprep.subr.bf16.mxu0 %v10111_v23  ;;  %v10142_v53 = vld [vmem:[%s13351_s4 + $0x68] sm:$0xff]  }
 0x3ef   :  { %9730 = vmatprep.subr.bf16.mxu1 %v10112_v8 }
 0x3f1   :  { %9707 = vmatmul.mubr.bf16.vlgmr.msra.gmra.mxu1 %v6014_v35  ;;  %9723 = vmatpush3.bf16.msra.mxu0 %v10111_v23  ;;  %v10146_v35 = vld [vmem:[%s13351_s4 + $0x58] sm:$0xff]  }
 0x3f2   :  { %9731 = vmatpush3.bf16.msra.mxu1 %v10112_v8  ;;  %9746 = vmatprep.mubr.bf16.mxu1 %v6267_v11  ;;  %v10143_v8 = vld [vmem:[%s13351_s4 + $0x20] sm:$0xff]   ;;  %v10150_v11 = vld [vmem:[%s13351_s4 + $0x48] sm:$0xff]  }
 0x3f3   :  { %9724 = vmatprep.subr.bf16.mxu0 %v10113_v51  ;;  %9732 = vmatprep.subr.bf16.mxu1 %v10114_v24 }
 0x3f5   :  { %9725 = vmatpush3.bf16.msra.mxu0 %v10113_v51  ;;  %v10148_v51 = vld [vmem:[%s13351_s4 + $0x50] sm:$0xff]  }
 0x3f6   :  { %9733 = vmatpush3.bf16.msra.mxu1 %v10114_v24  ;;  %9750 = vmatprep.subr.bf16.mxu0 %v10116_v33  ;;  %v10149_v24 = vld [vmem:[%s13351_s4 + $0x8] sm:$0xff]  }
 0x3f7   :  { %9734 = vmatprep.subr.bf16.mxu1 %v10115_v21 }
 0x3f8   :  { %9727 = vmatmul.mubr.bf16.vlgmr.msra.gmra.mxu0 %v6141_v36 }
 0x3f9   :  { %9751 = vmatpush3.bf16.msra.mxu0 %v10116_v33  ;;  %9766 = vmatprep.mubr.bf16.mxu0 %v6394_v12  ;;  %v10151_v33 = vld [vmem:[%s13351_s4] sm:$0xff]  }
 0x3fa   :  { %9735 = vmatpush3.bf16.msra.mxu1 %v10115_v21  ;;  %9752 = vmatprep.subr.bf16.mxu0 %v10118_v50 }
 0x3fb   :  { %9736 = vmatprep.subr.bf16.mxu1 %v10117_v22 }
 0x3fd   :  { %9753 = vmatpush3.bf16.msra.mxu0 %v10118_v50 }
 0x3fe   :  { %9737 = vmatpush3.bf16.msra.mxu1 %v10117_v22  ;;  %9754 = vmatprep.subr.bf16.mxu0 %v10120_v1 }
 0x3ff   :  { %9738 = vmatprep.subr.bf16.mxu1 %v10119_v5 }
 0x401   :  { %9755 = vmatpush3.bf16.msra.mxu0 %v10120_v1 }
 0x402   :  { %9739 = vmatpush3.bf16.msra.mxu1 %v10119_v5  ;;  %9756 = vmatprep.subr.bf16.mxu0 %v10122_v30 }
 0x403   :  { %9740 = vmatprep.subr.bf16.mxu1 %v10121_v29 }
 0x405   :  { %9757 = vmatpush3.bf16.msra.mxu0 %v10122_v30 }
 0x406   :  { %9741 = vmatpush3.bf16.msra.mxu1 %v10121_v29  ;;  %9758 = vmatprep.subr.bf16.mxu0 %v10124_v60 }
 0x407   :  { %9742 = vmatprep.subr.bf16.mxu1 %v10123_v40 }
 0x409   :  { %9759 = vmatpush3.bf16.msra.mxu0 %v10124_v60 }
 0x40a   :  { %9743 = vmatpush3.bf16.msra.mxu1 %v10123_v40  ;;  %9760 = vmatprep.subr.bf16.mxu0 %v10126_v38 }
 0x40b   :  { %9744 = vmatprep.subr.bf16.mxu1 %v10125_v14 }
 0x40d   :  { %9761 = vmatpush3.bf16.msra.mxu0 %v10126_v38 }
 0x40e   :  { %9745 = vmatpush3.bf16.msra.mxu1 %v10125_v14  ;;  %9762 = vmatprep.subr.bf16.mxu0 %v10127_v52 }
 0x40f   :  { %9770 = vmatprep.subr.bf16.mxu1 %v10128_v63 }
 0x411   :  { %9747 = vmatmul.mubr.bf16.vlgmr.msra.gmra.mxu1 %v6268_v7  ;;  %9763 = vmatpush3.bf16.msra.mxu0 %v10127_v52 }
 0x412   :  { %9771 = vmatpush3.bf16.msra.mxu1 %v10128_v63  ;;  %9786 = vmatprep.mubr.bf16.mxu1 %v6521_v19 }
 0x413   :  { %9764 = vmatprep.subr.bf16.mxu0 %v10129_v46  ;;  %9772 = vmatprep.subr.bf16.mxu1 %v10130_v42 }
 0x415   :  { %9765 = vmatpush3.bf16.msra.mxu0 %v10129_v46 }
 0x416   :  { %9773 = vmatpush3.bf16.msra.mxu1 %v10130_v42  ;;  %9790 = vmatprep.subr.bf16.mxu0 %v13010_v25 }
 0x417   :  { %9774 = vmatprep.subr.bf16.mxu1 %v10131_v41 }
 0x418   :  { %9767 = vmatmul.mubr.bf16.vlgmr.msra.gmra.mxu0 %v6395_v44 }
 0x419   :  { %9806 = vmatprep.mubr.msk.bf16.mxu0 %vm10253_vm2, %v13010_v25  ;;  %9791 = vmatpush3.bf16.msra.mxu0 %v10137_v31 }
 0x41a   :  { %9775 = vmatpush3.bf16.msra.mxu1 %v10131_v41  ;;  %9792 = vmatprep.subr.bf16.mxu0 %v13010_v25 }
 0x41b   :  { %9776 = vmatprep.subr.bf16.mxu1 %v10132_v45 }
 0x41d   :  { %9793 = vmatpush3.bf16.msra.mxu0 %v10139_v6 }
 0x41e   :  { %9777 = vmatpush3.bf16.msra.mxu1 %v10132_v45  ;;  %9794 = vmatprep.subr.bf16.mxu0 %v13010_v25 }
 0x41f   :  { %9778 = vmatprep.subr.bf16.mxu1 %v10133_v0 }
 0x421   :  { %9795 = vmatpush3.bf16.msra.mxu0 %v10141_v3 }
 0x422   :  { %9779 = vmatpush3.bf16.msra.mxu1 %v10133_v0  ;;  %9796 = vmatprep.subr.bf16.mxu0 %v13010_v25 }
 0x423   :  { %9780 = vmatprep.subr.bf16.mxu1 %v10134_v2 }
 0x425   :  { %9797 = vmatpush3.bf16.msra.mxu0 %v10143_v8 }
 0x426   :  { %9781 = vmatpush3.bf16.msra.mxu1 %v10134_v2  ;;  %9798 = vmatprep.subr.bf16.mxu0 %v13010_v25 }
 0x427   :  { %9782 = vmatprep.subr.bf16.mxu1 %v10135_v43 }
 0x429   :  { %9799 = vmatpush3.bf16.msra.mxu0 %v10145_v61 }
 0x42a   :  { %9783 = vmatpush3.bf16.msra.mxu1 %v10135_v43  ;;  %9800 = vmatprep.subr.bf16.mxu0 %v13010_v25 }
 0x42b   :  { %9784 = vmatprep.subr.bf16.mxu1 %v10136_v37 }
 0x42d   :  { %9801 = vmatpush3.bf16.msra.mxu0 %v10147_v59 }
 0x42e   :  { %9785 = vmatpush3.bf16.msra.mxu1 %v10136_v37  ;;  %9802 = vmatprep.subr.bf16.mxu0 %v13010_v25 }
 0x42f   :  { %9810 = vmatprep.subr.bf16.mxu1 %v13010_v25 }
 0x431   :  { %9787 = vmatmul.mubr.bf16.vlgmr.msra.gmra.mxu1 %v6522_v47  ;;  %9803 = vmatpush3.bf16.msra.mxu0 %v10149_v24 }
 0x432   :  { %9826 = vmatprep.mubr.msk.bf16.mxu1 %vm10253_vm2, %v13010_v25  ;;  %9811 = vmatpush3.bf16.msra.mxu1 %v10138_v49 }
 0x433   :  { %9812 = vmatprep.subr.bf16.mxu1 %v13010_v25  ;;  %9804 = vmatprep.subr.bf16.mxu0 %v13010_v25 }
 0x435   :  { %9805 = vmatpush3.bf16.msra.mxu0 %v10151_v33 }
 0x436   :  { %9813 = vmatpush3.bf16.msra.mxu1 %v10140_v26  ;;  %9830 = vmatprep.subr.bf16.mxu0 %v13010_v25 }
 0x437   :  { %9814 = vmatprep.subr.bf16.mxu1 %v13010_v25 }
 0x43a   :  { %9815 = vmatpush3.bf16.msra.mxu1 %v10142_v53 }
 0x43b   :  { %9816 = vmatprep.subr.bf16.mxu1 %v13010_v25 }
 0x43e   :  { %9817 = vmatpush3.bf16.msra.mxu1 %v10144_v39 }
 0x43f   :  { %9818 = vmatprep.subr.bf16.mxu1 %v13010_v25 }
 0x442   :  { %9819 = vmatpush3.bf16.msra.mxu1 %v10146_v35 }
 0x443   :  { %9820 = vmatprep.subr.bf16.mxu1 %v13010_v25 }
 0x446   :  { %9821 = vmatpush3.bf16.msra.mxu1 %v10148_v51 }
 0x447   :  { %9822 = vmatprep.subr.bf16.mxu1 %v13010_v25 }
 0x44a   :  { %9823 = vmatpush3.bf16.msra.mxu1 %v10150_v11 }
 0x44b   :  { %9824 = vmatprep.subr.bf16.mxu1 %v13010_v25 }
 0x44e   :  { %9825 = vmatpush3.bf16.msra.mxu1 %v10152_v15 }
 0x44f   :  { %9850 = vmatprep.subr.bf16.mxu1 %v13010_v25 }
 0x471   :  { %v9628_v54 = vpop.f32.mrf.mxu1 }
 0x472   :  { %v5621_v13 = vadd.f32 %v9628_v54, %v8083_v56 }
 0x473   :  { %v5612_v18 = vpop.f32.mrf.mxu1 }
 0x474   :  { %v5613_v58 = vadd.f32 %v8083_v56, %v5612_v18 }
 0x475   :  { %v9629_v62 = vpop.f32.mrf.mxu1 }
 0x477   :  { %v5615_v16 = vpop.f32.mrf.mxu1 }
 0x478   :  { %v9648_v27 = vpop.f32.mrf.mxu0  ;;  %v5616_v28 = vadd.f32 %v8083_v56, %v5615_v16 }
 0x479   :  { %v5752_v9 = vadd.f32 %v9648_v27, %v5621_v13 }
 0x47a   :  { %v5733_v32 = vpop.f32.mrf.mxu0 }
 0x47b   :  { %v5750_v20 = vadd.f32 %v5733_v32, %v5613_v58 }
 0x47c   :  { %v9649_v57 = vpop.f32.mrf.mxu0 }
 0x47e   :  { %v5736_v17 = vpop.f32.mrf.mxu0 }
 0x47f   :  { %v5751_v23 = vadd.f32 %v5736_v17, %v5616_v28 }
 0x491   :  { %v9668_v21 = vpop.f32.mrf.mxu1 }
 0x492   :  { %v5879_v10 = vadd.f32 %v9668_v21, %v5752_v9 }
 0x493   :  { %v5860_v36 = vpop.f32.mrf.mxu1 }
 0x494   :  { %v5877_v4 = vadd.f32 %v5860_v36, %v5750_v20 }
 0x495   :  { %v9669_v50 = vpop.f32.mrf.mxu1 }
 0x497   :  { %v5863_v29 = vpop.f32.mrf.mxu1 }
 0x498   :  { %v9688_v12 = vpop.f32.mrf.mxu0  ;;  %v5878_v2 = vadd.f32 %v5863_v29, %v5751_v23  ;;  %v10153_v29 = vld [vmem:[%s13351_s4 + $0xb8] sm:$0xff]  }
 0x499   :  { %v6006_v22 = vadd.f32 %v9688_v12, %v5879_v10 }
 0x49a   :  { %v5987_v1 = vpop.f32.mrf.mxu0 }
 0x49b   :  { %v6004_v5 = vadd.f32 %v5987_v1, %v5877_v4 }
 0x49c   :  { %v9689_v30 = vpop.f32.mrf.mxu0 }
 0x49e   :  { %v5990_v14 = vpop.f32.mrf.mxu0 }
 0x49f   :  { %v6005_v34 = vadd.f32 %v5990_v14, %v5878_v2  ;;  %v10167_v2 = vld [vmem:[%s13351_s4 + $0x80] sm:$0xff]  }
 0x4b1   :  { %v9708_v60 = vpop.f32.mrf.mxu1 }
 0x4b2   :  { %v6133_v0 = vadd.f32 %v9708_v60, %v6006_v22 }
 0x4b3   :  { %v6114_v40 = vpop.f32.mrf.mxu1 }
 0x4b4   :  { %v6131_v43 = vadd.f32 %v6114_v40, %v6004_v5 }
 0x4b5   :  { %v9709_v38 = vpop.f32.mrf.mxu1 }
 0x4b6   :  { %v10154_v38 = vld [vmem:[%s13351_s4 + $0xf8] sm:$0xff]  }
 0x4b7   :  { %v6117_v7 = vpop.f32.mrf.mxu1 }
 0x4b8   :  { %v9728_v52 = vpop.f32.mrf.mxu0  ;;  %v6132_v56 = vadd.f32 %v6117_v7, %v6005_v34  ;;  %v10158_v7 = vld [vmem:[%s13351_s4 + $0xe8] sm:$0xff]  }
 0x4b9   :  { %v6260_v37 = vadd.f32 %v9728_v52, %v6133_v0  ;;  %v10155_v52 = vld [vmem:[%s13351_s4 + $0xb0] sm:$0xff]   ;;  %v10166_v0 = vld [vmem:[%s13351_s4 + $0xc8] sm:$0xff]  }
 0x4ba   :  { %v6241_v63 = vpop.f32.mrf.mxu0 }
 0x4bb   :  { %v6258_v47 = vadd.f32 %v6241_v63, %v6131_v43  ;;  %v10156_v63 = vld [vmem:[%s13351_s4 + $0xf0] sm:$0xff]   ;;  %v10168_v43 = vld [vmem:[%s13351_s4 + $0xc0] sm:$0xff]  }
 0x4bc   :  { %v9729_v55 = vpop.f32.mrf.mxu0 }
 0x4bd   :  { %v10157_v55 = vld [vmem:[%s13351_s4 + $0xa8] sm:$0xff]  }
 0x4be   :  { %v6244_v48 = vpop.f32.mrf.mxu0 }
 0x4bf   :  { %v6259_v49 = vadd.f32 %v6244_v48, %v6132_v56  ;;  %v10162_v48 = vld [vmem:[%s13351_s4 + $0xd8] sm:$0xff]  }
 0x4d1   :  { %v9748_v46 = vpop.f32.mrf.mxu1 }
 0x4d2   :  { %v6387_v54 = vadd.f32 %v9748_v46, %v6260_v37  ;;  %v10159_v46 = vld [vmem:[%s13351_s4 + $0xa0] sm:$0xff]  }
 0x4d3   :  { %v6368_v42 = vpop.f32.mrf.mxu1 }
 0x4d4   :  { %v6385_v62 = vadd.f32 %v6368_v42, %v6258_v47  ;;  %v10160_v42 = vld [vmem:[%s13351_s4 + $0xe0] sm:$0xff]   ;;  %v10169_v47 = vld [vmem:[%s13351_s4 + $0x138] sm:$0xff]  }
 0x4d5   :  { %v9749_v19 = vpop.f32.mrf.mxu1 }
 0x4d6   :  { %v10161_v19 = vld [vmem:[%s13351_s4 + $0x98] sm:$0xff]  }
 0x4d7   :  { %v6371_v18 = vpop.f32.mrf.mxu1 }
 0x4d8   :  { %v9768_v41 = vpop.f32.mrf.mxu0  ;;  %v6386_v32 = vadd.f32 %v6371_v18, %v6259_v49  ;;  %v10170_v18 = vld [vmem:[%s13351_s4 + $0x178] sm:$0xff]   ;;  %v10174_v49 = vld [vmem:[%s13351_s4 + $0x168] sm:$0xff]  }
 0x4d9   :  { %v6514_v31 = vadd.f32 %v9768_v41, %v6387_v54  ;;  %v10163_v41 = vld [vmem:[%s13351_s4 + $0x90] sm:$0xff]  }
 0x4da   :  { %v6495_v44 = vpop.f32.mrf.mxu0 }
 0x4db   :  { %v6512_v27 = vadd.f32 %v6495_v44, %v6385_v62  ;;  %v10164_v44 = vld [vmem:[%s13351_s4 + $0xd0] sm:$0xff]  }
 0x4dc   :  { %v9769_v45 = vpop.f32.mrf.mxu0  ;;  %v10171_v62 = vld [vmem:[%s13351_s4 + $0x130] sm:$0xff]  }
 0x4dd   :  { %v10165_v45 = vld [vmem:[%s13351_s4 + $0x88] sm:$0xff]  }
 0x4de   :  { %v6498_v9 = vpop.f32.mrf.mxu0 }
 0x4df   :  { %v6513_v57 = vadd.f32 %v6498_v9, %v6386_v32  ;;  %v10177_v9 = vld [vmem:[%s13351_s4 + $0x118] sm:$0xff]   ;;  %v10179_v32 = vld [vmem:[%s13351_s4 + $0x110] sm:$0xff]  }
 0x4f1   :  { %v9788_v13 = vpop.f32.mrf.mxu1 }
 0x4f2   :  { %v6641_v58 = vadd.f32 %v9788_v13, %v6514_v31  ;;  %v10172_v31 = vld [vmem:[%s13351_s4 + $0x170] sm:$0xff]   ;;  %v10173_v13 = vld [vmem:[%s13351_s4 + $0x128] sm:$0xff]  }
 0x4f3   :  { %v6622_v16 = vpop.f32.mrf.mxu1 }
 0x4f4   :  { %v6644_v6 = vmax.f32 %v6641_v58, 0.0  ;;  %v6639_v26 = vadd.f32 %v6622_v16, %v6512_v27  ;;  %v10175_v27 = vld [vmem:[%s13351_s4 + $0x120] sm:$0xff]   ;;  %v10178_v16 = vld [vmem:[%s13351_s4 + $0x158] sm:$0xff]  }
 0x4f5   :  { %v9789_v20 = vpop.f32.mrf.mxu1  ;;  %v10176_v58 = vld [vmem:[%s13351_s4 + $0x160] sm:$0xff]  }
 0x4f6   :  { %6647 = vst [vmem:[#allocation7 + $0x10] sm:$0xff] %v6644_v6  ;;  %v6642_v28 = vmax.f32 %v6639_v26, 0.0  ;;  %v10180_v6 = vld [vmem:[%s13351_s4 + $0x150] sm:$0xff]   ;;  %v10181_v26 = vld [vmem:[%s13351_s4 + $0x108] sm:$0xff]  }
 0x4f7   :  { %v6625_v17 = vpop.f32.mrf.mxu1  ;;  %v10182_v20 = vld [vmem:[%s13351_s4 + $0x148] sm:$0xff]  }
 0x4f8   :  { %6645 = vst [vmem:[#allocation7] sm:$0xff] %v6642_v28  ;;  %v6640_v3 = vadd.f32 %v6625_v17, %v6513_v57  ;;  %v10183_v57 = vld [vmem:[%s13351_s4 + $0x100] sm:$0xff]  }
 0x4f9   :  { %v10184_v28 = vld [vmem:[%s13351_s4 + $0x140] sm:$0xff]  }
 0x4fa   :  { %v6643_v53 = vmax.f32 %v6640_v3, 0.0 }
 0x4fc   :  { %6646 = vst [vmem:[#allocation7 + $0x8] sm:$0xff] %v6643_v53  ;;  %v10185_v53 = vld [vmem:[%s13351_s4 + $0x1b8] sm:$0xff]  }
 0x4fd   :  { %v6672_v39 = vld [vmem:[#allocation7 + $0x12] ss:$2 sm:$0x3]  ;;  %v6674_v61 = vld [vmem:[#allocation7 + $0x13] ss:$2 sm:$0x3] }
 0x4fe   :  { %v6676_v15 = vmax.f32 %v6672_v39, %v6674_v61  ;;  %v10187_v61 = vld [vmem:[%s13351_s4 + $0x1b0] sm:$0xff]  }
 0x4ff   :  { %v6650_v23 = vld [vmem:[#allocation7] ss:$2 sm:$0x3]  ;;  %v6652_v8 = vld [vmem:[#allocation7 + $0x1] ss:$2 sm:$0x3] }
 0x500   :  { %v6657_v51 = vmax.f32 %v6650_v23, %v6652_v8  ;;  %v10186_v8 = vld [vmem:[%s13351_s4 + $0x1f8] sm:$0xff]  }
 0x503   :  { %v6654_v35 = vld [vmem:[#allocation7 + $0x6] ss:$2 sm:$0x3]  ;;  %v6656_v59 = vld [vmem:[#allocation7 + $0x7] ss:$2 sm:$0x3] }
 0x504   :  { %v6658_v24 = vmax.f32 %v6654_v35, %v6656_v59  ;;  %v6668_v11 = vld [vmem:[#allocation7 + $0xc] ss:$2 sm:$0x3]  ;;  %v6670_v33 = vld [vmem:[#allocation7 + $0xd] ss:$2 sm:$0x3] }
 0x505   :  { %v6675_v21 = vmax.f32 %v6668_v11, %v6670_v33  ;;  %v10188_v35 = vld [vmem:[%s13351_s4 + $0x1f0] sm:$0xff]   ;;  %v10189_v59 = vld [vmem:[%s13351_s4 + $0x1a8] sm:$0xff]   ;;  %v10192_v11 = vld [vmem:[%s13351_s4 + $0x1e0] sm:$0xff]  }
 0x506   :  { %v6659_v10 = vmax.f32 %v6657_v51, %v6658_v24  ;;  %v10190_v51 = vld [vmem:[%s13351_s4 + $0x1e8] sm:$0xff]   ;;  %v10191_v24 = vld [vmem:[%s13351_s4 + $0x1a0] sm:$0xff]   ;;  %v10193_v33 = vld [vmem:[%s13351_s4 + $0x198] sm:$0xff]  }
 0x507   :  { %v6677_v36 = vmax.f32 %v6675_v21, %v6676_v15  ;;  %v10194_v15 = vld [vmem:[%s13351_s4 + $0x1d8] sm:$0xff]   ;;  %v10195_v21 = vld [vmem:[%s13351_s4 + $0x190] sm:$0xff]  }
 0x508   :  { %v6661_v4 = vrot.slane %v6659_v10, 7  ;;  %v10196_v10 = vld [vmem:[%s13351_s4 + $0x1d0] sm:$0xff]  }
 0x509   :  { %v6679_v50 = vrot.slane %v6677_v36, 7  ;;  %v10197_v36 = vld [vmem:[%s13351_s4 + $0x188] sm:$0xff]  }
 0x50a   :  { %v6663_v12 = vsel %vm3658_vm3, 0.0, %v6661_v4  ;;  %v10198_v4 = vld [vmem:[%s13351_s4 + $0x1c8] sm:$0xff]  }
 0x50b   :  { %v6665_v22 = vsel %vm6664_vm9, %v6663_v12, 0.0  ;;  %v6681_v1 = vsel %vm3658_vm3, 0.0, %v6679_v50  ;;  %v10199_v50 = vld [vmem:[%s13351_s4 + $0x180] sm:$0xff]  }
 0x50c   :  { %6666 = vst [vmem:[#allocation4 + $0x4] sm:$0xf] %v6665_v22  ;;  %v6682_v5 = vsel %vm6664_vm9, %v6681_v1, 0.0  ;;  %v10200_v12 = vld [vmem:[%s13351_s4 + $0x1c0] sm:$0xff]  }
 0x50d   :  { %6683 = vst [vmem:[#allocation4 + $0x8] sm:$0xf] %v6682_v5  ;;  %v10201_v5 = vld [vmem:[%s13351_s4 + $0x238] sm:$0xff]  }
 0x513   :  { %v6685_v30 = vld [vmem:[#allocation4] sm:$0xff] }
 0x514   :  { %v6686_v60 = vpack.c.bf16 %v6685_v30, %v6685_v30  ;;  %v6798_v40 = vld [vmem:[#allocation4 + $0x1] sm:$0xff]  ;;  %v7458_v1 = vld [vmem:[#allocation4 + $0x9] sm:$0xff] }
 0x515   :  { %v6799_v14 = vpack.c.bf16 %v6798_v40, %v6798_v40  ;;  %v6908_v37 = vld [vmem:[#allocation4 + $0x2] sm:$0xff] }
 0x516   :  { %9807 = vmatmul.mubr.bf16.vlgmr.msra.gmra.mxu0 %v6686_v60  ;;  %v7018_v34 = vld [vmem:[#allocation4 + $0x4] sm:$0xff]  ;;  %v6909_v54 = vpack.c.bf16 %v6908_v37, %v6908_v37  ;;  %v10202_v60 = vld [vmem:[%s13351_s4 + $0x230] sm:$0xff]  }
 0x517   :  { %9827 = vmatmul.mubr.bf16.vlgmr.msra.gmra.mxu1 %v6799_v14  ;;  %9831 = vmatpush3.bf16.msra.mxu0 %v10153_v29  ;;  %v7019_v56 = vpack.c.bf16 %v7018_v34, %v7018_v34  ;;  %v7128_v17 = vld [vmem:[#allocation4 + $0x5] sm:$0xff]  ;;  %v7459_v29 = vpack.c.bf16 %v7458_v1, %v7458_v1  ;;  %v10205_v14 = vld [vmem:[%s13351_s4 + $0x218] sm:$0xff]  }
 0x518   :  { %9851 = vmatpush3.bf16.msra.mxu1 %v10154_v38  ;;  %9832 = vmatprep.subr.bf16.mxu0 %v13010_v25  ;;  %v7238_v3 = vld [vmem:[#allocation4 + $0x6] sm:$0xff]  ;;  %v7129_v23 = vpack.c.bf16 %v7128_v17, %v7128_v17 }
 0x519   :  { %9852 = vmatprep.subr.bf16.mxu1 %v13010_v25  ;;  %9846 = vmatprep.mubr.msk.bf16.mxu0 %vm10253_vm2, %v13010_v25  ;;  %v7239_v39 = vpack.c.bf16 %v7238_v3, %v7238_v3  ;;  %v7348_v22 = vld [vmem:[#allocation4 + $0x8] sm:$0xff]  ;;  %v10204_v38 = vld [vmem:[%s13351_s4 + $0x220] sm:$0xff]  }
 0x51a   :  { %9866 = vmatprep.mubr.msk.bf16.mxu1 %vm10253_vm2, %v13010_v25  ;;  %v7349_v30 = vpack.c.bf16 %v7348_v22, %v7348_v22  ;;  %v10203_v40 = vld [vmem:[%s13351_s4 + $0x228] sm:$0xff]  }
 0x51b   :  { %9833 = vmatpush3.bf16.msra.mxu0 %v10155_v52  ;;  %v10206_v52 = vld [vmem:[%s13351_s4 + $0x210] sm:$0xff]  }
 0x51c   :  { %9853 = vmatpush3.bf16.msra.mxu1 %v10156_v63  ;;  %9834 = vmatprep.subr.bf16.mxu0 %v13010_v25  ;;  %v10207_v63 = vld [vmem:[%s13351_s4 + $0x208] sm:$0xff]  }
 0x51d   :  { %9854 = vmatprep.subr.bf16.mxu1 %v13010_v25 }
 0x51f   :  { %9835 = vmatpush3.bf16.msra.mxu0 %v10157_v55  ;;  %v10208_v55 = vld [vmem:[%s13351_s4 + $0x200] sm:$0xff]  }
 0x520   :  { %9855 = vmatpush3.bf16.msra.mxu1 %v10158_v7  ;;  %9836 = vmatprep.subr.bf16.mxu0 %v13010_v25  ;;  %v7568_v7 = vld [vmem:[#allocation4 + $0xa] sm:$0xff] }
 0x521   :  { %9856 = vmatprep.subr.bf16.mxu1 %v13010_v25 }
 0x523   :  { %9837 = vmatpush3.bf16.msra.mxu0 %v10159_v46  ;;  %v7569_v46 = vpack.c.bf16 %v7568_v7, %v7568_v7 }
 0x524   :  { %9857 = vmatpush3.bf16.msra.mxu1 %v10160_v42  ;;  %9838 = vmatprep.subr.bf16.mxu0 %v13010_v25  ;;  %v8284_v42 = vld [vmem:[%s13352_s8] ss:$0 sm:$0xff] }
 0x525   :  { %9858 = vmatprep.subr.bf16.mxu1 %v13010_v25 }
 0x527   :  { %9839 = vmatpush3.bf16.msra.mxu0 %v10161_v19 }
 0x528   :  { %9859 = vmatpush3.bf16.msra.mxu1 %v10162_v48  ;;  %9840 = vmatprep.subr.bf16.mxu0 %v13010_v25 }
 0x529   :  { %9860 = vmatprep.subr.bf16.mxu1 %v13010_v25 }
 0x52b   :  { %9841 = vmatpush3.bf16.msra.mxu0 %v10163_v41 }
 0x52c   :  { %9861 = vmatpush3.bf16.msra.mxu1 %v10164_v44  ;;  %9842 = vmatprep.subr.bf16.mxu0 %v13010_v25 }
 0x52d   :  { %9862 = vmatprep.subr.bf16.mxu1 %v13010_v25 }
 0x52f   :  { %9843 = vmatpush3.bf16.msra.mxu0 %v10165_v45 }
 0x530   :  { %9863 = vmatpush3.bf16.msra.mxu1 %v10166_v0  ;;  %9844 = vmatprep.subr.bf16.mxu0 %v13010_v25 }
 0x531   :  { %9864 = vmatprep.subr.bf16.mxu1 %v13010_v25 }
 0x533   :  { %9845 = vmatpush3.bf16.msra.mxu0 %v10167_v2 }
 0x534   :  { %9865 = vmatpush3.bf16.msra.mxu1 %v10168_v43  ;;  %9870 = vmatprep.subr.bf16.mxu0 %v13010_v25 }
 0x535   :  { %9890 = vmatprep.subr.bf16.mxu1 %v13010_v25 }
 0x536   :  { %9847 = vmatmul.mubr.bf16.vlgmr.msra.gmra.mxu0 %v6909_v54 }
 0x537   :  { %9867 = vmatmul.mubr.bf16.vlgmr.msra.gmra.mxu1 %v7019_v56  ;;  %9871 = vmatpush3.bf16.msra.mxu0 %v10169_v47 }
 0x538   :  { %9891 = vmatpush3.bf16.msra.mxu1 %v10170_v18  ;;  %9872 = vmatprep.subr.bf16.mxu0 %v13010_v25 }
 0x539   :  { %9892 = vmatprep.subr.bf16.mxu1 %v13010_v25  ;;  %9886 = vmatprep.mubr.msk.bf16.mxu0 %vm10253_vm2, %v13010_v25 }
 0x53a   :  { %9906 = vmatprep.mubr.msk.bf16.mxu1 %vm10253_vm2, %v13010_v25 }
 0x53b   :  { %9873 = vmatpush3.bf16.msra.mxu0 %v10171_v62 }
 0x53c   :  { %9893 = vmatpush3.bf16.msra.mxu1 %v10172_v31  ;;  %9874 = vmatprep.subr.bf16.mxu0 %v13010_v25 }
 0x53d   :  { %9894 = vmatprep.subr.bf16.mxu1 %v13010_v25 }
 0x53f   :  { %9875 = vmatpush3.bf16.msra.mxu0 %v10173_v13 }
 0x540   :  { %9895 = vmatpush3.bf16.msra.mxu1 %v10174_v49  ;;  %9876 = vmatprep.subr.bf16.mxu0 %v13010_v25 }
 0x541   :  { %9896 = vmatprep.subr.bf16.mxu1 %v13010_v25 }
 0x543   :  { %9877 = vmatpush3.bf16.msra.mxu0 %v10175_v27 }
 0x544   :  { %9897 = vmatpush3.bf16.msra.mxu1 %v10176_v58  ;;  %9878 = vmatprep.subr.bf16.mxu0 %v13010_v25 }
 0x545   :  { %9898 = vmatprep.subr.bf16.mxu1 %v13010_v25 }
 0x547   :  { %9879 = vmatpush3.bf16.msra.mxu0 %v10177_v9 }
 0x548   :  { %9899 = vmatpush3.bf16.msra.mxu1 %v10178_v16  ;;  %9880 = vmatprep.subr.bf16.mxu0 %v13010_v25 }
 0x549   :  { %9900 = vmatprep.subr.bf16.mxu1 %v13010_v25 }
 0x54b   :  { %9881 = vmatpush3.bf16.msra.mxu0 %v10179_v32 }
 0x54c   :  { %9901 = vmatpush3.bf16.msra.mxu1 %v10180_v6  ;;  %9882 = vmatprep.subr.bf16.mxu0 %v13010_v25 }
 0x54d   :  { %9902 = vmatprep.subr.bf16.mxu1 %v13010_v25 }
 0x54f   :  { %9883 = vmatpush3.bf16.msra.mxu0 %v10181_v26 }
 0x550   :  { %9903 = vmatpush3.bf16.msra.mxu1 %v10182_v20  ;;  %9884 = vmatprep.subr.bf16.mxu0 %v13010_v25 }
 0x551   :  { %9904 = vmatprep.subr.bf16.mxu1 %v13010_v25 }
 0x553   :  { %9885 = vmatpush3.bf16.msra.mxu0 %v10183_v57 }
 0x554   :  { %9905 = vmatpush3.bf16.msra.mxu1 %v10184_v28  ;;  %9910 = vmatprep.subr.bf16.mxu0 %v13010_v25 }
 0x555   :  { %9930 = vmatprep.subr.bf16.mxu1 %v13010_v25 }
 0x556   :  { %9887 = vmatmul.mubr.bf16.vlgmr.msra.gmra.mxu0 %v7129_v23 }
 0x557   :  { %9907 = vmatmul.mubr.bf16.vlgmr.msra.gmra.mxu1 %v7239_v39  ;;  %9911 = vmatpush3.bf16.msra.mxu0 %v10185_v53 }
 0x558   :  { %9931 = vmatpush3.bf16.msra.mxu1 %v10186_v8  ;;  %9912 = vmatprep.subr.bf16.mxu0 %v13010_v25 }
 0x559   :  { %9932 = vmatprep.subr.bf16.mxu1 %v13010_v25  ;;  %9926 = vmatprep.mubr.msk.bf16.mxu0 %vm10253_vm2, %v13010_v25 }
 0x55a   :  { %9946 = vmatprep.mubr.msk.bf16.mxu1 %vm10253_vm2, %v13010_v25 }
 0x55b   :  { %9913 = vmatpush3.bf16.msra.mxu0 %v10187_v61 }
 0x55c   :  { %9933 = vmatpush3.bf16.msra.mxu1 %v10188_v35  ;;  %9914 = vmatprep.subr.bf16.mxu0 %v13010_v25 }
 0x55d   :  { %9934 = vmatprep.subr.bf16.mxu1 %v13010_v25 }
 0x55f   :  { %9915 = vmatpush3.bf16.msra.mxu0 %v10189_v59 }
 0x560   :  { %9935 = vmatpush3.bf16.msra.mxu1 %v10190_v51  ;;  %9916 = vmatprep.subr.bf16.mxu0 %v13010_v25 }
 0x561   :  { %9936 = vmatprep.subr.bf16.mxu1 %v13010_v25 }
 0x563   :  { %9917 = vmatpush3.bf16.msra.mxu0 %v10191_v24 }
 0x564   :  { %9937 = vmatpush3.bf16.msra.mxu1 %v10192_v11  ;;  %9918 = vmatprep.subr.bf16.mxu0 %v13010_v25 }
 0x565   :  { %9938 = vmatprep.subr.bf16.mxu1 %v13010_v25 }
 0x567   :  { %9919 = vmatpush3.bf16.msra.mxu0 %v10193_v33 }
 0x568   :  { %9939 = vmatpush3.bf16.msra.mxu1 %v10194_v15  ;;  %9920 = vmatprep.subr.bf16.mxu0 %v13010_v25 }
 0x569   :  { %9940 = vmatprep.subr.bf16.mxu1 %v13010_v25 }
 0x56b   :  { %9921 = vmatpush3.bf16.msra.mxu0 %v10195_v21 }
 0x56c   :  { %9941 = vmatpush3.bf16.msra.mxu1 %v10196_v10  ;;  %9922 = vmatprep.subr.bf16.mxu0 %v13010_v25 }
 0x56d   :  { %9942 = vmatprep.subr.bf16.mxu1 %v13010_v25 }
 0x56f   :  { %9923 = vmatpush3.bf16.msra.mxu0 %v10197_v36 }
 0x570   :  { %9943 = vmatpush3.bf16.msra.mxu1 %v10198_v4  ;;  %9924 = vmatprep.subr.bf16.mxu0 %v13010_v25 }
 0x571   :  { %9944 = vmatprep.subr.bf16.mxu1 %v13010_v25 }
 0x573   :  { %9925 = vmatpush3.bf16.msra.mxu0 %v10199_v50 }
 0x574   :  { %9945 = vmatpush3.bf16.msra.mxu1 %v10200_v12  ;;  %9950 = vmatprep.subr.bf16.mxu0 %v13010_v25 }
 0x576   :  { %9927 = vmatmul.mubr.bf16.vlgmr.msra.gmra.mxu0 %v7349_v30 }
 0x577   :  { %9947 = vmatmul.mubr.bf16.vlgmr.msra.gmra.mxu1 %v7459_v29  ;;  %9951 = vmatpush3.bf16.msra.mxu0 %v10201_v5 }
 0x578   :  { %9952 = vmatprep.subr.bf16.mxu0 %v13010_v25  ;;  %9966 = vmatprep.mubr.msk.bf16.mxu0 %vm10253_vm2, %v13010_v25 }
 0x57b   :  { %9953 = vmatpush3.bf16.msra.mxu0 %v10202_v60 }
 0x57c   :  { %9954 = vmatprep.subr.bf16.mxu0 %v13010_v25 }
 0x57f   :  { %9955 = vmatpush3.bf16.msra.mxu0 %v10203_v40 }
 0x580   :  { %9956 = vmatprep.subr.bf16.mxu0 %v13010_v25 }
 0x583   :  { %9957 = vmatpush3.bf16.msra.mxu0 %v10204_v38 }
 0x584   :  { %9958 = vmatprep.subr.bf16.mxu0 %v13010_v25 }
 0x587   :  { %9959 = vmatpush3.bf16.msra.mxu0 %v10205_v14 }
 0x588   :  { %9960 = vmatprep.subr.bf16.mxu0 %v13010_v25 }
 0x58b   :  { %9961 = vmatpush3.bf16.msra.mxu0 %v10206_v52 }
 0x58c   :  { %9962 = vmatprep.subr.bf16.mxu0 %v13010_v25 }
 0x58f   :  { %9963 = vmatpush3.bf16.msra.mxu0 %v10207_v63 }
 0x590   :  { %9964 = vmatprep.subr.bf16.mxu0 %v13010_v25 }
 0x593   :  { %9965 = vmatpush3.bf16.msra.mxu0 %v10208_v55 }
 0x596   :  { %9967 = vmatmul.mubr.bf16.vlgmr.msra.gmra.mxu0 %v7569_v46 }
 0x5d6   :  { %v6791_v19 = vpop.f32.mrf.mxu0 }
 0x5d7   :  { %v6792_v48 = vadd.f32 %v8284_v42, %v6791_v19  ;;  %v6899_v41 = vpop.f32.mrf.mxu1 }
 0x5d8   :  { %v9808_v44 = vpop.f32.mrf.mxu0 }
 0x5d9   :  { %v6906_v45 = vadd.f32 %v6899_v41, %v6792_v48  ;;  %v9828_v0 = vpop.f32.mrf.mxu1 }
 0x5da   :  { %v6794_v2 = vpop.f32.mrf.mxu0 }
 0x5db   :  { %v6902_v43 = vpop.f32.mrf.mxu1 }
 0x5dc   :  { %v9809_v37 = vpop.f32.mrf.mxu0 }
 0x5dd   :  { %v9829_v34 = vpop.f32.mrf.mxu1 }
 0x5f6   :  { %v7009_v47 = vpop.f32.mrf.mxu0 }
 0x5f7   :  { %v7016_v25 = vadd.f32 %v7009_v47, %v6906_v45  ;;  %v7119_v54 = vpop.f32.mrf.mxu1 }
 0x5f8   :  { %v9848_v18 = vpop.f32.mrf.mxu0 }
 0x5f9   :  { %v7126_v56 = vadd.f32 %v7119_v54, %v7016_v25  ;;  %v9868_v62 = vpop.f32.mrf.mxu1 }
 0x5fa   :  { %v7012_v31 = vpop.f32.mrf.mxu0 }
 0x5fb   :  { %v7122_v13 = vpop.f32.mrf.mxu1 }
 0x5fc   :  { %v9849_v49 = vpop.f32.mrf.mxu0 }
 0x5fd   :  { %v9869_v27 = vpop.f32.mrf.mxu1 }
 0x616   :  { %v7229_v58 = vpop.f32.mrf.mxu0 }
 0x617   :  { %v7339_v9 = vpop.f32.mrf.mxu1  ;;  %v7236_v35 = vadd.f32 %v7229_v58, %v7126_v56 }
 0x618   :  { %v9888_v16 = vpop.f32.mrf.mxu0 }
 0x619   :  { %v9908_v32 = vpop.f32.mrf.mxu1  ;;  %v7346_v59 = vadd.f32 %v7339_v9, %v7236_v35 }
 0x61a   :  { %v7232_v6 = vpop.f32.mrf.mxu0 }
 0x61b   :  { %v7342_v26 = vpop.f32.mrf.mxu1 }
 0x61c   :  { %v9889_v20 = vpop.f32.mrf.mxu0 }
 0x61d   :  { %v9909_v57 = vpop.f32.mrf.mxu1 }
 0x636   :  { %v7449_v28 = vpop.f32.mrf.mxu0 }
 0x637   :  { %v7559_v17 = vpop.f32.mrf.mxu1  ;;  %v7456_v51 = vadd.f32 %v7449_v28, %v7346_v59 }
 0x638   :  { %v9928_v3 = vpop.f32.mrf.mxu0 }
 0x639   :  { %v9948_v53 = vpop.f32.mrf.mxu1  ;;  %v7566_v24 = vadd.f32 %v7559_v17, %v7456_v51 }
 0x63a   :  { %v7452_v23 = vpop.f32.mrf.mxu0 }
 0x63b   :  { %v7562_v8 = vpop.f32.mrf.mxu1 }
 0x63c   :  { %v9929_v39 = vpop.f32.mrf.mxu0 }
 0x63d   :  { %v9949_v61 = vpop.f32.mrf.mxu1 }
 0x656   :  { %v7669_v11 = vpop.f32.mrf.mxu0 }
 0x657   :  { %v7676_v33 = vadd.f32 %v7669_v11, %v7566_v24 }
 0x658   :  { %v9968_v15 = vpop.f32.mrf.mxu0 }
 0x659   :  { %v7677_v21 = vmax.f32 %v7676_v33, 0.0 }
 0x65a   :  { %v7672_v10 = vpop.f32.mrf.mxu0 }
 0x65b   :  { %7678 = vst [vmem:[#allocation8] sm:$0xff] %v7677_v21 }
 0x65c   :  { %v9969_v36 = vpop.f32.mrf.mxu0 }
 0x662   :  { %v7679_v4 = vld [vmem:[#allocation8] ss:$2 sm:$0x1]  ;;  %v7681_v50 = vld [vmem:[#allocation8 + $0x1] ss:$2 sm:$0x1] }
 0x663   :  { %v7683_v12 = vld [vmem:[#allocation8 + $0x4] ss:$2 sm:$0x1]  ;;  %v7685_v22 = vld [vmem:[#allocation8 + $0x5] ss:$2 sm:$0x1]  ;;  %v7686_v1 = vmax.f32 %v7679_v4, %v7681_v50 }
 0x664   :  { %v7687_v5 = vmax.f32 %v7683_v12, %v7685_v22 }
 0x666   :  { %v7688_v30 = vmax.f32 %v7686_v1, %v7687_v5 }
 0x668   :  { %7689 = vst [vmem:[%s13353_s9] sm:$0x1] %v7688_v30 }

</bundles_post_ra>
